<compile_context>
chip_gen: v7x
topology: tpu7x:2x2x1
jax: 0.10.0
libtpu: 0.0.40
codegen_flags: <defaults>
</compile_context>

<pallas_src>
import functools
import math

import jax
import jax.numpy as jnp
from jax.experimental import pallas as pl
from jax.experimental.pallas import tpu as pltpu


def _round_up(x, m):
    return ((x + m - 1) // m) * m


def _round_down(x, m):
    return max(m, (x // m) * m)


def _vmem_capacity_bytes(default=64 << 20):
    """Physical VMEM per TensorCore; conservative (v7x) fallback."""
    try:
        cap = int(pltpu.get_tpu_info().vmem_capacity_bytes)
        if cap > 0:
            return cap
    except Exception:
        pass
    return default


def ae_tied_kernel(b_ref, x_ref, wcol_ref, wrow_ref, o_ref):
    # b_ref:    (1, 1) SMEM f32 scalar
    # x_ref:    (tile_n, d) VMEM, input dtype
    # wcol_ref: (d, 1) VMEM, input dtype, pre-scaled by 1/sqrt(d)  (MXU operand)
    # wrow_ref: (1, d) VMEM f32,          pre-scaled by 1/sqrt(d)  (outer product)
    x = x_ref[...]                         # (tn, d) native dtype
    w_col = wcol_ref[...]                  # (d, 1)
    w_row = wrow_ref[...]                  # (1, d) f32
    b = b_ref[0, 0]                        # f32 scalar

    # Row dot on the MXU (skinny matvec), f32 accumulation, highest precision
    # so f32 inputs match the reference closely.
    s = jnp.dot(x, w_col,
                preferred_element_type=jnp.float32,
                precision=jax.lax.Precision.HIGHEST)          # (tn, 1)
    h = jnp.tanh(s)                                           # (tn, 1) -> EUP

    # Rank-1 reconstruction + residual in f32; single cast at the store.
    yhat = h * w_row + b * x.astype(jnp.float32)              # (tn, d) f32
    o_ref[...] = yhat.astype(o_ref.dtype)


def ae_tied_forward(x, w, b, *, tile_n=None,
                    target_tile_bytes=6 << 20,     # ~6 MiB input tile target
                    min_grid_steps=2,              # keep both v7x TCs busy
                    vmem_budget_bytes=None,        # live bytes per grid step
                    vmem_limit_bytes=None):
    """x: (N, d), w: (d,), b: (1,) -> (N, d) with the AE_tied forward."""
    N, d = x.shape
    inv_sqrt_d = 1.0 / math.sqrt(d)

    itemsize = jnp.dtype(x.dtype).itemsize
    row_align = 16 if jnp.dtype(x.dtype) == jnp.dtype(jnp.bfloat16) else 8

    # Per-generation VMEM sizing: v7x ~64 MiB/TC -> budget ~28 MiB, limit ~54 MiB;
    # v5e/v6e 128 MiB -> budget 56 MiB, limit 100 MiB.
    vmem_cap = _vmem_capacity_bytes()
    if vmem_limit_bytes is None:
        vmem_limit_bytes = min(int(vmem_cap * 0.85), 100 << 20)
    if vmem_budget_bytes is None:
        vmem_budget_bytes = min(int(vmem_cap * 0.44), 56 << 20)

    if tile_n is None:
        # Live bytes per step: 2x input + 2x output double-buffers plus ~3 f32
        # rows of kernel temporaries (upcast residual / f32 yhat before cast).
        bytes_per_row = 4 * d * itemsize + 3 * d * 4
        cap_rows = max(row_align, vmem_budget_bytes // bytes_per_row)
        tgt_rows = max(row_align, target_tile_bytes // (d * itemsize))
        tile_n = min(cap_rows, tgt_rows, _round_up(N, row_align))
        tile_n = _round_down(tile_n, row_align)
        if min_grid_steps > 1:
            # Don't let the grid collapse to 1 step (v7x: one TC would idle).
            per_step = _round_up(pl.cdiv(N, min_grid_steps), row_align)
            tile_n = max(row_align, min(tile_n, per_step))

    # Pre-scale w once in the wrapper (tiny (d,) op, reused for all rows).
    w_scaled = w.astype(jnp.float32) * inv_sqrt_d
    w_col = w_scaled.reshape(d, 1).astype(x.dtype)   # MXU operand
    w_row = w_scaled.reshape(1, d)                   # f32 outer-product row
    b2 = b.reshape(1, 1).astype(jnp.float32)

    grid = (pl.cdiv(N, tile_n),)

    cost = pl.CostEstimate(
        flops=5 * N * d,                 # dot (2Nd) + outer + residual FMA (3Nd)
        transcendentals=N,               # tanh per row
        bytes_accessed=2 * N * d * itemsize + d * (itemsize + 4) + 4,
    )

    return pl.pallas_call(
        ae_tied_kernel,
        out_shape=jax.ShapeDtypeStruct((N, d), x.dtype),
        grid_spec=pltpu.PrefetchScalarGridSpec(
            num_scalar_prefetch=0,
            grid=grid,
            in_specs=[
                pl.BlockSpec(memory_space=pltpu.MemorySpace.SMEM),   # b (1,1)
                pl.BlockSpec((tile_n, d), lambda i: (i, 0)),         # x tile
                pl.BlockSpec((d, 1), lambda i: (0, 0)),              # w column
                pl.BlockSpec((1, d), lambda i: (0, 0)),              # w row
            ],
            out_specs=pl.BlockSpec((tile_n, d), lambda i: (i, 0)),
        ),
        compiler_params=pltpu.CompilerParams(
            dimension_semantics=("parallel",),
            vmem_limit_bytes=vmem_limit_bytes,
        ),
        cost_estimate=cost,
    )(b2, x, w_col, w_row)


if __name__ == "__main__":
    # Module's d=784 (MNIST); small N chosen so the grid has >1 step and the
    # last row block is partial (exercises masked writeback).
    d = 784
    N = 300
    key = jax.random.PRNGKey(0)
    kx, kw = jax.random.split(key)
    x = jax.random.normal(kx, (N, d), dtype=jnp.float32)
    w = jax.random.normal(kw, (d,), dtype=jnp.float32)   # torch.randn(d)
    b = jnp.array([1.0], dtype=jnp.float32)              # torch.Tensor([1])

    out = jax.block_until_ready(ae_tied_forward(x, w, b))

    # Pure-JAX reference (highest-precision dot to match the kernel's MXU path).
    inv = 1.0 / math.sqrt(d)
    hp = jax.lax.Precision.HIGHEST
    s_ref = jnp.dot(x, w, precision=hp) * inv
    ref = jnp.tanh(s_ref)[:, None] * w[None, :] * inv + b[0] * x
    assert out.shape == (N, d)
    err = float(jnp.max(jnp.abs(out - ref)))
    assert jnp.allclose(out, ref, atol=1e-4, rtol=1e-4), err

    # bf16 smoke test (mixed-precision path; f32 math inside, bf16 load/store).
    xb = x.astype(jnp.bfloat16)
    wb = w.astype(jnp.bfloat16)
    outb = jax.block_until_ready(ae_tied_forward(xb, wb, b))
    xb32 = xb.astype(jnp.float32)
    wb32 = wb.astype(jnp.float32)
    sb = jnp.dot(xb32, wb32, precision=hp) * inv
    refb = jnp.tanh(sb)[:, None] * wb32[None, :] * inv + b[0] * xb32
    errb = float(jnp.max(jnp.abs(outb.astype(jnp.float32) - refb)))
    assert jnp.allclose(outb.astype(jnp.float32), refb, atol=5e-2, rtol=5e-2), errb

    print("KERNEL_OK")
</pallas_src>

<mosaic_0001>
module attributes {stable_mosaic.version = 11 : i64} {
  func.func @ae_tied_kernel(%arg0: i32, %arg1: memref<1x1xf32, #tpu.memory_space<smem>>, %arg2: memref<152x784xf32, #tpu.memory_space<vmem>>, %arg3: memref<784x1xf32, #tpu.memory_space<vmem>>, %arg4: memref<1x784xf32, #tpu.memory_space<vmem>>, %arg5: memref<152x784xf32, #tpu.memory_space<vmem>>) attributes {dimension_semantics = [#tpu.dimension_semantics<parallel>], iteration_bounds = array<i64: 2>, scalar_prefetch = 0 : i64, scratch_operands = 0 : i64, tpu.core_type = #tpu.core_type<tc>, window_params = [{transform_indices = @transform_0, window_bounds = array<i64: 1, 1>}, {transform_indices = @transform_1, window_bounds = array<i64: 152, 784>}, {pipeline_mode = #tpu.pipeline_mode<synchronous>, transform_indices = @transform_2, window_bounds = array<i64: 784, 1>}, {pipeline_mode = #tpu.pipeline_mode<synchronous>, transform_indices = @transform_3, window_bounds = array<i64: 1, 784>}, {transform_indices = @transform_4, window_bounds = array<i64: 152, 784>}]} {
    %c0 = arith.constant 0 : index
    %c0_0 = arith.constant 0 : index
    %0 = vector.load %arg2[%c0, %c0_0] : memref<152x784xf32, #tpu.memory_space<vmem>>, vector<152x784xf32>
    %c0_1 = arith.constant 0 : index
    %c0_2 = arith.constant 0 : index
    %1 = vector.load %arg3[%c0_1, %c0_2] : memref<784x1xf32, #tpu.memory_space<vmem>>, vector<784x1xf32>
    %c0_3 = arith.constant 0 : index
    %c0_4 = arith.constant 0 : index
    %2 = vector.load %arg4[%c0_3, %c0_4] : memref<1x784xf32, #tpu.memory_space<vmem>>, vector<1x784xf32>
    %c0_5 = arith.constant 0 : index
    %c0_6 = arith.constant 0 : index
    %3 = memref.load %arg1[%c0_5, %c0_6] : memref<1x1xf32, #tpu.memory_space<smem>>
    %cst = arith.constant dense<0.000000e+00> : vector<152x1xf32>
    %4 = tpu.matmul %0, %1, %cst {dimension_numbers = #tpu.dot_dimension_numbers<[1], [0], [0], [1], [0, 0, 1, 1], [], []>, precision = #tpu.contract_precision<fp32>} : vector<152x784xf32>, vector<784x1xf32>, vector<152x1xf32> -> vector<152x1xf32>
    %5 = math.tanh %4 : vector<152x1xf32>
    %6 = vector.broadcast %5 : vector<152x1xf32> to vector<152x784xf32>
    %7 = vector.broadcast %2 : vector<1x784xf32> to vector<152x784xf32>
    %8 = arith.mulf %6, %7 : vector<152x784xf32>
    %9 = vector.broadcast %3 : f32 to vector<152x784xf32>
    %10 = arith.mulf %9, %0 : vector<152x784xf32>
    %11 = arith.addf %8, %10 : vector<152x784xf32>
    %c0_7 = arith.constant 0 : index
    %c0_8 = arith.constant 0 : index
    %12 = vector.load %arg5[%c0_7, %c0_8] : memref<152x784xf32, #tpu.memory_space<vmem>>, vector<152x784xf32>
    tpu.vector_store %arg5[%c0_7, %c0_8], %11 {strides = array<i32>} : memref<152x784xf32, #tpu.memory_space<vmem>>, vector<152x784xf32>,
    return
  }
  func.func @transform_0(%arg0: i32) -> (i32, i32) {
    %c0_i32 = arith.constant 0 : i32
    %c0_i32_0 = arith.constant 0 : i32
    %c0_i32_1 = arith.constant 0 : i32
    return %c0_i32, %c0_i32_0 : i32, i32
  }
  func.func @transform_1(%arg0: i32) -> (i32, i32) {
    %c0_i32 = arith.constant 0 : i32
    %c0_i32_0 = arith.constant 0 : i32
    return %arg0, %c0_i32 : i32, i32
  }
  func.func @transform_2(%arg0: i32) -> (i32, i32) {
    %c0_i32 = arith.constant 0 : i32
    %c0_i32_0 = arith.constant 0 : i32
    %c0_i32_1 = arith.constant 0 : i32
    return %c0_i32, %c0_i32_0 : i32, i32
  }
  func.func @transform_3(%arg0: i32) -> (i32, i32) {
    %c0_i32 = arith.constant 0 : i32
    %c0_i32_0 = arith.constant 0 : i32
    %c0_i32_1 = arith.constant 0 : i32
    return %c0_i32, %c0_i32_0 : i32, i32
  }
  func.func @transform_4(%arg0: i32) -> (i32, i32) {
    %c0_i32 = arith.constant 0 : i32
    %c0_i32_0 = arith.constant 0 : i32
    return %arg0, %c0_i32 : i32, i32
  }
}

</mosaic_0001>

<bundles_post_ra>
// kernel: tpu_custom_call.1
= control target key start
LH: loop header
LB: loop body
LE: loop exit
PB: predicated region body
PF: predicated region fallthrough
CT: control target
= control target key end

     0   :  { %s16956_s0 = inlined_call_operand.<no memory space> [shape: f32[1,1], index: 0, kind: input, shape index: {}]   ;;  %s16957_s1 = inlined_call_operand.hbm [shape: f32[300,784], index: 1, kind: input, shape index: {}]   ;;  %s16958_s2 = inlined_call_operand.vmem [shape: f32[784,1], index: 2, kind: input, shape index: {}]   ;;  %s16959_s3 = inlined_call_operand.hbm [shape: f32[1,784], index: 3, kind: input, shape index: {}]   ;;  %s16960_s4 = inlined_call_operand.hbm [shape: f32[300,784], index: 4, kind: output, shape index: {}]  }
   0x1   :  { %9 = sst [smem:[#allocation2]] %s16956_s0 }
   0x2   :  { %10 = vsyncpa [#allocation4], 0 }
   0x3   :  { %12 = vsyncpa [#allocation4 + $0x1], 0 }
   0x4   :  { %13 = vsyncpa [#allocation7], 0 }
   0x5   :  { %14 = vsyncpa [#allocation5], 0 }
   0x6   :  { %16 = vsyncpa [#allocation5 + $0x1], 0  ;;  %s10800_s17 = smov 0   ;;  %s10802_s18 = smov 0  }
   0x7   :  { %s10804_s19 = smov 0   ;;  %s10806_s20 = smov 0  }
   0x8 LB: > { %s10821_s0 = sadd.s32 4294967295, %s10759_s20   ;;  %s8148_s21 = sadd.s32 4294967294, %s10759_s20   ;;  %s10759_s20 = sphi %s10806_s20, %s19729_s20   ;;  %s10755_s19 = sphi %s10804_s19, %s19728_s19   ;;  %s10751_s18 = sphi %s10802_s18, %s19727_s18   ;;  %s10747_s17 = sphi %s10800_s17, %s19726_s17  }
   0x9   : > { %s10825_s22 = sadd.s32 1, %s10759_s20   ;;  %s50_s23 = sadd.s32 1, %s10755_s19 }
   0xa   : > { %s47_s24 = ssub.s32 %s10759_s20, %s10825_s22  ;;  %p57_p0 = scmp.ne.s32.totalorder %s10755_s19, %s10751_s18 }
   0xb   : > { %p48_p1 = scmp.eq.s32.totalorder %s47_s24, 0  ;;  %p58_p2 = scmp.eq.s32.totalorder %s10759_s20, 0 }
   0xc   : > { %p63_p3 = scmp.ne.s32.totalorder %s10751_s18, %s10747_s17  ;;  %p16961_p4 = scmp.eq.s32.totalorder %s10821_s0, 0 }
   0xd   : > { %s10837_s25 = scalar_select %p48_p1, %s10755_s19, %s50_s23  }
   0xe   : > { %p10839_p5 = por %p58_p2, %p57_p0  ;;  %p10845_p6 = por %p16961_p4, %p63_p3 }
   0xf   : > { %p129_p7 = scmp.eq.s32.totalorder %s10821_s0, 1  ;;  %p135_p8 = scmp.eq.s32.totalorder %s8148_s21, 1 }
  0x10   : > { %s17922_s27 = scalar_select %p10845_p6, 1, 0 }
  0x11   : > { %p8149_p9 = scmp.ge.s32.totalorder %s10759_s20, 1  ;;  %p142_p10 = scmp.lt.s32.totalorder %s10759_s20, 3 }
  0x12   : > { %p10852_p11 = por %p129_p7, %p57_p0  ;;  %p10856_p12 = por %p135_p8, %p63_p3 }
  0x13   : > { %p10860_p13 = pnand %p8149_p9, %p142_p10  ;;  %s10761_s5 = smov [#allocation6]  }
  0x14   : > { %s17923_s28 = scalar_select %p10852_p11, 1, 0 }
  0x15   : > { %s17924_s29 = scalar_select %p10856_p12, 1, 0 }
  0x16   : > { %s17925_s30 = scalar_select %p10860_p13, 1, 0 }
  0x17   : > { %p10399_p2 = pneg %p10860_p13  ;;  %s161_s6 = sshll.u32 %s10761_s5, 4  ;;  %s162_s6 = int_to_ptr.vmem [resolvable:$true] %s161_s6 }
  0x18   : > { %p10412_p4 = scmp.lt.s32.totalorder %s10759_s20, 2  ;;  %p17926_p0 = scmp.eq.s32.totalorder %s10821_s0, 0 }
  0x19   : > { %s172_s9 = sand.u32 1, %s10755_s19   ;;  %s10631_s12 = scalar_lea.hbm %s16959_s3, 112 }
  0x1a   : > { %p10870_p7 = pnand %p10399_p2, %p17926_p0  ;;  %p10876_p3 = pnand %p10412_p4, %p10839_p5 }
  0x1b   : > { %p10632_p8 = scmp.ne.s32.totalorder %s16959_s3, %s10631_s12  ;;  %p10638_p4 = scmp.lt.u32.totalorder %s10631_s12, %s16959_s3 }
  0x1c   : > { %s17928_s8 = scalar_select %p10876_p3, 1, 0 }
  0x1d   : > { %p10633_p9 = pneg %p10870_p7 }
  0x1f   : > { %p10634_p10 = pnand %p10633_p9, %p10632_p8 }
  0x21   : > { %p10635_p2 = pneg %p10634_p10 }
  0x23   : > { %p10640_p5 = pnand %p10638_p4, %p10635_p2 }
  0x25   : > { %10643 = shalt.err (!%p10640_p5)
}
  0x26   : > { %s10644_s21 = scalar_lea.vmem %s162_s6, 112  ;;  %s10651_s23 = scalar_lea.vmem %s162_s6, 128 }
  0x27   : > { %p10645_p0 = scmp.ne.s32.totalorder %s162_s6, %s10644_s21  ;;  %p10652_p11 = scmp.lt.s32.totalorder %s162_s6, %s162_s6 }
  0x28   : > { %p10653_p6 = scmp.lt.s32.totalorder %s10651_s23, %s10644_s21 }
  0x29   : > { %p10647_p1 = pnand %p10645_p0, %p10633_p9 }
  0x2a   : > { %p10654_p13 = por %p10653_p6, %p10652_p11 }
  0x2b   : > { %p10648_p12 = pneg %p10647_p1 }
  0x2d   : > { %p10655_p3 = pnand %p10654_p13, %p10648_p12 }
  0x2f   : > { %10658 = shalt.err (!%p10655_p3)
}
  0x30   : > { %10402 = dma.hbm_to_vmem [thread:$0]  (!%p10870_p7), %s16959_s3, 112, %s162_s6, [#allocation7]  }
  0x31   : > { %s10387_s5 = smul.u32 1064, %s172_s9  ;;  %s10905_s15 = scalar_lea.sflag [#allocation4], %s172_s9 }
  0x32   : > { %s10413_s10 = smul.u32 17024, %s10759_s20  ;;  %p17929_p11 = scmp.ne.s32.totalorder %s17928_s8, 0 }
  0x33   : > { %s176_s14 = scalar_lea.vmem [#allocation3], %s10387_s5  ;;  %s10664_s23 = scalar_lea.hbm %s16957_s1, 34048 }
  0x34   : > { %s10901_s13 = scalar_lea.hbm %s16957_s1, %s10413_s10  ;;  %s184_s7 = sshll.u32 %s176_s14, 4  ;;  %s10903_s7 = int_to_ptr.vmem [resolvable:$true] %s184_s7 }
  0x35   : > { %s10659_s16 = scalar_lea.hbm %s10901_s13, 17024  ;;  %p10661_p12 = pneg %p17929_p11 }
  0x36   : > { %p10660_p6 = scmp.ne.s32.totalorder %s10901_s13, %s10659_s16  ;;  %p10665_p7 = scmp.lt.u32.totalorder %s10901_s13, %s16957_s1 }
  0x37   : > { %p10666_p3 = scmp.lt.u32.totalorder %s10664_s23, %s10659_s16  ;;  %p10668_p9 = scmp.lt.u32.totalorder %s10659_s16, %s10901_s13 }
  0x38   : > { %p10662_p13 = pnand %p10661_p12, %p10660_p6 }
  0x39   : > { %p10667_p8 = por %p10666_p3, %p10665_p7 }
  0x3a   : > { %p10663_p1 = pneg %p10662_p13 }
  0x3b   : > { %p10669_p10 = por %p10668_p9, %p10667_p8 }
  0x3d   : > { %p10670_p2 = pnand %p10669_p10, %p10663_p1 }
  0x3f   : > { %10673 = shalt.err (!%p10670_p2)
}
  0x40   : > { %s10674_s9 = scalar_lea.vmem %s10903_s7, 17024  ;;  %s10762_s5 = smov [#allocation3]  }
  0x41   : > { %p10675_p4 = scmp.ne.s32.totalorder %s10903_s7, %s10674_s9  ;;  %s10679_s10 = sshll.u32 %s10762_s5, 4  ;;  %s10680_s10 = int_to_ptr.vmem [resolvable:$false] %s10679_s10 }
  0x42   : > { %s10681_s11 = scalar_lea.vmem %s10680_s10, 34048  ;;  %p10682_p6 = scmp.lt.s32.totalorder %s10903_s7, %s10680_s10 }
  0x43   : > { %p10677_p5 = pnand %p10675_p4, %p10661_p12  ;;  %p10683_p13 = scmp.lt.s32.totalorder %s10681_s11, %s10674_s9 }
  0x45   : > { %p10678_p0 = pneg %p10677_p5  ;;  %p10684_p7 = por %p10683_p13, %p10682_p6 }
  0x47   : > { %p10685_p3 = pnand %p10684_p7, %p10678_p0 }
  0x49   : > { %10688 = shalt.err (!%p10685_p3)
}
  0x4a   : > { %s10763_s12 = smov 896   ;;  %s10764_s14 = smov 56  }
  0x4b   : > { %10406 = dma.hbm_to_vmem [thread:$0]  (!%p17929_p11), %s10901_s13, 17024, %s10903_s7, %s10905_s15, %s10763_s12, %s10763_s12, %s10764_s14  }
  0x4c   : > { %p17930_p12 = scmp.ne.s32.totalorder %s17925_s30, 0 }
  0x4e   : > { %196 = sbr.rel (%p17930_p12) target bundleno = 1549 (0x60d), region = 36 }
  0x55   : > { %s10936_s16 = sand.u32 1, %s10751_s18   ;;  %p17931_p1 = scmp.ne.s32.totalorder %s17922_s27, 0 }
  0x56   : > { %s10389_s6 = smul.u32 1064, %s10936_s16  ;;  %s199_s21 = scalar_lea.sflag [#allocation4], %s10936_s16 }
  0x58   : > { %s10942_s23 = scalar_lea.vmem [#allocation3], %s10389_s6 }
  0x59   : > { %10734 = dma.done.wait (%p17931_p1), %s199_s21, 17024  }
  0x5a   : > { %10736 = vsyncadd (%p17931_p1), %s199_s21, 4294950272  ;;  %p17932_p11 = scmp.eq.s32.totalorder %s10821_s0, 0 }
  0x5c   : > { %10738 = dma.done.wait (%p17932_p11), [#allocation7], 112   ;;  %p17933_p8 = pmov %p17932_p11 }
  0x5d   : > { %v16981_v0 = vmov 0.0|0.0   ;;  %v10957_v1 = vld [vmem:[%s16958_s2] sm:$0xff]  ;;  %v10962_v2 = vld [vmem:[%s16958_s2 + $0x8] sm:$0xff]  ;;  %v10980_v8 = vld [vmem:[%s16958_s2 + $0x10] sm:$0xff]  ;;  %vm466_vm0 = vcmask 130048   ;;  %vm10766_vm1 = vmmov 0  }
  0x5e   : > { %10740 = vsyncadd (%p17933_p8), [#allocation7], 4294967184  ;;  %8650 = vmatprep.subr.bf16.mxu1 %v16981_v0  ;;  %9226 = vmatprep.subr.bf16.mxu0 %v16981_v0  ;;  %v10967_v3 = vld [vmem:[%s16958_s2 + $0x200] sm:$0xff]  ;;  %v525_v4 = vand.u32 4294901760, %v10957_v1  ;;  %v528_v5 = vand.u32 4294901760, %v10962_v2  ;;  %v10974_v6 = vld [vmem:[%s16958_s2 + $0x208] sm:$0xff] }
  0x5f   : > { %v16979_v7 = vand.u32 4294901760, %v10967_v3  ;;  %v10985_v9 = vld [vmem:[%s16958_s2 + $0x18] sm:$0xff]  ;;  %v16976_v10 = vand.u32 4294901760, %v10974_v6  ;;  %v16975_v11 = vand.u32 4294901760, %v10980_v8  ;;  %v10993_v13 = vld [vmem:[%s16958_s2 + $0x210] sm:$0xff]  ;;  %v11003_v15 = vld [vmem:[%s16958_s2 + $0x20] sm:$0xff] }
  0x60   : > { %v16974_v12 = vand.u32 4294901760, %v10985_v9  ;;  %v10998_v14 = vld [vmem:[%s16958_s2 + $0x218] sm:$0xff]  ;;  %v11009_v16 = vpack.c.bf16 %v528_v5, %v525_v4  ;;  %v11014_v17 = vld [vmem:[%s16958_s2 + $0x28] sm:$0xff]  ;;  %v11019_v18 = vld [vmem:[%s16958_s2 + $0x220] sm:$0xff]  ;;  %v16973_v22 = vand.u32 4294901760, %v10993_v13  ;;  %v16971_v24 = vand.u32 4294901760, %v11003_v15 }
  0x61   : > { %v11024_v19 = vld [vmem:[%s16958_s2 + $0x228] sm:$0xff]  ;;  %v11030_v20 = vpack.c.bf16 %v16976_v10, %v16979_v7  ;;  %v16972_v23 = vand.u32 4294901760, %v10998_v14  ;;  %v16970_v25 = vand.u32 4294901760, %v11014_v17  ;;  %v16969_v26 = vand.u32 4294901760, %v11019_v18  ;;  %v11050_v28 = vld [vmem:[%s16958_s2 + $0x30] sm:$0xff]  ;;  %v11055_v29 = vld [vmem:[%s16958_s2 + $0x38] sm:$0xff] }
  0x62   : > { %17934 = vst [vmem:[#allocation12_spill] sm:$0xff] %v11009_v16  ;;  %8652 = vmatpush1.bf16.msra.mxu1 %v11009_v16  ;;  %v11037_v21 = vpack.c.bf16 %v16974_v12, %v16975_v11  ;;  %v16968_v27 = vand.u32 4294901760, %v11024_v19  ;;  %v436_v30 = vld [vmem:[%s16958_s2 + $0x230] sm:$0xff]  ;;  %v437_v32 = vld [vmem:[%s16958_s2 + $0x238] sm:$0xff]  ;;  %v374_v33 = vld [vmem:[%s16958_s2 + $0x40] sm:$0xff]  ;;  %v16967_v38 = vand.u32 4294901760, %v11050_v28  ;;  %v11153_v61 = vsub.f32 %v10957_v1, %v525_v4 }
  0x63   : > { %17935 = vst [vmem:[#allocation13_spill] sm:$0xff] %v11030_v20  ;;  %9228 = vmatpush1.bf16.msra.mxu0 %v11030_v20  ;;  %8653 = vmatprep.subr.bf16.mxu1 %v16981_v0  ;;  %v11065_v31 = vpack.c.bf16 %v16972_v23, %v16973_v22  ;;  %v375_v34 = vld [vmem:[%s16958_s2 + $0x48] sm:$0xff]  ;;  %v438_v35 = vld [vmem:[%s16958_s2 + $0x240] sm:$0xff]  ;;  %v11087_v37 = vpack.c.bf16 %v16970_v25, %v16971_v24  ;;  %v16966_v39 = vand.u32 4294901760, %v11055_v29  ;;  %v4283_v40 = vand.u32 4294901760, %v436_v30  ;;  %v376_v48 = vld [vmem:[%s16958_s2 + $0x50] sm:$0xff] }
  0x64   : > { %17936 = vst [vmem:[#allocation14_spill] sm:$0xff] %v11037_v21  ;;  %9229 = vmatprep.subr.bf16.mxu0 %v16981_v0  ;;  %v439_v36 = vld [vmem:[%s16958_s2 + $0x248] sm:$0xff]  ;;  %v11097_v41 = vpack.c.bf16 %v16968_v27, %v16969_v26  ;;  %v4286_v42 = vand.u32 4294901760, %v437_v32  ;;  %v549_v43 = vand.u32 4294901760, %v374_v33  ;;  %v552_v45 = vand.u32 4294901760, %v375_v34  ;;  %v377_v49 = vld [vmem:[%s16958_s2 + $0x58] sm:$0xff] }
  0x65   : > { %17937 = vst [vmem:[#allocation15_spill] sm:$0xff] %v11065_v31  ;;  %17938 = vst [vmem:[#allocation16_spill] sm:$0xff] %v11087_v37  ;;  %v11100_v44 = vsub.f32 %v436_v30, %v4283_v40  ;;  %v4289_v46 = vand.u32 4294901760, %v438_v35  ;;  %v4292_v47 = vand.u32 4294901760, %v439_v36  ;;  %v11115_v52 = vld [vmem:[%s16958_s2 + $0x250] sm:$0xff]  ;;  %v11120_v53 = vld [vmem:[%s16958_s2 + $0x258] sm:$0xff]  ;;  %v11132_v55 = vpack.c.bf16 %v16966_v39, %v16967_v38 }
  0x66   : > { %8655 = vmatpush1.bf16.msra.mxu1 %v11037_v21  ;;  %17939 = vst [vmem:[#allocation17_spill] sm:$0xff] %v11097_v41  ;;  %v11108_v50 = vsub.f32 %v437_v32, %v4286_v42  ;;  %v11110_v51 = vsub.f32 %v374_v33, %v549_v43  ;;  %v11125_v54 = vld [vmem:[%s16958_s2 + $0x60] sm:$0xff]  ;;  %v11134_v56 = vsub.f32 %v375_v34, %v552_v45  ;;  %v11143_v59 = vld [vmem:[%s16958_s2 + $0x68] sm:$0xff]  ;;  %v555_v63 = vand.u32 4294901760, %v376_v48  ;;  %v11189_v39 = vld [vmem:[%s16958_s2 + $0x270] sm:$0xff]  ;;  %s465_s8 = sld [smem:[#allocation2]] }
  0x67   : > { %9231 = vmatpush1.bf16.msra.mxu0 %v11065_v31  ;;  %8656 = vmatprep.subr.bf16.mxu1 %v16981_v0  ;;  %17941 = vst [vmem:[#allocation19_spill] sm:$0xff] %v11132_v55  ;;  %v11136_v57 = vsub.f32 %v438_v35, %v4289_v46  ;;  %v11138_v58 = vsub.f32 %v439_v36, %v4292_v47  ;;  %v11148_v60 = vld [vmem:[%s16958_s2 + $0x260] sm:$0xff]  ;;  %v558_v30 = vand.u32 4294901760, %v377_v49  ;;  %v11162_v32 = vld [vmem:[%s16958_s2 + $0x268] sm:$0xff]  ;;  %v4295_v1 = vand.u32 4294901760, %v11115_v52  ;;  %v11173_v35 = vld [vmem:[%s16958_s2 + $0x70] sm:$0xff] }
  0x68   : > { %9232 = vmatprep.subr.bf16.mxu0 %v16981_v0  ;;  %17940 = vst [vmem:[#allocation18_spill] sm:$0xff] %v11110_v51  ;;  %17942 = vst [vmem:[#allocation20_spill] sm:$0xff] %v11134_v56  ;;  %v11157_v62 = vpack.c.bf16 %v4286_v42, %v4283_v40  ;;  %v11165_v33 = vpack.c.bf16 %v552_v45, %v549_v43  ;;  %v4298_v4 = vand.u32 4294901760, %v11120_v53  ;;  %v16978_v34 = vand.u32 4294901760, %v11125_v54  ;;  %v11184_v45 = vld [vmem:[%s16958_s2 + $0x78] sm:$0xff]  ;;  %v11230_v22 = vld [vmem:[%s16958_s2 + $0x88] sm:$0xff] }
  0x69   : > { %17943 = vst [vmem:[#allocation21_spill] sm:$0xff] %v11136_v57  ;;  %17944 = vst [vmem:[#allocation22_spill] sm:$0xff] %v11138_v58  ;;  %v11175_v36 = vsub.f32 %v376_v48, %v555_v63  ;;  %v11177_v40 = vsub.f32 %v377_v49, %v558_v30  ;;  %v564_v42 = vand.u32 4294901760, %v11143_v59  ;;  %v16977_v43 = vand.u32 4294901760, %v11148_v60  ;;  %v11207_v26 = vld [vmem:[%s16958_s2 + $0x278] sm:$0xff]  ;;  %v11251_v10 = vld [vmem:[%s16958_s2 + $0x288] sm:$0xff] }
  0x6a   : > { %8658 = vmatpush1.bf16.msra.mxu1 %v11087_v37  ;;  %17945 = vst [vmem:[#allocation23_spill] sm:$0xff] %v11157_v62  ;;  %17946 = vst [vmem:[#allocation24_spill] sm:$0xff] %v11165_v33  ;;  %v11193_v48 = vsub.f32 %v11115_v52, %v4295_v1  ;;  %v11196_v49 = vsub.f32 %v11120_v53, %v4298_v4  ;;  %v11201_v38 = vsub.f32 %v11125_v54, %v16978_v34  ;;  %v11212_v52 = vld [vmem:[%s16958_s2 + $0x80] sm:$0xff]  ;;  %v11265_v34 = vld [vmem:[%s16958_s2 + $0x90] sm:$0xff]  ;;  %s16387_s13 = scalar_lea.vmem [#allocation8], %s10389_s6  ;;  %s10415_s6 = smul.u32 17024, %s10821_s0 }
  0x6b   : > { %9234 = vmatpush1.bf16.msra.mxu0 %v11097_v41  ;;  %8659 = vmatprep.subr.bf16.mxu1 %v16981_v0  ;;  %17947 = vst [vmem:[#allocation25_spill] sm:$0xff] %v11175_v36  ;;  %17948 = vst [vmem:[#allocation26_spill] sm:$0xff] %v11177_v40  ;;  %v4304_v27 = vand.u32 4294901760, %v11162_v32  ;;  %v11216_v53 = vpack.c.bf16 %v4292_v47, %v4289_v46  ;;  %v11219_v25 = vsub.f32 %v11143_v59, %v564_v42  ;;  %v11235_v46 = vld [vmem:[%s16958_s2 + $0x280] sm:$0xff]  ;;  %v11270_v7 = vld [vmem:[%s16958_s2 + $0x98] sm:$0xff]  ;;  %s8065_s7 = sshll.u32 %s16387_s13, 4  ;;  %s16902_s7 = int_to_ptr.vmem [resolvable:$true] %s8065_s7 }
  0x6c   : > { %9235 = vmatprep.subr.bf16.mxu0 %v16981_v0  ;;  %17949 = vst [vmem:[#allocation27_spill] sm:$0xff] %v11193_v48  ;;  %17950 = vst [vmem:[#allocation28_spill] sm:$0xff] %v11196_v49  ;;  %v11224_v24 = vsub.f32 %v11148_v60, %v16977_v43  ;;  %v16980_v23 = vand.u32 4294901760, %v11173_v35  ;;  %v11240_v47 = vsub.f32 %v10962_v2, %v528_v5  ;;  %v570_v12 = vand.u32 4294901760, %v11184_v45  ;;  %v11286_v5 = vld [vmem:[%s16958_s2 + $0x290] sm:$0xff]  ;;  %v11329_v37 = vld [vmem:[%s16958_s2 + $0xa8] sm:$0xff]  ;;  %s16900_s27 = scalar_lea.hbm %s16960_s4, %s10415_s6 }
  0x6d   : > { %17951 = vst [vmem:[#allocation29_spill] sm:$0xff] %v11201_v38  ;;  %17952 = vst [vmem:[#allocation30_spill] sm:$0xff] %v11216_v53  ;;  %v11244_v59 = vsub.f32 %v11162_v32, %v4304_v27  ;;  %v16983_v11 = vand.u32 4294901760, %v11189_v39  ;;  %v11253_v43 = vpack.c.bf16 %v558_v30, %v555_v63  ;;  %v17970_v31 = vand.u32 4294901760, %v10967_v3  ;;  %v11351_v16 = vld [vmem:[%s16958_s2 + $0x2a8] sm:$0xff]  ;;  %s8051_s15 = scalar_lea.sflag [#allocation5], %s10936_s16 }
  0x6e   : > { %8661 = vmatpush1.bf16.msra.mxu1 %v11132_v55  ;;  %17953 = vst [vmem:[#allocation31_spill] sm:$0xff] %v11219_v25  ;;  %17954 = vst [vmem:[#allocation32_spill] sm:$0xff] %v11224_v24  ;;  %v11258_v2 = vsub.f32 %v11173_v35, %v16980_v23  ;;  %v11274_v63 = vsub.f32 %v11184_v45, %v570_v12  ;;  %v17960_v45 = vmov 0.0|0.0   ;;  %v17962_v23 = vand.u32 4294901760, %v11207_v26  ;;  %v11346_v55 = vld [vmem:[%s16958_s2 + $0x2a0] sm:$0xff]  ;;  %s10689_s24 = scalar_lea.vmem %s16902_s7, 17024 }
  0x6f   : > { %9237 = vmatpush1.bf16.msra.mxu0 %v11157_v62  ;;  %8662 = vmatprep.subr.bf16.mxu1 %v16981_v0  ;;  %17955 = vst [vmem:[#allocation33_spill] sm:$0xff] %v11244_v59  ;;  %17956 = vst [vmem:[#allocation34_spill] sm:$0xff] %v11253_v43  ;;  %v11279_v30 = vsub.f32 %v11189_v39, %v16983_v11  ;;  %v11295_v11 = vpack.c.bf16 %v4298_v4, %v4295_v1  ;;  %v17966_v1 = vand.u32 4294901760, %v11230_v22  ;;  %v233_v24 = vld [vmem:[%s10942_s23] sm:$0xff]  ;;  %p10690_p9 = scmp.ne.s32.totalorder %s16902_s7, %s10689_s24  ;;  %p19723_p10 = scmp.ne.s32.totalorder %s17923_s28, 0 }
  0x70   : > { %9238 = vmatprep.subr.bf16.mxu0 %v16981_v0  ;;  %17957 = vst [vmem:[#allocation35_spill] sm:$0xff] %v11258_v2  ;;  %17958 = vst [vmem:[#allocation36_spill] sm:$0xff] %v11274_v63  ;;  %v11291_v0 = vld [vmem:[%s16958_s2 + $0x298] sm:$0xff]  ;;  %v11300_v32 = vsub.f32 %v11207_v26, %v17962_v23  ;;  %v17968_v23 = vand.u32 4294901760, %v11235_v46  ;;  %v11334_v21 = vsub.f32 %v10967_v3, %v17970_v31  ;;  %v11356_v3 = vld [vmem:[%s16958_s2 + $0xb0] sm:$0xff]  ;;  %v17973_v31 = vand.u32 4294901760, %v11125_v54 }
  0x71   : > { %17959 = vst [vmem:[#allocation37_spill] sm:$0xff] %v11279_v30  ;;  %17961 = vst [vmem:[#allocation38_spill] sm:$0xff] %v11295_v11  ;;  %v11317_v4 = vsub.f32 %v11230_v22, %v17966_v1  ;;  %v17971_v1 = vand.u32 4294901760, %v11251_v10  ;;  %v11382_v54 = vld [vmem:[%s16958_s2 + $0x2b0] sm:$0xff]  ;;  %v11530_v30 = vld [vmem:[%s16958_s2 + $0x2d8] sm:$0xff]  ;;  %v18027_v2 = vand.u32 4294901760, %v11265_v34  ;;  %p10691_p2 = pnand %p10690_p9, %p19723_p10 }
  0x72   : > { %8664 = vmatpush1.bf16.msra.mxu1 %v11165_v33  ;;  %17963 = vst [vmem:[#allocation39_spill] sm:$0xff] %v11300_v32  ;;  %v17964_v33 = vand.u32 4294901760, %v11212_v52  ;;  %v11322_v41 = vsub.f32 %v11235_v46, %v17968_v23  ;;  %v237_v38 = vld [vmem:[%s10942_s23 + $0x20] sm:$0xff]  ;;  %s10769_s26 = smov [#allocation8]  }
  0x73   : > { %9240 = vmatpush1.bf16.msra.mxu0 %v11216_v53  ;;  %8665 = vmatprep.subr.bf16.mxu1 %v17960_v45  ;;  %v11311_v53 = vld [vmem:[%s16958_s2 + $0xa0] sm:$0xff]  ;;  %17967 = vst [vmem:[#allocation41_spill] sm:$0xff] %v11317_v4  ;;  %v11339_v20 = vsub.f32 %v11251_v10, %v17971_v1  ;;  %v11361_v1 = vpack.c.bf16 %v564_v42, %v17973_v31  ;;  %v17979_v42 = vand.u32 4294901760, %v11148_v60  ;;  %v17983_v4 = vand.u32 4294901760, %v11291_v0  ;;  %p10692_p4 = pneg %p10691_p2  ;;  %s10693_s9 = sshll.u32 %s10769_s26, 4  ;;  %s10694_s9 = int_to_ptr.vmem [resolvable:$false] %s10693_s9 }
  0x74   : > { %v11305_v62 = vsub.f32 %v11212_v52, %v17964_v33  ;;  %9241 = vmatprep.subr.bf16.mxu0 %v17960_v45  ;;  %17969 = vst [vmem:[#allocation42_spill] sm:$0xff] %v11322_v41  ;;  %v17975_v33 = vand.u32 4294901760, %v11265_v34  ;;  %s10695_s5 = scalar_lea.vmem %s10694_s9, 34048  ;;  %p10696_p5 = scmp.lt.s32.totalorder %s16902_s7, %s10694_s9 }
  0x75   : > { %17972 = vst [vmem:[#allocation43_spill] sm:$0xff] %v11339_v20  ;;  %17974 = vst [vmem:[#allocation44_spill] sm:$0xff] %v11361_v1  ;;  %v17977_v20 = vand.u32 4294901760, %v11270_v7  ;;  %p10697_p0 = scmp.lt.s32.totalorder %s10695_s5, %s10689_s24 }
  0x76   : > { %17965 = vst [vmem:[#allocation40_spill] sm:$0xff] %v11305_v62  ;;  %8667 = vmatpush1.bf16.msra.mxu1 %v11253_v43  ;;  %v11366_v23 = vsub.f32 %v11265_v34, %v17975_v33  ;;  %v11377_v43 = vld [vmem:[%s16958_s2 + $0xb8] sm:$0xff]  ;;  %v17981_v33 = vand.u32 4294901760, %v11286_v5  ;;  %v17996_v62 = vand.u32 4294901760, %v11356_v3 }
  0x77   : > { %v11371_v41 = vsub.f32 %v11270_v7, %v17977_v20  ;;  %9243 = vmatpush1.bf16.msra.mxu0 %v11295_v11  ;;  %8668 = vmatprep.subr.bf16.mxu1 %v17960_v45  ;;  %v11388_v20 = vpack.c.bf16 %v4304_v27, %v17979_v42  ;;  %v17985_v11 = vand.u32 4294901760, %v11311_v53  ;;  %v17994_v27 = vand.u32 4294901760, %v11351_v16  ;;  %p10698_p6 = por %p10697_p0, %p10696_p5 }
  0x78   : > { %17976 = vst [vmem:[#allocation45_spill] sm:$0xff] %v11366_v23  ;;  %v11393_v31 = vsub.f32 %v11286_v5, %v17981_v33  ;;  %9244 = vmatprep.subr.bf16.mxu0 %v17960_v45  ;;  %v17987_v23 = vand.u32 4294901760, %v10974_v6  ;;  %v11430_v33 = vld [vmem:[%s16958_s2 + $0xc0] sm:$0xff]  ;;  %v11455_v32 = vsub.f32 %v11356_v3, %v17996_v62 }
  0x79   : > { %17978 = vst [vmem:[#allocation46_spill] sm:$0xff] %v11371_v41  ;;  %17980 = vst [vmem:[#allocation47_spill] sm:$0xff] %v11388_v20  ;;  %v11398_v41 = vsub.f32 %v11291_v0, %v17983_v4  ;;  %v11405_v60 = vsub.f32 %v11311_v53, %v17985_v11  ;;  %v11413_v4 = vld [vmem:[%s16958_s2 + $0x2b8] sm:$0xff]  ;;  %p10699_p13 = pnand %p10698_p6, %p10692_p4 }
  0x7a   : > { %17982 = vst [vmem:[#allocation48_spill] sm:$0xff] %v11393_v31  ;;  %v17988_v31 = vand.u32 4294901760, %v11329_v37  ;;  %8670 = vmatpush1.bf16.msra.mxu1 %v11361_v1  ;;  %17997 = vst [vmem:[#allocation55_spill] sm:$0xff] %v11455_v32 }
  0x7b   : > { %17984 = vst [vmem:[#allocation49_spill] sm:$0xff] %v11398_v41  ;;  %17986 = vst [vmem:[#allocation50_spill] sm:$0xff] %v11405_v60  ;;  %v11418_v41 = vsub.f32 %v10974_v6, %v17987_v23  ;;  %v11435_v60 = vld [vmem:[%s16958_s2 + $0xc8] sm:$0xff]  ;;  %v17990_v6 = vand.u32 4294901760, %v11173_v35  ;;  %9246 = vmatpush1.bf16.msra.mxu0 %v11388_v20  ;;  %8671 = vmatprep.subr.bf16.mxu1 %v17960_v45 }
  0x7c   : > { %v11423_v11 = vsub.f32 %v11329_v37, %v17988_v31  ;;  %v17992_v31 = vand.u32 4294901760, %v11346_v55  ;;  %v11465_v35 = vld [vmem:[%s16958_s2 + $0x2c8] sm:$0xff]  ;;  %9247 = vmatprep.subr.bf16.mxu0 %v17960_v45 }
  0x7d   : > { %v11440_v23 = vpack.c.bf16 %v570_v12, %v17990_v6  ;;  %v11460_v12 = vld [vmem:[%s16958_s2 + $0x2c0] sm:$0xff]  ;;  %v17999_v6 = vand.u32 4294901760, %v11207_v26  ;;  %v11494_v26 = vld [vmem:[%s16958_s2 + $0xd8] sm:$0xff] }
  0x7e   : > { %17989 = vst [vmem:[#allocation51_spill] sm:$0xff] %v11423_v11  ;;  %v11445_v42 = vsub.f32 %v11346_v55, %v17992_v31  ;;  %v11450_v11 = vsub.f32 %v11351_v16, %v17994_v27  ;;  %v17998_v27 = vand.u32 4294901760, %v11189_v39  ;;  %v18001_v31 = vand.u32 4294901760, %v11377_v43  ;;  %v11489_v39 = vld [vmem:[%s16958_s2 + $0xd0] sm:$0xff] }
  0x7f   : > { %17991 = vst [vmem:[#allocation52_spill] sm:$0xff] %v11440_v23  ;;  %8673 = vmatpush1.bf16.msra.mxu1 %v11440_v23  ;;  %v11558_v23 = vld [vmem:[%s16958_s2 + $0x2e0] sm:$0xff]  ;;  %v18019_v32 = vand.u32 4294901760, %v11460_v12 }
  0x80   : > { %17993 = vst [vmem:[#allocation53_spill] sm:$0xff] %v11445_v42  ;;  %17995 = vst [vmem:[#allocation54_spill] sm:$0xff] %v11450_v11  ;;  %v11473_v62 = vpack.c.bf16 %v17999_v6, %v17998_v27  ;;  %v11478_v1 = vsub.f32 %v11377_v43, %v18001_v31  ;;  %v18003_v11 = vand.u32 4294901760, %v11382_v54  ;;  %v18005_v27 = vand.u32 4294901760, %v10980_v8  ;;  %8674 = vmatprep.subr.bf16.mxu1 %v17960_v45 }
  0x81   : > { %v18006_v31 = vand.u32 4294901760, %v10985_v9 }
  0x82   : > { %18000 = vst [vmem:[#allocation56_spill] sm:$0xff] %v11473_v62  ;;  %18002 = vst [vmem:[#allocation57_spill] sm:$0xff] %v11478_v1  ;;  %v11484_v42 = vsub.f32 %v11382_v54, %v18003_v11  ;;  %v11499_v6 = vsub.f32 %v10980_v8, %v18005_v27  ;;  %v18007_v1 = vand.u32 4294901760, %v11212_v52  ;;  %v18008_v8 = vand.u32 4294901760, %v11230_v22  ;;  %v11535_v22 = vld [vmem:[%s16958_s2 + $0xe0] sm:$0xff]  ;;  %9249 = vmatpush1.bf16.msra.mxu0 %v11473_v62  ;;  %v11641_v62 = vld [vmem:[%s16958_s2 + $0x2f8] sm:$0xff] }
  0x83   : > { %v11504_v11 = vsub.f32 %v10985_v9, %v18006_v31  ;;  %v18010_v9 = vand.u32 4294901760, %v11413_v4  ;;  %v18012_v52 = vand.u32 4294901760, %v11430_v33  ;;  %9250 = vmatprep.subr.bf16.mxu0 %v17960_v45 }
  0x84   : > { %18004 = vst [vmem:[#allocation58_spill] sm:$0xff] %v11484_v42  ;;  %v11512_v42 = vld [vmem:[%s16958_s2 + $0x2d0] sm:$0xff]  ;;  %v11518_v27 = vpack.c.bf16 %v18008_v8, %v18007_v1  ;;  %v18014_v8 = vand.u32 4294901760, %v11435_v60 }
  0x85   : > { %v11523_v31 = vsub.f32 %v11413_v4, %v18010_v9  ;;  %v11541_v1 = vsub.f32 %v11430_v33, %v18012_v52  ;;  %v18016_v52 = vand.u32 4294901760, %v11235_v46  ;;  %v11582_v46 = vld [vmem:[%s16958_s2 + $0x2e8] sm:$0xff]  ;;  %v18030_v59 = vand.u32 4294901760, %v11512_v42 }
  0x86   : > { %18009 = vst [vmem:[#allocation59_spill] sm:$0xff] %v11518_v27  ;;  %v11546_v9 = vsub.f32 %v11435_v60, %v18014_v8  ;;  %v18017_v8 = vand.u32 4294901760, %v11251_v10  ;;  %v11587_v10 = vld [vmem:[%s16958_s2 + $0xf0] sm:$0xff]  ;;  %8676 = vmatpush1.bf16.msra.mxu1 %v11518_v27 }
  0x87   : > { %18011 = vst [vmem:[#allocation60_spill] sm:$0xff] %v11523_v31  ;;  %18013 = vst [vmem:[#allocation61_spill] sm:$0xff] %v11541_v1  ;;  %v11553_v31 = vld [vmem:[%s16958_s2 + $0xe8] sm:$0xff]  ;;  %v18021_v1 = vand.u32 4294901760, %v11465_v35  ;;  %8677 = vmatprep.subr.bf16.mxu1 %v17960_v45 }
  0x88   : > { %18015 = vst [vmem:[#allocation62_spill] sm:$0xff] %v11546_v9  ;;  %v11566_v20 = vpack.c.bf16 %v18017_v8, %v18016_v52  ;;  %v11571_v9 = vsub.f32 %v11460_v12, %v18019_v32  ;;  %v18023_v32 = vand.u32 4294901760, %v11489_v39  ;;  %v234_v27 = vld [vmem:[%s10942_s23 + $0x8] sm:$0xff] }
  0x89   : > { %v11576_v63 = vsub.f32 %v11465_v35, %v18021_v1  ;;  %v18025_v1 = vand.u32 4294901760, %v11494_v26 }
  0x8a   : > { %18018 = vst [vmem:[#allocation63_spill] sm:$0xff] %v11566_v20  ;;  %18020 = vst [vmem:[#allocation64_spill] sm:$0xff] %v11571_v9  ;;  %v11593_v52 = vsub.f32 %v11489_v39, %v18023_v32  ;;  %v11605_v9 = vld [vmem:[%s16958_s2 + $0xf8] sm:$0xff]  ;;  %v18028_v32 = vand.u32 4294901760, %v11270_v7  ;;  %v18032_v7 = vand.u32 4294901760, %v11530_v30  ;;  %9252 = vmatpush1.bf16.msra.mxu0 %v11566_v20 }
  0x8b   : > { %18022 = vst [vmem:[#allocation65_spill] sm:$0xff] %v11576_v63  ;;  %v11598_v8 = vsub.f32 %v11494_v26, %v18025_v1  ;;  %v11616_v1 = vsub.f32 %v11512_v42, %v18030_v59  ;;  %v18034_v59 = vand.u32 4294901760, %v11535_v22  ;;  %v18038_v63 = vand.u32 4294901760, %v11291_v0  ;;  %9253 = vmatprep.subr.bf16.mxu0 %v17960_v45 }
  0x8c   : > { %18024 = vst [vmem:[#allocation66_spill] sm:$0xff] %v11593_v52  ;;  %v11611_v52 = vpack.c.bf16 %v18028_v32, %v18027_v2  ;;  %v11629_v34 = vsub.f32 %v11530_v30, %v18032_v7 }
  0x8d   : > { %18026 = vst [vmem:[#allocation67_spill] sm:$0xff] %v11598_v8  ;;  %18031 = vst [vmem:[#allocation69_spill] sm:$0xff] %v11616_v1  ;;  %v11623_v8 = vld [vmem:[%s16958_s2 + $0x2f0] sm:$0xff]  ;;  %v11634_v2 = vsub.f32 %v11535_v22, %v18034_v59  ;;  %v18036_v1 = vand.u32 4294901760, %v10993_v13  ;;  %v18037_v59 = vand.u32 4294901760, %v11286_v5  ;;  %v18044_v5 = vand.u32 4294901760, %v11582_v46 }
  0x8e   : > { %18029 = vst [vmem:[#allocation68_spill] sm:$0xff] %v11611_v52  ;;  %18033 = vst [vmem:[#allocation70_spill] sm:$0xff] %v11629_v34  ;;  %8679 = vmatpush1.bf16.msra.mxu1 %v11611_v52 }
  0x8f   : > { %18035 = vst [vmem:[#allocation71_spill] sm:$0xff] %v11634_v2  ;;  %v11647_v7 = vsub.f32 %v10993_v13, %v18036_v1  ;;  %v11655_v32 = vpack.c.bf16 %v18038_v63, %v18037_v59  ;;  %v18040_v2 = vand.u32 4294901760, %v11553_v31  ;;  %v238_v13 = vld [vmem:[%s10942_s23 + $0x28] sm:$0xff]  ;;  %v18042_v1 = vand.u32 4294901760, %v11558_v23  ;;  %8680 = vmatprep.subr.bf16.mxu1 %v17960_v45 }
  0x90   : > { %v11673_v0 = vsub.f32 %v11582_v46, %v18044_v5  ;;  %v18046_v63 = vand.u32 4294901760, %v11587_v10 }
  0x91   : > { %18039 = vst [vmem:[#allocation72_spill] sm:$0xff] %v11655_v32  ;;  %v11660_v34 = vsub.f32 %v11553_v31, %v18040_v2  ;;  %v11668_v20 = vsub.f32 %v11558_v23, %v18042_v1  ;;  %v18049_v1 = vand.u32 4294901760, %v11605_v9  ;;  %9255 = vmatpush1.bf16.msra.mxu0 %v11655_v32  ;;  %v18066_v32 = vand.u32 4294901760, %v11014_v17 }
  0x92   : > { %18045 = vst [vmem:[#allocation75_spill] sm:$0xff] %v11673_v0  ;;  %v11678_v2 = vsub.f32 %v11587_v10, %v18046_v63  ;;  %v11693_v0 = vand.u32 4294901760, %v234_v27  ;;  %v18052_v63 = vand.u32 4294901760, %v11003_v15  ;;  %9256 = vmatprep.subr.bf16.mxu0 %v17960_v45 }
  0x93   : > { %18041 = vst [vmem:[#allocation73_spill] sm:$0xff] %v11660_v34  ;;  %18043 = vst [vmem:[#allocation74_spill] sm:$0xff] %v11668_v20  ;;  %v18048_v34 = vand.u32 4294901760, %v10998_v14  ;;  %v11690_v20 = vsub.f32 %v11605_v9, %v18049_v1  ;;  %v18056_v1 = vand.u32 4294901760, %v11623_v8  ;;  %v11736_v52 = vsub.f32 %v11014_v17, %v18066_v32 }
  0x94   : > { %18047 = vst [vmem:[#allocation76_spill] sm:$0xff] %v11678_v2  ;;  %18051 = vst [vmem:[#allocation78_spill] sm:$0xff] %v11693_v0  ;;  %v11699_v59 = vsub.f32 %v11003_v15, %v18052_v63  ;;  %v18059_v15 = vand.u32 4294901760, %v11346_v55  ;;  %v18060_v63 = vand.u32 4294901760, %v11351_v16  ;;  %v18067_v55 = vand.u32 4294901760, %v11019_v18 }
  0x95   : > { %v11685_v25 = vsub.f32 %v10998_v14, %v18048_v34  ;;  %18050 = vst [vmem:[#allocation77_spill] sm:$0xff] %v11690_v20  ;;  %v18053_v14 = vand.u32 4294901760, %v11311_v53  ;;  %v18054_v34 = vand.u32 4294901760, %v11329_v37  ;;  %v11711_v5 = vsub.f32 %v11623_v8, %v18056_v1 }
  0x96   : > { %v11713_v20 = vand.u32 4294901760, %v238_v13  ;;  %v11721_v53 = vpack.c.bf16 %v18060_v63, %v18059_v15  ;;  %v18062_v37 = vand.u32 4294901760, %v11641_v62  ;;  %v11731_v1 = vand.u32 4294901760, %v233_v24 }
  0x97   : > { %v11706_v2 = vpack.c.bf16 %v18054_v34, %v18053_v14  ;;  %18057 = vst [vmem:[#allocation80_spill] sm:$0xff] %v11711_v5  ;;  %v11729_v34 = vsub.f32 %v234_v27, %v11693_v0  ;;  %v11741_v16 = vsub.f32 %v11019_v18, %v18067_v55  ;;  %v11747_v63 = vand.u32 4294901760, %v237_v38 }
  0x98   : > { %18058 = vst [vmem:[#allocation81_spill] sm:$0xff] %v11713_v20  ;;  %18061 = vst [vmem:[#allocation82_spill] sm:$0xff] %v11721_v53  ;;  %v11726_v14 = vsub.f32 %v11641_v62, %v18062_v37  ;;  %v11745_v15 = vsub.f32 %v238_v13, %v11713_v20  ;;  %v11751_v37 = vsub.f32 %v233_v24, %v11731_v1  ;;  %v18071_v0 = vand.u32 4294901760, %v11024_v19 }
  0x99   : > { %18055 = vst [vmem:[#allocation79_spill] sm:$0xff] %v11706_v2  ;;  %18064 = vst [vmem:[#allocation84_spill] sm:$0xff] %v11729_v34  ;;  %8682 = vmatpush1.bf16.msra.mxu1 %v11706_v2  ;;  %v18072_v13 = vand.u32 4294901760, %v11356_v3  ;;  %v18073_v55 = vand.u32 4294901760, %v11377_v43  ;;  %v11769_v17 = vsub.f32 %v237_v38, %v11747_v63  ;;  %v18076_v32 = vand.u32 4294901760, %v11050_v28  ;;  %9258 = vmatpush1.bf16.msra.mxu0 %v11721_v53 }
  0x9a   : > { %18063 = vst [vmem:[#allocation83_spill] sm:$0xff] %v11726_v14  ;;  %18065 = vst [vmem:[#allocation85_spill] sm:$0xff] %v11731_v1  ;;  %v11758_v18 = vsub.f32 %v11024_v19, %v18071_v0  ;;  %v17066_v24 = vand.u32 4294901760, %v11745_v15  ;;  %8683 = vmatprep.subr.bf16.mxu1 %v17960_v45  ;;  %v18077_v19 = vand.u32 4294901760, %v11382_v54  ;;  %v18078_v43 = vand.u32 4294901760, %v11413_v4  ;;  %9259 = vmatprep.subr.bf16.mxu0 %v17960_v45 }
  0x9b   : > { %18068 = vst [vmem:[#allocation86_spill] sm:$0xff] %v11745_v15  ;;  %18069 = vst [vmem:[#allocation87_spill] sm:$0xff] %v11747_v63  ;;  %v11765_v27 = vpack.c.bf16 %v18073_v55, %v18072_v13  ;;  %v11774_v1 = vsub.f32 %v11050_v28, %v18076_v32  ;;  %v18080_v0 = vand.u32 4294901760, %v11729_v34  ;;  %v18081_v4 = vand.u32 4294901760, %v11153_v61 }
  0x9c   : > { %18070 = vst [vmem:[#allocation88_spill] sm:$0xff] %v11751_v37  ;;  %18075 = vst [vmem:[#allocation90_spill] sm:$0xff] %v11769_v17  ;;  %v11782_v3 = vpack.c.bf16 %v18078_v43, %v18077_v19  ;;  %v4363_v28 = vsub.f32 %v11745_v15, %v17066_v24  ;;  %v241_v19 = vld [vmem:[%s10942_s23 + $0x40] sm:$0xff]  ;;  %v18082_v43 = vand.u32 4294901760, %v11055_v29  ;;  %v18083_v13 = vand.u32 4294901760, %v11430_v33 }
  0x9d   : > { %18074 = vst [vmem:[#allocation89_spill] sm:$0xff] %v11765_v27  ;;  %v623_v38 = vsub.f32 %v11729_v34, %v18080_v0  ;;  %v11796_v32 = vsub.f32 %v11153_v61, %v18081_v4  ;;  %v18084_v24 = vand.u32 4294901760, %v11435_v60  ;;  %v18086_v2 = vand.u32 4294901760, %v11240_v47  ;;  %v245_v15 = vld [vmem:[%s10942_s23 + $0x60] sm:$0xff]  ;;  %8685 = vmatpush1.bf16.msra.mxu1 %v11765_v27 }
  0x9e   : > { %18079 = vst [vmem:[#allocation91_spill] sm:$0xff] %v11782_v3  ;;  %v11803_v0 = vsub.f32 %v11055_v29, %v18082_v43  ;;  %v18087_v55 = vand.u32 4294901760, %v11460_v12  ;;  %v18088_v34 = vand.u32 4294901760, %v11465_v35  ;;  %v18090_v33 = vand.u32 4294901760, %v11489_v39  ;;  %v240_v43 = vld [vmem:[%s10942_s23 + $0x38] sm:$0xff]  ;;  %9261 = vmatpush1.bf16.msra.mxu0 %v11782_v3  ;;  %8686 = vmatprep.subr.bf16.mxu1 %v17960_v45 }
  0x9f   : > { %v11809_v53 = vpack.c.bf16 %v18084_v24, %v18083_v13  ;;  %v624_v54 = vand.u32 4294901760, %v623_v38  ;;  %v917_v4 = vsub.f32 %v11240_v47, %v18086_v2  ;;  %v18091_v60 = vand.u32 4294901760, %v11494_v26  ;;  %v244_v2 = vld [vmem:[%s10942_s23 + $0x58] sm:$0xff]  ;;  %9262 = vmatprep.subr.bf16.mxu0 %v17960_v45 }
  0xa0   : > { %v11820_v29 = vpack.c.bf16 %v18088_v34, %v18087_v55  ;;  %v4364_v38 = vand.u32 4294901760, %v4363_v28  ;;  %v17075_v13 = vand.u32 4294901760, %v11769_v17  ;;  %v18093_v12 = vand.u32 4294901760, %v11512_v42 }
  0xa1   : > { %18085 = vst [vmem:[#allocation92_spill] sm:$0xff] %v11809_v53  ;;  %v11826_v24 = vpack.c.bf16 %v18091_v60, %v18090_v33  ;;  %v18094_v35 = vand.u32 4294901760, %v11530_v30  ;;  %v18096_v39 = vand.u32 4294901760, %v11535_v22  ;;  %v18097_v26 = vand.u32 4294901760, %v11553_v31  ;;  %625 = vmatprep.mubr.f32.mxu1 %v624_v54  ;;  %8688 = vmatpush1.bf16.msra.mxu1 %v11809_v53  ;;  %v248_v53 = vld [vmem:[%s10942_s23 + $0x78] sm:$0xff] }
  0xa2   : > { %18089 = vst [vmem:[#allocation93_spill] sm:$0xff] %v11820_v29  ;;  %v18099_v28 = vand.u32 4294901760, %v11334_v21  ;;  %v11848_v60 = vand.u32 4294901760, %v241_v19  ;;  %v18101_v42 = vand.u32 4294901760, %v11751_v37  ;;  %v911_v22 = vand.u32 4294901760, %v11796_v32  ;;  %4365 = vmatprep.mubr.f32.mxu0 %v4364_v38  ;;  %9264 = vmatpush1.bf16.msra.mxu0 %v11820_v29 }
  0xa3   : > { %18092 = vst [vmem:[#allocation94_spill] sm:$0xff] %v11826_v24  ;;  %v11837_v34 = vpack.c.bf16 %v18094_v35, %v18093_v12  ;;  %v11843_v55 = vpack.c.bf16 %v18097_v26, %v18096_v39  ;;  %v18102_v31 = vand.u32 4294901760, %v11418_v41  ;;  %v11860_v35 = vand.u32 4294901760, %v245_v15  ;;  %8689 = vmatprep.subr.bf16.mxu1 %v17960_v45  ;;  %9265 = vmatprep.subr.bf16.mxu0 %v17960_v45 }
  0xa4   : > { %v4650_v33 = vsub.f32 %v11334_v21, %v18099_v28  ;;  %18100 = vst [vmem:[#allocation97_spill] sm:$0xff] %v11848_v60  ;;  %v11854_v30 = vsub.f32 %v11751_v37, %v18101_v42  ;;  %v918_v39 = vand.u32 4294901760, %v917_v4  ;;  %v11863_v26 = vsub.f32 %v241_v19, %v11848_v60  ;;  %v259_v37 = vld [vmem:[%s10942_s23 + $0xd0] sm:$0xff] }
  0xa5   : > { %18095 = vst [vmem:[#allocation95_spill] sm:$0xff] %v11837_v34  ;;  %18098 = vst [vmem:[#allocation96_spill] sm:$0xff] %v11843_v55  ;;  %v4657_v12 = vsub.f32 %v11418_v41, %v18102_v31  ;;  %v11865_v28 = vand.u32 4294901760, %v240_v43  ;;  %v11867_v54 = vand.u32 4294901760, %v244_v2  ;;  %v11873_v32 = vsub.f32 %v11769_v17, %v17075_v13  ;;  %8691 = vmatpush1.bf16.msra.mxu1 %v11826_v24 }
  0xa6   : > { %18103 = vst [vmem:[#allocation98_spill] sm:$0xff] %v11860_v35  ;;  %18104 = vst [vmem:[#allocation99_spill] sm:$0xff] %v11863_v26  ;;  %v11876_v42 = vsub.f32 %v245_v15, %v11860_v35  ;;  %v4651_v38 = vand.u32 4294901760, %v4650_v33  ;;  %v18110_v3 = vand.u32 4294901760, %v11558_v23  ;;  %v18111_v19 = vand.u32 4294901760, %v11582_v46  ;;  %9267 = vmatpush1.bf16.msra.mxu0 %v11837_v34  ;;  %8692 = vmatprep.subr.bf16.mxu1 %v17960_v45 }
  0xa7   : > { %18105 = vst [vmem:[#allocation100_spill] sm:$0xff] %v11865_v28  ;;  %18106 = vst [vmem:[#allocation101_spill] sm:$0xff] %v11867_v54  ;;  %v11884_v31 = vsub.f32 %v240_v43, %v11865_v28  ;;  %v11887_v13 = vsub.f32 %v244_v2, %v11867_v54  ;;  %v4658_v4 = vand.u32 4294901760, %v4657_v12  ;;  %v18113_v2 = vand.u32 4294901760, %v11863_v26  ;;  %9268 = vmatprep.subr.bf16.mxu0 %v17960_v45 }
  0xa8   : > { %18107 = vst [vmem:[#allocation102_spill] sm:$0xff] %v11876_v42  ;;  %v11897_v43 = vpack.c.bf16 %v18111_v19, %v18110_v3  ;;  %v18114_v15 = vand.u32 4294901760, %v11499_v6  ;;  %v18115_v12 = vand.u32 4294901760, %v11504_v11  ;;  %v18116_v23 = vand.u32 4294901760, %v11587_v10 }
  0xa9   : > { %18108 = vst [vmem:[#allocation103_spill] sm:$0xff] %v11884_v31  ;;  %18109 = vst [vmem:[#allocation104_spill] sm:$0xff] %v11887_v13  ;;  %v11902_v27 = vsub.f32 %v11863_v26, %v18113_v2  ;;  %v18117_v46 = vand.u32 4294901760, %v11605_v9  ;;  %v18119_v19 = vand.u32 4294901760, %v11623_v8  ;;  %v18120_v2 = vand.u32 4294901760, %v11641_v62  ;;  %v252_v26 = vld [vmem:[%s10942_s23 + $0x98] sm:$0xff]  ;;  %8694 = vmatpush1.bf16.msra.mxu1 %v11843_v55 }
  0xaa   : > { %18112 = vst [vmem:[#allocation105_spill] sm:$0xff] %v11897_v43  ;;  %v924_v33 = vsub.f32 %v11499_v6, %v18114_v15  ;;  %v931_v29 = vsub.f32 %v11504_v11, %v18115_v12  ;;  %v630_v9 = vand.u32 4294901760, %v11854_v30  ;;  %v8699_v10 = vpack.c.bf16 %v918_v39, %v911_v22  ;;  %v251_v39 = vld [vmem:[%s10942_s23 + $0x90] sm:$0xff]  ;;  %9270 = vmatpush1.bf16.msra.mxu0 %v11897_v43 }
  0xab   : > { %v11916_v3 = vpack.c.bf16 %v18117_v46, %v18116_v23  ;;  %v11922_v17 = vpack.c.bf16 %v18120_v2, %v18119_v19  ;;  %v18122_v8 = vand.u32 4294901760, %v11876_v42  ;;  %v18123_v23 = vand.u32 4294901760, %v11647_v7  ;;  %v247_v19 = vld [vmem:[%s10942_s23 + $0x70] sm:$0xff]  ;;  %8695 = vmatprep.subr.bf16.mxu1 %v17960_v45  ;;  %9271 = vmatprep.subr.bf16.mxu0 %v17960_v45 }
  0xac   : > { %v4370_v2 = vand.u32 4294901760, %v11873_v32  ;;  %v9275_v12 = vpack.c.bf16 %v4658_v4, %v4651_v38  ;;  %v18124_v15 = vand.u32 4294901760, %v11685_v25  ;;  %v11944_v22 = vand.u32 4294901760, %v248_v53 }
  0xad   : > { %18118 = vst [vmem:[#allocation106_spill] sm:$0xff] %v11916_v3  ;;  %18121 = vst [vmem:[#allocation107_spill] sm:$0xff] %v11922_v17  ;;  %v11933_v62 = vsub.f32 %v11876_v42, %v18122_v8  ;;  %v4664_v46 = vsub.f32 %v11647_v7, %v18123_v23  ;;  %v639_v8 = vand.u32 4294901760, %v11902_v27  ;;  %v925_v34 = vand.u32 4294901760, %v924_v33  ;;  %v255_v23 = vld [vmem:[%s10942_s23 + $0xb0] sm:$0xff]  ;;  %8697 = vmatpush1.bf16.msra.mxu1 %v11916_v3 }
  0xae   : > { %v4671_v30 = vsub.f32 %v11685_v25, %v18124_v15  ;;  %18125 = vst [vmem:[#allocation108_spill] sm:$0xff] %v11944_v22  ;;  %v932_v24 = vand.u32 4294901760, %v931_v29  ;;  %v11948_v42 = vand.u32 4294901760, %v252_v26  ;;  %v18127_v32 = vand.u32 4294901760, %v11884_v31  ;;  %9273 = vmatpush1.bf16.msra.mxu0 %v11922_v17  ;;  %8698 = vmatprep.subr.bf16.mxu1 %v17960_v45 }
  0xaf   : > { %v18128_v4 = vand.u32 4294901760, %v11887_v13  ;;  %v11963_v27 = vsub.f32 %v248_v53, %v11944_v22  ;;  %v11965_v33 = vand.u32 4294901760, %v247_v19  ;;  %v4379_v29 = vand.u32 4294901760, %v11933_v62  ;;  %9274 = vmatprep.subr.bf16.mxu0 %v17960_v45 }
  0xb0   : > { %18126 = vst [vmem:[#allocation109_spill] sm:$0xff] %v11948_v42  ;;  %v11955_v38 = vsub.f32 %v11884_v31, %v18127_v32  ;;  %v4665_v55 = vand.u32 4294901760, %v4664_v46  ;;  %v11971_v32 = vsub.f32 %v252_v26, %v11948_v42  ;;  %v11973_v31 = vand.u32 4294901760, %v251_v39  ;;  %631 = vmatmul.mubr.f32.vlgmr.msra.gmra.mrb[0].mxu1 %v630_v9 }
  0xb1   : > { %v11960_v15 = vsub.f32 %v11887_v13, %v18128_v4  ;;  %18129 = vst [vmem:[#allocation110_spill] sm:$0xff] %v11963_v27  ;;  %18130 = vst [vmem:[#allocation111_spill] sm:$0xff] %v11965_v33  ;;  %v4672_v4 = vand.u32 4294901760, %v4671_v30  ;;  %v17110_v53 = vand.u32 4294901760, %v11963_v27  ;;  %v11979_v13 = vsub.f32 %v247_v19, %v11965_v33  ;;  %4371 = vmatmul.mubr.f32.vlgmr.msra.gmra.mrb[0].mxu0 %v4370_v2  ;;  %v262_v2 = vld [vmem:[%s10942_s23 + $0xe8] sm:$0xff] }
  0xb2   : > { %18131 = vst [vmem:[#allocation112_spill] sm:$0xff] %v11971_v32  ;;  %18132 = vst [vmem:[#allocation113_spill] sm:$0xff] %v11973_v31  ;;  %v11981_v43 = vand.u32 4294901760, %v255_v23  ;;  %v17117_v54 = vand.u32 4294901760, %v11971_v32  ;;  %v11985_v62 = vsub.f32 %v251_v39, %v11973_v31  ;;  %v17118_v26 = vand.u32 4294901760, %v11699_v59  ;;  %8700 = vmatpush1.bf16.msra.mxu1 %v8699_v10  ;;  %9276 = vmatpush1.bf16.msra.mxu0 %v9275_v12  ;;  %v266_v12 = vld [vmem:[%s10942_s23 + $0x108] sm:$0xff] }
  0xb3   : > { %18133 = vst [vmem:[#allocation114_spill] sm:$0xff] %v11979_v13  ;;  %v653_v30 = vsub.f32 %v11963_v27, %v17110_v53  ;;  %v11997_v42 = vand.u32 4294901760, %v259_v37  ;;  %v8702_v17 = vpack.c.bf16 %v932_v24, %v925_v34  ;;  %v18139_v3 = vand.u32 4294901760, %v11979_v13  ;;  %v254_v34 = vld [vmem:[%s10942_s23 + $0xa8] sm:$0xff]  ;;  %640 = vmatprep.mubr.f32.mxu1 %v639_v8  ;;  %4380 = vmatprep.mubr.f32.mxu0 %v4379_v29 }
  0xb4   : > { %18134 = vst [vmem:[#allocation115_spill] sm:$0xff] %v11981_v43  ;;  %18135 = vst [vmem:[#allocation116_spill] sm:$0xff] %v11985_v62  ;;  %v11995_v33 = vsub.f32 %v255_v23, %v11981_v43  ;;  %v4393_v39 = vsub.f32 %v11971_v32, %v17117_v54  ;;  %v938_v53 = vsub.f32 %v11699_v59, %v17118_v26  ;;  %v18138_v23 = vand.u32 4294901760, %v11736_v52 }
  0xb5   : > { %18137 = vst [vmem:[#allocation118_spill] sm:$0xff] %v11997_v42  ;;  %v659_v27 = vsub.f32 %v11979_v13, %v18139_v3  ;;  %v12017_v46 = vsub.f32 %v259_v37, %v11997_v42  ;;  %v645_v26 = vand.u32 4294901760, %v11955_v38  ;;  %v18141_v32 = vand.u32 4294901760, %v11985_v62  ;;  %v258_v38 = vld [vmem:[%s10942_s23 + $0xc8] sm:$0xff]  ;;  %8701 = vmatprep.subr.bf16.mxu1 %v17960_v45  ;;  %9277 = vmatprep.subr.bf16.mxu0 %v17960_v45 }
  0xb6   : > { %18136 = vst [vmem:[#allocation117_spill] sm:$0xff] %v11995_v33  ;;  %v945_v19 = vsub.f32 %v11736_v52, %v18138_v23  ;;  %v17125_v54 = vand.u32 4294901760, %v11995_v33  ;;  %v939_v31 = vand.u32 4294901760, %v938_v53  ;;  %v4385_v3 = vand.u32 4294901760, %v11960_v15  ;;  %8703 = vmatpush1.bf16.msra.mxu1 %v8702_v17 }
  0xb7   : > { %18140 = vst [vmem:[#allocation119_spill] sm:$0xff] %v12017_v46  ;;  %v4399_v23 = vsub.f32 %v11985_v62, %v18141_v32  ;;  %v9278_v13 = vpack.c.bf16 %v4672_v4, %v4665_v55  ;;  %v17126_v9 = vand.u32 4294901760, %v12017_v46  ;;  %v654_v32 = vand.u32 4294901760, %v653_v30  ;;  %646 = vmatmul.mubr.f32.gmra.mrb[2].mxu1 %v645_v26  ;;  %8704 = vmatprep.subr.bf16.mxu1 %v17960_v45 }
  0xb8   : > { %v946_v24 = vand.u32 4294901760, %v945_v19  ;;  %v668_v37 = vsub.f32 %v11995_v33, %v17125_v54  ;;  %v4394_v53 = vand.u32 4294901760, %v4393_v39  ;;  %v17127_v19 = vand.u32 4294901760, %v11741_v16  ;;  %v261_v39 = vld [vmem:[%s10942_s23 + $0xe0] sm:$0xff]  ;;  %4386 = vmatmul.mubr.f32.gmra.mrb[2].mxu0 %v4385_v3  ;;  %v275_v33 = vld [vmem:[%s10942_s23 + $0x150] sm:$0xff] }
  0xb9   : > { %v17130_v10 = vand.u32 4294901760, %v11758_v18  ;;  %v660_v55 = vand.u32 4294901760, %v659_v27  ;;  %v4400_v15 = vand.u32 4294901760, %v4399_v23  ;;  %v4408_v4 = vsub.f32 %v12017_v46, %v17126_v9  ;;  %9279 = vmatpush1.bf16.msra.mxu0 %v9278_v13  ;;  %655 = vmatprep.mubr.f32.mxu1 %v654_v32 }
  0xba   : > { %v12037_v54 = vand.u32 4294901760, %v254_v34  ;;  %v8705_v8 = vpack.c.bf16 %v946_v24, %v939_v31  ;;  %v4678_v30 = vsub.f32 %v11741_v16, %v17127_v19  ;;  %v12047_v29 = vand.u32 4294901760, %v258_v38  ;;  %4395 = vmatprep.mubr.f32.mxu0 %v4394_v53  ;;  %9280 = vmatprep.subr.bf16.mxu0 %v17960_v45 }
  0xbb   : > { %v4685_v27 = vsub.f32 %v11758_v18, %v17130_v10  ;;  %v669_v23 = vand.u32 4294901760, %v668_v37  ;;  %v4409_v9 = vand.u32 4294901760, %v4408_v4  ;;  %v12053_v31 = vand.u32 4294901760, %v262_v2  ;;  %v265_v37 = vld [vmem:[%s10942_s23 + $0x100] sm:$0xff]  ;;  %661 = vmatmul.mubr.f32.gmra.mrb[4].mxu1 %v660_v55 }
  0xbc   : > { %18142 = vst [vmem:[#allocation120_spill] sm:$0xff] %v12037_v54  ;;  %18143 = vst [vmem:[#allocation121_spill] sm:$0xff] %v12047_v29  ;;  %v12051_v26 = vsub.f32 %v254_v34, %v12037_v54  ;;  %v4679_v24 = vand.u32 4294901760, %v4678_v30  ;;  %v12056_v46 = vsub.f32 %v258_v38, %v12047_v29  ;;  %v12058_v10 = vand.u32 4294901760, %v266_v12  ;;  %4401 = vmatmul.mubr.f32.gmra.mrb[4].mxu0 %v4400_v15  ;;  %v346_v29 = vld [vmem:[%s10942_s23 + $0x388] sm:$0xff] }
  0xbd   : > { %18145 = vst [vmem:[#allocation123_spill] sm:$0xff] %v12053_v31  ;;  %v4686_v19 = vand.u32 4294901760, %v4685_v27  ;;  %v12063_v3 = vsub.f32 %v262_v2, %v12053_v31  ;;  %v12065_v34 = vand.u32 4294901760, %v261_v39  ;;  %670 = vmatprep.mubr.f32.mxu1 %v669_v23  ;;  %v17134_v55 = vand.u32 4294901760, %v11774_v1  ;;  %8706 = vmatpush1.bf16.msra.mxu1 %v8705_v8 }
  0xbe   : > { %18144 = vst [vmem:[#allocation122_spill] sm:$0xff] %v12051_v26  ;;  %18146 = vst [vmem:[#allocation124_spill] sm:$0xff] %v12056_v46  ;;  %v17133_v17 = vand.u32 4294901760, %v12051_v26  ;;  %v17131_v38 = vand.u32 4294901760, %v12056_v46  ;;  %v12071_v32 = vsub.f32 %v266_v12, %v12058_v10  ;;  %4410 = vmatprep.mubr.f32.mxu0 %v4409_v9  ;;  %v17140_v12 = vand.u32 4294901760, %v11803_v0  ;;  %8707 = vmatprep.subr.bf16.mxu1 %v17960_v45 }
  0xbf   : > { %18147 = vst [vmem:[#allocation125_spill] sm:$0xff] %v12058_v10  ;;  %18148 = vst [vmem:[#allocation126_spill] sm:$0xff] %v12063_v3  ;;  %v9281_v13 = vpack.c.bf16 %v4686_v19, %v4679_v24  ;;  %v17132_v2 = vand.u32 4294901760, %v12063_v3  ;;  %v12078_v4 = vsub.f32 %v261_v39, %v12065_v34  ;;  %v12086_v30 = vand.u32 4294901760, %v265_v37 }
  0xc0   : > { %18149 = vst [vmem:[#allocation127_spill] sm:$0xff] %v12065_v34  ;;  %18150 = vst [vmem:[#allocation128_spill] sm:$0xff] %v12071_v32  ;;  %v674_v53 = vsub.f32 %v12051_v26, %v17133_v17  ;;  %v4414_v19 = vsub.f32 %v12056_v46, %v17131_v38  ;;  %v17135_v15 = vand.u32 4294901760, %v12071_v32  ;;  %v952_v8 = vsub.f32 %v11774_v1, %v17134_v55  ;;  %v269_v38 = vld [vmem:[%s10942_s23 + $0x120] sm:$0xff] }
  0xc1   : > { %18151 = vst [vmem:[#allocation129_spill] sm:$0xff] %v12078_v4  ;;  %18152 = vst [vmem:[#allocation130_spill] sm:$0xff] %v12086_v30  ;;  %9282 = vmatpush1.bf16.msra.mxu0 %v9281_v13  ;;  %v683_v39 = vsub.f32 %v12063_v3, %v17132_v2  ;;  %v17146_v9 = vand.u32 4294901760, %v12078_v4  ;;  %v959_v13 = vsub.f32 %v11803_v0, %v17140_v12  ;;  %v273_v55 = vld [vmem:[%s10942_s23 + $0x140] sm:$0xff]  ;;  %v17147_v12 = vand.u32 4294901760, %v11100_v44  ;;  %v268_v3 = vld [vmem:[%s10942_s23 + $0x118] sm:$0xff] }
  0xc2   : > { %v675_v27 = vand.u32 4294901760, %v674_v53  ;;  %v4415_v23 = vand.u32 4294901760, %v4414_v19  ;;  %v4423_v24 = vsub.f32 %v12071_v32, %v17135_v15  ;;  %9283 = vmatprep.subr.bf16.mxu0 %v17960_v45  ;;  %v12104_v53 = vsub.f32 %v265_v37, %v12086_v30 }
  0xc3   : > { %v684_v2 = vand.u32 4294901760, %v683_v39  ;;  %v689_v19 = vsub.f32 %v12078_v4, %v17146_v9  ;;  %v953_v17 = vand.u32 4294901760, %v952_v8  ;;  %v960_v32 = vand.u32 4294901760, %v959_v13 }
  0xc4   : > { %18153 = vst [vmem:[#allocation131_spill] sm:$0xff] %v12104_v53  ;;  %676 = vmatmul.mubr.f32.gmra.mrb[6].mxu1 %v675_v27  ;;  %4416 = vmatmul.mubr.f32.gmra.mrb[6].mxu0 %v4415_v23  ;;  %v4424_v15 = vand.u32 4294901760, %v4423_v24  ;;  %v17145_v46 = vand.u32 4294901760, %v12104_v53  ;;  %v17148_v27 = vand.u32 4294901760, %v11108_v50  ;;  %v12115_v39 = vand.u32 4294901760, %v269_v38 }
  0xc5   : > { %685 = vmatprep.mubr.f32.mxu1 %v684_v2  ;;  %v690_v37 = vand.u32 4294901760, %v689_v19  ;;  %v8708_v26 = vpack.c.bf16 %v960_v32, %v953_v17  ;;  %v4692_v23 = vsub.f32 %v11100_v44, %v17147_v12  ;;  %v12123_v24 = vand.u32 4294901760, %v273_v55  ;;  %v272_v17 = vld [vmem:[%s10942_s23 + $0x138] sm:$0xff] }
  0xc6   : > { %18154 = vst [vmem:[#allocation132_spill] sm:$0xff] %v12115_v39  ;;  %4425 = vmatprep.mubr.f32.mxu0 %v4424_v15  ;;  %v4429_v8 = vsub.f32 %v12104_v53, %v17145_v46  ;;  %v4699_v2 = vsub.f32 %v11108_v50, %v17148_v27  ;;  %v12129_v13 = vsub.f32 %v269_v38, %v12115_v39  ;;  %v12131_v15 = vand.u32 4294901760, %v268_v3 }
  0xc7   : > { %18155 = vst [vmem:[#allocation133_spill] sm:$0xff] %v12123_v24  ;;  %8709 = vmatpush1.bf16.msra.mxu1 %v8708_v26  ;;  %v4693_v19 = vand.u32 4294901760, %v4692_v23  ;;  %v12135_v46 = vsub.f32 %v273_v55, %v12123_v24  ;;  %v17152_v38 = vand.u32 4294901760, %v11110_v51  ;;  %v17162_v26 = vand.u32 4294901760, %v11134_v56 }
  0xc8   : > { %691 = vmatmul.mubr.f32.gmra.mrb[8].mxu1 %v690_v37  ;;  %18156 = vst [vmem:[#allocation134_spill] sm:$0xff] %v12129_v13  ;;  %18157 = vst [vmem:[#allocation135_spill] sm:$0xff] %v12131_v15  ;;  %v4430_v32 = vand.u32 4294901760, %v4429_v8  ;;  %v4700_v9 = vand.u32 4294901760, %v4699_v2  ;;  %v17151_v12 = vand.u32 4294901760, %v12129_v13  ;;  %8710 = vmatprep.subr.bf16.mxu1 %v17960_v45  ;;  %v12140_v37 = vsub.f32 %v268_v3, %v12131_v15 }
  0xc9   : > { %18158 = vst [vmem:[#allocation136_spill] sm:$0xff] %v12135_v46  ;;  %v17157_v27 = vand.u32 4294901760, %v12135_v46  ;;  %v12145_v8 = vand.u32 4294901760, %v272_v17  ;;  %v966_v3 = vsub.f32 %v11110_v51, %v17152_v38  ;;  %v973_v53 = vsub.f32 %v11134_v56, %v17162_v26  ;;  %v18317_v56 = vld [vmem:[#allocation74_spill] sm:$0xff] }
  0xca   : > { %18159 = vst [vmem:[#allocation137_spill] sm:$0xff] %v12140_v37  ;;  %4431 = vmatmul.mubr.f32.gmra.mrb[8].mxu0 %v4430_v32  ;;  %v9284_v55 = vpack.c.bf16 %v4700_v9, %v4693_v19  ;;  %v698_v23 = vsub.f32 %v12129_v13, %v17151_v12  ;;  %v17171_v19 = vand.u32 4294901760, %v11136_v57  ;;  %v276_v12 = vld [vmem:[%s10942_s23 + $0x158] sm:$0xff]  ;;  %v18162_v38 = vand.u32 4294901760, %v12140_v37 }
  0xcb   : > { %18160 = vst [vmem:[#allocation138_spill] sm:$0xff] %v12145_v8  ;;  %v4438_v32 = vsub.f32 %v12135_v46, %v17157_v27  ;;  %v12161_v9 = vsub.f32 %v272_v17, %v12145_v8  ;;  %v967_v4 = vand.u32 4294901760, %v966_v3  ;;  %v17172_v27 = vand.u32 4294901760, %v11138_v58  ;;  %v280_v46 = vld [vmem:[%s10942_s23 + $0x178] sm:$0xff] }
  0xcc   : > { %9285 = vmatpush1.bf16.msra.mxu0 %v9284_v55  ;;  %v699_v2 = vand.u32 4294901760, %v698_v23  ;;  %v704_v13 = vsub.f32 %v12140_v37, %v18162_v38  ;;  %v974_v26 = vand.u32 4294901760, %v973_v53  ;;  %v4706_v55 = vsub.f32 %v11136_v57, %v17171_v19  ;;  %v279_v37 = vld [vmem:[%s10942_s23 + $0x170] sm:$0xff]  ;;  %v364_v51 = vld [vmem:[%s10942_s23 + $0x418] sm:$0xff] }
  0xcd   : > { %18161 = vst [vmem:[#allocation139_spill] sm:$0xff] %v12161_v9  ;;  %v4439_v62 = vand.u32 4294901760, %v4438_v32  ;;  %9286 = vmatprep.subr.bf16.mxu0 %v17960_v45  ;;  %v17175_v17 = vand.u32 4294901760, %v12161_v9  ;;  %v4713_v38 = vsub.f32 %v11138_v58, %v17172_v27  ;;  %v12179_v3 = vand.u32 4294901760, %v276_v12  ;;  %v338_v58 = vld [vmem:[%s10942_s23 + $0x348] sm:$0xff] }
  0xce   : > { %700 = vmatprep.mubr.f32.mxu1 %v699_v2  ;;  %v705_v23 = vand.u32 4294901760, %v704_v13  ;;  %v8711_v32 = vpack.c.bf16 %v974_v26, %v967_v4  ;;  %v4707_v8 = vand.u32 4294901760, %v4706_v55  ;;  %v12185_v15 = vand.u32 4294901760, %v280_v46 }
  0xcf   : > { %18163 = vst [vmem:[#allocation140_spill] sm:$0xff] %v12179_v3  ;;  %4440 = vmatprep.mubr.f32.mxu0 %v4439_v62  ;;  %v4444_v53 = vsub.f32 %v12161_v9, %v17175_v17  ;;  %v4714_v19 = vand.u32 4294901760, %v4713_v38  ;;  %v12188_v13 = vsub.f32 %v276_v12, %v12179_v3  ;;  %v12190_v2 = vand.u32 4294901760, %v275_v33  ;;  %v283_v17 = vld [vmem:[%s10942_s23 + $0x190] sm:$0xff] }
  0xd0   : > { %18164 = vst [vmem:[#allocation141_spill] sm:$0xff] %v12185_v15  ;;  %706 = vmatmul.mubr.f32.gmra.mrb[10].mxu1 %v705_v23  ;;  %v12193_v24 = vsub.f32 %v280_v46, %v12185_v15  ;;  %v12195_v62 = vand.u32 4294901760, %v279_v37  ;;  %v17180_v46 = vand.u32 4294901760, %v11175_v36  ;;  %v17185_v38 = vand.u32 4294901760, %v11177_v40 }
  0xd1   : > { %18165 = vst [vmem:[#allocation142_spill] sm:$0xff] %v12188_v13  ;;  %18166 = vst [vmem:[#allocation143_spill] sm:$0xff] %v12190_v2  ;;  %8712 = vmatpush1.bf16.msra.mxu1 %v8711_v32  ;;  %v4445_v27 = vand.u32 4294901760, %v4444_v53  ;;  %v9287_v4 = vpack.c.bf16 %v4714_v19, %v4707_v8  ;;  %v17176_v26 = vand.u32 4294901760, %v12188_v13  ;;  %v12199_v55 = vsub.f32 %v275_v33, %v12190_v2  ;;  %v282_v2 = vld [vmem:[%s10942_s23 + $0x188] sm:$0xff] }
  0xd2   : > { %18167 = vst [vmem:[#allocation144_spill] sm:$0xff] %v12193_v24  ;;  %18168 = vst [vmem:[#allocation145_spill] sm:$0xff] %v12195_v62  ;;  %8713 = vmatprep.subr.bf16.mxu1 %v17960_v45  ;;  %v17177_v12 = vand.u32 4294901760, %v12193_v24  ;;  %v12204_v23 = vsub.f32 %v279_v37, %v12195_v62  ;;  %v17197_v19 = vand.u32 4294901760, %v11193_v48  ;;  %v980_v53 = vsub.f32 %v11175_v36, %v17180_v46  ;;  %v287_v46 = vld [vmem:[%s10942_s23 + $0x1b0] sm:$0xff] }
  0xd3   : > { %18169 = vst [vmem:[#allocation146_spill] sm:$0xff] %v12199_v55  ;;  %4446 = vmatmul.mubr.f32.gmra.mrb[10].mxu0 %v4445_v27  ;;  %v713_v33 = vsub.f32 %v12188_v13, %v17176_v26  ;;  %v17192_v8 = vand.u32 4294901760, %v12199_v55  ;;  %v18171_v32 = vand.u32 4294901760, %v11196_v49  ;;  %v12240_v3 = vand.u32 4294901760, %v283_v17 }
  0xd4   : > { %18170 = vst [vmem:[#allocation147_spill] sm:$0xff] %v12204_v23  ;;  %9288 = vmatpush1.bf16.msra.mxu0 %v9287_v4  ;;  %v4453_v37 = vsub.f32 %v12193_v24, %v17177_v12  ;;  %v987_v4 = vsub.f32 %v11177_v40, %v17185_v38  ;;  %v4720_v12 = vsub.f32 %v11193_v48, %v17197_v19  ;;  %v18172_v13 = vand.u32 4294901760, %v12204_v23  ;;  %v286_v19 = vld [vmem:[%s10942_s23 + $0x1a8] sm:$0xff]  ;;  %v335_v40 = vld [vmem:[%s10942_s23 + $0x330] sm:$0xff] }
  0xd5   : > { %9289 = vmatprep.subr.bf16.mxu0 %v17960_v45  ;;  %v714_v26 = vand.u32 4294901760, %v713_v33  ;;  %v719_v27 = vsub.f32 %v12199_v55, %v17192_v8  ;;  %v4727_v24 = vsub.f32 %v11196_v49, %v18171_v32  ;;  %v981_v62 = vand.u32 4294901760, %v980_v53  ;;  %18173 = vst [vmem:[#allocation148_spill] sm:$0xff] %v12240_v3  ;;  %v290_v53 = vld [vmem:[%s10942_s23 + $0x1c8] sm:$0xff] }
  0xd6   : > { %v4454_v9 = vand.u32 4294901760, %v4453_v37  ;;  %v4459_v38 = vsub.f32 %v12204_v23, %v18172_v13  ;;  %v988_v33 = vand.u32 4294901760, %v987_v4  ;;  %v4721_v8 = vand.u32 4294901760, %v4720_v12 }
  0xd7   : > { %715 = vmatprep.mubr.f32.mxu1 %v714_v26  ;;  %v720_v15 = vand.u32 4294901760, %v719_v27  ;;  %v4728_v55 = vand.u32 4294901760, %v4727_v24  ;;  %v12243_v32 = vand.u32 4294901760, %v287_v46  ;;  %v12246_v49 = vsub.f32 %v283_v17, %v12240_v3 }
  0xd8   : > { %4455 = vmatprep.mubr.f32.mxu0 %v4454_v9  ;;  %v4460_v48 = vand.u32 4294901760, %v4459_v38  ;;  %v8714_v30 = vpack.c.bf16 %v988_v33, %v981_v62  ;;  %v12248_v13 = vand.u32 4294901760, %v282_v2  ;;  %v12253_v24 = vand.u32 4294901760, %v286_v19 }
  0xd9   : > { %18174 = vst [vmem:[#allocation149_spill] sm:$0xff] %v12243_v32  ;;  %721 = vmatmul.mubr.f32.gmra.mrb[12].mxu1 %v720_v15  ;;  %v9290_v37 = vpack.c.bf16 %v4728_v55, %v4721_v8  ;;  %18175 = vst [vmem:[#allocation150_spill] sm:$0xff] %v12246_v49  ;;  %v12251_v26 = vsub.f32 %v287_v46, %v12243_v32  ;;  %v17204_v9 = vand.u32 4294901760, %v12246_v49  ;;  %v18180_v15 = vld [vmem:[#allocation29_spill] sm:$0xff]  ;;  %v18181_v55 = vld [vmem:[#allocation31_spill] sm:$0xff] }
  0xda   : > { %18176 = vst [vmem:[#allocation151_spill] sm:$0xff] %v12248_v13  ;;  %4461 = vmatmul.mubr.f32.gmra.mrb[12].mxu0 %v4460_v48  ;;  %8715 = vmatpush1.bf16.msra.mxu1 %v8714_v30  ;;  %18178 = vst [vmem:[#allocation153_spill] sm:$0xff] %v12253_v24  ;;  %v12257_v62 = vsub.f32 %v282_v2, %v12248_v13  ;;  %v17205_v17 = vand.u32 4294901760, %v18180_v15  ;;  %v17208_v12 = vand.u32 4294901760, %v18181_v55  ;;  %v18183_v46 = vld [vmem:[#allocation32_spill] sm:$0xff]  ;;  %v18184_v8 = vld [vmem:[#allocation33_spill] sm:$0xff] }
  0xdb   : > { %18177 = vst [vmem:[#allocation152_spill] sm:$0xff] %v12251_v26  ;;  %9291 = vmatpush1.bf16.msra.mxu0 %v9290_v37  ;;  %8716 = vmatprep.subr.bf16.mxu1 %v17960_v45  ;;  %v17215_v48 = vand.u32 4294901760, %v12251_v26  ;;  %v12264_v30 = vsub.f32 %v286_v19, %v12253_v24  ;;  %v17220_v38 = vand.u32 4294901760, %v18183_v46  ;;  %v17224_v2 = vand.u32 4294901760, %v18184_v8 }
  0xdc   : > { %18179 = vst [vmem:[#allocation154_spill] sm:$0xff] %v12257_v62  ;;  %9292 = vmatprep.subr.bf16.mxu0 %v17960_v45  ;;  %v728_v27 = vsub.f32 %v12246_v49, %v17204_v9  ;;  %v994_v4 = vsub.f32 %v18180_v15, %v17205_v17  ;;  %v1001_v19 = vsub.f32 %v18181_v55, %v17208_v12  ;;  %v18185_v12 = vand.u32 4294901760, %v12257_v62  ;;  %v297_v15 = vld [vmem:[%s10942_s23 + $0x200] sm:$0xff] }
  0xdd   : > { %18182 = vst [vmem:[#allocation155_spill] sm:$0xff] %v12264_v30  ;;  %v4468_v33 = vsub.f32 %v12251_v26, %v17215_v48  ;;  %v17228_v37 = vand.u32 4294901760, %v12264_v30  ;;  %v4734_v9 = vsub.f32 %v18183_v46, %v17220_v38  ;;  %v4741_v17 = vsub.f32 %v18184_v8, %v17224_v2  ;;  %v294_v48 = vld [vmem:[%s10942_s23 + $0x1e8] sm:$0xff]  ;;  %v289_v46 = vld [vmem:[%s10942_s23 + $0x1c0] sm:$0xff] }
  0xde   : > { %v729_v23 = vand.u32 4294901760, %v728_v27  ;;  %v734_v49 = vsub.f32 %v12257_v62, %v18185_v12  ;;  %v995_v24 = vand.u32 4294901760, %v994_v4  ;;  %v1002_v13 = vand.u32 4294901760, %v1001_v19  ;;  %v293_v2 = vld [vmem:[%s10942_s23 + $0x1e0] sm:$0xff] }
  0xdf   : > { %v4469_v26 = vand.u32 4294901760, %v4468_v33  ;;  %v4474_v32 = vsub.f32 %v12264_v30, %v17228_v37  ;;  %v4735_v38 = vand.u32 4294901760, %v4734_v9  ;;  %v4742_v3 = vand.u32 4294901760, %v4741_v17  ;;  %v301_v37 = vld [vmem:[%s10942_s23 + $0x220] sm:$0xff] }
  0xe0   : > { %730 = vmatprep.mubr.f32.mxu1 %v729_v23  ;;  %v735_v8 = vand.u32 4294901760, %v734_v49  ;;  %v8717_v27 = vpack.c.bf16 %v1002_v13, %v995_v24  ;;  %v12299_v55 = vand.u32 4294901760, %v290_v53  ;;  %v12302_v19 = vand.u32 4294901760, %v294_v48 }
  0xe1   : > { %4470 = vmatprep.mubr.f32.mxu0 %v4469_v26  ;;  %v4475_v12 = vand.u32 4294901760, %v4474_v32  ;;  %v9293_v4 = vpack.c.bf16 %v4742_v3, %v4735_v38  ;;  %v12307_v9 = vand.u32 4294901760, %v289_v46  ;;  %v12309_v17 = vand.u32 4294901760, %v293_v2  ;;  %v18195_v26 = vld [vmem:[#allocation35_spill] sm:$0xff] }
  0xe2   : > { %18186 = vst [vmem:[#allocation156_spill] sm:$0xff] %v12299_v55  ;;  %18187 = vst [vmem:[#allocation157_spill] sm:$0xff] %v12302_v19  ;;  %736 = vmatmul.mubr.f32.gmra.mrb[14].mxu1 %v735_v8  ;;  %v12305_v33 = vsub.f32 %v290_v53, %v12299_v55  ;;  %v12313_v49 = vsub.f32 %v294_v48, %v12302_v19  ;;  %v12315_v23 = vand.u32 4294901760, %v297_v15  ;;  %v17236_v24 = vand.u32 4294901760, %v18195_v26  ;;  %v18197_v8 = vld [vmem:[#allocation36_spill] sm:$0xff]  ;;  %v18203_v55 = vld [vmem:[#allocation37_spill] sm:$0xff] }
  0xe3   : > { %18189 = vst [vmem:[#allocation159_spill] sm:$0xff] %v12307_v9  ;;  %18190 = vst [vmem:[#allocation160_spill] sm:$0xff] %v12309_v17  ;;  %4476 = vmatmul.mubr.f32.gmra.mrb[14].mxu0 %v4475_v12  ;;  %8718 = vmatpush1.bf16.msra.mxu1 %v8717_v27  ;;  %v12319_v32 = vsub.f32 %v289_v46, %v12307_v9  ;;  %v12322_v13 = vsub.f32 %v293_v2, %v12309_v17  ;;  %v12332_v27 = vand.u32 4294901760, %v301_v37 }
  0xe4   : > { %18188 = vst [vmem:[#allocation158_spill] sm:$0xff] %v12305_v33  ;;  %18191 = vst [vmem:[#allocation161_spill] sm:$0xff] %v12313_v49  ;;  %9294 = vmatpush1.bf16.msra.mxu0 %v9293_v4  ;;  %v17231_v3 = vand.u32 4294901760, %v12305_v33  ;;  %8719 = vmatprep.subr.bf16.mxu1 %v17960_v45  ;;  %v17239_v38 = vand.u32 4294901760, %v12313_v49  ;;  %v12329_v48 = vsub.f32 %v297_v15, %v12315_v23  ;;  %v18199_v30 = vand.u32 4294901760, %v18197_v8 }
  0xe5   : > { %18192 = vst [vmem:[#allocation162_spill] sm:$0xff] %v12315_v23  ;;  %18193 = vst [vmem:[#allocation163_spill] sm:$0xff] %v12319_v32  ;;  %9295 = vmatprep.subr.bf16.mxu0 %v17960_v45  ;;  %v1008_v4 = vsub.f32 %v18195_v26, %v17236_v24  ;;  %v12350_v2 = vsub.f32 %v301_v37, %v12332_v27  ;;  %v18201_v12 = vand.u32 4294901760, %v12319_v32  ;;  %v18202_v24 = vand.u32 4294901760, %v12322_v13  ;;  %v296_v37 = vld [vmem:[%s10942_s23 + $0x1f8] sm:$0xff] }
  0xe6   : > { %18194 = vst [vmem:[#allocation164_spill] sm:$0xff] %v12322_v13  ;;  %18196 = vst [vmem:[#allocation165_spill] sm:$0xff] %v12329_v48  ;;  %v743_v46 = vsub.f32 %v12305_v33, %v17231_v3  ;;  %v4483_v15 = vsub.f32 %v12313_v49, %v17239_v38  ;;  %v17254_v53 = vand.u32 4294901760, %v12329_v48  ;;  %v1015_v3 = vsub.f32 %v18197_v8, %v18199_v30 }
  0xe7   : > { %18198 = vst [vmem:[#allocation166_spill] sm:$0xff] %v12332_v27  ;;  %18200 = vst [vmem:[#allocation167_spill] sm:$0xff] %v12350_v2  ;;  %v749_v62 = vsub.f32 %v12319_v32, %v18201_v12  ;;  %v4489_v17 = vsub.f32 %v12322_v13, %v18202_v24  ;;  %v1009_v38 = vand.u32 4294901760, %v1008_v4  ;;  %v17255_v9 = vand.u32 4294901760, %v12350_v2  ;;  %v300_v27 = vld [vmem:[%s10942_s23 + $0x218] sm:$0xff] }
  0xe8   : > { %v744_v33 = vand.u32 4294901760, %v743_v46  ;;  %v4484_v49 = vand.u32 4294901760, %v4483_v15  ;;  %v758_v23 = vsub.f32 %v12329_v48, %v17254_v53  ;;  %v1016_v30 = vand.u32 4294901760, %v1015_v3  ;;  %v304_v32 = vld [vmem:[%s10942_s23 + $0x238] sm:$0xff] }
  0xe9   : > { %v750_v46 = vand.u32 4294901760, %v749_v62  ;;  %v4490_v19 = vand.u32 4294901760, %v4489_v17  ;;  %v17257_v12 = vand.u32 4294901760, %v18203_v55  ;;  %v4498_v15 = vsub.f32 %v12350_v2, %v17255_v9  ;;  %v18204_v53 = vld [vmem:[#allocation39_spill] sm:$0xff] }
  0xea   : > { %745 = vmatprep.mubr.f32.mxu1 %v744_v33  ;;  %4485 = vmatprep.mubr.f32.mxu0 %v4484_v49  ;;  %v759_v24 = vand.u32 4294901760, %v758_v23  ;;  %v8720_v4 = vpack.c.bf16 %v1016_v30, %v1009_v38  ;;  %v17256_v3 = vand.u32 4294901760, %v18204_v53  ;;  %v12373_v33 = vand.u32 4294901760, %v296_v37  ;;  %v308_v30 = vld [vmem:[%s10942_s23 + $0x258] sm:$0xff] }
  0xeb   : > { %751 = vmatmul.mubr.f32.gmra.mrb[16].mxu1 %v750_v46  ;;  %4491 = vmatmul.mubr.f32.gmra.mrb[16].mxu0 %v4490_v19  ;;  %v4748_v62 = vsub.f32 %v18203_v55, %v17257_v12  ;;  %v12375_v17 = vand.u32 4294901760, %v300_v27  ;;  %v4499_v49 = vand.u32 4294901760, %v4498_v15  ;;  %v12380_v38 = vand.u32 4294901760, %v304_v32  ;;  %v18211_v15 = vld [vmem:[#allocation40_spill] sm:$0xff]  ;;  %v18212_v12 = vld [vmem:[#allocation41_spill] sm:$0xff] }
  0xec   : > { %18205 = vst [vmem:[#allocation168_spill] sm:$0xff] %v12373_v33  ;;  %760 = vmatprep.mubr.f32.mxu1 %v759_v24  ;;  %8721 = vmatpush1.bf16.msra.mxu1 %v8720_v4  ;;  %v4755_v23 = vsub.f32 %v18204_v53, %v17256_v3  ;;  %v12384_v19 = vsub.f32 %v296_v37, %v12373_v33  ;;  %v17268_v3 = vand.u32 4294901760, %v18211_v15  ;;  %v17269_v2 = vand.u32 4294901760, %v18212_v12 }
  0xed   : > { %18206 = vst [vmem:[#allocation169_spill] sm:$0xff] %v12375_v17  ;;  %18207 = vst [vmem:[#allocation170_spill] sm:$0xff] %v12380_v38  ;;  %v4749_v46 = vand.u32 4294901760, %v4748_v62  ;;  %v12387_v9 = vsub.f32 %v300_v27, %v12375_v17  ;;  %8722 = vmatprep.subr.bf16.mxu1 %v17960_v45  ;;  %4500 = vmatprep.mubr.f32.mxu0 %v4499_v49  ;;  %v12391_v4 = vsub.f32 %v304_v32, %v12380_v38  ;;  %v303_v38 = vld [vmem:[%s10942_s23 + $0x230] sm:$0xff] }
  0xee   : > { %18208 = vst [vmem:[#allocation171_spill] sm:$0xff] %v12384_v19  ;;  %v4756_v24 = vand.u32 4294901760, %v4755_v23  ;;  %v17273_v62 = vand.u32 4294901760, %v12384_v19  ;;  %v12397_v13 = vand.u32 4294901760, %v308_v30  ;;  %v1022_v49 = vsub.f32 %v18211_v15, %v17268_v3  ;;  %v307_v15 = vld [vmem:[%s10942_s23 + $0x250] sm:$0xff] }
  0xef   : > { %18209 = vst [vmem:[#allocation172_spill] sm:$0xff] %v12387_v9  ;;  %18210 = vst [vmem:[#allocation173_spill] sm:$0xff] %v12391_v4  ;;  %v17279_v37 = vand.u32 4294901760, %v12387_v9  ;;  %v1029_v32 = vsub.f32 %v18212_v12, %v17269_v2  ;;  %v18216_v3 = vand.u32 4294901760, %v12391_v4 }
  0xf0   : > { %18213 = vst [vmem:[#allocation174_spill] sm:$0xff] %v12397_v13  ;;  %v9296_v27 = vpack.c.bf16 %v4756_v24, %v4749_v46  ;;  %v764_v23 = vsub.f32 %v12384_v19, %v17273_v62  ;;  %v12413_v46 = vsub.f32 %v308_v30, %v12397_v13  ;;  %v18215_v24 = vld [vmem:[#allocation42_spill] sm:$0xff]  ;;  %v1023_v33 = vand.u32 4294901760, %v1022_v49  ;;  %v18217_v62 = vld [vmem:[#allocation43_spill] sm:$0xff] }
  0xf1   : > { %v4504_v17 = vsub.f32 %v12387_v9, %v17279_v37  ;;  %v17284_v48 = vand.u32 4294901760, %v18215_v24  ;;  %v773_v2 = vsub.f32 %v12391_v4, %v18216_v3  ;;  %v1030_v12 = vand.u32 4294901760, %v1029_v32  ;;  %v311_v37 = vld [vmem:[%s10942_s23 + $0x270] sm:$0xff] }
  0xf2   : > { %18214 = vst [vmem:[#allocation175_spill] sm:$0xff] %v12413_v46  ;;  %9297 = vmatpush1.bf16.msra.mxu0 %v9296_v27  ;;  %v17285_v19 = vand.u32 4294901760, %v18217_v62  ;;  %v765_v53 = vand.u32 4294901760, %v764_v23  ;;  %v17288_v30 = vand.u32 4294901760, %v12413_v46  ;;  %v12431_v49 = vand.u32 4294901760, %v303_v38  ;;  %v315_v32 = vld [vmem:[%s10942_s23 + $0x290] sm:$0xff] }
  0xf3   : > { %v4505_v55 = vand.u32 4294901760, %v4504_v17  ;;  %9298 = vmatprep.subr.bf16.mxu0 %v17960_v45  ;;  %v4762_v27 = vsub.f32 %v18215_v24, %v17284_v48  ;;  %v774_v9 = vand.u32 4294901760, %v773_v2  ;;  %v8723_v13 = vpack.c.bf16 %v1030_v12, %v1023_v33 }
  0xf4   : > { %v4769_v3 = vsub.f32 %v18217_v62, %v17285_v19  ;;  %18218 = vst [vmem:[#allocation176_spill] sm:$0xff] %v12431_v49  ;;  %766 = vmatmul.mubr.f32.gmra.mrb[18].mxu1 %v765_v53  ;;  %v4513_v17 = vsub.f32 %v12413_v46, %v17288_v30  ;;  %v12437_v48 = vand.u32 4294901760, %v307_v15  ;;  %v12440_v12 = vsub.f32 %v303_v38, %v12431_v49  ;;  %v310_v19 = vld [vmem:[%s10942_s23 + $0x268] sm:$0xff]  ;;  %v18228_v46 = vld [vmem:[#allocation46_spill] sm:$0xff]  ;;  %v317_v62 = vld [vmem:[%s10942_s23 + $0x2a0] sm:$0xff] }
  0xf5   : > { %4506 = vmatmul.mubr.f32.gmra.mrb[18].mxu0 %v4505_v55  ;;  %v4763_v23 = vand.u32 4294901760, %v4762_v27  ;;  %775 = vmatprep.mubr.f32.mxu1 %v774_v9  ;;  %v12442_v33 = vand.u32 4294901760, %v311_v37  ;;  %v12449_v53 = vand.u32 4294901760, %v315_v32 }
  0xf6   : > { %18219 = vst [vmem:[#allocation177_spill] sm:$0xff] %v12437_v48  ;;  %8724 = vmatpush1.bf16.msra.mxu1 %v8723_v13  ;;  %v4770_v2 = vand.u32 4294901760, %v4769_v3  ;;  %18220 = vst [vmem:[#allocation178_spill] sm:$0xff] %v12440_v12  ;;  %v4514_v4 = vand.u32 4294901760, %v4513_v17  ;;  %v12446_v55 = vsub.f32 %v307_v15, %v12437_v48  ;;  %v17293_v30 = vand.u32 4294901760, %v12440_v12  ;;  %v314_v13 = vld [vmem:[%s10942_s23 + $0x288] sm:$0xff] }
  0xf7   : > { %18221 = vst [vmem:[#allocation179_spill] sm:$0xff] %v12442_v33  ;;  %8725 = vmatprep.subr.bf16.mxu1 %v17960_v45  ;;  %18223 = vst [vmem:[#allocation181_spill] sm:$0xff] %v12449_v53  ;;  %v12453_v9 = vsub.f32 %v311_v37, %v12442_v33  ;;  %v12458_v3 = vsub.f32 %v315_v32, %v12449_v53  ;;  %v12460_v17 = vand.u32 4294901760, %v310_v19 }
  0xf8   : > { %18222 = vst [vmem:[#allocation180_spill] sm:$0xff] %v12446_v55  ;;  %v9299_v27 = vpack.c.bf16 %v4770_v2, %v4763_v23  ;;  %4515 = vmatprep.mubr.f32.mxu0 %v4514_v4  ;;  %v17298_v38 = vand.u32 4294901760, %v12446_v55  ;;  %v779_v15 = vsub.f32 %v12440_v12, %v17293_v30  ;;  %v18227_v2 = vld [vmem:[#allocation45_spill] sm:$0xff]  ;;  %v12476_v30 = vand.u32 4294901760, %v314_v13 }
  0xf9   : > { %18224 = vst [vmem:[#allocation182_spill] sm:$0xff] %v12453_v9  ;;  %18225 = vst [vmem:[#allocation183_spill] sm:$0xff] %v12458_v3  ;;  %v18231_v12 = vand.u32 4294901760, %v12453_v9  ;;  %v18232_v48 = vand.u32 4294901760, %v18227_v2 }
  0xfa   : > { %18226 = vst [vmem:[#allocation184_spill] sm:$0xff] %v12460_v17  ;;  %9300 = vmatpush1.bf16.msra.mxu0 %v9299_v27  ;;  %v4519_v4 = vsub.f32 %v12446_v55, %v17298_v38  ;;  %v12474_v27 = vsub.f32 %v310_v19, %v12460_v17  ;;  %18230 = vst [vmem:[#allocation186_spill] sm:$0xff] %v12476_v30  ;;  %v780_v23 = vand.u32 4294901760, %v779_v15  ;;  %v18233_v38 = vand.u32 4294901760, %v18228_v46 }
  0xfb   : > { %9301 = vmatprep.subr.bf16.mxu0 %v17960_v45  ;;  %v788_v37 = vsub.f32 %v12453_v9, %v18231_v12  ;;  %v1036_v53 = vsub.f32 %v18227_v2, %v18232_v48  ;;  %v18234_v19 = vand.u32 4294901760, %v12458_v3  ;;  %v12492_v33 = vsub.f32 %v314_v13, %v12476_v30  ;;  %v318_v12 = vld [vmem:[%s10942_s23 + $0x2a8] sm:$0xff] }
  0xfc   : > { %18229 = vst [vmem:[#allocation185_spill] sm:$0xff] %v12474_v27  ;;  %v1043_v32 = vsub.f32 %v18228_v46, %v18233_v38  ;;  %v4520_v55 = vand.u32 4294901760, %v4519_v4  ;;  %v17316_v15 = vand.u32 4294901760, %v12474_v27  ;;  %781 = vmatmul.mubr.f32.gmra.mrb[20].mxu1 %v780_v23  ;;  %v322_v2 = vld [vmem:[%s10942_s23 + $0x2c8] sm:$0xff] }
  0xfd   : > { %v4528_v17 = vsub.f32 %v12458_v3, %v18234_v19  ;;  %18235 = vst [vmem:[#allocation187_spill] sm:$0xff] %v12492_v33  ;;  %v789_v9 = vand.u32 4294901760, %v788_v37  ;;  %v1037_v49 = vand.u32 4294901760, %v1036_v53  ;;  %v17317_v19 = vand.u32 4294901760, %v12492_v33  ;;  %v18236_v3 = vld [vmem:[#allocation48_spill] sm:$0xff]  ;;  %v18237_v30 = vld [vmem:[#allocation49_spill] sm:$0xff] }
  0xfe   : > { %v1044_v48 = vand.u32 4294901760, %v1043_v32  ;;  %4521 = vmatmul.mubr.f32.gmra.mrb[20].mxu0 %v4520_v55  ;;  %v794_v4 = vsub.f32 %v12474_v27, %v17316_v15  ;;  %v17318_v46 = vand.u32 4294901760, %v18236_v3  ;;  %v17321_v23 = vand.u32 4294901760, %v18237_v30  ;;  %v321_v15 = vld [vmem:[%s10942_s23 + $0x2c0] sm:$0xff] }
  0xff   : > { %v4529_v38 = vand.u32 4294901760, %v4528_v17  ;;  %790 = vmatprep.mubr.f32.mxu1 %v789_v9  ;;  %v12503_v37 = vand.u32 4294901760, %v318_v12  ;;  %v4534_v55 = vsub.f32 %v12492_v33, %v17317_v19  ;;  %v12511_v32 = vand.u32 4294901760, %v322_v2 }
 0x100   : > { %v8726_v13 = vpack.c.bf16 %v1044_v48, %v1037_v49  ;;  %v795_v53 = vand.u32 4294901760, %v794_v4  ;;  %v4776_v17 = vsub.f32 %v18236_v3, %v17318_v46  ;;  %v4783_v49 = vsub.f32 %v18237_v30, %v17321_v23  ;;  %v328_v3 = vld [vmem:[%s10942_s23 + $0x2f8] sm:$0xff] }
 0x101   : > { %18238 = vst [vmem:[#allocation188_spill] sm:$0xff] %v12503_v37  ;;  %4530 = vmatprep.mubr.f32.mxu0 %v4529_v38  ;;  %18239 = vst [vmem:[#allocation189_spill] sm:$0xff] %v12511_v32  ;;  %v12518_v9 = vsub.f32 %v318_v12, %v12503_v37  ;;  %v12520_v48 = vand.u32 4294901760, %v317_v62  ;;  %v4535_v38 = vand.u32 4294901760, %v4534_v55  ;;  %v12523_v19 = vsub.f32 %v322_v2, %v12511_v32 }
 0x102   : > { %8727 = vmatpush1.bf16.msra.mxu1 %v8726_v13  ;;  %v4777_v4 = vand.u32 4294901760, %v4776_v17  ;;  %v4784_v46 = vand.u32 4294901760, %v4783_v49  ;;  %v12530_v23 = vand.u32 4294901760, %v321_v15  ;;  %v18246_v17 = vld [vmem:[#allocation51_spill] sm:$0xff] }
 0x103   : > { %18240 = vst [vmem:[#allocation190_spill] sm:$0xff] %v12518_v9  ;;  %18241 = vst [vmem:[#allocation191_spill] sm:$0xff] %v12520_v48  ;;  %796 = vmatmul.mubr.f32.gmra.mrb[22].mxu1 %v795_v53  ;;  %8728 = vmatprep.subr.bf16.mxu1 %v17960_v45  ;;  %v17330_v13 = vand.u32 4294901760, %v12518_v9  ;;  %v12528_v33 = vsub.f32 %v317_v62, %v12520_v48  ;;  %v17333_v12 = vand.u32 4294901760, %v12523_v19  ;;  %v18245_v53 = vld [vmem:[#allocation50_spill] sm:$0xff]  ;;  %v17340_v2 = vand.u32 4294901760, %v18246_v17 }
 0x104   : > { %18242 = vst [vmem:[#allocation192_spill] sm:$0xff] %v12523_v19  ;;  %18244 = vst [vmem:[#allocation194_spill] sm:$0xff] %v12530_v23  ;;  %4536 = vmatmul.mubr.f32.gmra.mrb[22].mxu0 %v4535_v38  ;;  %v17338_v55 = vand.u32 4294901760, %v18245_v53  ;;  %v9302_v27 = vpack.c.bf16 %v4784_v46, %v4777_v4  ;;  %v12540_v62 = vsub.f32 %v321_v15, %v12530_v23  ;;  %v18248_v4 = vld [vmem:[#allocation53_spill] sm:$0xff] }
 0x105   : > { %18243 = vst [vmem:[#allocation193_spill] sm:$0xff] %v12528_v33  ;;  %v803_v49 = vsub.f32 %v12518_v9, %v17330_v13  ;;  %v4543_v38 = vsub.f32 %v12523_v19, %v17333_v12  ;;  %v1057_v46 = vsub.f32 %v18246_v17, %v17340_v2  ;;  %v17347_v37 = vand.u32 4294901760, %v18248_v4  ;;  %v325_v13 = vld [vmem:[%s10942_s23 + $0x2e0] sm:$0xff]  ;;  %v18250_v19 = vld [vmem:[#allocation54_spill] sm:$0xff] }
 0x106   : > { %18247 = vst [vmem:[#allocation195_spill] sm:$0xff] %v12540_v62  ;;  %v1050_v48 = vsub.f32 %v18245_v53, %v17338_v55  ;;  %9303 = vmatpush1.bf16.msra.mxu0 %v9302_v27  ;;  %v18249_v15 = vand.u32 4294901760, %v12528_v33  ;;  %v17348_v12 = vand.u32 4294901760, %v12540_v62  ;;  %v17349_v23 = vand.u32 4294901760, %v18250_v19  ;;  %v329_v55 = vld [vmem:[%s10942_s23 + $0x300] sm:$0xff] }
 0x107   : > { %v804_v32 = vand.u32 4294901760, %v803_v49  ;;  %v4544_v53 = vand.u32 4294901760, %v4543_v38  ;;  %9304 = vmatprep.subr.bf16.mxu0 %v17960_v45  ;;  %v1058_v17 = vand.u32 4294901760, %v1057_v46  ;;  %v4790_v27 = vsub.f32 %v18248_v4, %v17347_v37  ;;  %v324_v38 = vld [vmem:[%s10942_s23 + $0x2d8] sm:$0xff] }
 0x108   : > { %v809_v9 = vsub.f32 %v12528_v33, %v18249_v15  ;;  %v1051_v2 = vand.u32 4294901760, %v1050_v48  ;;  %v4549_v15 = vsub.f32 %v12540_v62, %v17348_v12  ;;  %v4797_v33 = vsub.f32 %v18250_v19, %v17349_v23 }
 0x109   : > { %805 = vmatprep.mubr.f32.mxu1 %v804_v32  ;;  %v12569_v30 = vand.u32 4294901760, %v325_v13  ;;  %4545 = vmatprep.mubr.f32.mxu0 %v4544_v53  ;;  %v4791_v46 = vand.u32 4294901760, %v4790_v27  ;;  %v12573_v24 = vand.u32 4294901760, %v329_v55  ;;  %v12581_v23 = vand.u32 4294901760, %v324_v38 }
 0x10a   : > { %v810_v49 = vand.u32 4294901760, %v809_v9  ;;  %v8729_v48 = vpack.c.bf16 %v1058_v17, %v1051_v2  ;;  %v4550_v32 = vand.u32 4294901760, %v4549_v15  ;;  %v4798_v9 = vand.u32 4294901760, %v4797_v33  ;;  %v18257_v2 = vld [vmem:[#allocation55_spill] sm:$0xff] }
 0x10b   : > { %18251 = vst [vmem:[#allocation196_spill] sm:$0xff] %v12569_v30  ;;  %18252 = vst [vmem:[#allocation197_spill] sm:$0xff] %v12573_v24  ;;  %v12576_v37 = vsub.f32 %v325_v13, %v12569_v30  ;;  %v12579_v12 = vsub.f32 %v329_v55, %v12573_v24  ;;  %v12583_v62 = vand.u32 4294901760, %v328_v3  ;;  %v17357_v33 = vand.u32 4294901760, %v18257_v2  ;;  %v18262_v13 = vld [vmem:[#allocation60_spill] sm:$0xff] }
 0x10c   : > { %811 = vmatmul.mubr.f32.gmra.mrb[24].mxu1 %v810_v49  ;;  %18255 = vst [vmem:[#allocation200_spill] sm:$0xff] %v12581_v23  ;;  %4551 = vmatmul.mubr.f32.gmra.mrb[24].mxu0 %v4550_v32  ;;  %v9305_v53 = vpack.c.bf16 %v4798_v9, %v4791_v46  ;;  %v12590_v27 = vsub.f32 %v324_v38, %v12581_v23  ;;  %v18260_v49 = vld [vmem:[#allocation57_spill] sm:$0xff]  ;;  %v18261_v32 = vld [vmem:[#allocation58_spill] sm:$0xff] }
 0x10d   : > { %18253 = vst [vmem:[#allocation198_spill] sm:$0xff] %v12576_v37  ;;  %8730 = vmatpush1.bf16.msra.mxu1 %v8729_v48  ;;  %18254 = vst [vmem:[#allocation199_spill] sm:$0xff] %v12579_v12  ;;  %v17354_v17 = vand.u32 4294901760, %v12576_v37  ;;  %v12593_v55 = vsub.f32 %v328_v3, %v12583_v62  ;;  %v1064_v46 = vsub.f32 %v18257_v2, %v17357_v33  ;;  %v18263_v23 = vand.u32 4294901760, %v12579_v12  ;;  %v332_v33 = vld [vmem:[%s10942_s23 + $0x318] sm:$0xff] }
 0x10e   : > { %18256 = vst [vmem:[#allocation201_spill] sm:$0xff] %v12583_v62  ;;  %8731 = vmatprep.subr.bf16.mxu1 %v17960_v45  ;;  %18258 = vst [vmem:[#allocation202_spill] sm:$0xff] %v12590_v27  ;;  %9306 = vmatpush1.bf16.msra.mxu0 %v9305_v53  ;;  %v18265_v38 = vand.u32 4294901760, %v18261_v32  ;;  %v18267_v30 = vand.u32 4294901760, %v12590_v27 }
 0x10f   : > { %18259 = vst [vmem:[#allocation203_spill] sm:$0xff] %v12593_v55  ;;  %v818_v48 = vsub.f32 %v12576_v37, %v17354_v17  ;;  %v4558_v3 = vsub.f32 %v12579_v12, %v18263_v23  ;;  %9307 = vmatprep.subr.bf16.mxu0 %v17960_v45  ;;  %v18264_v17 = vand.u32 4294901760, %v18260_v49  ;;  %v1065_v62 = vand.u32 4294901760, %v1064_v46  ;;  %v336_v12 = vld [vmem:[%s10942_s23 + $0x338] sm:$0xff]  ;;  %v331_v46 = vld [vmem:[%s10942_s23 + $0x310] sm:$0xff] }
 0x110   : > { %v4804_v24 = vsub.f32 %v18261_v32, %v18265_v38  ;;  %v18266_v23 = vand.u32 4294901760, %v18262_v13  ;;  %v824_v19 = vsub.f32 %v12590_v27, %v18267_v30  ;;  %v12628_v38 = vand.u32 4294901760, %v332_v33 }
 0x111   : > { %v1071_v37 = vsub.f32 %v18260_v49, %v18264_v17  ;;  %v819_v9 = vand.u32 4294901760, %v818_v48  ;;  %v4559_v53 = vand.u32 4294901760, %v4558_v3  ;;  %v18268_v17 = vand.u32 4294901760, %v12593_v55 }
 0x112   : > { %v4811_v15 = vsub.f32 %v18262_v13, %v18266_v23  ;;  %v4805_v8 = vand.u32 4294901760, %v4804_v24  ;;  %18269 = vst [vmem:[#allocation204_spill] sm:$0xff] %v12628_v38  ;;  %v825_v23 = vand.u32 4294901760, %v824_v19  ;;  %v12631_v39 = vand.u32 4294901760, %v336_v12 }
 0x113   : > { %v4564_v4 = vsub.f32 %v12593_v55, %v18268_v17  ;;  %v1072_v48 = vand.u32 4294901760, %v1071_v37  ;;  %820 = vmatprep.mubr.f32.mxu1 %v819_v9  ;;  %4560 = vmatprep.mubr.f32.mxu0 %v4559_v53  ;;  %v12634_v30 = vsub.f32 %v332_v33, %v12628_v38  ;;  %v12636_v27 = vand.u32 4294901760, %v331_v46  ;;  %v18280_v9 = vld [vmem:[#allocation65_spill] sm:$0xff] }
 0x114   : > { %v4812_v26 = vand.u32 4294901760, %v4811_v15  ;;  %18270 = vst [vmem:[#allocation205_spill] sm:$0xff] %v12631_v39  ;;  %826 = vmatmul.mubr.f32.gmra.mrb[26].mxu1 %v825_v23  ;;  %v12639_v24 = vsub.f32 %v336_v12, %v12631_v39  ;;  %v12641_v37 = vand.u32 4294901760, %v335_v40  ;;  %v17401_v53 = vand.u32 4294901760, %v18280_v9 }
 0x115   : > { %v4565_v36 = vand.u32 4294901760, %v4564_v4  ;;  %v8732_v3 = vpack.c.bf16 %v1072_v48, %v1065_v62  ;;  %18271 = vst [vmem:[#allocation206_spill] sm:$0xff] %v12634_v30  ;;  %18272 = vst [vmem:[#allocation207_spill] sm:$0xff] %v12636_v27  ;;  %v17380_v19 = vand.u32 4294901760, %v12634_v30  ;;  %v12645_v62 = vsub.f32 %v331_v46, %v12636_v27  ;;  %v18277_v4 = vld [vmem:[#allocation62_spill] sm:$0xff] }
 0x116   : > { %v9308_v34 = vpack.c.bf16 %v4812_v26, %v4805_v8  ;;  %18273 = vst [vmem:[#allocation208_spill] sm:$0xff] %v12639_v24  ;;  %18274 = vst [vmem:[#allocation209_spill] sm:$0xff] %v12641_v37  ;;  %v18276_v26 = vld [vmem:[#allocation61_spill] sm:$0xff]  ;;  %v17384_v33 = vand.u32 4294901760, %v18277_v4  ;;  %v17391_v15 = vand.u32 4294901760, %v12639_v24 }
 0x117   : > { %4566 = vmatmul.mubr.f32.gmra.mrb[26].mxu0 %v4565_v36  ;;  %8733 = vmatpush1.bf16.msra.mxu1 %v8732_v3  ;;  %18275 = vst [vmem:[#allocation210_spill] sm:$0xff] %v12645_v62  ;;  %v17381_v8 = vand.u32 4294901760, %v18276_v26  ;;  %v12651_v36 = vsub.f32 %v335_v40, %v12641_v37  ;;  %v833_v17 = vsub.f32 %v12634_v30, %v17380_v19  ;;  %v339_v48 = vld [vmem:[%s10942_s23 + $0x350] sm:$0xff] }
 0x118   : > { %9309 = vmatpush1.bf16.msra.mxu0 %v9308_v34  ;;  %8734 = vmatprep.subr.bf16.mxu1 %v17960_v45  ;;  %v18279_v34 = vld [vmem:[#allocation64_spill] sm:$0xff]  ;;  %v1085_v46 = vsub.f32 %v18277_v4, %v17384_v33  ;;  %v4573_v23 = vsub.f32 %v12639_v24, %v17391_v15  ;;  %v18281_v33 = vand.u32 4294901760, %v12645_v62  ;;  %v343_v15 = vld [vmem:[%s10942_s23 + $0x370] sm:$0xff]  ;;  %v12687_v10 = vand.u32 4294901760, %v339_v48 }
 0x119   : > { %18278 = vst [vmem:[#allocation211_spill] sm:$0xff] %v12651_v36  ;;  %9310 = vmatprep.subr.bf16.mxu0 %v17960_v45  ;;  %v17396_v12 = vand.u32 4294901760, %v18279_v34  ;;  %v1078_v40 = vsub.f32 %v18276_v26, %v17381_v8  ;;  %v17408_v3 = vand.u32 4294901760, %v12651_v36  ;;  %v4825_v8 = vsub.f32 %v18280_v9, %v17401_v53  ;;  %v342_v53 = vld [vmem:[%s10942_s23 + $0x368] sm:$0xff] }
 0x11a   : > { %v834_v55 = vand.u32 4294901760, %v833_v17  ;;  %v839_v30 = vsub.f32 %v12645_v62, %v18281_v33  ;;  %v1086_v27 = vand.u32 4294901760, %v1085_v46  ;;  %v4574_v24 = vand.u32 4294901760, %v4573_v23  ;;  %18282 = vst [vmem:[#allocation212_spill] sm:$0xff] %v12687_v10 }
 0x11b   : > { %v4818_v19 = vsub.f32 %v18279_v34, %v17396_v12  ;;  %v1079_v37 = vand.u32 4294901760, %v1078_v40  ;;  %v4579_v39 = vsub.f32 %v12651_v36, %v17408_v3  ;;  %v4826_v38 = vand.u32 4294901760, %v4825_v8  ;;  %v350_v3 = vld [vmem:[%s10942_s23 + $0x3a8] sm:$0xff] }
 0x11c   : > { %835 = vmatprep.mubr.f32.mxu1 %v834_v55  ;;  %v840_v57 = vand.u32 4294901760, %v839_v30  ;;  %4575 = vmatprep.mubr.f32.mxu0 %v4574_v24  ;;  %v12690_v46 = vand.u32 4294901760, %v343_v15  ;;  %v12693_v23 = vsub.f32 %v339_v48, %v12687_v10  ;;  %v12697_v8 = vand.u32 4294901760, %v342_v53  ;;  %v18291_v30 = vld [vmem:[#allocation66_spill] sm:$0xff]  ;;  %v353_v10 = vld [vmem:[%s10942_s23 + $0x3c0] sm:$0xff] }
 0x11d   : > { %v4819_v12 = vand.u32 4294901760, %v4818_v19  ;;  %v8735_v17 = vpack.c.bf16 %v1086_v27, %v1079_v37  ;;  %v4580_v33 = vand.u32 4294901760, %v4579_v39  ;;  %v12695_v19 = vand.u32 4294901760, %v338_v58 }
 0x11e   : > { %18283 = vst [vmem:[#allocation213_spill] sm:$0xff] %v12690_v46  ;;  %841 = vmatmul.mubr.f32.gmra.mrb[28].mxu1 %v840_v57  ;;  %18284 = vst [vmem:[#allocation214_spill] sm:$0xff] %v12693_v23  ;;  %v12701_v27 = vsub.f32 %v343_v15, %v12690_v46  ;;  %v12703_v55 = vand.u32 4294901760, %v346_v29  ;;  %v17411_v39 = vand.u32 4294901760, %v12693_v23  ;;  %v17416_v24 = vand.u32 4294901760, %v18291_v30 }
 0x11f   : > { %v9311_v40 = vpack.c.bf16 %v4826_v38, %v4819_v12  ;;  %18285 = vst [vmem:[#allocation215_spill] sm:$0xff] %v12695_v19  ;;  %18286 = vst [vmem:[#allocation216_spill] sm:$0xff] %v12697_v8  ;;  %4581 = vmatmul.mubr.f32.gmra.mrb[28].mxu0 %v4580_v33  ;;  %8736 = vmatpush1.bf16.msra.mxu1 %v8735_v17  ;;  %v12707_v57 = vsub.f32 %v338_v58, %v12695_v19  ;;  %v18293_v12 = vld [vmem:[#allocation67_spill] sm:$0xff]  ;;  %v12720_v17 = vand.u32 4294901760, %v350_v3 }
 0x120   : > { %18287 = vst [vmem:[#allocation217_spill] sm:$0xff] %v12701_v27  ;;  %18288 = vst [vmem:[#allocation218_spill] sm:$0xff] %v12703_v55  ;;  %v12710_v38 = vsub.f32 %v342_v53, %v12697_v8  ;;  %8737 = vmatprep.subr.bf16.mxu1 %v17960_v45  ;;  %v17419_v37 = vand.u32 4294901760, %v12701_v27  ;;  %v12717_v15 = vsub.f32 %v346_v29, %v12703_v55  ;;  %v18295_v36 = vand.u32 4294901760, %v18293_v12 }
 0x121   : > { %9312 = vmatpush1.bf16.msra.mxu0 %v9311_v40  ;;  %18289 = vst [vmem:[#allocation219_spill] sm:$0xff] %v12707_v57  ;;  %18294 = vst [vmem:[#allocation222_spill] sm:$0xff] %v12720_v17  ;;  %v848_v58 = vsub.f32 %v12693_v23, %v17411_v39  ;;  %v1092_v40 = vsub.f32 %v18291_v30, %v17416_v24  ;;  %v12738_v53 = vsub.f32 %v350_v3, %v12720_v17  ;;  %v345_v3 = vld [vmem:[%s10942_s23 + $0x380] sm:$0xff] }
 0x122   : > { %18290 = vst [vmem:[#allocation220_spill] sm:$0xff] %v12710_v38  ;;  %9313 = vmatprep.subr.bf16.mxu0 %v17960_v45  ;;  %18292 = vst [vmem:[#allocation221_spill] sm:$0xff] %v12717_v15  ;;  %v4588_v29 = vsub.f32 %v12701_v27, %v17419_v37  ;;  %v17434_v48 = vand.u32 4294901760, %v12717_v15  ;;  %v1099_v39 = vsub.f32 %v18293_v12, %v18295_v36  ;;  %v18297_v33 = vand.u32 4294901760, %v12707_v57  ;;  %v349_v17 = vld [vmem:[%s10942_s23 + $0x3a0] sm:$0xff] }
 0x123   : > { %18296 = vst [vmem:[#allocation223_spill] sm:$0xff] %v12738_v53  ;;  %v849_v23 = vand.u32 4294901760, %v848_v58  ;;  %v18298_v24 = vand.u32 4294901760, %v12710_v38  ;;  %v1093_v37 = vand.u32 4294901760, %v1092_v40  ;;  %v17435_v19 = vand.u32 4294901760, %v12738_v53 }
 0x124   : > { %v854_v62 = vsub.f32 %v12707_v57, %v18297_v33  ;;  %v4589_v27 = vand.u32 4294901760, %v4588_v29  ;;  %v863_v55 = vsub.f32 %v12717_v15, %v17434_v48  ;;  %v1100_v36 = vand.u32 4294901760, %v1099_v39  ;;  %v18299_v33 = vld [vmem:[#allocation69_spill] sm:$0xff]  ;;  %v18300_v39 = vld [vmem:[#allocation70_spill] sm:$0xff] }
 0x125   : > { %v4594_v8 = vsub.f32 %v12710_v38, %v18298_v24  ;;  %850 = vmatprep.mubr.f32.mxu1 %v849_v23  ;;  %v17436_v57 = vand.u32 4294901760, %v18299_v33  ;;  %v4603_v29 = vsub.f32 %v12738_v53, %v17435_v19  ;;  %v17437_v48 = vand.u32 4294901760, %v18300_v39 }
 0x126   : > { %v855_v58 = vand.u32 4294901760, %v854_v62  ;;  %4590 = vmatprep.mubr.f32.mxu0 %v4589_v27  ;;  %v864_v24 = vand.u32 4294901760, %v863_v55  ;;  %v8738_v40 = vpack.c.bf16 %v1100_v36, %v1093_v37  ;;  %v12761_v23 = vand.u32 4294901760, %v345_v3  ;;  %v357_v27 = vld [vmem:[%s10942_s23 + $0x3e0] sm:$0xff] }
 0x127   : > { %v4595_v46 = vand.u32 4294901760, %v4594_v8  ;;  %v4832_v62 = vsub.f32 %v18299_v33, %v17436_v57  ;;  %v12763_v8 = vand.u32 4294901760, %v349_v17  ;;  %v4604_v55 = vand.u32 4294901760, %v4603_v29 }
 0x128   : > { %856 = vmatmul.mubr.f32.gmra.mrb[30].mxu1 %v855_v58  ;;  %18301 = vst [vmem:[#allocation224_spill] sm:$0xff] %v12761_v23  ;;  %v4839_v37 = vsub.f32 %v18300_v39, %v17437_v48  ;;  %v12769_v36 = vand.u32 4294901760, %v353_v10  ;;  %v12773_v19 = vsub.f32 %v345_v3, %v12761_v23  ;;  %v12782_v29 = vand.u32 4294901760, %v357_v27  ;;  %v356_v3 = vld [vmem:[%s10942_s23 + $0x3d8] sm:$0xff] }
 0x129   : > { %4596 = vmatmul.mubr.f32.gmra.mrb[30].mxu0 %v4595_v46  ;;  %18302 = vst [vmem:[#allocation225_spill] sm:$0xff] %v12763_v8  ;;  %865 = vmatprep.mubr.f32.mxu1 %v864_v24  ;;  %v352_v46 = vld [vmem:[%s10942_s23 + $0x3b8] sm:$0xff]  ;;  %v4833_v58 = vand.u32 4294901760, %v4832_v62  ;;  %v12776_v57 = vsub.f32 %v349_v17, %v12763_v8 }
 0x12a   : > { %8739 = vmatpush1.bf16.msra.mxu1 %v8738_v40  ;;  %18303 = vst [vmem:[#allocation226_spill] sm:$0xff] %v12769_v36  ;;  %18304 = vst [vmem:[#allocation227_spill] sm:$0xff] %v12773_v19  ;;  %4605 = vmatprep.mubr.f32.mxu0 %v4604_v55  ;;  %v4840_v24 = vand.u32 4294901760, %v4839_v37  ;;  %v12780_v40 = vsub.f32 %v353_v10, %v12769_v36  ;;  %v17450_v48 = vand.u32 4294901760, %v12773_v19  ;;  %v12786_v62 = vand.u32 4294901760, %v352_v46  ;;  %v18310_v55 = vld [vmem:[#allocation71_spill] sm:$0xff] }
 0x12b   : > { %18305 = vst [vmem:[#allocation228_spill] sm:$0xff] %v12776_v57  ;;  %8740 = vmatprep.subr.bf16.mxu1 %v17960_v45  ;;  %18307 = vst [vmem:[#allocation230_spill] sm:$0xff] %v12782_v29  ;;  %v17453_v53 = vand.u32 4294901760, %v12776_v57  ;;  %v12791_v15 = vsub.f32 %v357_v27, %v12782_v29  ;;  %v18313_v29 = vand.u32 4294901760, %v18310_v55 }
 0x12c   : > { %18306 = vst [vmem:[#allocation229_spill] sm:$0xff] %v12780_v40  ;;  %18308 = vst [vmem:[#allocation231_spill] sm:$0xff] %v12786_v62  ;;  %v9314_v38 = vpack.c.bf16 %v4840_v24, %v4833_v58  ;;  %v17456_v17 = vand.u32 4294901760, %v12780_v40  ;;  %v869_v10 = vsub.f32 %v12773_v19, %v17450_v48  ;;  %v12801_v36 = vsub.f32 %v352_v46, %v12786_v62  ;;  %v18312_v58 = vld [vmem:[#allocation73_spill] sm:$0xff] }
 0x12d   : > { %18309 = vst [vmem:[#allocation232_spill] sm:$0xff] %v12791_v15  ;;  %v4609_v8 = vsub.f32 %v12776_v57, %v17453_v53  ;;  %v17465_v24 = vand.u32 4294901760, %v18312_v58  ;;  %v1106_v48 = vsub.f32 %v18310_v55, %v18313_v29  ;;  %v12811_v19 = vand.u32 4294901760, %v356_v3 }
 0x12e   : > { %18311 = vst [vmem:[#allocation233_spill] sm:$0xff] %v12801_v36  ;;  %9315 = vmatpush1.bf16.msra.mxu0 %v9314_v38  ;;  %v878_v27 = vsub.f32 %v12780_v40, %v17456_v17  ;;  %v870_v53 = vand.u32 4294901760, %v869_v10  ;;  %v17472_v46 = vand.u32 4294901760, %v12801_v36  ;;  %v360_v17 = vld [vmem:[%s10942_s23 + $0x3f8] sm:$0xff]  ;;  %v18315_v40 = vand.u32 4294901760, %v12791_v15 }
 0x12f   : > { %18314 = vst [vmem:[#allocation234_spill] sm:$0xff] %v12811_v19  ;;  %v4610_v57 = vand.u32 4294901760, %v4609_v8  ;;  %9316 = vmatprep.subr.bf16.mxu0 %v17960_v45  ;;  %v1113_v38 = vsub.f32 %v18312_v58, %v17465_v24  ;;  %v1107_v62 = vand.u32 4294901760, %v1106_v48  ;;  %v12823_v23 = vsub.f32 %v356_v3, %v12811_v19  ;;  %v359_v3 = vld [vmem:[%s10942_s23 + $0x3f0] sm:$0xff] }
 0x130   : > { %v879_v37 = vand.u32 4294901760, %v878_v27  ;;  %v4618_v29 = vsub.f32 %v12791_v15, %v18315_v40  ;;  %871 = vmatmul.mubr.f32.gmra.mrb[32].mxu1 %v870_v53  ;;  %v884_v8 = vsub.f32 %v12801_v36, %v17472_v46  ;;  %v17475_v24 = vand.u32 4294901760, %v18317_v56  ;;  %v18318_v40 = vld [vmem:[#allocation75_spill] sm:$0xff] }
 0x131   : > { %18316 = vst [vmem:[#allocation235_spill] sm:$0xff] %v12823_v23  ;;  %4611 = vmatmul.mubr.f32.gmra.mrb[32].mxu0 %v4610_v57  ;;  %v1114_v10 = vand.u32 4294901760, %v1113_v38  ;;  %v17478_v31 = vand.u32 4294901760, %v12823_v23  ;;  %v17479_v48 = vand.u32 4294901760, %v18318_v40  ;;  %v12832_v15 = vand.u32 4294901760, %v360_v17 }
 0x132   : > { %880 = vmatprep.mubr.f32.mxu1 %v879_v37  ;;  %v4619_v27 = vand.u32 4294901760, %v4618_v29  ;;  %v885_v53 = vand.u32 4294901760, %v884_v8  ;;  %v4846_v46 = vsub.f32 %v18317_v56, %v17475_v24  ;;  %v12847_v36 = vand.u32 4294901760, %v364_v51  ;;  %v363_v8 = vld [vmem:[%s10942_s23 + $0x410] sm:$0xff] }
 0x133   : > { %18319 = vst [vmem:[#allocation236_spill] sm:$0xff] %v12832_v15  ;;  %v8741_v57 = vpack.c.bf16 %v1114_v10, %v1107_v62  ;;  %v4624_v38 = vsub.f32 %v12823_v23, %v17478_v31  ;;  %v4853_v37 = vsub.f32 %v18318_v40, %v17479_v48  ;;  %v12845_v29 = vsub.f32 %v360_v17, %v12832_v15  ;;  %v18326_v23 = vld [vmem:[#allocation76_spill] sm:$0xff] }
 0x134   : > { %4620 = vmatprep.mubr.f32.mxu0 %v4619_v27  ;;  %18321 = vst [vmem:[#allocation238_spill] sm:$0xff] %v12847_v36  ;;  %886 = vmatmul.mubr.f32.gmra.mrb[34].mxu1 %v885_v53  ;;  %v4847_v62 = vand.u32 4294901760, %v4846_v46  ;;  %v12850_v10 = vand.u32 4294901760, %v359_v3  ;;  %v12854_v31 = vsub.f32 %v364_v51, %v12847_v36  ;;  %v12860_v17 = vand.u32 4294901760, %v363_v8 }
 0x135   : > { %18320 = vst [vmem:[#allocation237_spill] sm:$0xff] %v12845_v29  ;;  %8742 = vmatpush1.bf16.msra.mxu1 %v8741_v57  ;;  %v4625_v27 = vand.u32 4294901760, %v4624_v38  ;;  %v4854_v24 = vand.u32 4294901760, %v4853_v37  ;;  %v17486_v19 = vand.u32 4294901760, %v12845_v29  ;;  %v17489_v53 = vand.u32 4294901760, %v18326_v23  ;;  %v18327_v37 = vld [vmem:[#allocation77_spill] sm:$0xff] }
 0x136   : > { %18322 = vst [vmem:[#allocation239_spill] sm:$0xff] %v12850_v10  ;;  %18323 = vst [vmem:[#allocation240_spill] sm:$0xff] %v12854_v31  ;;  %v12857_v48 = vsub.f32 %v359_v3, %v12850_v10  ;;  %8743 = vmatprep.subr.bf16.mxu1 %v17960_v45  ;;  %v17490_v38 = vand.u32 4294901760, %v12854_v31  ;;  %v17493_v51 = vand.u32 4294901760, %v18327_v37  ;;  %v12870_v3 = vsub.f32 %v363_v8, %v12860_v17 }
 0x137   : > { %18325 = vst [vmem:[#allocation242_spill] sm:$0xff] %v12860_v17  ;;  %4626 = vmatmul.mubr.f32.gmra.mrb[34].mxu0 %v4625_v27  ;;  %v9317_v46 = vpack.c.bf16 %v4854_v24, %v4847_v62  ;;  %v893_v57 = vsub.f32 %v12845_v29, %v17486_v19  ;;  %v1120_v10 = vsub.f32 %v18326_v23, %v17489_v53  ;;  %v17502_v27 = vand.u32 4294901760, %v11711_v5 }
 0x138   : > { %18324 = vst [vmem:[#allocation241_spill] sm:$0xff] %v12857_v48  ;;  %v4633_v62 = vsub.f32 %v12854_v31, %v17490_v38  ;;  %v1127_v19 = vsub.f32 %v18327_v37, %v17493_v51  ;;  %v17504_v36 = vand.u32 4294901760, %v11726_v14  ;;  %v18328_v8 = vand.u32 4294901760, %v12857_v48 }
 0x139   : > { %9318 = vmatpush1.bf16.msra.mxu0 %v9317_v46  ;;  %v894_v24 = vand.u32 4294901760, %v893_v57  ;;  %v17503_v53 = vand.u32 4294901760, %v12870_v3  ;;  %v1121_v46 = vand.u32 4294901760, %v1120_v10  ;;  %v4860_v57 = vsub.f32 %v11711_v5, %v17502_v27 }
 0x13a   : > { %v899_v29 = vsub.f32 %v12857_v48, %v18328_v8  ;;  %9319 = vmatprep.subr.bf16.mxu0 %v17960_v45  ;;  %v4634_v38 = vand.u32 4294901760, %v4633_v62  ;;  %v1128_v31 = vand.u32 4294901760, %v1127_v19  ;;  %v4867_v51 = vsub.f32 %v11726_v14, %v17504_v36  ;;  %v18333_v36 = vld [vmem:[#allocation111_spill] sm:$0xff]  ;;  %v18338_v62 = vld [vmem:[#allocation20_spill] sm:$0xff] }
 0x13b   : > { %895 = vmatprep.mubr.f32.mxu1 %v894_v24  ;;  %v4639_v8 = vsub.f32 %v12870_v3, %v17503_v53  ;;  %v4861_v48 = vand.u32 4294901760, %v4860_v57  ;;  %v18329_v24 = vld [vmem:[#allocation78_spill] sm:$0xff]  ;;  %v8747_v19 = vpack.c.bf16 %v11240_v47, %v11153_v61  ;;  %v18332_v53 = vld [vmem:[#allocation109_spill] sm:$0xff]  ;;  %v18335_v57 = vld [vmem:[#allocation120_spill] sm:$0xff] }
 0x13c   : > { %v900_v17 = vand.u32 4294901760, %v899_v29  ;;  %4635 = vmatprep.mubr.f32.mxu0 %v4634_v38  ;;  %v8744_v15 = vpack.c.bf16 %v1128_v31, %v1121_v46  ;;  %v4868_v10 = vand.u32 4294901760, %v4867_v51  ;;  %v9323_v29 = vpack.c.bf16 %v11418_v41, %v11334_v21  ;;  %v18330_v31 = vld [vmem:[#allocation85_spill] sm:$0xff]  ;;  %v18336_v46 = vld [vmem:[#allocation123_spill] sm:$0xff] }
 0x13d   : > { %v4640_v54 = vand.u32 4294901760, %v4639_v8  ;;  %v8753_v8 = vpack.c.bf16 %v11736_v52, %v11699_v59  ;;  %v18339_v51 = vld [vmem:[#allocation121_spill] sm:$0xff] }
 0x13e   : > { %901 = vmatmul.mubr.f32.gmra.mrb[36].mxu1 %v900_v17  ;;  %v9320_v27 = vpack.c.bf16 %v4868_v10, %v4861_v48  ;;  %v18334_v10 = vld [vmem:[#allocation113_spill] sm:$0xff]  ;;  %v18342_v17 = vld [vmem:[#allocation22_spill] sm:$0xff] }
 0x13f   : > { %8745 = vmatpush1.bf16.msra.mxu1 %v8744_v15  ;;  %1131 = vmatprep.mubr.f32.mxu1 %v18329_v24  ;;  %v8750_v15 = vpack.c.bf16 %v11504_v11, %v11499_v6  ;;  %v18340_v38 = vld [vmem:[#allocation125_spill] sm:$0xff] }
 0x140   : > { %4641 = vmatmul.mubr.f32.gmra.mrb[36].mxu0 %v4640_v54  ;;  %8746 = vmatprep.subr.bf16.mxu1 %v17960_v45  ;;  %v9326_v54 = vpack.c.bf16 %v11685_v25, %v11647_v7 }
 0x141   : > { %9321 = vmatpush1.bf16.msra.mxu0 %v9320_v27  ;;  %4871 = vmatprep.mubr.f32.mxu0 %v11713_v20  ;;  %v18367_v20 = vld [vmem:[#allocation151_spill] sm:$0xff] }
 0x142   : > { %1133 = vmatmul.mubr.f32.vlgmr.msra.gmra.mrb[0].mxu1 %v18330_v31  ;;  %9322 = vmatprep.subr.bf16.mxu0 %v17960_v45 }
 0x143   : > { %8748 = vmatpush1.bf16.msra.mxu1 %v8747_v19  ;;  %1138 = vmatprep.mubr.f32.mxu1 %v11848_v60  ;;  %v8756_v19 = vpack.c.bf16 %v11803_v0, %v11774_v1  ;;  %v18363_v60 = vld [vmem:[#allocation145_spill] sm:$0xff] }
 0x144   : > { %4873 = vmatmul.mubr.f32.vlgmr.msra.gmra.mrb[0].mxu0 %v11747_v63  ;;  %8749 = vmatprep.subr.bf16.mxu1 %v17960_v45 }
 0x145   : > { %9324 = vmatpush1.bf16.msra.mxu0 %v9323_v29  ;;  %4878 = vmatprep.mubr.f32.mxu0 %v11860_v35  ;;  %v18331_v29 = vld [vmem:[#allocation101_spill] sm:$0xff]  ;;  %v18359_v35 = vld [vmem:[#allocation143_spill] sm:$0xff] }
 0x146   : > { %1140 = vmatmul.mubr.f32.gmra.mrb[2].mxu1 %v11865_v28  ;;  %9325 = vmatprep.subr.bf16.mxu0 %v17960_v45 }
 0x147   : > { %8751 = vmatpush1.bf16.msra.mxu1 %v8750_v15  ;;  %1145 = vmatprep.mubr.f32.mxu1 %v11944_v22  ;;  %v9329_v15 = vpack.c.bf16 %v11758_v18, %v11741_v16  ;;  %v18355_v22 = vld [vmem:[#allocation138_spill] sm:$0xff] }
 0x148   : > { %4880 = vmatmul.mubr.f32.gmra.mrb[2].mxu0 %v18331_v29  ;;  %8752 = vmatprep.subr.bf16.mxu1 %v17960_v45 }
 0x149   : > { %9327 = vmatpush1.bf16.msra.mxu0 %v9326_v54  ;;  %4885 = vmatprep.mubr.f32.mxu0 %v18332_v53  ;;  %v9332_v54 = vpack.c.bf16 %v11108_v50, %v11100_v44  ;;  %v18351_v53 = vld [vmem:[#allocation135_spill] sm:$0xff] }
 0x14a   : > { %1147 = vmatmul.mubr.f32.gmra.mrb[4].mxu1 %v18333_v36  ;;  %9328 = vmatprep.subr.bf16.mxu0 %v17960_v45 }
 0x14b   : > { %1152 = vmatprep.mubr.f32.mxu1 %v11981_v43  ;;  %8754 = vmatpush1.bf16.msra.mxu1 %v8753_v8  ;;  %v18337_v8 = vld [vmem:[#allocation18_spill] sm:$0xff] }
 0x14c   : > { %4887 = vmatmul.mubr.f32.gmra.mrb[4].mxu0 %v18334_v10  ;;  %8755 = vmatprep.subr.bf16.mxu1 %v17960_v45  ;;  %v8759_v27 = vpack.c.bf16 %v18338_v62, %v18337_v8  ;;  %v18347_v43 = vld [vmem:[#allocation130_spill] sm:$0xff] }
 0x14d   : > { %4892 = vmatprep.mubr.f32.mxu0 %v11997_v42  ;;  %9330 = vmatpush1.bf16.msra.mxu0 %v9329_v15  ;;  %v18341_v15 = vld [vmem:[#allocation21_spill] sm:$0xff]  ;;  %v18343_v42 = vld [vmem:[#allocation127_spill] sm:$0xff] }
 0x14e   : > { %1154 = vmatmul.mubr.f32.gmra.mrb[6].mxu1 %v18335_v57  ;;  %9331 = vmatprep.subr.bf16.mxu0 %v17960_v45  ;;  %v9335_v48 = vpack.c.bf16 %v18342_v17, %v18341_v15  ;;  %v18344_v57 = vld [vmem:[#allocation132_spill] sm:$0xff] }
 0x14f   : > { %1159 = vmatprep.mubr.f32.mxu1 %v18336_v46  ;;  %8757 = vmatpush1.bf16.msra.mxu1 %v8756_v19  ;;  %v18345_v19 = vld [vmem:[#allocation25_spill] sm:$0xff]  ;;  %v18346_v46 = vld [vmem:[#allocation26_spill] sm:$0xff] }
 0x150   : > { %4894 = vmatmul.mubr.f32.gmra.mrb[6].mxu0 %v18339_v51  ;;  %8758 = vmatprep.subr.bf16.mxu1 %v17960_v45  ;;  %v8762_v10 = vpack.c.bf16 %v18346_v46, %v18345_v19  ;;  %v18348_v51 = vld [vmem:[#allocation133_spill] sm:$0xff] }
 0x151   : > { %4899 = vmatprep.mubr.f32.mxu0 %v18340_v38  ;;  %9333 = vmatpush1.bf16.msra.mxu0 %v9332_v54  ;;  %v18349_v54 = vld [vmem:[#allocation27_spill] sm:$0xff]  ;;  %v18350_v38 = vld [vmem:[#allocation28_spill] sm:$0xff] }
 0x152   : > { %1161 = vmatmul.mubr.f32.gmra.mrb[8].mxu1 %v18343_v42  ;;  %9334 = vmatprep.subr.bf16.mxu0 %v17960_v45  ;;  %v9338_v36 = vpack.c.bf16 %v18350_v38, %v18349_v54  ;;  %v18352_v42 = vld [vmem:[#allocation140_spill] sm:$0xff] }
 0x153   : > { %1166 = vmatprep.mubr.f32.mxu1 %v18344_v57  ;;  %8760 = vmatpush1.bf16.msra.mxu1 %v8759_v27  ;;  %v18353_v27 = vld [vmem:[#allocation29_spill] sm:$0xff]  ;;  %v18354_v57 = vld [vmem:[#allocation31_spill] sm:$0xff] }
 0x154   : > { %4901 = vmatmul.mubr.f32.gmra.mrb[8].mxu0 %v18347_v43  ;;  %8761 = vmatprep.subr.bf16.mxu1 %v17960_v45  ;;  %v8765_v29 = vpack.c.bf16 %v18354_v57, %v18353_v27  ;;  %v18356_v43 = vld [vmem:[#allocation141_spill] sm:$0xff] }
 0x155   : > { %4906 = vmatprep.mubr.f32.mxu0 %v18348_v51  ;;  %9336 = vmatpush1.bf16.msra.mxu0 %v9335_v48  ;;  %v18357_v48 = vld [vmem:[#allocation32_spill] sm:$0xff]  ;;  %v18358_v51 = vld [vmem:[#allocation33_spill] sm:$0xff] }
 0x156   : > { %1168 = vmatmul.mubr.f32.gmra.mrb[10].mxu1 %v18351_v53  ;;  %9337 = vmatprep.subr.bf16.mxu0 %v17960_v45  ;;  %v9341_v28 = vpack.c.bf16 %v18358_v51, %v18357_v48  ;;  %v18360_v53 = vld [vmem:[#allocation148_spill] sm:$0xff]  ;;  %v18482_v51 = vld [vmem:[#allocation155_spill] sm:$0xff] }
 0x157   : > { %1173 = vmatprep.mubr.f32.mxu1 %v18352_v42  ;;  %8763 = vmatpush1.bf16.msra.mxu1 %v8762_v10  ;;  %v18361_v10 = vld [vmem:[#allocation35_spill] sm:$0xff]  ;;  %v18362_v42 = vld [vmem:[#allocation36_spill] sm:$0xff] }
 0x158   : > { %4908 = vmatmul.mubr.f32.gmra.mrb[10].mxu0 %v18355_v22  ;;  %8764 = vmatprep.subr.bf16.mxu1 %v17960_v45  ;;  %v8768_v63 = vpack.c.bf16 %v18362_v42, %v18361_v10  ;;  %v18364_v22 = vld [vmem:[#allocation149_spill] sm:$0xff]  ;;  %v18479_v10 = vld [vmem:[#allocation154_spill] sm:$0xff]  ;;  %v18540_v48 = vld [vmem:[#allocation240_spill] sm:$0xff] }
 0x159   : > { %4913 = vmatprep.mubr.f32.mxu0 %v18356_v43  ;;  %9339 = vmatpush1.bf16.msra.mxu0 %v9338_v36  ;;  %v18365_v36 = vld [vmem:[#allocation37_spill] sm:$0xff]  ;;  %v18366_v43 = vld [vmem:[#allocation39_spill] sm:$0xff] }
 0x15a   : > { %1175 = vmatmul.mubr.f32.gmra.mrb[12].mxu1 %v18359_v35  ;;  %9340 = vmatprep.subr.bf16.mxu0 %v17960_v45  ;;  %v9344_v31 = vpack.c.bf16 %v18366_v43, %v18365_v36  ;;  %v18368_v35 = vld [vmem:[#allocation156_spill] sm:$0xff]  ;;  %v18371_v42 = vld [vmem:[#allocation153_spill] sm:$0xff]  ;;  %v18375_v36 = vld [vmem:[#allocation159_spill] sm:$0xff] }
 0x15b   : > { %1180 = vmatprep.mubr.f32.mxu1 %v18360_v53  ;;  %8766 = vmatpush1.bf16.msra.mxu1 %v8765_v29  ;;  %v18369_v29 = vld [vmem:[#allocation40_spill] sm:$0xff]  ;;  %v18370_v53 = vld [vmem:[#allocation41_spill] sm:$0xff] }
 0x15c   : > { %4915 = vmatmul.mubr.f32.gmra.mrb[12].mxu0 %v18363_v60  ;;  %8767 = vmatprep.subr.bf16.mxu1 %v17960_v45  ;;  %v8771_v24 = vpack.c.bf16 %v18370_v53, %v18369_v29  ;;  %v18372_v60 = vld [vmem:[#allocation157_spill] sm:$0xff]  ;;  %v18379_v29 = vld [vmem:[#allocation160_spill] sm:$0xff] }
 0x15d   : > { %4920 = vmatprep.mubr.f32.mxu0 %v18364_v22  ;;  %9342 = vmatpush1.bf16.msra.mxu0 %v9341_v28  ;;  %v18373_v28 = vld [vmem:[#allocation42_spill] sm:$0xff]  ;;  %v18374_v22 = vld [vmem:[#allocation43_spill] sm:$0xff] }
 0x15e   : > { %1182 = vmatmul.mubr.f32.gmra.mrb[14].mxu1 %v18367_v20  ;;  %9343 = vmatprep.subr.bf16.mxu0 %v17960_v45  ;;  %v9347_v43 = vpack.c.bf16 %v18374_v22, %v18373_v28  ;;  %v18376_v20 = vld [vmem:[#allocation162_spill] sm:$0xff]  ;;  %v18383_v28 = vld [vmem:[#allocation168_spill] sm:$0xff] }
 0x15f   : > { %1187 = vmatprep.mubr.f32.mxu1 %v18368_v35  ;;  %8769 = vmatpush1.bf16.msra.mxu1 %v8768_v63  ;;  %v18377_v63 = vld [vmem:[#allocation45_spill] sm:$0xff]  ;;  %v18378_v35 = vld [vmem:[#allocation46_spill] sm:$0xff] }
 0x160   : > { %4922 = vmatmul.mubr.f32.gmra.mrb[14].mxu0 %v18371_v42  ;;  %8770 = vmatprep.subr.bf16.mxu1 %v17960_v45  ;;  %v8774_v53 = vpack.c.bf16 %v18378_v35, %v18377_v63  ;;  %v18380_v42 = vld [vmem:[#allocation166_spill] sm:$0xff]  ;;  %v18387_v63 = vld [vmem:[#allocation169_spill] sm:$0xff] }
 0x161   : > { %4927 = vmatprep.mubr.f32.mxu0 %v18372_v60  ;;  %9345 = vmatpush1.bf16.msra.mxu0 %v9344_v31  ;;  %v18381_v31 = vld [vmem:[#allocation48_spill] sm:$0xff]  ;;  %v18382_v60 = vld [vmem:[#allocation49_spill] sm:$0xff] }
 0x162   : > { %1189 = vmatmul.mubr.f32.gmra.mrb[16].mxu1 %v18375_v36  ;;  %9346 = vmatprep.subr.bf16.mxu0 %v17960_v45  ;;  %v9350_v22 = vpack.c.bf16 %v18382_v60, %v18381_v31  ;;  %v18384_v36 = vld [vmem:[#allocation170_spill] sm:$0xff]  ;;  %v18391_v31 = vld [vmem:[#allocation176_spill] sm:$0xff] }
 0x163   : > { %1194 = vmatprep.mubr.f32.mxu1 %v18376_v20  ;;  %8772 = vmatpush1.bf16.msra.mxu1 %v8771_v24  ;;  %v18385_v24 = vld [vmem:[#allocation50_spill] sm:$0xff]  ;;  %v18386_v20 = vld [vmem:[#allocation51_spill] sm:$0xff] }
 0x164   : > { %4929 = vmatmul.mubr.f32.gmra.mrb[16].mxu0 %v18379_v29  ;;  %8773 = vmatprep.subr.bf16.mxu1 %v17960_v45  ;;  %v8777_v35 = vpack.c.bf16 %v18386_v20, %v18385_v24  ;;  %v18388_v29 = vld [vmem:[#allocation174_spill] sm:$0xff]  ;;  %v18476_v20 = vld [vmem:[#allocation147_spill] sm:$0xff] }
 0x165   : > { %4934 = vmatprep.mubr.f32.mxu0 %v18380_v42  ;;  %9348 = vmatpush1.bf16.msra.mxu0 %v9347_v43  ;;  %v18389_v43 = vld [vmem:[#allocation53_spill] sm:$0xff]  ;;  %v18390_v42 = vld [vmem:[#allocation54_spill] sm:$0xff]  ;;  %v18478_v24 = vld [vmem:[#allocation47_spill] sm:$0xff] }
 0x166   : > { %1196 = vmatmul.mubr.f32.gmra.mrb[18].mxu1 %v18383_v28  ;;  %9349 = vmatprep.subr.bf16.mxu0 %v17960_v45  ;;  %v9353_v60 = vpack.c.bf16 %v18390_v42, %v18389_v43  ;;  %v18392_v28 = vld [vmem:[#allocation179_spill] sm:$0xff]  ;;  %v18473_v42 = vld [vmem:[#allocation146_spill] sm:$0xff]  ;;  %v18475_v43 = vld [vmem:[#allocation44_spill] sm:$0xff] }
 0x167   : > { %1201 = vmatprep.mubr.f32.mxu1 %v18384_v36  ;;  %8775 = vmatpush1.bf16.msra.mxu1 %v8774_v53  ;;  %v18393_v53 = vld [vmem:[#allocation177_spill] sm:$0xff]  ;;  %v18395_v36 = vld [vmem:[#allocation184_spill] sm:$0xff] }
 0x168   : > { %4936 = vmatmul.mubr.f32.gmra.mrb[18].mxu0 %v18387_v63  ;;  %8776 = vmatprep.subr.bf16.mxu1 %v17960_v45  ;;  %v18394_v63 = vld [vmem:[#allocation181_spill] sm:$0xff] }
 0x169   : > { %4941 = vmatprep.mubr.f32.mxu0 %v18388_v29  ;;  %9351 = vmatpush1.bf16.msra.mxu0 %v9350_v22  ;;  %v18396_v22 = vld [vmem:[#allocation188_spill] sm:$0xff]  ;;  %v18398_v29 = vld [vmem:[#allocation186_spill] sm:$0xff] }
 0x16a   : > { %1203 = vmatmul.mubr.f32.gmra.mrb[20].mxu1 %v18391_v31  ;;  %9352 = vmatprep.subr.bf16.mxu0 %v17960_v45  ;;  %v18397_v31 = vpack.c.bf16 %v18260_v49, %v18257_v2  ;;  %v18470_v49 = vld [vmem:[#allocation139_spill] sm:$0xff]  ;;  %v18472_v2 = vld [vmem:[#allocation38_spill] sm:$0xff] }
 0x16b   : > { %1208 = vmatprep.mubr.f32.mxu1 %v18392_v28  ;;  %8778 = vmatpush1.bf16.msra.mxu1 %v8777_v35  ;;  %v18399_v35 = vld [vmem:[#allocation189_spill] sm:$0xff]  ;;  %v18431_v28 = vld [vmem:[#allocation234_spill] sm:$0xff] }
 0x16c   : > { %4943 = vmatmul.mubr.f32.gmra.mrb[20].mxu0 %v18393_v53  ;;  %8779 = vmatprep.subr.bf16.mxu1 %v17960_v45  ;;  %v18428_v53 = vld [vmem:[#allocation230_spill] sm:$0xff] }
 0x16d   : > { %4948 = vmatprep.mubr.f32.mxu0 %v18394_v63  ;;  %9354 = vmatpush1.bf16.msra.mxu0 %v9353_v60  ;;  %v18400_v63 = vpack.c.bf16 %v18262_v13, %v18261_v32  ;;  %v18401_v60 = vld [vmem:[#allocation191_spill] sm:$0xff]  ;;  %v18467_v13 = vld [vmem:[#allocation137_spill] sm:$0xff]  ;;  %v18469_v32 = vld [vmem:[#allocation34_spill] sm:$0xff] }
 0x16e   : > { %1210 = vmatmul.mubr.f32.gmra.mrb[22].mxu1 %v18395_v36  ;;  %9355 = vmatprep.subr.bf16.mxu0 %v17960_v45  ;;  %v18402_v36 = vld [vmem:[#allocation196_spill] sm:$0xff] }
 0x16f   : > { %1215 = vmatprep.mubr.f32.mxu1 %v18396_v22  ;;  %8781 = vmatpush1.bf16.msra.mxu1 %v18397_v31  ;;  %v18403_v22 = vpack.c.bf16 %v18277_v4, %v18276_v26  ;;  %v18404_v31 = vld [vmem:[#allocation194_spill] sm:$0xff]  ;;  %v18464_v4 = vld [vmem:[#allocation131_spill] sm:$0xff] }
 0x170   : > { %4950 = vmatmul.mubr.f32.gmra.mrb[22].mxu0 %v18398_v29  ;;  %8782 = vmatprep.subr.bf16.mxu1 %v17960_v45  ;;  %v18405_v29 = vld [vmem:[#allocation197_spill] sm:$0xff]  ;;  %v18466_v26 = vld [vmem:[#allocation30_spill] sm:$0xff] }
 0x171   : > { %4955 = vmatprep.mubr.f32.mxu0 %v18399_v35  ;;  %9357 = vmatpush1.bf16.msra.mxu0 %v18400_v63  ;;  %v18406_v35 = vpack.c.bf16 %v18280_v9, %v18279_v34  ;;  %v18407_v63 = vld [vmem:[#allocation200_spill] sm:$0xff]  ;;  %v18461_v9 = vld [vmem:[#allocation129_spill] sm:$0xff] }
 0x172   : > { %1217 = vmatmul.mubr.f32.gmra.mrb[24].mxu1 %v18401_v60  ;;  %9358 = vmatprep.subr.bf16.mxu0 %v17960_v45  ;;  %v18408_v60 = vld [vmem:[#allocation204_spill] sm:$0xff] }
 0x173   : > { %1222 = vmatprep.mubr.f32.mxu1 %v18402_v36  ;;  %8784 = vmatpush1.bf16.msra.mxu1 %v18403_v22  ;;  %v18409_v36 = vpack.c.bf16 %v18293_v12, %v18291_v30  ;;  %v18410_v22 = vld [vmem:[#allocation201_spill] sm:$0xff]  ;;  %v18458_v12 = vld [vmem:[#allocation124_spill] sm:$0xff]  ;;  %v18460_v30 = vld [vmem:[#allocation23_spill] sm:$0xff] }
 0x174   : > { %4957 = vmatmul.mubr.f32.gmra.mrb[24].mxu0 %v18404_v31  ;;  %8785 = vmatprep.subr.bf16.mxu1 %v17960_v45  ;;  %v18411_v31 = vld [vmem:[#allocation205_spill] sm:$0xff]  ;;  %v18463_v34 = vld [vmem:[#allocation24_spill] sm:$0xff] }
 0x175   : > { %4962 = vmatprep.mubr.f32.mxu0 %v18405_v29  ;;  %9360 = vmatpush1.bf16.msra.mxu0 %v18406_v35  ;;  %v18412_v29 = vpack.c.bf16 %v18300_v39, %v18299_v33  ;;  %v18413_v35 = vld [vmem:[#allocation207_spill] sm:$0xff]  ;;  %v18455_v39 = vld [vmem:[#allocation122_spill] sm:$0xff] }
 0x176   : > { %1224 = vmatmul.mubr.f32.gmra.mrb[26].mxu1 %v18407_v63  ;;  %9361 = vmatprep.subr.bf16.mxu0 %v17960_v45  ;;  %v18414_v63 = vld [vmem:[#allocation212_spill] sm:$0xff]  ;;  %v18457_v33 = vld [vmem:[#allocation19_spill] sm:$0xff] }
 0x177   : > { %1229 = vmatprep.mubr.f32.mxu1 %v18408_v60  ;;  %8787 = vmatpush1.bf16.msra.mxu1 %v18409_v36  ;;  %v18415_v60 = vpack.c.bf16 %v18312_v58, %v18310_v55  ;;  %v18416_v36 = vld [vmem:[#allocation209_spill] sm:$0xff]  ;;  %v18452_v58 = vld [vmem:[#allocation116_spill] sm:$0xff] }
 0x178   : > { %4964 = vmatmul.mubr.f32.gmra.mrb[26].mxu0 %v18410_v22  ;;  %8788 = vmatprep.subr.bf16.mxu1 %v17960_v45  ;;  %v18417_v22 = vld [vmem:[#allocation213_spill] sm:$0xff] }
 0x179   : > { %4969 = vmatprep.mubr.f32.mxu0 %v18411_v31  ;;  %9363 = vmatpush1.bf16.msra.mxu0 %v18412_v29  ;;  %v18418_v31 = vpack.c.bf16 %v18318_v40, %v18317_v56  ;;  %v18419_v29 = vld [vmem:[#allocation215_spill] sm:$0xff]  ;;  %v18449_v40 = vld [vmem:[#allocation114_spill] sm:$0xff]  ;;  %v18451_v56 = vld [vmem:[#allocation16_spill] sm:$0xff] }
 0x17a   : > { %1231 = vmatmul.mubr.f32.gmra.mrb[28].mxu1 %v18413_v35  ;;  %9364 = vmatprep.subr.bf16.mxu0 %v17960_v45  ;;  %v18420_v35 = vld [vmem:[#allocation218_spill] sm:$0xff]  ;;  %v18454_v55 = vld [vmem:[#allocation17_spill] sm:$0xff] }
 0x17b   : > { %1236 = vmatprep.mubr.f32.mxu1 %v18414_v63  ;;  %8790 = vmatpush1.bf16.msra.mxu1 %v18415_v60  ;;  %v18421_v63 = vpack.c.bf16 %v18327_v37, %v18326_v23  ;;  %v18422_v60 = vld [vmem:[#allocation216_spill] sm:$0xff] }
 0x17c   : > { %4971 = vmatmul.mubr.f32.gmra.mrb[28].mxu0 %v18416_v36  ;;  %8791 = vmatprep.subr.bf16.mxu1 %v17960_v45  ;;  %v18423_v36 = vld [vmem:[#allocation222_spill] sm:$0xff]  ;;  %v18446_v37 = vld [vmem:[#allocation104_spill] sm:$0xff] }
 0x17d   : > { %4976 = vmatprep.mubr.f32.mxu0 %v18417_v22  ;;  %9366 = vmatpush1.bf16.msra.mxu0 %v18418_v31  ;;  %v18424_v22 = vpack.c.bf16 %v11726_v14, %v11711_v5  ;;  %v18425_v31 = vld [vmem:[#allocation224_spill] sm:$0xff]  ;;  %v18433_v14 = vld [vmem:[#allocation239_spill] sm:$0xff]  ;;  %v18436_v5 = vld [vmem:[#allocation86_spill] sm:$0xff] }
 0x17e   : > { %1238 = vmatmul.mubr.f32.gmra.mrb[30].mxu1 %v18419_v29  ;;  %9367 = vmatprep.subr.bf16.mxu0 %v17960_v45  ;;  %v18426_v29 = vld [vmem:[#allocation226_spill] sm:$0xff]  ;;  %v18448_v23 = vld [vmem:[#allocation112_spill] sm:$0xff] }
 0x17f   : > { %1243 = vmatprep.mubr.f32.mxu1 %v18420_v35  ;;  %8793 = vmatpush1.bf16.msra.mxu1 %v18421_v63  ;;  %v18427_v35 = vld [vmem:[#allocation225_spill] sm:$0xff]  ;;  %v18429_v63 = vld [vmem:[#allocation231_spill] sm:$0xff] }
 0x180   : > { %4978 = vmatmul.mubr.f32.gmra.mrb[30].mxu0 %v18422_v60  ;;  %8794 = vmatprep.subr.bf16.mxu1 %v17960_v45  ;;  %v18430_v60 = vld [vmem:[#allocation236_spill] sm:$0xff] }
 0x181   : > { %4983 = vmatprep.mubr.f32.mxu0 %v18423_v36  ;;  %9369 = vmatpush1.bf16.msra.mxu0 %v18424_v22  ;;  %v18432_v36 = vld [vmem:[#allocation238_spill] sm:$0xff]  ;;  %v18434_v22 = vld [vmem:[#allocation84_spill] sm:$0xff] }
 0x182   : > { %1245 = vmatmul.mubr.f32.gmra.mrb[32].mxu1 %v18425_v31  ;;  %9370 = vmatprep.subr.bf16.mxu0 %v17960_v45  ;;  %v18435_v31 = vld [vmem:[#allocation242_spill] sm:$0xff] }
 0x183   : > { %1250 = vmatprep.mubr.f32.mxu1 %v18426_v29  ;;  %v18437_v29 = vld [vmem:[#allocation88_spill] sm:$0xff] }
 0x184   : > { %4985 = vmatmul.mubr.f32.gmra.mrb[32].mxu0 %v18427_v35  ;;  %v18438_v35 = vld [vmem:[#allocation12_spill] sm:$0xff] }
 0x185   : > { %4990 = vmatprep.mubr.f32.mxu0 %v18428_v53  ;;  %v18439_v53 = vld [vmem:[#allocation99_spill] sm:$0xff] }
 0x186   : > { %1252 = vmatmul.mubr.f32.gmra.mrb[34].mxu1 %v18429_v63  ;;  %v18440_v63 = vld [vmem:[#allocation90_spill] sm:$0xff] }
 0x187   : > { %1257 = vmatprep.mubr.f32.mxu1 %v18430_v60  ;;  %v18445_v60 = vld [vmem:[#allocation110_spill] sm:$0xff] }
 0x188   : > { %4992 = vmatmul.mubr.f32.gmra.mrb[34].mxu0 %v18431_v28  ;;  %v18441_v28 = vld [vmem:[#allocation13_spill] sm:$0xff] }
 0x189   : > { %4997 = vmatprep.mubr.f32.mxu0 %v18432_v36  ;;  %v18442_v36 = vld [vmem:[#allocation102_spill] sm:$0xff] }
 0x18a   : > { %1259 = vmatmul.mubr.f32.gmra.mrb[36].mxu1 %v18433_v14  ;;  %v18443_v14 = vld [vmem:[#allocation103_spill] sm:$0xff] }
 0x18b   : > { %1394 = vmatprep.mubr.f32.mxu1 %v18434_v22 }
 0x18c   : > { %4999 = vmatmul.mubr.f32.gmra.mrb[36].mxu0 %v18435_v31  ;;  %v18444_v31 = vld [vmem:[#allocation14_spill] sm:$0xff] }
 0x18d   : > { %5134 = vmatprep.mubr.f32.mxu0 %v18436_v5 }
 0x18e   : > { %1397 = vmatmul.mubr.f32.vlgmr.msra.gmra.mrb[0].mxu1 %v18437_v29 }
 0x18f   : > { %8796 = vmatpush1.bf16.msra.mxu1 %v18438_v35  ;;  %1403 = vmatprep.mubr.f32.mxu1 %v18439_v53  ;;  %v18447_v35 = vld [vmem:[#allocation15_spill] sm:$0xff] }
 0x190   : > { %5137 = vmatmul.mubr.f32.vlgmr.msra.gmra.mrb[0].mxu0 %v18440_v63  ;;  %8797 = vmatprep.subr.bf16.mxu1 %v17960_v45 }
 0x191   : > { %9372 = vmatpush1.bf16.msra.mxu0 %v18441_v28  ;;  %5143 = vmatprep.mubr.f32.mxu0 %v18442_v36  ;;  %v18450_v28 = vld [vmem:[#allocation117_spill] sm:$0xff] }
 0x192   : > { %1406 = vmatmul.mubr.f32.gmra.mrb[2].mxu1 %v18443_v14  ;;  %9373 = vmatprep.subr.bf16.mxu0 %v17960_v45 }
 0x193   : > { %8799 = vmatpush1.bf16.msra.mxu1 %v18444_v31  ;;  %1412 = vmatprep.mubr.f32.mxu1 %v18445_v60  ;;  %v18453_v31 = vld [vmem:[#allocation119_spill] sm:$0xff] }
 0x194   : > { %5146 = vmatmul.mubr.f32.gmra.mrb[2].mxu0 %v18446_v37  ;;  %8800 = vmatprep.subr.bf16.mxu1 %v17960_v45 }
 0x195   : > { %9375 = vmatpush1.bf16.msra.mxu0 %v18447_v35  ;;  %5152 = vmatprep.mubr.f32.mxu0 %v18448_v23  ;;  %v18456_v35 = vld [vmem:[#allocation126_spill] sm:$0xff] }
 0x196   : > { %1415 = vmatmul.mubr.f32.gmra.mrb[4].mxu1 %v18449_v40  ;;  %9376 = vmatprep.subr.bf16.mxu0 %v17960_v45 }
 0x197   : > { %1421 = vmatprep.mubr.f32.mxu1 %v18450_v28  ;;  %8802 = vmatpush1.bf16.msra.mxu1 %v18451_v56  ;;  %v18459_v56 = vld [vmem:[#allocation128_spill] sm:$0xff] }
 0x198   : > { %5155 = vmatmul.mubr.f32.gmra.mrb[4].mxu0 %v18452_v58  ;;  %8803 = vmatprep.subr.bf16.mxu1 %v17960_v45 }
 0x199   : > { %5161 = vmatprep.mubr.f32.mxu0 %v18453_v31  ;;  %9378 = vmatpush1.bf16.msra.mxu0 %v18454_v55  ;;  %v18462_v55 = vld [vmem:[#allocation134_spill] sm:$0xff] }
 0x19a   : > { %1424 = vmatmul.mubr.f32.gmra.mrb[6].mxu1 %v18455_v39  ;;  %9379 = vmatprep.subr.bf16.mxu0 %v17960_v45 }
 0x19b   : > { %1430 = vmatprep.mubr.f32.mxu1 %v18456_v35  ;;  %8805 = vmatpush1.bf16.msra.mxu1 %v18457_v33  ;;  %v18465_v33 = vld [vmem:[#allocation136_spill] sm:$0xff] }
 0x19c   : > { %5164 = vmatmul.mubr.f32.gmra.mrb[6].mxu0 %v18458_v12  ;;  %8806 = vmatprep.subr.bf16.mxu1 %v17960_v45 }
 0x19d   : > { %5170 = vmatprep.mubr.f32.mxu0 %v18459_v56  ;;  %9381 = vmatpush1.bf16.msra.mxu0 %v18460_v30  ;;  %v18468_v30 = vld [vmem:[#allocation142_spill] sm:$0xff] }
 0x19e   : > { %1433 = vmatmul.mubr.f32.gmra.mrb[8].mxu1 %v18461_v9  ;;  %9382 = vmatprep.subr.bf16.mxu0 %v17960_v45 }
 0x19f   : > { %1439 = vmatprep.mubr.f32.mxu1 %v18462_v55  ;;  %8808 = vmatpush1.bf16.msra.mxu1 %v18463_v34  ;;  %v18471_v34 = vld [vmem:[#allocation144_spill] sm:$0xff] }
 0x1a0   : > { %5173 = vmatmul.mubr.f32.gmra.mrb[8].mxu0 %v18464_v4  ;;  %8809 = vmatprep.subr.bf16.mxu1 %v17960_v45 }
 0x1a1   : > { %5179 = vmatprep.mubr.f32.mxu0 %v18465_v33  ;;  %9384 = vmatpush1.bf16.msra.mxu0 %v18466_v26  ;;  %v18474_v26 = vld [vmem:[#allocation150_spill] sm:$0xff] }
 0x1a2   : > { %1442 = vmatmul.mubr.f32.gmra.mrb[10].mxu1 %v18467_v13  ;;  %9385 = vmatprep.subr.bf16.mxu0 %v17960_v45 }
 0x1a3   : > { %1448 = vmatprep.mubr.f32.mxu1 %v18468_v30  ;;  %8811 = vmatpush1.bf16.msra.mxu1 %v18469_v32  ;;  %v18477_v32 = vld [vmem:[#allocation152_spill] sm:$0xff] }
 0x1a4   : > { %5182 = vmatmul.mubr.f32.gmra.mrb[10].mxu0 %v18470_v49  ;;  %8812 = vmatprep.subr.bf16.mxu1 %v17960_v45 }
 0x1a5   : > { %5188 = vmatprep.mubr.f32.mxu0 %v18471_v34  ;;  %9387 = vmatpush1.bf16.msra.mxu0 %v18472_v2  ;;  %v18480_v2 = vld [vmem:[#allocation158_spill] sm:$0xff] }
 0x1a6   : > { %1451 = vmatmul.mubr.f32.gmra.mrb[12].mxu1 %v18473_v42  ;;  %9388 = vmatprep.subr.bf16.mxu0 %v17960_v45  ;;  %v18481_v42 = vld [vmem:[#allocation52_spill] sm:$0xff] }
 0x1a7   : > { %1457 = vmatprep.mubr.f32.mxu1 %v18474_v26  ;;  %8814 = vmatpush1.bf16.msra.mxu1 %v18475_v43  ;;  %v18483_v43 = vld [vmem:[#allocation161_spill] sm:$0xff]  ;;  %v18485_v26 = vld [vmem:[#allocation163_spill] sm:$0xff] }
 0x1a8   : > { %5191 = vmatmul.mubr.f32.gmra.mrb[12].mxu0 %v18476_v20  ;;  %8815 = vmatprep.subr.bf16.mxu1 %v17960_v45  ;;  %v18484_v20 = vld [vmem:[#allocation56_spill] sm:$0xff] }
 0x1a9   : > { %5197 = vmatprep.mubr.f32.mxu0 %v18477_v32  ;;  %9390 = vmatpush1.bf16.msra.mxu0 %v18478_v24  ;;  %v18486_v24 = vld [vmem:[#allocation165_spill] sm:$0xff]  ;;  %v18488_v32 = vld [vmem:[#allocation164_spill] sm:$0xff] }
 0x1aa   : > { %1460 = vmatmul.mubr.f32.gmra.mrb[14].mxu1 %v18479_v10  ;;  %9391 = vmatprep.subr.bf16.mxu0 %v17960_v45  ;;  %v18487_v10 = vld [vmem:[#allocation59_spill] sm:$0xff] }
 0x1ab   : > { %1466 = vmatprep.mubr.f32.mxu1 %v18480_v2  ;;  %8817 = vmatpush1.bf16.msra.mxu1 %v18481_v42  ;;  %v18489_v42 = vld [vmem:[#allocation167_spill] sm:$0xff] }
 0x1ac   : > { %5200 = vmatmul.mubr.f32.gmra.mrb[14].mxu0 %v18482_v51  ;;  %8818 = vmatprep.subr.bf16.mxu1 %v17960_v45  ;;  %v18490_v51 = vld [vmem:[#allocation63_spill] sm:$0xff] }
 0x1ad   : > { %5206 = vmatprep.mubr.f32.mxu0 %v18483_v43  ;;  %9393 = vmatpush1.bf16.msra.mxu0 %v18484_v20  ;;  %v18491_v2 = vld [vmem:[#allocation171_spill] sm:$0xff]  ;;  %v18492_v20 = vld [vmem:[#allocation173_spill] sm:$0xff]  ;;  %v18494_v43 = vld [vmem:[#allocation172_spill] sm:$0xff] }
 0x1ae   : > { %1469 = vmatmul.mubr.f32.gmra.mrb[16].mxu1 %v18485_v26  ;;  %9394 = vmatprep.subr.bf16.mxu0 %v17960_v45  ;;  %v18493_v26 = vld [vmem:[#allocation68_spill] sm:$0xff] }
 0x1af   : > { %1475 = vmatprep.mubr.f32.mxu1 %v18486_v24  ;;  %8820 = vmatpush1.bf16.msra.mxu1 %v18487_v10  ;;  %v18495_v10 = vld [vmem:[#allocation175_spill] sm:$0xff]  ;;  %v18497_v24 = vld [vmem:[#allocation178_spill] sm:$0xff] }
 0x1b0   : > { %5209 = vmatmul.mubr.f32.gmra.mrb[16].mxu0 %v18488_v32  ;;  %8821 = vmatprep.subr.bf16.mxu1 %v17960_v45  ;;  %v18496_v32 = vld [vmem:[#allocation72_spill] sm:$0xff] }
 0x1b1   : > { %5215 = vmatprep.mubr.f32.mxu0 %v18489_v42  ;;  %9396 = vmatpush1.bf16.msra.mxu0 %v18490_v51  ;;  %v18498_v51 = vld [vmem:[#allocation182_spill] sm:$0xff]  ;;  %v18500_v42 = vld [vmem:[#allocation180_spill] sm:$0xff] }
 0x1b2   : > { %1478 = vmatmul.mubr.f32.gmra.mrb[18].mxu1 %v18491_v2  ;;  %9397 = vmatprep.subr.bf16.mxu0 %v17960_v45  ;;  %v18499_v2 = vld [vmem:[#allocation79_spill] sm:$0xff] }
 0x1b3   : > { %1484 = vmatprep.mubr.f32.mxu1 %v18492_v20  ;;  %8823 = vmatpush1.bf16.msra.mxu1 %v18493_v26  ;;  %v18501_v26 = vld [vmem:[#allocation183_spill] sm:$0xff]  ;;  %v18503_v20 = vld [vmem:[#allocation185_spill] sm:$0xff] }
 0x1b4   : > { %5218 = vmatmul.mubr.f32.gmra.mrb[18].mxu0 %v18494_v43  ;;  %8824 = vmatprep.subr.bf16.mxu1 %v17960_v45  ;;  %v18502_v43 = vld [vmem:[#allocation82_spill] sm:$0xff] }
 0x1b5   : > { %5224 = vmatprep.mubr.f32.mxu0 %v18495_v10  ;;  %9399 = vmatpush1.bf16.msra.mxu0 %v18496_v32  ;;  %v18504_v32 = vld [vmem:[#allocation190_spill] sm:$0xff]  ;;  %v18506_v10 = vld [vmem:[#allocation187_spill] sm:$0xff] }
 0x1b6   : > { %1487 = vmatmul.mubr.f32.gmra.mrb[20].mxu1 %v18497_v24  ;;  %9400 = vmatprep.subr.bf16.mxu0 %v17960_v45  ;;  %v18505_v24 = vld [vmem:[#allocation89_spill] sm:$0xff] }
 0x1b7   : > { %1493 = vmatprep.mubr.f32.mxu1 %v18498_v51  ;;  %8826 = vmatpush1.bf16.msra.mxu1 %v18499_v2  ;;  %v18507_v2 = vld [vmem:[#allocation192_spill] sm:$0xff]  ;;  %v18509_v51 = vld [vmem:[#allocation193_spill] sm:$0xff] }
 0x1b8   : > { %5227 = vmatmul.mubr.f32.gmra.mrb[20].mxu0 %v18500_v42  ;;  %8827 = vmatprep.subr.bf16.mxu1 %v17960_v45  ;;  %v18508_v42 = vld [vmem:[#allocation91_spill] sm:$0xff] }
 0x1b9   : > { %5233 = vmatprep.mubr.f32.mxu0 %v18501_v26  ;;  %9402 = vmatpush1.bf16.msra.mxu0 %v18502_v43  ;;  %v18510_v43 = vld [vmem:[#allocation198_spill] sm:$0xff]  ;;  %v18512_v26 = vld [vmem:[#allocation195_spill] sm:$0xff] }
 0x1ba   : > { %1496 = vmatmul.mubr.f32.gmra.mrb[22].mxu1 %v18503_v20  ;;  %9403 = vmatprep.subr.bf16.mxu0 %v17960_v45  ;;  %v18511_v20 = vld [vmem:[#allocation92_spill] sm:$0xff] }
 0x1bb   : > { %1502 = vmatprep.mubr.f32.mxu1 %v18504_v32  ;;  %8829 = vmatpush1.bf16.msra.mxu1 %v18505_v24  ;;  %v18513_v24 = vld [vmem:[#allocation199_spill] sm:$0xff]  ;;  %v18515_v32 = vld [vmem:[#allocation202_spill] sm:$0xff] }
 0x1bc   : > { %5236 = vmatmul.mubr.f32.gmra.mrb[22].mxu0 %v18506_v10  ;;  %8830 = vmatprep.subr.bf16.mxu1 %v17960_v45  ;;  %v18514_v10 = vld [vmem:[#allocation93_spill] sm:$0xff] }
 0x1bd   : > { %5242 = vmatprep.mubr.f32.mxu0 %v18507_v2  ;;  %9405 = vmatpush1.bf16.msra.mxu0 %v18508_v42  ;;  %v18516_v42 = vld [vmem:[#allocation206_spill] sm:$0xff]  ;;  %v18518_v2 = vld [vmem:[#allocation203_spill] sm:$0xff] }
 0x1be   : > { %1505 = vmatmul.mubr.f32.gmra.mrb[24].mxu1 %v18509_v51  ;;  %9406 = vmatprep.subr.bf16.mxu0 %v17960_v45  ;;  %v18517_v51 = vld [vmem:[#allocation94_spill] sm:$0xff] }
 0x1bf   : > { %1511 = vmatprep.mubr.f32.mxu1 %v18510_v43  ;;  %8832 = vmatpush1.bf16.msra.mxu1 %v18511_v20  ;;  %v18519_v20 = vld [vmem:[#allocation208_spill] sm:$0xff]  ;;  %v18521_v43 = vld [vmem:[#allocation210_spill] sm:$0xff] }
 0x1c0   : > { %5245 = vmatmul.mubr.f32.gmra.mrb[24].mxu0 %v18512_v26  ;;  %8833 = vmatprep.subr.bf16.mxu1 %v17960_v45  ;;  %v18520_v26 = vld [vmem:[#allocation95_spill] sm:$0xff] }
 0x1c1   : > { %5251 = vmatprep.mubr.f32.mxu0 %v18513_v24  ;;  %9408 = vmatpush1.bf16.msra.mxu0 %v18514_v10  ;;  %v18522_v10 = vld [vmem:[#allocation214_spill] sm:$0xff]  ;;  %v18524_v24 = vld [vmem:[#allocation211_spill] sm:$0xff] }
 0x1c2   : > { %1514 = vmatmul.mubr.f32.gmra.mrb[26].mxu1 %v18515_v32  ;;  %9409 = vmatprep.subr.bf16.mxu0 %v17960_v45  ;;  %v18523_v32 = vld [vmem:[#allocation96_spill] sm:$0xff] }
 0x1c3   : > { %1520 = vmatprep.mubr.f32.mxu1 %v18516_v42  ;;  %8835 = vmatpush1.bf16.msra.mxu1 %v18517_v51  ;;  %v18525_v51 = vld [vmem:[#allocation217_spill] sm:$0xff]  ;;  %v18527_v42 = vld [vmem:[#allocation219_spill] sm:$0xff] }
 0x1c4   : > { %5254 = vmatmul.mubr.f32.gmra.mrb[26].mxu0 %v18518_v2  ;;  %8836 = vmatprep.subr.bf16.mxu1 %v17960_v45  ;;  %v18526_v2 = vld [vmem:[#allocation105_spill] sm:$0xff] }
 0x1c5   : > { %5260 = vmatprep.mubr.f32.mxu0 %v18519_v20  ;;  %9411 = vmatpush1.bf16.msra.mxu0 %v18520_v26  ;;  %v18528_v26 = vld [vmem:[#allocation221_spill] sm:$0xff]  ;;  %v18530_v20 = vld [vmem:[#allocation220_spill] sm:$0xff] }
 0x1c6   : > { %1523 = vmatmul.mubr.f32.gmra.mrb[28].mxu1 %v18521_v43  ;;  %9412 = vmatprep.subr.bf16.mxu0 %v17960_v45  ;;  %v18529_v43 = vld [vmem:[#allocation106_spill] sm:$0xff] }
 0x1c7   : > { %1529 = vmatprep.mubr.f32.mxu1 %v18522_v10  ;;  %8838 = vmatpush1.bf16.msra.mxu1 %v18523_v32  ;;  %v18531_v32 = vld [vmem:[#allocation223_spill] sm:$0xff] }
 0x1c8   : > { %5263 = vmatmul.mubr.f32.gmra.mrb[28].mxu0 %v18524_v24  ;;  %8839 = vmatprep.subr.bf16.mxu1 %v17960_v45  ;;  %v18532_v24 = vld [vmem:[#allocation107_spill] sm:$0xff] }
 0x1c9   : > { %5269 = vmatprep.mubr.f32.mxu0 %v18525_v51  ;;  %9414 = vmatpush1.bf16.msra.mxu0 %v18526_v2  ;;  %v18533_v10 = vld [vmem:[#allocation227_spill] sm:$0xff]  ;;  %v18534_v2 = vld [vmem:[#allocation229_spill] sm:$0xff]  ;;  %v18536_v51 = vld [vmem:[#allocation232_spill] sm:$0xff] }
 0x1ca   : > { %1532 = vmatmul.mubr.f32.gmra.mrb[30].mxu1 %v18527_v42  ;;  %9415 = vmatprep.subr.bf16.mxu0 %v17960_v45  ;;  %v18535_v42 = vld [vmem:[#allocation228_spill] sm:$0xff] }
 0x1cb   : > { %1538 = vmatprep.mubr.f32.mxu1 %v18528_v26  ;;  %8841 = vmatpush1.bf16.msra.mxu1 %v18529_v43  ;;  %v18537_v26 = vld [vmem:[#allocation233_spill] sm:$0xff] }
 0x1cc   : > { %5272 = vmatmul.mubr.f32.gmra.mrb[30].mxu0 %v18530_v20  ;;  %8842 = vmatprep.subr.bf16.mxu1 %v17960_v45  ;;  %v18538_v43 = vld [vmem:[#allocation237_spill] sm:$0xff]  ;;  %v18539_v20 = vld [vmem:[#allocation235_spill] sm:$0xff] }
 0x1cd   : > { %5278 = vmatprep.mubr.f32.mxu0 %v18531_v32  ;;  %9417 = vmatpush1.bf16.msra.mxu0 %v18532_v24  ;;  %v18541_v32 = vld [vmem:[#allocation241_spill] sm:$0xff]  ;;  %v18542_v24 = vand.u32 4294901760, %v18434_v22  ;;  %v18584_v22 = vand.u32 4294901760, %v18464_v4  ;;  %v18590_v4 = vand.u32 4294901760, %v18353_v27 }
 0x1ce   : > { %1541 = vmatmul.mubr.f32.gmra.mrb[32].mxu1 %v18533_v10  ;;  %9418 = vmatprep.subr.bf16.mxu0 %v17960_v45  ;;  %v18543_v10 = vand.u32 4294901760, %v11153_v61  ;;  %v18550_v61 = vand.u32 4294901760, %v11499_v6  ;;  %v18557_v6 = vand.u32 4294901760, %v18445_v60 }
 0x1cf   : > { %1547 = vmatprep.mubr.f32.mxu1 %v18534_v2  ;;  %v18544_v2 = vand.u32 4294901760, %v11240_v47  ;;  %v18551_v47 = vand.u32 4294901760, %v11504_v11  ;;  %v18558_v11 = vand.u32 4294901760, %v11699_v59  ;;  %v18566_v59 = vand.u32 4294901760, %v11774_v1 }
 0x1d0   : > { %5281 = vmatmul.mubr.f32.gmra.mrb[32].mxu0 %v18535_v42  ;;  %v18573_v1 = vand.u32 4294901760, %v18456_v35 }
 0x1d1   : > { %5287 = vmatprep.mubr.f32.mxu0 %v18536_v51  ;;  %v8843_v42 = vpack.c.bf16 %v18544_v2, %v18543_v10  ;;  %v8846_v2 = vpack.c.bf16 %v18551_v47, %v18550_v61  ;;  %v18560_v10 = vand.u32 4294901760, %v18446_v37  ;;  %v18567_v37 = vand.u32 4294901760, %v11803_v0  ;;  %v18596_v47 = vld [vmem:[#allocation33_spill] sm:$0xff] }
 0x1d2   : > { %1550 = vmatmul.mubr.f32.gmra.mrb[34].mxu1 %v18537_v26  ;;  %v18545_v26 = vand.u32 4294901760, %v18436_v5  ;;  %v18552_v5 = vand.u32 4294901760, %v18440_v63  ;;  %v18574_v0 = vand.u32 4294901760, %v18337_v8  ;;  %v18580_v63 = vand.u32 4294901760, %v18461_v9 }
 0x1d3   : > { %1556 = vmatprep.mubr.f32.mxu1 %v18538_v43  ;;  %v18546_v43 = vand.u32 4294901760, %v11334_v21  ;;  %v18553_v21 = vand.u32 4294901760, %v18442_v36  ;;  %v18568_v36 = vand.u32 4294901760, %v18452_v58  ;;  %v18575_v58 = vand.u32 4294901760, %v18338_v62 }
 0x1d4   : > { %5290 = vmatmul.mubr.f32.gmra.mrb[34].mxu0 %v18539_v20  ;;  %v18547_v20 = vand.u32 4294901760, %v11418_v41  ;;  %v18554_v41 = vand.u32 4294901760, %v11647_v7  ;;  %v18562_v7 = vand.u32 4294901760, %v11741_v16  ;;  %v18569_v16 = vand.u32 4294901760, %v18453_v31 }
 0x1d5   : > { %5296 = vmatprep.mubr.f32.mxu0 %v18540_v48  ;;  %v8855_v60 = vpack.c.bf16 %v18575_v58, %v18574_v0  ;;  %v18576_v31 = vand.u32 4294901760, %v18458_v12  ;;  %v18581_v62 = vand.u32 4294901760, %v18462_v55  ;;  %v18582_v12 = vand.u32 4294901760, %v18345_v19  ;;  %v18620_v58 = vld [vmem:[#allocation41_spill] sm:$0xff] }
 0x1d6   : > { %1559 = vmatmul.mubr.f32.gmra.mrb[36].mxu1 %v18541_v32  ;;  %v9419_v48 = vpack.c.bf16 %v18547_v20, %v18546_v43  ;;  %v18548_v32 = vand.u32 4294901760, %v18437_v29  ;;  %v18555_v20 = vand.u32 4294901760, %v11685_v25  ;;  %v18561_v25 = vand.u32 4294901760, %v18448_v23 }
 0x1d7   : > { %1663 = vmatprep.mubr.f32.mxu1 %v18542_v24  ;;  %v18549_v24 = vand.u32 4294901760, %v18439_v53  ;;  %v18564_v53 = vand.u32 4294901760, %v18449_v40  ;;  %v8852_v23 = vpack.c.bf16 %v18567_v37, %v18566_v59  ;;  %v18571_v40 = vand.u32 4294901760, %v11108_v50 }
 0x1d8   : > { %5299 = vmatmul.mubr.f32.gmra.mrb[36].mxu0 %v12870_v3  ;;  %v18572_v29 = vand.u32 4294901760, %v18455_v39  ;;  %v18578_v50 = vand.u32 4294901760, %v18341_v15  ;;  %v18579_v39 = vand.u32 4294901760, %v18342_v17  ;;  %v18585_v17 = vand.u32 4294901760, %v18465_v33 }
 0x1d9   : > { %5403 = vmatprep.mubr.f32.mxu0 %v18545_v26  ;;  %v18559_v26 = vand.u32 4294901760, %v11736_v52  ;;  %v18565_v52 = vand.u32 4294901760, %v18450_v28  ;;  %v18586_v9 = vand.u32 4294901760, %v18349_v54  ;;  %v18587_v55 = vand.u32 4294901760, %v18350_v38 }
 0x1da   : > { %1667 = vmatmul.mubr.f32.vlgmr.msra.gmra.mrb[0].mxu1 %v18548_v32  ;;  %v18556_v32 = vand.u32 4294901760, %v18443_v14  ;;  %v18563_v14 = vand.u32 4294901760, %v11758_v18  ;;  %v18570_v18 = vand.u32 4294901760, %v11100_v44  ;;  %v18577_v44 = vand.u32 4294901760, %v18459_v56 }
 0x1db   : > { %8844 = vmatpush1.bf16.msra.mxu1 %v8843_v42  ;;  %1674 = vmatprep.mubr.f32.mxu1 %v18549_v24  ;;  %v9422_v42 = vpack.c.bf16 %v18555_v20, %v18554_v41  ;;  %v9431_v35 = vpack.c.bf16 %v18579_v39, %v18578_v50  ;;  %v18583_v56 = vand.u32 4294901760, %v18346_v46  ;;  %v9434_v15 = vpack.c.bf16 %v18587_v55, %v18586_v9  ;;  %v18604_v20 = vld [vmem:[#allocation36_spill] sm:$0xff]  ;;  %v18624_v39 = vld [vmem:[#allocation155_spill] sm:$0xff] }
 0x1dc   : > { %5407 = vmatmul.mubr.f32.vlgmr.msra.gmra.mrb[0].mxu0 %v18552_v5  ;;  %8845 = vmatprep.subr.bf16.mxu1 %v17960_v45  ;;  %v9425_v43 = vpack.c.bf16 %v18563_v14, %v18562_v7  ;;  %v9428_v28 = vpack.c.bf16 %v18571_v40, %v18570_v18  ;;  %v18588_v24 = vand.u32 4294901760, %v18467_v13  ;;  %v18589_v46 = vand.u32 4294901760, %v18468_v30  ;;  %v18594_v13 = vld [vmem:[#allocation32_spill] sm:$0xff]  ;;  %v18598_v5 = vld [vmem:[#allocation146_spill] sm:$0xff]  ;;  %v18610_v7 = vld [vmem:[#allocation37_spill] sm:$0xff] }
 0x1dd   : > { %9420 = vmatpush1.bf16.msra.mxu0 %v9419_v48  ;;  %5414 = vmatprep.mubr.f32.mxu0 %v18553_v21  ;;  %v8849_v48 = vpack.c.bf16 %v18559_v26, %v18558_v11  ;;  %v8858_v8 = vpack.c.bf16 %v18583_v56, %v18582_v12  ;;  %v18591_v33 = vand.u32 4294901760, %v18354_v57  ;;  %v18592_v61 = vand.u32 4294901760, %v18470_v49  ;;  %v18600_v57 = vld [vmem:[#allocation150_spill] sm:$0xff]  ;;  %v18602_v49 = vld [vmem:[#allocation35_spill] sm:$0xff]  ;;  %v13380_v26 = vld [vmem:[%s16958_s2 + $0x108] sm:$0xff] }
 0x1de   : > { %1678 = vmatmul.mubr.f32.gmra.mrb[2].mxu1 %v18556_v32  ;;  %9421 = vmatprep.subr.bf16.mxu0 %v17960_v45  ;;  %v18593_v38 = vand.u32 4294901760, %v18471_v34  ;;  %v18595_v54 = vand.u32 4294901760, %v18594_v13  ;;  %v18597_v30 = vand.u32 4294901760, %v18596_v47  ;;  %v18599_v21 = vand.u32 4294901760, %v18598_v5  ;;  %v18606_v32 = vld [vmem:[#allocation147_spill] sm:$0xff]  ;;  %v13437_v12 = vld [vmem:[%s16958_s2 + $0x110] sm:$0xff] }
 0x1df   : > { %8847 = vmatpush1.bf16.msra.mxu1 %v8846_v2  ;;  %1685 = vmatprep.mubr.f32.mxu1 %v18557_v6  ;;  %v8861_v19 = vpack.c.bf16 %v18591_v33, %v18590_v4  ;;  %v18601_v27 = vand.u32 4294901760, %v18600_v57  ;;  %v18603_v41 = vand.u32 4294901760, %v18602_v49  ;;  %v18605_v34 = vand.u32 4294901760, %v18604_v20  ;;  %v13375_v11 = vld [vmem:[%s16958_s2 + $0x100] sm:$0xff]  ;;  %v13442_v56 = vld [vmem:[%s16958_s2 + $0x118] sm:$0xff]  ;;  %v18638_v13 = vld [vmem:[#allocation45_spill] sm:$0xff] }
 0x1e0   : > { %5418 = vmatmul.mubr.f32.gmra.mrb[2].mxu0 %v18560_v10  ;;  %8848 = vmatprep.subr.bf16.mxu1 %v17960_v45  ;;  %v9437_v2 = vpack.c.bf16 %v18597_v30, %v18595_v54  ;;  %v18607_v6 = vand.u32 4294901760, %v18606_v32  ;;  %v18608_v10 = vld [vmem:[#allocation152_spill] sm:$0xff]  ;;  %v18611_v14 = vand.u32 4294901760, %v18610_v7  ;;  %v17564_v59 = vand.u32 4294901760, %v13375_v11  ;;  %v18632_v55 = vld [vmem:[#allocation43_spill] sm:$0xff]  ;;  %v18640_v47 = vld [vmem:[#allocation46_spill] sm:$0xff] }
 0x1e1   : > { %9423 = vmatpush1.bf16.msra.mxu0 %v9422_v42  ;;  %5425 = vmatprep.mubr.f32.mxu0 %v18561_v25  ;;  %v8864_v42 = vpack.c.bf16 %v18605_v34, %v18603_v41  ;;  %v18609_v25 = vand.u32 4294901760, %v18608_v10  ;;  %v17563_v37 = vand.u32 4294901760, %v13380_v26  ;;  %v17558_v4 = vand.u32 4294901760, %v13442_v56  ;;  %v18634_v33 = vld [vmem:[#allocation163_spill] sm:$0xff]  ;;  %v18644_v57 = vld [vmem:[#allocation164_spill] sm:$0xff] }
 0x1e2   : > { %1689 = vmatmul.mubr.f32.gmra.mrb[4].mxu1 %v18564_v53  ;;  %9424 = vmatprep.subr.bf16.mxu0 %v17960_v45  ;;  %v18639_v54 = vand.u32 4294901760, %v18638_v13  ;;  %v18641_v30 = vand.u32 4294901760, %v18640_v47  ;;  %v13477_v49 = vld [vmem:[%s16958_s2 + $0x120] sm:$0xff]  ;;  %v13482_v41 = vld [vmem:[%s16958_s2 + $0x128] sm:$0xff] }
 0x1e3   : > { %1696 = vmatprep.mubr.f32.mxu1 %v18565_v52  ;;  %8850 = vmatpush1.bf16.msra.mxu1 %v8849_v48  ;;  %v13385_v48 = vld [vmem:[%s16958_s2 + $0x300] sm:$0xff]  ;;  %v13419_v50 = vsub.f32 %v13380_v26, %v17563_v37  ;;  %v17556_v7 = vand.u32 4294901760, %v13477_v49  ;;  %v18810_v37 = vld [vmem:[#allocation108_spill] sm:$0xff] }
 0x1e4   : > { %5429 = vmatmul.mubr.f32.gmra.mrb[4].mxu0 %v18568_v36  ;;  %8851 = vmatprep.subr.bf16.mxu1 %v17960_v45  ;;  %v18614_v36 = vld [vmem:[#allocation154_spill] sm:$0xff]  ;;  %v17562_v18 = vand.u32 4294901760, %v13385_v48  ;;  %v18646_v20 = vld [vmem:[#allocation167_spill] sm:$0xff] }
 0x1e5   : > { %5436 = vmatprep.mubr.f32.mxu0 %v18569_v16  ;;  %9426 = vmatpush1.bf16.msra.mxu0 %v9425_v43  ;;  %v18612_v43 = vld [vmem:[#allocation39_spill] sm:$0xff]  ;;  %v18615_v16 = vand.u32 4294901760, %v18614_v36  ;;  %18623 = vst [vmem:[#allocation20_spill] sm:$0xff] %v13419_v50  ;;  %v18647_v34 = vand.u32 4294901760, %v18646_v20  ;;  %v18833_v50 = vld [vmem:[#allocation121_spill] sm:$0xff] }
 0x1e6   : > { %1700 = vmatmul.mubr.f32.gmra.mrb[6].mxu1 %v18572_v29  ;;  %9427 = vmatprep.subr.bf16.mxu0 %v17960_v45  ;;  %v18613_v53 = vand.u32 4294901760, %v18612_v43  ;;  %v18652_v43 = vld [vmem:[#allocation171_spill] sm:$0xff] }
 0x1e7   : > { %1707 = vmatprep.mubr.f32.mxu1 %v18573_v1  ;;  %8853 = vmatpush1.bf16.msra.mxu1 %v8852_v23  ;;  %v13398_v23 = vld [vmem:[%s16958_s2 + $0x308] sm:$0xff] }
 0x1e8   : > { %5440 = vmatmul.mubr.f32.gmra.mrb[6].mxu0 %v18576_v31  ;;  %8854 = vmatprep.subr.bf16.mxu1 %v17960_v45  ;;  %v9440_v52 = vpack.c.bf16 %v18613_v53, %v18611_v14  ;;  %v17561_v40 = vand.u32 4294901760, %v13398_v23  ;;  %v18618_v1 = vld [vmem:[#allocation40_spill] sm:$0xff]  ;;  %v17555_v14 = vand.u32 4294901760, %v13482_v41  ;;  %v18653_v53 = vand.u32 4294901760, %v18652_v43 }
 0x1e9   : > { %5447 = vmatprep.mubr.f32.mxu0 %v18577_v44  ;;  %9429 = vmatpush1.bf16.msra.mxu0 %v9428_v28  ;;  %v18616_v28 = vld [vmem:[#allocation158_spill] sm:$0xff]  ;;  %v18619_v0 = vand.u32 4294901760, %v18618_v1  ;;  %v13414_v44 = vsub.f32 %v13375_v11, %v17564_v59  ;;  %v18684_v43 = vld [vmem:[#allocation60_spill] sm:$0xff] }
 0x1ea   : > { %1711 = vmatmul.mubr.f32.gmra.mrb[8].mxu1 %v18580_v63  ;;  %9430 = vmatprep.subr.bf16.mxu0 %v17960_v45  ;;  %v18617_v29 = vand.u32 4294901760, %v18616_v28  ;;  %v13427_v63 = vsub.f32 %v13385_v48, %v17562_v18  ;;  %v18809_v18 = vld [vmem:[#allocation14_spill] sm:$0xff] }
 0x1eb   : > { %1718 = vmatprep.mubr.f32.mxu1 %v18581_v62  ;;  %8856 = vmatpush1.bf16.msra.mxu1 %v8855_v60  ;;  %v18621_v60 = vand.u32 4294901760, %v18620_v58  ;;  %18622 = vst [vmem:[#allocation18_spill] sm:$0xff] %v13414_v44  ;;  %v13432_v62 = vsub.f32 %v13398_v23, %v17561_v40  ;;  %v13504_v58 = vsub.f32 %v13477_v49, %v17556_v7  ;;  %v13832_v7 = vld [vmem:[%s16958_s2 + $0x1b8] sm:$0xff]  ;;  %v18808_v40 = vld [vmem:[#allocation100_spill] sm:$0xff]  ;;  %v13917_v44 = vld [vmem:[%s16958_s2 + $0x1e0] sm:$0xff] }
 0x1ec   : > { %5451 = vmatmul.mubr.f32.gmra.mrb[8].mxu0 %v18584_v22  ;;  %8857 = vmatprep.subr.bf16.mxu1 %v17960_v45  ;;  %18626 = vst [vmem:[#allocation21_spill] sm:$0xff] %v13427_v63  ;;  %18805 = vst [vmem:[#allocation136_spill] sm:$0xff] %v13832_v7 }
 0x1ed   : > { %5458 = vmatprep.mubr.f32.mxu0 %v18585_v17  ;;  %9432 = vmatpush1.bf16.msra.mxu0 %v9431_v35  ;;  %v8867_v31 = vpack.c.bf16 %v18621_v60, %v18619_v0  ;;  %v18625_v35 = vand.u32 4294901760, %v18624_v39  ;;  %18627 = vst [vmem:[#allocation22_spill] sm:$0xff] %v13432_v62  ;;  %v18630_v17 = vld [vmem:[#allocation42_spill] sm:$0xff]  ;;  %18660 = vst [vmem:[#allocation27_spill] sm:$0xff] %v13504_v58  ;;  %v13509_v60 = vsub.f32 %v13482_v41, %v17555_v14  ;;  %v18803_v14 = vld [vmem:[#allocation87_spill] sm:$0xff] }
 0x1ee   : > { %1722 = vmatmul.mubr.f32.gmra.mrb[10].mxu1 %v18588_v24  ;;  %9433 = vmatprep.subr.bf16.mxu0 %v17960_v45  ;;  %v18631_v9 = vand.u32 4294901760, %v18630_v17  ;;  %v18830_v62 = vld [vmem:[#allocation19_spill] sm:$0xff]  ;;  %18834 = vst [vmem:[#allocation36_spill] sm:$0xff] %v13917_v44 }
 0x1ef   : > { %1729 = vmatprep.mubr.f32.mxu1 %v18589_v46  ;;  %8859 = vmatpush1.bf16.msra.mxu1 %v8858_v8  ;;  %v18628_v8 = vld [vmem:[#allocation161_spill] sm:$0xff]  ;;  %v17560_v46 = vand.u32 4294901760, %v13437_v12  ;;  %18661 = vst [vmem:[#allocation28_spill] sm:$0xff] %v13509_v60 }
 0x1f0   : > { %5462 = vmatmul.mubr.f32.gmra.mrb[10].mxu0 %v18592_v61  ;;  %8860 = vmatprep.subr.bf16.mxu1 %v17960_v45  ;;  %v18629_v22 = vand.u32 4294901760, %v18628_v8  ;;  %v18636_v61 = vld [vmem:[#allocation165_spill] sm:$0xff] }
 0x1f1   : > { %5469 = vmatprep.mubr.f32.mxu0 %v18593_v38  ;;  %9435 = vmatpush1.bf16.msra.mxu0 %v9434_v15  ;;  %v18633_v15 = vand.u32 4294901760, %v18632_v55  ;;  %v18637_v38 = vand.u32 4294901760, %v18636_v61  ;;  %v13464_v5 = vsub.f32 %v13437_v12, %v17560_v46  ;;  %v13531_v61 = vld [vmem:[%s16958_s2 + $0x138] sm:$0xff]  ;;  %v17569_v46 = vand.u32 4294901760, %v13832_v7  ;;  %v18827_v60 = vld [vmem:[#allocation17_spill] sm:$0xff] }
 0x1f2   : > { %1733 = vmatmul.mubr.f32.gmra.mrb[12].mxu1 %v18599_v21  ;;  %9436 = vmatprep.subr.bf16.mxu0 %v17960_v45  ;;  %v13469_v21 = vsub.f32 %v13442_v56, %v17558_v4  ;;  %v17551_v20 = vand.u32 4294901760, %v13531_v61  ;;  %v18807_v4 = vld [vmem:[#allocation98_spill] sm:$0xff] }
 0x1f3   : > { %1740 = vmatprep.mubr.f32.mxu1 %v18601_v27  ;;  %8862 = vmatpush1.bf16.msra.mxu1 %v8861_v19  ;;  %v9443_v24 = vpack.c.bf16 %v18633_v15, %v18631_v9  ;;  %v18635_v19 = vand.u32 4294901760, %v18634_v33  ;;  %18642 = vst [vmem:[#allocation25_spill] sm:$0xff] %v13464_v5  ;;  %v18645_v27 = vand.u32 4294901760, %v18644_v57  ;;  %v18668_v9 = vld [vmem:[#allocation54_spill] sm:$0xff]  ;;  %v18829_v5 = vld [vmem:[#allocation123_spill] sm:$0xff] }
 0x1f4   : > { %5473 = vmatmul.mubr.f32.gmra.mrb[12].mxu0 %v18607_v6  ;;  %8863 = vmatprep.subr.bf16.mxu1 %v17960_v45  ;;  %18643 = vst [vmem:[#allocation26_spill] sm:$0xff] %v13469_v21  ;;  %v18650_v6 = vld [vmem:[#allocation49_spill] sm:$0xff]  ;;  %v18669_v55 = vand.u32 4294901760, %v18668_v9  ;;  %v18828_v21 = vld [vmem:[#allocation120_spill] sm:$0xff] }
 0x1f5   : > { %5480 = vmatprep.mubr.f32.mxu0 %v18609_v25  ;;  %9438 = vmatpush1.bf16.msra.mxu0 %v9437_v2  ;;  %v8870_v2 = vpack.c.bf16 %v18641_v30, %v18639_v54  ;;  %v18651_v10 = vand.u32 4294901760, %v18650_v6  ;;  %v18674_v54 = vld [vmem:[#allocation55_spill] sm:$0xff]  ;;  %v18676_v30 = vld [vmem:[#allocation57_spill] sm:$0xff] }
 0x1f6   : > { %1744 = vmatmul.mubr.f32.gmra.mrb[14].mxu1 %v18615_v16  ;;  %9439 = vmatprep.subr.bf16.mxu0 %v17960_v45  ;;  %v18656_v16 = vld [vmem:[#allocation50_spill] sm:$0xff]  ;;  %v18675_v47 = vand.u32 4294901760, %v18674_v54  ;;  %v18700_v54 = vld [vmem:[#allocation64_spill] sm:$0xff] }
 0x1f7   : > { %1751 = vmatprep.mubr.f32.mxu1 %v18617_v29  ;;  %8865 = vmatpush1.bf16.msra.mxu1 %v8864_v42  ;;  %v18648_v42 = vld [vmem:[#allocation48_spill] sm:$0xff]  ;;  %v18657_v28 = vand.u32 4294901760, %v18656_v16  ;;  %v18658_v29 = vld [vmem:[#allocation51_spill] sm:$0xff]  ;;  %v13558_v16 = vsub.f32 %v13531_v61, %v17551_v20  ;;  %v18793_v20 = vld [vmem:[#allocation78_spill] sm:$0xff] }
 0x1f8   : > { %5484 = vmatmul.mubr.f32.gmra.mrb[14].mxu0 %v18625_v35  ;;  %8866 = vmatprep.subr.bf16.mxu1 %v17960_v45  ;;  %v18649_v32 = vand.u32 4294901760, %v18648_v42  ;;  %v18659_v1 = vand.u32 4294901760, %v18658_v29  ;;  %v18664_v35 = vld [vmem:[#allocation175_spill] sm:$0xff] }
 0x1f9   : > { %5491 = vmatprep.mubr.f32.mxu0 %v18629_v22  ;;  %9441 = vmatpush1.bf16.msra.mxu0 %v9440_v52  ;;  %v18654_v52 = vld [vmem:[#allocation173_spill] sm:$0xff]  ;;  %v18665_v8 = vand.u32 4294901760, %v18664_v35  ;;  %18687 = vst [vmem:[#allocation31_spill] sm:$0xff] %v13558_v16 }
 0x1fa   : > { %1755 = vmatmul.mubr.f32.gmra.mrb[16].mxu1 %v18635_v19  ;;  %9442 = vmatprep.subr.bf16.mxu0 %v17960_v45  ;;  %v9446_v25 = vpack.c.bf16 %v18651_v10, %v18649_v32  ;;  %v18655_v36 = vand.u32 4294901760, %v18654_v52  ;;  %v8873_v0 = vpack.c.bf16 %v18659_v1, %v18657_v28  ;;  %v18666_v22 = vld [vmem:[#allocation53_spill] sm:$0xff]  ;;  %v18680_v32 = vld [vmem:[#allocation183_spill] sm:$0xff]  ;;  %v18682_v10 = vld [vmem:[#allocation58_spill] sm:$0xff] }
 0x1fb   : > { %1762 = vmatprep.mubr.f32.mxu1 %v18637_v38  ;;  %8868 = vmatpush1.bf16.msra.mxu1 %v8867_v31  ;;  %v18662_v31 = vld [vmem:[#allocation172_spill] sm:$0xff]  ;;  %v18667_v17 = vand.u32 4294901760, %v18666_v22  ;;  %v13526_v19 = vld [vmem:[%s16958_s2 + $0x130] sm:$0xff]  ;;  %v18672_v38 = vld [vmem:[#allocation182_spill] sm:$0xff]  ;;  %v18681_v6 = vand.u32 4294901760, %v18680_v32 }
 0x1fc   : > { %5495 = vmatmul.mubr.f32.gmra.mrb[16].mxu0 %v18645_v27  ;;  %8869 = vmatprep.subr.bf16.mxu1 %v17960_v45  ;;  %v18663_v39 = vand.u32 4294901760, %v18662_v31  ;;  %v18673_v13 = vand.u32 4294901760, %v18672_v38  ;;  %v17554_v27 = vand.u32 4294901760, %v13526_v19  ;;  %v18688_v28 = vld [vmem:[#allocation185_spill] sm:$0xff]  ;;  %v13566_v1 = vld [vmem:[%s16958_s2 + $0x140] sm:$0xff]  ;;  %v18690_v31 = vld [vmem:[#allocation190_spill] sm:$0xff] }
 0x1fd   : > { %5502 = vmatprep.mubr.f32.mxu0 %v18647_v34  ;;  %9444 = vmatpush1.bf16.msra.mxu0 %v9443_v24  ;;  %v9449_v15 = vpack.c.bf16 %v18669_v55, %v18667_v17  ;;  %v18670_v24 = vld [vmem:[#allocation178_spill] sm:$0xff]  ;;  %v18678_v34 = vld [vmem:[#allocation180_spill] sm:$0xff]  ;;  %v18689_v29 = vand.u32 4294901760, %v18688_v28  ;;  %v18692_v35 = vld [vmem:[#allocation61_spill] sm:$0xff]  ;;  %v17550_v55 = vand.u32 4294901760, %v13566_v1 }
 0x1fe   : > { %1766 = vmatmul.mubr.f32.gmra.mrb[18].mxu1 %v18653_v53  ;;  %9445 = vmatprep.subr.bf16.mxu0 %v17960_v45  ;;  %v18671_v33 = vand.u32 4294901760, %v18670_v24  ;;  %v18679_v42 = vand.u32 4294901760, %v18678_v34  ;;  %v18685_v53 = vand.u32 4294901760, %v18684_v43  ;;  %v18694_v22 = vld [vmem:[#allocation62_spill] sm:$0xff]  ;;  %v18696_v24 = vld [vmem:[#allocation187_spill] sm:$0xff]  ;;  %v18698_v38 = vld [vmem:[#allocation192_spill] sm:$0xff] }
 0x1ff   : > { %1773 = vmatprep.mubr.f32.mxu1 %v18655_v36  ;;  %8871 = vmatpush1.bf16.msra.mxu1 %v8870_v2  ;;  %v18677_v2 = vand.u32 4294901760, %v18676_v30  ;;  %v13553_v36 = vsub.f32 %v13526_v19, %v17554_v27  ;;  %v18695_v17 = vand.u32 4294901760, %v18694_v22  ;;  %v18702_v30 = vld [vmem:[#allocation65_spill] sm:$0xff]  ;;  %v13593_v34 = vsub.f32 %v13566_v1, %v17550_v55  ;;  %v18710_v43 = vld [vmem:[#allocation66_spill] sm:$0xff]  ;;  %v18716_v22 = vld [vmem:[#allocation199_spill] sm:$0xff] }
 0x200   : > { %5506 = vmatmul.mubr.f32.gmra.mrb[18].mxu0 %v18663_v39  ;;  %8872 = vmatprep.subr.bf16.mxu1 %v17960_v45  ;;  %v18691_v39 = vand.u32 4294901760, %v18690_v31  ;;  %v18706_v32 = vld [vmem:[#allocation193_spill] sm:$0xff]  ;;  %v18714_v31 = vld [vmem:[#allocation195_spill] sm:$0xff] }
 0x201   : > { %5513 = vmatprep.mubr.f32.mxu0 %v18665_v8  ;;  %9447 = vmatpush1.bf16.msra.mxu0 %v9446_v25  ;;  %v8876_v57 = vpack.c.bf16 %v18677_v2, %v18675_v47  ;;  %v18683_v25 = vand.u32 4294901760, %v18682_v10  ;;  %18686 = vst [vmem:[#allocation29_spill] sm:$0xff] %v13553_v36  ;;  %v18693_v8 = vand.u32 4294901760, %v18692_v35  ;;  %v18701_v47 = vand.u32 4294901760, %v18700_v54  ;;  %18704 = vst [vmem:[#allocation84_spill] sm:$0xff] %v13593_v34  ;;  %v18708_v10 = vld [vmem:[#allocation198_spill] sm:$0xff] }
 0x202   : > { %1777 = vmatmul.mubr.f32.gmra.mrb[20].mxu1 %v18671_v33  ;;  %9448 = vmatprep.subr.bf16.mxu0 %v17960_v45  ;;  %v18697_v33 = vand.u32 4294901760, %v18696_v24  ;;  %v18703_v2 = vand.u32 4294901760, %v18702_v30  ;;  %v13615_v35 = vld [vmem:[%s16958_s2 + $0x150] sm:$0xff]  ;;  %v18722_v30 = vld [vmem:[#allocation202_spill] sm:$0xff] }
 0x203   : > { %1784 = vmatprep.mubr.f32.mxu1 %v18673_v13  ;;  %8874 = vmatpush1.bf16.msra.mxu1 %v8873_v0  ;;  %v9452_v52 = vpack.c.bf16 %v18685_v53, %v18683_v25  ;;  %v13571_v0 = vld [vmem:[%s16958_s2 + $0x148] sm:$0xff]  ;;  %v8879_v9 = vpack.c.bf16 %v18695_v17, %v18693_v8  ;;  %v18699_v13 = vand.u32 4294901760, %v18698_v38  ;;  %v18709_v25 = vand.u32 4294901760, %v18708_v10  ;;  %v13620_v8 = vld [vmem:[%s16958_s2 + $0x158] sm:$0xff]  ;;  %v18726_v10 = vld [vmem:[#allocation71_spill] sm:$0xff] }
 0x204   : > { %5517 = vmatmul.mubr.f32.gmra.mrb[20].mxu0 %v18679_v42  ;;  %8875 = vmatprep.subr.bf16.mxu1 %v17960_v45  ;;  %v18711_v53 = vand.u32 4294901760, %v18710_v43  ;;  %v18717_v17 = vand.u32 4294901760, %v18716_v22  ;;  %v17544_v54 = vand.u32 4294901760, %v13615_v35  ;;  %v13660_v22 = vld [vmem:[%s16958_s2 + $0x168] sm:$0xff]  ;;  %v18823_v16 = vld [vmem:[#allocation113_spill] sm:$0xff] }
 0x205   : > { %5524 = vmatprep.mubr.f32.mxu0 %v18681_v6  ;;  %9450 = vmatpush1.bf16.msra.mxu0 %v9449_v15  ;;  %v17549_v15 = vand.u32 4294901760, %v13571_v0  ;;  %v18707_v6 = vand.u32 4294901760, %v18706_v32  ;;  %v18724_v32 = vld [vmem:[#allocation206_spill] sm:$0xff]  ;;  %v13887_v36 = vld [vmem:[%s16958_s2 + $0x1d0] sm:$0xff] }
 0x206   : > { %1788 = vmatmul.mubr.f32.gmra.mrb[22].mxu1 %v18689_v29  ;;  %9451 = vmatprep.subr.bf16.mxu0 %v17960_v45  ;;  %18824 = vst [vmem:[#allocation33_spill] sm:$0xff] %v13887_v36 }
 0x207   : > { %1795 = vmatprep.mubr.f32.mxu1 %v18691_v39  ;;  %8877 = vmatpush1.bf16.msra.mxu1 %v8876_v57  ;;  %v9455_v57 = vpack.c.bf16 %v18703_v2, %v18701_v47  ;;  %v13598_v42 = vsub.f32 %v13571_v0, %v17549_v15  ;;  %v18715_v39 = vand.u32 4294901760, %v18714_v31  ;;  %v17543_v47 = vand.u32 4294901760, %v13620_v8  ;;  %v18732_v31 = vld [vmem:[#allocation203_spill] sm:$0xff] }
 0x208   : > { %5528 = vmatmul.mubr.f32.gmra.mrb[22].mxu0 %v18697_v33  ;;  %8878 = vmatprep.subr.bf16.mxu1 %v17960_v45  ;;  %v18720_v33 = vld [vmem:[#allocation70_spill] sm:$0xff]  ;;  %v18723_v2 = vand.u32 4294901760, %v18722_v30 }
 0x209   : > { %5535 = vmatprep.mubr.f32.mxu0 %v18699_v13  ;;  %9453 = vmatpush1.bf16.msra.mxu0 %v9452_v52  ;;  %18705 = vst [vmem:[#allocation86_spill] sm:$0xff] %v13598_v42  ;;  %v18712_v52 = vld [vmem:[#allocation67_spill] sm:$0xff]  ;;  %v18721_v38 = vand.u32 4294901760, %v18720_v33  ;;  %v18820_v42 = vld [vmem:[#allocation16_spill] sm:$0xff] }
 0x20a   : > { %1799 = vmatmul.mubr.f32.gmra.mrb[24].mxu1 %v18707_v6  ;;  %9454 = vmatprep.subr.bf16.mxu0 %v17960_v45  ;;  %v18713_v28 = vand.u32 4294901760, %v18712_v52  ;;  %v18725_v6 = vand.u32 4294901760, %v18724_v32  ;;  %v13642_v52 = vsub.f32 %v13615_v35, %v17544_v54 }
 0x20b   : > { %1806 = vmatprep.mubr.f32.mxu1 %v18709_v25  ;;  %8880 = vmatpush1.bf16.msra.mxu1 %v8879_v9  ;;  %v18718_v9 = vld [vmem:[#allocation69_spill] sm:$0xff] }
 0x20c   : > { %v8882_v29 = vpack.c.bf16 %v18713_v28, %v18711_v53  ;;  %5539 = vmatmul.mubr.f32.gmra.mrb[24].mxu0 %v18715_v39  ;;  %8881 = vmatprep.subr.bf16.mxu1 %v17960_v45  ;;  %v18719_v24 = vand.u32 4294901760, %v18718_v9  ;;  %v18728_v25 = vld [vmem:[#allocation73_spill] sm:$0xff]  ;;  %18730 = vst [vmem:[#allocation88_spill] sm:$0xff] %v13642_v52  ;;  %v13647_v28 = vsub.f32 %v13620_v8, %v17543_v47  ;;  %v18733_v39 = vand.u32 4294901760, %v18732_v31  ;;  %v18744_v31 = vld [vmem:[#allocation76_spill] sm:$0xff]  ;;  %v18819_v52 = vld [vmem:[#allocation115_spill] sm:$0xff] }
 0x20d   : > { %5546 = vmatprep.mubr.f32.mxu0 %v18717_v17  ;;  %9456 = vmatpush1.bf16.msra.mxu0 %v9455_v57  ;;  %v18727_v57 = vand.u32 4294901760, %v18726_v10  ;;  %v18729_v43 = vand.u32 4294901760, %v18728_v25  ;;  %v18734_v17 = vld [vmem:[#allocation208_spill] sm:$0xff]  ;;  %v18740_v10 = vld [vmem:[#allocation210_spill] sm:$0xff]  ;;  %v18760_v47 = vld [vmem:[#allocation221_spill] sm:$0xff] }
 0x20e   : > { %v9458_v13 = vpack.c.bf16 %v18721_v38, %v18719_v24  ;;  %1810 = vmatmul.mubr.f32.gmra.mrb[26].mxu1 %v18723_v2  ;;  %9457 = vmatprep.subr.bf16.mxu0 %v17960_v45  ;;  %18731 = vst [vmem:[#allocation99_spill] sm:$0xff] %v13647_v28  ;;  %v18735_v9 = vand.u32 4294901760, %v18734_v17  ;;  %v18736_v24 = vld [vmem:[#allocation74_spill] sm:$0xff]  ;;  %v18738_v38 = vld [vmem:[#allocation75_spill] sm:$0xff]  ;;  %v18761_v54 = vand.u32 4294901760, %v18760_v47  ;;  %v13736_v47 = vld [vmem:[%s16958_s2 + $0x188] sm:$0xff] }
 0x20f   : > { %1817 = vmatprep.mubr.f32.mxu1 %v18725_v6  ;;  %8883 = vmatpush1.bf16.msra.mxu1 %v8882_v29  ;;  %v8885_v53 = vpack.c.bf16 %v18729_v43, %v18727_v57  ;;  %v13655_v29 = vld [vmem:[%s16958_s2 + $0x160] sm:$0xff]  ;;  %v18737_v33 = vand.u32 4294901760, %v18736_v24  ;;  %v18739_v30 = vand.u32 4294901760, %v18738_v38  ;;  %v17541_v6 = vand.u32 4294901760, %v13660_v22  ;;  %v18742_v25 = vld [vmem:[#allocation214_spill] sm:$0xff]  ;;  %18767 = vst [vmem:[#allocation112_spill] sm:$0xff] %v13736_v47 }
 0x210   : > { %5550 = vmatmul.mubr.f32.gmra.mrb[26].mxu0 %v18733_v39  ;;  %8884 = vmatprep.subr.bf16.mxu1 %v17960_v45  ;;  %v17542_v32 = vand.u32 4294901760, %v13655_v29  ;;  %v18741_v57 = vand.u32 4294901760, %v18740_v10  ;;  %v18743_v43 = vand.u32 4294901760, %v18742_v25  ;;  %v18746_v39 = vld [vmem:[#allocation77_spill] sm:$0xff]  ;;  %v18750_v38 = vld [vmem:[#allocation211_spill] sm:$0xff]  ;;  %v13700_v10 = vld [vmem:[%s16958_s2 + $0x178] sm:$0xff] }
 0x211   : > { %5557 = vmatprep.mubr.f32.mxu0 %v18735_v9  ;;  %9459 = vmatpush1.bf16.msra.mxu0 %v9458_v13  ;;  %v9461_v2 = vpack.c.bf16 %v18739_v30, %v18737_v33  ;;  %v18745_v13 = vand.u32 4294901760, %v18744_v31  ;;  %v18747_v17 = vand.u32 4294901760, %v18746_v39  ;;  %v13687_v33 = vsub.f32 %v13660_v22, %v17541_v6  ;;  %v18758_v6 = vld [vmem:[#allocation219_spill] sm:$0xff] }
 0x212   : > { %1821 = vmatmul.mubr.f32.gmra.mrb[28].mxu1 %v18741_v57  ;;  %9460 = vmatprep.subr.bf16.mxu0 %v17960_v45  ;;  %v13682_v24 = vsub.f32 %v13655_v29, %v17542_v32  ;;  %v18751_v30 = vand.u32 4294901760, %v18750_v38  ;;  %v18752_v57 = vld [vmem:[#allocation217_spill] sm:$0xff]  ;;  %v18759_v32 = vand.u32 4294901760, %v18758_v6  ;;  %v18818_v28 = vld [vmem:[#allocation111_spill] sm:$0xff] }
 0x213   : > { %1828 = vmatprep.mubr.f32.mxu1 %v18743_v43  ;;  %8886 = vmatpush1.bf16.msra.mxu1 %v8885_v53  ;;  %v8888_v9 = vpack.c.bf16 %v18747_v17, %v18745_v13  ;;  %18749 = vst [vmem:[#allocation102_spill] sm:$0xff] %v13687_v33  ;;  %v13695_v53 = vld [vmem:[%s16958_s2 + $0x170] sm:$0xff]  ;;  %v18753_v25 = vand.u32 4294901760, %v18752_v57  ;;  %v18754_v43 = vld [vmem:[#allocation80_spill] sm:$0xff]  ;;  %v18756_v13 = vld [vmem:[#allocation83_spill] sm:$0xff] }
 0x214   : > { %18748 = vst [vmem:[#allocation90_spill] sm:$0xff] %v13682_v24  ;;  %5561 = vmatmul.mubr.f32.gmra.mrb[28].mxu0 %v18751_v30  ;;  %8887 = vmatprep.subr.bf16.mxu1 %v17960_v45  ;;  %v18755_v31 = vand.u32 4294901760, %v18754_v43  ;;  %v18757_v39 = vand.u32 4294901760, %v18756_v13  ;;  %v17546_v38 = vand.u32 4294901760, %v13695_v53  ;;  %v17545_v30 = vand.u32 4294901760, %v13700_v10  ;;  %v18770_v13 = vld [vmem:[#allocation227_spill] sm:$0xff] }
 0x215   : > { %5568 = vmatprep.mubr.f32.mxu0 %v18753_v25  ;;  %9462 = vmatpush1.bf16.msra.mxu0 %v9461_v2  ;;  %v18764_v25 = vld [vmem:[#allocation220_spill] sm:$0xff]  ;;  %v18817_v33 = vld [vmem:[#allocation109_spill] sm:$0xff] }
 0x216   : > { %v9464_v17 = vpack.c.bf16 %v18757_v39, %v18755_v31  ;;  %1832 = vmatmul.mubr.f32.gmra.mrb[30].mxu1 %v18759_v32  ;;  %9463 = vmatprep.subr.bf16.mxu0 %v17960_v45  ;;  %v13718_v2 = vsub.f32 %v13695_v53, %v17546_v38  ;;  %v13723_v57 = vsub.f32 %v13700_v10, %v17545_v30  ;;  %v18765_v43 = vand.u32 4294901760, %v18764_v25  ;;  %v18768_v32 = vld [vmem:[#allocation223_spill] sm:$0xff]  ;;  %v18772_v25 = vld [vmem:[#allocation229_spill] sm:$0xff] }
 0x217   : > { %1839 = vmatprep.mubr.f32.mxu1 %v18761_v54  ;;  %8889 = vmatpush1.bf16.msra.mxu1 %v8888_v9  ;;  %v13731_v54 = vld [vmem:[%s16958_s2 + $0x180] sm:$0xff]  ;;  %v18769_v6 = vand.u32 4294901760, %v18768_v32  ;;  %v17547_v31 = vand.u32 4294901760, %v13736_v47  ;;  %v18771_v39 = vand.u32 4294901760, %v18770_v13  ;;  %v18776_v32 = vld [vmem:[#allocation228_spill] sm:$0xff]  ;;  %v18778_v13 = vand.u32 4294901760, %v18536_v51 }
 0x218   : > { %18762 = vst [vmem:[#allocation103_spill] sm:$0xff] %v13718_v2  ;;  %18763 = vst [vmem:[#allocation110_spill] sm:$0xff] %v13723_v57  ;;  %5572 = vmatmul.mubr.f32.gmra.mrb[30].mxu0 %v18765_v43  ;;  %8890 = vmatprep.subr.bf16.mxu1 %v17960_v45  ;;  %v17548_v9 = vand.u32 4294901760, %v13731_v54  ;;  %v18773_v43 = vand.u32 4294901760, %v18772_v25  ;;  %v13766_v25 = vld [vmem:[%s16958_s2 + $0x190] sm:$0xff]  ;;  %v13862_v2 = vld [vmem:[%s16958_s2 + $0x1c8] sm:$0xff] }
 0x219   : > { %18766 = vst [vmem:[#allocation104_spill] sm:$0xff] %v13731_v54  ;;  %5579 = vmatprep.mubr.f32.mxu0 %v18769_v6  ;;  %9465 = vmatpush1.bf16.msra.mxu0 %v9464_v17  ;;  %v13755_v17 = vsub.f32 %v13736_v47, %v17547_v31  ;;  %v18777_v6 = vand.u32 4294901760, %v18776_v32  ;;  %18781 = vst [vmem:[#allocation116_spill] sm:$0xff] %v13766_v25  ;;  %v18783_v31 = vld [vmem:[#allocation237_spill] sm:$0xff]  ;;  %v17553_v32 = vand.u32 4294901760, %v13766_v25  ;;  %v17579_v24 = vand.u32 4294901760, %v13862_v2 }
 0x21a   : > { %1843 = vmatmul.mubr.f32.gmra.mrb[32].mxu1 %v18771_v39  ;;  %9466 = vmatprep.subr.bf16.mxu0 %v17960_v45  ;;  %v13750_v30 = vsub.f32 %v13731_v54, %v17548_v9  ;;  %v18779_v39 = vld [vmem:[#allocation233_spill] sm:$0xff]  ;;  %v18784_v9 = vand.u32 4294901760, %v18783_v31  ;;  %18815 = vst [vmem:[#allocation144_spill] sm:$0xff] %v13862_v2  ;;  %v18858_v47 = vld [vmem:[#allocation44_spill] sm:$0xff] }
 0x21b   : > { %1850 = vmatprep.mubr.f32.mxu1 %v18773_v43  ;;  %18775 = vst [vmem:[#allocation117_spill] sm:$0xff] %v13755_v17  ;;  %v18780_v38 = vand.u32 4294901760, %v18779_v39  ;;  %v13771_v43 = vld [vmem:[%s16958_s2 + $0x198] sm:$0xff]  ;;  %v13784_v15 = vsub.f32 %v13766_v25, %v17553_v32  ;;  %v18813_v57 = vld [vmem:[#allocation101_spill] sm:$0xff]  ;;  %v18856_v25 = vld [vmem:[#allocation143_spill] sm:$0xff] }
 0x21c   : > { %18774 = vst [vmem:[#allocation114_spill] sm:$0xff] %v13750_v30  ;;  %5583 = vmatmul.mubr.f32.gmra.mrb[32].mxu0 %v18777_v6  ;;  %18782 = vst [vmem:[#allocation119_spill] sm:$0xff] %v13771_v43  ;;  %v17552_v51 = vand.u32 4294901760, %v13771_v43  ;;  %v18785_v6 = vld [vmem:[#allocation235_spill] sm:$0xff]  ;;  %v18859_v54 = vld [vmem:[#allocation145_spill] sm:$0xff] }
 0x21d   : > { %5590 = vmatprep.mubr.f32.mxu0 %v18778_v13  ;;  %v18786_v13 = vand.u32 4294901760, %v18785_v6  ;;  %18789 = vst [vmem:[#allocation122_spill] sm:$0xff] %v13784_v15  ;;  %v18794_v6 = vand.u32 4294901760, %v12870_v3  ;;  %v18799_v3 = vld [vmem:[#allocation12_spill] sm:$0xff] }
 0x21e   : > { %1854 = vmatmul.mubr.f32.gmra.mrb[34].mxu1 %v18780_v38  ;;  %v18787_v38 = vld [vmem:[#allocation240_spill] sm:$0xff]  ;;  %v13789_v31 = vsub.f32 %v13771_v43, %v17552_v51  ;;  %v18798_v51 = vld [vmem:[#allocation85_spill] sm:$0xff]  ;;  %v18855_v43 = vld [vmem:[#allocation38_spill] sm:$0xff] }
 0x21f   : > { %1861 = vmatprep.mubr.f32.mxu1 %v18784_v9  ;;  %v18788_v39 = vand.u32 4294901760, %v18787_v38  ;;  %v18791_v9 = vld [vmem:[#allocation241_spill] sm:$0xff]  ;;  %v13804_v38 = vld [vmem:[%s16958_s2 + $0x1a8] sm:$0xff] }
 0x220   : > { %5594 = vmatmul.mubr.f32.gmra.mrb[34].mxu0 %v18786_v13  ;;  %18790 = vst [vmem:[#allocation126_spill] sm:$0xff] %v13789_v31  ;;  %v18792_v55 = vand.u32 4294901760, %v18791_v9  ;;  %v13799_v13 = vld [vmem:[%s16958_s2 + $0x1a0] sm:$0xff]  ;;  %18796 = vst [vmem:[#allocation128_spill] sm:$0xff] %v13804_v38 }
 0x221   : > { %5601 = vmatprep.mubr.f32.mxu0 %v18788_v39  ;;  %18795 = vst [vmem:[#allocation124_spill] sm:$0xff] %v13799_v13  ;;  %v18797_v39 = vld [vmem:[#allocation81_spill] sm:$0xff]  ;;  %v17557_v9 = vand.u32 4294901760, %v13799_v13 }
 0x222   : > { %1865 = vmatmul.mubr.f32.gmra.mrb[36].mxu1 %v18792_v55  ;;  %v17559_v55 = vand.u32 4294901760, %v13804_v38 }
 0x223   : > { %2031 = vmatprep.mubr.f32.mxu1 %v18793_v20  ;;  %v13815_v32 = vsub.f32 %v13799_v13, %v17557_v9  ;;  %v18806_v9 = vld [vmem:[#allocation13_spill] sm:$0xff]  ;;  %v18851_v13 = vld [vmem:[#allocation138_spill] sm:$0xff] }
 0x224   : > { %5605 = vmatmul.mubr.f32.gmra.mrb[36].mxu0 %v18794_v6  ;;  %v18800_v6 = vld [vmem:[#allocation97_spill] sm:$0xff]  ;;  %v13820_v27 = vsub.f32 %v13804_v38, %v17559_v55  ;;  %v18850_v38 = vld [vmem:[#allocation34_spill] sm:$0xff] }
 0x225   : > { %5771 = vmatprep.mubr.f32.mxu0 %v18797_v39  ;;  %18801 = vst [vmem:[#allocation129_spill] sm:$0xff] %v13815_v32 }
 0x226   : > { %2033 = vmatmul.mubr.f32.vlgmr.msra.gmra.mrb[0].mxu1 %v18798_v51  ;;  %18802 = vst [vmem:[#allocation134_spill] sm:$0xff] %v13820_v27 }
 0x227   : > { %8892 = vmatpush1.bf16.msra.mxu1 %v18799_v3  ;;  %2038 = vmatprep.mubr.f32.mxu1 %v18800_v6  ;;  %v13827_v3 = vld [vmem:[%s16958_s2 + $0x1b0] sm:$0xff] }
 0x228   : > { %5773 = vmatmul.mubr.f32.vlgmr.msra.gmra.mrb[0].mxu0 %v18803_v14  ;;  %8893 = vmatprep.subr.bf16.mxu1 %v17960_v45  ;;  %18804 = vst [vmem:[#allocation131_spill] sm:$0xff] %v13827_v3  ;;  %v17567_v55 = vand.u32 4294901760, %v13827_v3 }
 0x229   : > { %9468 = vmatpush1.bf16.msra.mxu0 %v18806_v9  ;;  %5778 = vmatprep.mubr.f32.mxu0 %v18807_v4  ;;  %v13850_v9 = vsub.f32 %v13832_v7, %v17569_v46  ;;  %v18843_v7 = vld [vmem:[#allocation130_spill] sm:$0xff] }
 0x22a   : > { %2040 = vmatmul.mubr.f32.gmra.mrb[2].mxu1 %v18808_v40  ;;  %9469 = vmatprep.subr.bf16.mxu0 %v17960_v45  ;;  %v13845_v59 = vsub.f32 %v13827_v3, %v17567_v55  ;;  %v18816_v55 = vld [vmem:[#allocation15_spill] sm:$0xff]  ;;  %v13947_v3 = vld [vmem:[%s16958_s2 + $0x1f0] sm:$0xff] }
 0x22b   : > { %8895 = vmatpush1.bf16.msra.mxu1 %v18809_v18  ;;  %2045 = vmatprep.mubr.f32.mxu1 %v18810_v37  ;;  %18812 = vst [vmem:[#allocation142_spill] sm:$0xff] %v13850_v9  ;;  %v13857_v18 = vld [vmem:[%s16958_s2 + $0x1c0] sm:$0xff]  ;;  %18844 = vst [vmem:[#allocation39_spill] sm:$0xff] %v13947_v3 }
 0x22c   : > { %18811 = vst [vmem:[#allocation137_spill] sm:$0xff] %v13845_v59  ;;  %5780 = vmatmul.mubr.f32.gmra.mrb[2].mxu0 %v18813_v57  ;;  %8896 = vmatprep.subr.bf16.mxu1 %v17960_v45  ;;  %18814 = vst [vmem:[#allocation139_spill] sm:$0xff] %v13857_v18  ;;  %v17577_v46 = vand.u32 4294901760, %v13857_v18  ;;  %v18868_v9 = vld [vmem:[#allocation159_spill] sm:$0xff] }
 0x22d   : > { %9471 = vmatpush1.bf16.msra.mxu0 %v18816_v55  ;;  %5785 = vmatprep.mubr.f32.mxu0 %v18817_v33  ;;  %v13880_v55 = vsub.f32 %v13862_v2, %v17579_v24  ;;  %v17587_v24 = vand.u32 4294901760, %v13887_v36  ;;  %v18840_v2 = vld [vmem:[#allocation24_spill] sm:$0xff]  ;;  %v18870_v59 = vld [vmem:[#allocation59_spill] sm:$0xff] }
 0x22e   : > { %2047 = vmatmul.mubr.f32.gmra.mrb[4].mxu1 %v18818_v28  ;;  %9472 = vmatprep.subr.bf16.mxu0 %v17960_v45  ;;  %v13875_v34 = vsub.f32 %v13857_v18, %v17577_v46  ;;  %v18826_v46 = vld [vmem:[#allocation118_spill] sm:$0xff] }
 0x22f   : > { %2052 = vmatprep.mubr.f32.mxu1 %v18819_v52  ;;  %8898 = vmatpush1.bf16.msra.mxu1 %v18820_v42  ;;  %18822 = vst [vmem:[#allocation32_spill] sm:$0xff] %v13880_v55  ;;  %v13892_v42 = vld [vmem:[%s16958_s2 + $0x1d8] sm:$0xff]  ;;  %v13905_v63 = vsub.f32 %v13887_v36, %v17587_v24  ;;  %v18836_v24 = vld [vmem:[#allocation125_spill] sm:$0xff]  ;;  %v18839_v36 = vld [vmem:[#allocation132_spill] sm:$0xff] }
 0x230   : > { %18821 = vst [vmem:[#allocation232_spill] sm:$0xff] %v13875_v34  ;;  %5787 = vmatmul.mubr.f32.gmra.mrb[4].mxu0 %v18823_v16  ;;  %8899 = vmatprep.subr.bf16.mxu1 %v17960_v45  ;;  %18825 = vst [vmem:[#allocation146_spill] sm:$0xff] %v13892_v42  ;;  %v17589_v58 = vand.u32 4294901760, %v13892_v42  ;;  %v18854_v34 = vld [vmem:[#allocation141_spill] sm:$0xff] }
 0x231   : > { %5792 = vmatprep.mubr.f32.mxu0 %v18826_v46  ;;  %9474 = vmatpush1.bf16.msra.mxu0 %v18827_v60  ;;  %18831 = vst [vmem:[#allocation150_spill] sm:$0xff] %v13905_v63  ;;  %v18837_v63 = vld [vmem:[#allocation23_spill] sm:$0xff] }
 0x232   : > { %2054 = vmatmul.mubr.f32.gmra.mrb[6].mxu1 %v18828_v21  ;;  %9475 = vmatprep.subr.bf16.mxu0 %v17960_v45  ;;  %v13910_v60 = vsub.f32 %v13892_v42, %v17589_v58  ;;  %v17597_v58 = vand.u32 4294901760, %v13917_v44  ;;  %v18838_v42 = vld [vmem:[#allocation127_spill] sm:$0xff] }
 0x233   : > { %2059 = vmatprep.mubr.f32.mxu1 %v18829_v5  ;;  %8901 = vmatpush1.bf16.msra.mxu1 %v18830_v62  ;;  %v13922_v62 = vld [vmem:[%s16958_s2 + $0x1e8] sm:$0xff] }
 0x234   : > { %18832 = vst [vmem:[#allocation35_spill] sm:$0xff] %v13910_v60  ;;  %5794 = vmatmul.mubr.f32.gmra.mrb[6].mxu0 %v18833_v50  ;;  %8902 = vmatprep.subr.bf16.mxu1 %v17960_v45  ;;  %18835 = vst [vmem:[#allocation147_spill] sm:$0xff] %v13922_v62  ;;  %v17599_v60 = vand.u32 4294901760, %v13922_v62  ;;  %v13935_v18 = vsub.f32 %v13917_v44, %v17597_v58  ;;  %v18846_v58 = vld [vmem:[#allocation133_spill] sm:$0xff]  ;;  %v18849_v44 = vld [vmem:[#allocation140_spill] sm:$0xff] }
 0x235   : > { %5799 = vmatprep.mubr.f32.mxu0 %v18836_v24  ;;  %9477 = vmatpush1.bf16.msra.mxu0 %v18837_v63 }
 0x236   : > { %2061 = vmatmul.mubr.f32.gmra.mrb[8].mxu1 %v18838_v42  ;;  %9478 = vmatprep.subr.bf16.mxu0 %v17960_v45  ;;  %18841 = vst [vmem:[#allocation152_spill] sm:$0xff] %v13935_v18  ;;  %v13940_v63 = vsub.f32 %v13922_v62, %v17599_v60  ;;  %v18847_v18 = vld [vmem:[#allocation30_spill] sm:$0xff]  ;;  %v18848_v60 = vld [vmem:[#allocation135_spill] sm:$0xff] }
 0x237   : > { %2066 = vmatprep.mubr.f32.mxu1 %v18839_v36  ;;  %8904 = vmatpush1.bf16.msra.mxu1 %v18840_v2  ;;  %v13952_v2 = vld [vmem:[%s16958_s2 + $0x1f8] sm:$0xff] }
 0x238   : > { %18842 = vst [vmem:[#allocation37_spill] sm:$0xff] %v13940_v63  ;;  %5801 = vmatmul.mubr.f32.gmra.mrb[8].mxu0 %v18843_v7  ;;  %8905 = vmatprep.subr.bf16.mxu1 %v17960_v45  ;;  %18845 = vst [vmem:[#allocation154_spill] sm:$0xff] %v13952_v2  ;;  %v17611_v63 = vand.u32 4294901760, %v13947_v3  ;;  %v17612_v62 = vand.u32 4294901760, %v13952_v2 }
 0x239   : > { %5806 = vmatprep.mubr.f32.mxu0 %v18846_v58  ;;  %9480 = vmatpush1.bf16.msra.mxu0 %v18847_v18 }
 0x23a   : > { %2068 = vmatmul.mubr.f32.gmra.mrb[10].mxu1 %v18848_v60  ;;  %9481 = vmatprep.subr.bf16.mxu0 %v17960_v45  ;;  %v13967_v18 = vsub.f32 %v13947_v3, %v17611_v63  ;;  %v13972_v55 = vsub.f32 %v13952_v2, %v17612_v62  ;;  %v18860_v63 = vld [vmem:[#allocation149_spill] sm:$0xff]  ;;  %v18861_v62 = vld [vmem:[#allocation47_spill] sm:$0xff]  ;;  %v18867_v3 = vld [vmem:[#allocation56_spill] sm:$0xff] }
 0x23b   : > { %2073 = vmatprep.mubr.f32.mxu1 %v18849_v44  ;;  %8907 = vmatpush1.bf16.msra.mxu1 %v18850_v38  ;;  %v18857_v38 = vld [vmem:[#allocation148_spill] sm:$0xff]  ;;  %v18865_v2 = vld [vmem:[#allocation153_spill] sm:$0xff] }
 0x23c   : > { %5808 = vmatmul.mubr.f32.gmra.mrb[10].mxu0 %v18851_v13  ;;  %8908 = vmatprep.subr.bf16.mxu1 %v17960_v45  ;;  %18852 = vst [vmem:[#allocation158_spill] sm:$0xff] %v13967_v18  ;;  %18853 = vst [vmem:[#allocation40_spill] sm:$0xff] %v13972_v55  ;;  %v18862_v55 = vld [vmem:[#allocation151_spill] sm:$0xff]  ;;  %v18864_v18 = vld [vmem:[#allocation52_spill] sm:$0xff] }
 0x23d   : > { %5813 = vmatprep.mubr.f32.mxu0 %v18854_v34  ;;  %9483 = vmatpush1.bf16.msra.mxu0 %v18855_v43  ;;  %v18863_v43 = vld [vmem:[#allocation156_spill] sm:$0xff] }
 0x23e   : > { %2075 = vmatmul.mubr.f32.gmra.mrb[12].mxu1 %v18856_v25  ;;  %9484 = vmatprep.subr.bf16.mxu0 %v17960_v45 }
 0x23f   : > { %2080 = vmatprep.mubr.f32.mxu1 %v18857_v38  ;;  %8910 = vmatpush1.bf16.msra.mxu1 %v18858_v47  ;;  %v18866_v47 = vld [vmem:[#allocation157_spill] sm:$0xff] }
 0x240   : > { %5815 = vmatmul.mubr.f32.gmra.mrb[12].mxu0 %v18859_v54  ;;  %8911 = vmatprep.subr.bf16.mxu1 %v17960_v45 }
 0x241   : > { %5820 = vmatprep.mubr.f32.mxu0 %v18860_v63  ;;  %9486 = vmatpush1.bf16.msra.mxu0 %v18861_v62  ;;  %v18869_v62 = vld [vmem:[#allocation162_spill] sm:$0xff] }
 0x242   : > { %2082 = vmatmul.mubr.f32.gmra.mrb[14].mxu1 %v18862_v55  ;;  %9487 = vmatprep.subr.bf16.mxu0 %v17960_v45  ;;  %v18871_v55 = vld [vmem:[#allocation160_spill] sm:$0xff]  ;;  %v18923_v63 = vld [vmem:[#allocation238_spill] sm:$0xff] }
 0x243   : > { %2087 = vmatprep.mubr.f32.mxu1 %v18863_v43  ;;  %8913 = vmatpush1.bf16.msra.mxu1 %v18864_v18  ;;  %v18872_v18 = vld [vmem:[#allocation166_spill] sm:$0xff]  ;;  %v18874_v43 = vld [vmem:[#allocation168_spill] sm:$0xff] }
 0x244   : > { %5822 = vmatmul.mubr.f32.gmra.mrb[14].mxu0 %v18865_v2  ;;  %8914 = vmatprep.subr.bf16.mxu1 %v17960_v45  ;;  %v18873_v2 = vld [vmem:[#allocation63_spill] sm:$0xff] }
 0x245   : > { %5827 = vmatprep.mubr.f32.mxu0 %v18866_v47  ;;  %9489 = vmatpush1.bf16.msra.mxu0 %v18867_v3  ;;  %v18875_v3 = vld [vmem:[#allocation170_spill] sm:$0xff]  ;;  %v18877_v47 = vld [vmem:[#allocation169_spill] sm:$0xff] }
 0x246   : > { %2089 = vmatmul.mubr.f32.gmra.mrb[16].mxu1 %v18868_v9  ;;  %9490 = vmatprep.subr.bf16.mxu0 %v17960_v45  ;;  %v18876_v9 = vld [vmem:[#allocation68_spill] sm:$0xff] }
 0x247   : > { %2094 = vmatprep.mubr.f32.mxu1 %v18869_v62  ;;  %8916 = vmatpush1.bf16.msra.mxu1 %v18870_v59  ;;  %v18878_v59 = vld [vmem:[#allocation174_spill] sm:$0xff]  ;;  %v18880_v62 = vld [vmem:[#allocation176_spill] sm:$0xff] }
 0x248   : > { %5829 = vmatmul.mubr.f32.gmra.mrb[16].mxu0 %v18871_v55  ;;  %8917 = vmatprep.subr.bf16.mxu1 %v17960_v45  ;;  %v18879_v55 = vld [vmem:[#allocation72_spill] sm:$0xff] }
 0x249   : > { %5834 = vmatprep.mubr.f32.mxu0 %v18872_v18  ;;  %9492 = vmatpush1.bf16.msra.mxu0 %v18873_v2  ;;  %v18881_v2 = vld [vmem:[#allocation179_spill] sm:$0xff]  ;;  %v18883_v18 = vld [vmem:[#allocation177_spill] sm:$0xff] }
 0x24a   : > { %2096 = vmatmul.mubr.f32.gmra.mrb[18].mxu1 %v18874_v43  ;;  %9493 = vmatprep.subr.bf16.mxu0 %v17960_v45  ;;  %v18882_v43 = vld [vmem:[#allocation79_spill] sm:$0xff] }
 0x24b   : > { %2101 = vmatprep.mubr.f32.mxu1 %v18875_v3  ;;  %8919 = vmatpush1.bf16.msra.mxu1 %v18876_v9  ;;  %v18884_v9 = vld [vmem:[#allocation181_spill] sm:$0xff]  ;;  %v18886_v3 = vld [vmem:[#allocation184_spill] sm:$0xff] }
 0x24c   : > { %5836 = vmatmul.mubr.f32.gmra.mrb[18].mxu0 %v18877_v47  ;;  %8920 = vmatprep.subr.bf16.mxu1 %v17960_v45  ;;  %v18885_v47 = vld [vmem:[#allocation82_spill] sm:$0xff] }
 0x24d   : > { %5841 = vmatprep.mubr.f32.mxu0 %v18878_v59  ;;  %9495 = vmatpush1.bf16.msra.mxu0 %v18879_v55  ;;  %v18887_v55 = vld [vmem:[#allocation188_spill] sm:$0xff]  ;;  %v18889_v59 = vld [vmem:[#allocation186_spill] sm:$0xff] }
 0x24e   : > { %2103 = vmatmul.mubr.f32.gmra.mrb[20].mxu1 %v18880_v62  ;;  %9496 = vmatprep.subr.bf16.mxu0 %v17960_v45  ;;  %v18888_v62 = vld [vmem:[#allocation89_spill] sm:$0xff] }
 0x24f   : > { %2108 = vmatprep.mubr.f32.mxu1 %v18881_v2  ;;  %8922 = vmatpush1.bf16.msra.mxu1 %v18882_v43  ;;  %v18890_v43 = vld [vmem:[#allocation189_spill] sm:$0xff]  ;;  %v18892_v2 = vld [vmem:[#allocation191_spill] sm:$0xff] }
 0x250   : > { %5843 = vmatmul.mubr.f32.gmra.mrb[20].mxu0 %v18883_v18  ;;  %8923 = vmatprep.subr.bf16.mxu1 %v17960_v45  ;;  %v18891_v18 = vld [vmem:[#allocation91_spill] sm:$0xff] }
 0x251   : > { %5848 = vmatprep.mubr.f32.mxu0 %v18884_v9  ;;  %9498 = vmatpush1.bf16.msra.mxu0 %v18885_v47  ;;  %v18893_v47 = vld [vmem:[#allocation196_spill] sm:$0xff]  ;;  %v18895_v9 = vld [vmem:[#allocation194_spill] sm:$0xff] }
 0x252   : > { %2110 = vmatmul.mubr.f32.gmra.mrb[22].mxu1 %v18886_v3  ;;  %9499 = vmatprep.subr.bf16.mxu0 %v17960_v45  ;;  %v18894_v3 = vld [vmem:[#allocation92_spill] sm:$0xff] }
 0x253   : > { %2115 = vmatprep.mubr.f32.mxu1 %v18887_v55  ;;  %8925 = vmatpush1.bf16.msra.mxu1 %v18888_v62  ;;  %v18896_v62 = vld [vmem:[#allocation197_spill] sm:$0xff]  ;;  %v18898_v55 = vld [vmem:[#allocation200_spill] sm:$0xff] }
 0x254   : > { %5850 = vmatmul.mubr.f32.gmra.mrb[22].mxu0 %v18889_v59  ;;  %8926 = vmatprep.subr.bf16.mxu1 %v17960_v45  ;;  %v18897_v59 = vld [vmem:[#allocation93_spill] sm:$0xff] }
 0x255   : > { %5855 = vmatprep.mubr.f32.mxu0 %v18890_v43  ;;  %9501 = vmatpush1.bf16.msra.mxu0 %v18891_v18  ;;  %v18899_v18 = vld [vmem:[#allocation204_spill] sm:$0xff]  ;;  %v18901_v43 = vld [vmem:[#allocation201_spill] sm:$0xff] }
 0x256   : > { %2117 = vmatmul.mubr.f32.gmra.mrb[24].mxu1 %v18892_v2  ;;  %9502 = vmatprep.subr.bf16.mxu0 %v17960_v45  ;;  %v18900_v2 = vld [vmem:[#allocation94_spill] sm:$0xff] }
 0x257   : > { %2122 = vmatprep.mubr.f32.mxu1 %v18893_v47  ;;  %8928 = vmatpush1.bf16.msra.mxu1 %v18894_v3  ;;  %v18902_v3 = vld [vmem:[#allocation205_spill] sm:$0xff]  ;;  %v18904_v47 = vld [vmem:[#allocation207_spill] sm:$0xff] }
 0x258   : > { %5857 = vmatmul.mubr.f32.gmra.mrb[24].mxu0 %v18895_v9  ;;  %8929 = vmatprep.subr.bf16.mxu1 %v17960_v45  ;;  %v18903_v9 = vld [vmem:[#allocation95_spill] sm:$0xff] }
 0x259   : > { %5862 = vmatprep.mubr.f32.mxu0 %v18896_v62  ;;  %9504 = vmatpush1.bf16.msra.mxu0 %v18897_v59  ;;  %v18905_v59 = vld [vmem:[#allocation212_spill] sm:$0xff]  ;;  %v18907_v62 = vld [vmem:[#allocation209_spill] sm:$0xff] }
 0x25a   : > { %2124 = vmatmul.mubr.f32.gmra.mrb[26].mxu1 %v18898_v55  ;;  %9505 = vmatprep.subr.bf16.mxu0 %v17960_v45  ;;  %v18906_v55 = vld [vmem:[#allocation96_spill] sm:$0xff] }
 0x25b   : > { %2129 = vmatprep.mubr.f32.mxu1 %v18899_v18  ;;  %8931 = vmatpush1.bf16.msra.mxu1 %v18900_v2  ;;  %v18908_v2 = vld [vmem:[#allocation213_spill] sm:$0xff]  ;;  %v18910_v18 = vld [vmem:[#allocation215_spill] sm:$0xff] }
 0x25c   : > { %5864 = vmatmul.mubr.f32.gmra.mrb[26].mxu0 %v18901_v43  ;;  %8932 = vmatprep.subr.bf16.mxu1 %v17960_v45  ;;  %v18909_v43 = vld [vmem:[#allocation105_spill] sm:$0xff] }
 0x25d   : > { %5869 = vmatprep.mubr.f32.mxu0 %v18902_v3  ;;  %9507 = vmatpush1.bf16.msra.mxu0 %v18903_v9  ;;  %v18911_v9 = vld [vmem:[#allocation218_spill] sm:$0xff]  ;;  %v18913_v3 = vld [vmem:[#allocation216_spill] sm:$0xff] }
 0x25e   : > { %2131 = vmatmul.mubr.f32.gmra.mrb[28].mxu1 %v18904_v47  ;;  %9508 = vmatprep.subr.bf16.mxu0 %v17960_v45  ;;  %v18912_v47 = vld [vmem:[#allocation106_spill] sm:$0xff] }
 0x25f   : > { %2136 = vmatprep.mubr.f32.mxu1 %v18905_v59  ;;  %8934 = vmatpush1.bf16.msra.mxu1 %v18906_v55  ;;  %v18914_v55 = vld [vmem:[#allocation222_spill] sm:$0xff]  ;;  %v18916_v59 = vld [vmem:[#allocation224_spill] sm:$0xff] }
 0x260   : > { %5871 = vmatmul.mubr.f32.gmra.mrb[28].mxu0 %v18907_v62  ;;  %8935 = vmatprep.subr.bf16.mxu1 %v17960_v45  ;;  %v18915_v62 = vld [vmem:[#allocation107_spill] sm:$0xff] }
 0x261   : > { %5876 = vmatprep.mubr.f32.mxu0 %v18908_v2  ;;  %9510 = vmatpush1.bf16.msra.mxu0 %v18909_v43  ;;  %v18917_v43 = vld [vmem:[#allocation226_spill] sm:$0xff] }
 0x262   : > { %2138 = vmatmul.mubr.f32.gmra.mrb[30].mxu1 %v18910_v18  ;;  %9511 = vmatprep.subr.bf16.mxu0 %v17960_v45  ;;  %v18918_v18 = vld [vmem:[#allocation225_spill] sm:$0xff]  ;;  %v18919_v2 = vld [vmem:[#allocation230_spill] sm:$0xff] }
 0x263   : > { %2143 = vmatprep.mubr.f32.mxu1 %v18911_v9  ;;  %8937 = vmatpush1.bf16.msra.mxu1 %v18912_v47  ;;  %v18920_v9 = vld [vmem:[#allocation231_spill] sm:$0xff]  ;;  %v18921_v47 = vld [vmem:[#allocation236_spill] sm:$0xff] }
 0x264   : > { %5878 = vmatmul.mubr.f32.gmra.mrb[30].mxu0 %v18913_v3  ;;  %8938 = vmatprep.subr.bf16.mxu1 %v17960_v45  ;;  %v18922_v3 = vld [vmem:[#allocation234_spill] sm:$0xff] }
 0x265   : > { %5883 = vmatprep.mubr.f32.mxu0 %v18914_v55  ;;  %9513 = vmatpush1.bf16.msra.mxu0 %v18915_v62  ;;  %v18924_v55 = vld [vmem:[#allocation239_spill] sm:$0xff]  ;;  %v18925_v62 = vand.u32 4294901760, %v13375_v11  ;;  %v18932_v11 = vand.u32 4294901760, %v13437_v12 }
 0x266   : > { %2145 = vmatmul.mubr.f32.gmra.mrb[32].mxu1 %v18916_v59  ;;  %9514 = vmatprep.subr.bf16.mxu0 %v17960_v45 }
 0x267   : > { %2150 = vmatprep.mubr.f32.mxu1 %v18917_v43  ;;  %v18926_v43 = vand.u32 4294901760, %v13380_v26  ;;  %v18933_v26 = vand.u32 4294901760, %v13442_v56  ;;  %v17628_v56 = vand.u32 4294901760, %v13750_v30 }
 0x268   : > { %5885 = vmatmul.mubr.f32.gmra.mrb[32].mxu0 %v18918_v18  ;;  %v18928_v18 = vld [vmem:[#allocation242_spill] sm:$0xff] }
 0x269   : > { %5890 = vmatprep.mubr.f32.mxu0 %v18919_v2  ;;  %v14071_v59 = vpack.c.bf16 %v18926_v43, %v18925_v62  ;;  %v18953_v43 = vld [vmem:[#allocation149_spill] sm:$0xff] }
 0x26a   : > { %2152 = vmatmul.mubr.f32.gmra.mrb[34].mxu1 %v18920_v9  ;;  %v18956_v62 = vld [vmem:[#allocation137_spill] sm:$0xff] }
 0x26b   : > { %2157 = vmatprep.mubr.f32.mxu1 %v18921_v47  ;;  %18927 = vst [vmem:[#allocation41_spill] sm:$0xff] %v14071_v59  ;;  %v18929_v47 = vand.u32 4294901760, %v13385_v48  ;;  %v18935_v48 = vand.u32 4294901760, %v13477_v49  ;;  %v18938_v49 = vand.u32 4294901760, %v13526_v19  ;;  %v18941_v19 = vand.u32 4294901760, %v13566_v1 }
 0x26c   : > { %5892 = vmatmul.mubr.f32.gmra.mrb[34].mxu0 %v18922_v3  ;;  %v18930_v3 = vand.u32 4294901760, %v13398_v23  ;;  %v18936_v23 = vand.u32 4294901760, %v13482_v41  ;;  %v18939_v41 = vand.u32 4294901760, %v13531_v61  ;;  %v18942_v61 = vand.u32 4294901760, %v13571_v0 }
 0x26d   : > { %5897 = vmatprep.mubr.f32.mxu0 %v18923_v63 }
 0x26e   : > { %2159 = vmatmul.mubr.f32.gmra.mrb[36].mxu1 %v18924_v55  ;;  %v14079_v9 = vpack.c.bf16 %v18930_v3, %v18929_v47  ;;  %v14102_v12 = vpack.c.bf16 %v18936_v23, %v18935_v48  ;;  %v18954_v47 = vld [vmem:[#allocation151_spill] sm:$0xff]  ;;  %v18958_v23 = vld [vmem:[#allocation156_spill] sm:$0xff] }
 0x26f   : > { %2261 = vmatprep.mubr.f32.mxu1 %v18793_v20  ;;  %v14088_v20 = vpack.c.bf16 %v18933_v26, %v18932_v11  ;;  %v17622_v11 = vand.u32 4294901760, %v18956_v62  ;;  %v18957_v26 = vld [vmem:[#allocation142_spill] sm:$0xff] }
 0x270   : > { %5899 = vmatmul.mubr.f32.gmra.mrb[36].mxu0 %v18928_v18  ;;  %18931 = vst [vmem:[#allocation155_spill] sm:$0xff] %v14079_v9  ;;  %18937 = vst [vmem:[#allocation42_spill] sm:$0xff] %v14102_v12  ;;  %v17621_v48 = vand.u32 4294901760, %v18957_v26 }
 0x271   : > { %6001 = vmatprep.mubr.f32.mxu0 %v18797_v39  ;;  %18934 = vst [vmem:[#allocation161_spill] sm:$0xff] %v14088_v20 }
 0x272   : > { %2263 = vmatmul.mubr.f32.vlgmr.msra.gmra.mrb[0].mxu1 %v18798_v51  ;;  %v17625_v51 = vand.u32 4294901760, %v13789_v31 }
 0x273   : > { %8940 = vmatpush1.bf16.msra.mxu1 %v14071_v59  ;;  %2268 = vmatprep.mubr.f32.mxu1 %v18800_v6  ;;  %v19047_v59 = vld [vmem:[#allocation196_spill] sm:$0xff] }
 0x274   : > { %6003 = vmatmul.mubr.f32.vlgmr.msra.gmra.mrb[0].mxu0 %v18803_v14  ;;  %8941 = vmatprep.subr.bf16.mxu1 %v17960_v45  ;;  %v14122_v14 = vpack.c.bf16 %v18939_v41, %v18938_v49 }
 0x275   : > { %9516 = vmatpush3.bf16.msra.mxu0 %v14079_v9  ;;  %6008 = vmatprep.mubr.f32.mxu0 %v18807_v4 }
 0x276   : > { %2270 = vmatmul.mubr.f32.gmra.mrb[2].mxu1 %v18808_v40  ;;  %9517 = vmatprep.subr.bf16.mxu0 %v17960_v45  ;;  %v17627_v40 = vand.u32 4294901760, %v13755_v17  ;;  %18940 = vst [vmem:[#allocation43_spill] sm:$0xff] %v14122_v14 }
 0x277   : > { %8943 = vmatpush1.bf16.msra.mxu1 %v14088_v20  ;;  %2275 = vmatprep.mubr.f32.mxu1 %v18810_v37  ;;  %v2892_v37 = vsub.f32 %v13750_v30, %v17628_v56 }
 0x278   : > { %6010 = vmatmul.mubr.f32.gmra.mrb[2].mxu0 %v18813_v57  ;;  %8944 = vmatprep.subr.bf16.mxu1 %v17960_v45  ;;  %v2899_v4 = vsub.f32 %v13755_v17, %v17627_v40 }
 0x279   : > { %6015 = vmatprep.mubr.f32.mxu0 %v18817_v33  ;;  %v2893_v33 = vand.u32 4294901760, %v2892_v37 }
 0x27a   : > { %2277 = vmatmul.mubr.f32.gmra.mrb[4].mxu1 %v18818_v28  ;;  %v2900_v28 = vand.u32 4294901760, %v2899_v4  ;;  %v18961_v4 = vld [vmem:[#allocation112_spill] sm:$0xff] }
 0x27b   : > { %2282 = vmatprep.mubr.f32.mxu1 %v18819_v52  ;;  %8946 = vmatpush1.bf16.msra.mxu1 %v14102_v12  ;;  %v14136_v52 = vpack.c.bf16 %v18942_v61, %v18941_v19  ;;  %v18962_v49 = vand.u32 4294901760, %v18961_v4  ;;  %v2934_v19 = vsub.f32 %v18956_v62, %v17622_v11  ;;  %v2941_v61 = vsub.f32 %v18957_v26, %v17621_v48  ;;  %v18980_v4 = vld [vmem:[#allocation166_spill] sm:$0xff]  ;;  %v18995_v48 = vld [vmem:[#allocation136_spill] sm:$0xff] }
 0x27c   : > { %6017 = vmatmul.mubr.f32.gmra.mrb[4].mxu0 %v18823_v16  ;;  %8947 = vmatprep.subr.bf16.mxu1 %v17960_v45  ;;  %v14128_v57 = vpack.c.bf16 %v2900_v28, %v2893_v33  ;;  %v17626_v16 = vand.u32 4294901760, %v13784_v15  ;;  %v18965_v28 = vld [vmem:[#allocation153_spill] sm:$0xff] }
 0x27d   : > { %6022 = vmatprep.mubr.f32.mxu0 %v18826_v46  ;;  %18943 = vst [vmem:[#allocation163_spill] sm:$0xff] %v14136_v52 }
 0x27e   : > { %2284 = vmatmul.mubr.f32.gmra.mrb[6].mxu1 %v18828_v21  ;;  %v2906_v46 = vsub.f32 %v13784_v15, %v17626_v16  ;;  %v18945_v21 = vand.u32 4294901760, %v13620_v8  ;;  %v19020_v16 = vld [vmem:[#allocation154_spill] sm:$0xff] }
 0x27f   : > { %2289 = vmatprep.mubr.f32.mxu1 %v18829_v5  ;;  %8949 = vmatpush1.bf16.msra.mxu1 %v14122_v14  ;;  %v2913_v5 = vsub.f32 %v13789_v31, %v17625_v51  ;;  %v19007_v51 = vld [vmem:[#allocation146_spill] sm:$0xff]  ;;  %v19021_v40 = vand.u32 4294901760, %v19020_v16  ;;  %v19040_v14 = vld [vmem:[#allocation189_spill] sm:$0xff] }
 0x280   : > { %6024 = vmatmul.mubr.f32.gmra.mrb[6].mxu0 %v18833_v50  ;;  %8950 = vmatprep.subr.bf16.mxu1 %v17960_v45  ;;  %v18944_v50 = vand.u32 4294901760, %v13615_v35  ;;  %v2907_v0 = vand.u32 4294901760, %v2906_v46  ;;  %v18948_v35 = vand.u32 4294901760, %v13660_v22  ;;  %v18950_v22 = vand.u32 4294901760, %v13695_v53  ;;  %v18966_v46 = vld [vmem:[#allocation157_spill] sm:$0xff] }
 0x281   : > { %6029 = vmatprep.mubr.f32.mxu0 %v18836_v24  ;;  %v2914_v24 = vand.u32 4294901760, %v2913_v5 }
 0x282   : > { %2291 = vmatmul.mubr.f32.gmra.mrb[8].mxu1 %v18838_v42  ;;  %v14156_v1 = vpack.c.bf16 %v18945_v21, %v18944_v50  ;;  %v239_v42 = vld [vmem:[%s10942_s23 + $0x30] sm:$0xff]  ;;  %v18968_v50 = vld [vmem:[#allocation159_spill] sm:$0xff] }
 0x283   : > { %2296 = vmatprep.mubr.f32.mxu1 %v18839_v36  ;;  %8952 = vmatpush1.bf16.msra.mxu1 %v14136_v52  ;;  %v14161_v39 = vpack.c.bf16 %v2914_v24, %v2907_v0  ;;  %v18947_v36 = vand.u32 4294901760, %v13655_v29  ;;  %v243_v0 = vld [vmem:[%s10942_s23 + $0x50] sm:$0xff]  ;;  %v2935_v24 = vand.u32 4294901760, %v2934_v19  ;;  %v18983_v19 = vld [vmem:[#allocation168_spill] sm:$0xff] }
 0x284   : > { %18946 = vst [vmem:[#allocation165_spill] sm:$0xff] %v14156_v1  ;;  %6031 = vmatmul.mubr.f32.gmra.mrb[8].mxu0 %v18843_v7  ;;  %8953 = vmatprep.subr.bf16.mxu1 %v17960_v45  ;;  %v17624_v7 = vand.u32 4294901760, %v13815_v32  ;;  %v19038_v52 = vld [vmem:[#allocation186_spill] sm:$0xff] }
 0x285   : > { %6036 = vmatprep.mubr.f32.mxu0 %v18846_v58  ;;  %v14170_v8 = vpack.c.bf16 %v18948_v35, %v18947_v36  ;;  %v17623_v58 = vand.u32 4294901760, %v13820_v27  ;;  %v2942_v36 = vand.u32 4294901760, %v2941_v61  ;;  %v18970_v35 = vld [vmem:[#allocation162_spill] sm:$0xff] }
 0x286   : > { %2298 = vmatmul.mubr.f32.gmra.mrb[10].mxu1 %v18848_v60 }
 0x287   : > { %2303 = vmatprep.mubr.f32.mxu1 %v18849_v44  ;;  %8955 = vmatpush1.bf16.msra.mxu1 %v14156_v1  ;;  %18949 = vst [vmem:[#allocation45_spill] sm:$0xff] %v14170_v8  ;;  %v2920_v44 = vsub.f32 %v13815_v32, %v17624_v7  ;;  %v2927_v29 = vsub.f32 %v13820_v27, %v17623_v58  ;;  %v19000_v58 = vld [vmem:[#allocation144_spill] sm:$0xff] }
 0x288   : > { %6038 = vmatmul.mubr.f32.gmra.mrb[10].mxu0 %v18851_v13  ;;  %8956 = vmatprep.subr.bf16.mxu1 %v17960_v45  ;;  %v18951_v13 = vand.u32 4294901760, %v13700_v10  ;;  %v468_v10 = vsel %vm466_vm0, %v239_v42, 0  ;;  %v253_v1 = vld [vmem:[%s10942_s23 + $0xa0] sm:$0xff] }
 0x289   : > { %6043 = vmatprep.mubr.f32.mxu0 %v18854_v34  ;;  %v236_v34 = vld [vmem:[%s10942_s23 + $0x18] sm:$0xff]  ;;  %v2921_v60 = vand.u32 4294901760, %v2920_v44  ;;  %v2928_v3 = vand.u32 4294901760, %v2927_v29  ;;  %v14225_v5 = vand.u32 4294901760, %v468_v10  ;;  %v18971_v44 = vld [vmem:[#allocation116_spill] sm:$0xff] }
 0x28a   : > { %2305 = vmatmul.mubr.f32.gmra.mrb[12].mxu1 %v18856_v25  ;;  %v14190_v6 = vpack.c.bf16 %v18951_v13, %v18950_v22  ;;  %v235_v25 = vld [vmem:[%s10942_s23 + $0x10] sm:$0xff]  ;;  %v14201_v53 = vand.u32 4294901760, %v236_v34  ;;  %v18972_v29 = vand.u32 4294901760, %v18971_v44  ;;  %v18973_v22 = vld [vmem:[#allocation119_spill] sm:$0xff] }
 0x28b   : > { %2310 = vmatprep.mubr.f32.mxu1 %v18857_v38  ;;  %8958 = vmatpush1.bf16.msra.mxu1 %v14170_v8  ;;  %v14198_v38 = vpack.c.bf16 %v2928_v3, %v2921_v60  ;;  %v14214_v33 = vand.u32 4294901760, %v235_v25  ;;  %18967 = vst [vmem:[#allocation49_spill] sm:$0xff] %v14225_v5  ;;  %v18974_v13 = vand.u32 4294901760, %v18973_v22  ;;  %v18977_v3 = vld [vmem:[#allocation160_spill] sm:$0xff] }
 0x28c   : > { %18952 = vst [vmem:[#allocation46_spill] sm:$0xff] %v14190_v6  ;;  %6045 = vmatmul.mubr.f32.gmra.mrb[12].mxu0 %v18859_v54  ;;  %8959 = vmatprep.subr.bf16.mxu1 %v17960_v45  ;;  %18955 = vst [vmem:[#allocation164_spill] sm:$0xff] %v14201_v53  ;;  %v18959_v54 = vld [vmem:[#allocation104_spill] sm:$0xff]  ;;  %v14229_v21 = vsub.f32 %v236_v34, %v14201_v53 }
 0x28d   : > { %6050 = vmatprep.mubr.f32.mxu0 %v18953_v43  ;;  %v18960_v37 = vand.u32 4294901760, %v18959_v54  ;;  %18964 = vst [vmem:[#allocation48_spill] sm:$0xff] %v14214_v33  ;;  %v14238_v42 = vpack.c.bf16 %v18974_v13, %v18972_v29  ;;  %v14241_v60 = vsub.f32 %v235_v25, %v14214_v33  ;;  %v246_v34 = vld [vmem:[%s10942_s23 + $0x68] sm:$0xff]  ;;  %v14246_v43 = vpack.c.bf16 %v2942_v36, %v2935_v24  ;;  %v18984_v24 = vld [vmem:[#allocation170_spill] sm:$0xff] }
 0x28e   : > { %2312 = vmatmul.mubr.f32.gmra.mrb[14].mxu1 %v18954_v47  ;;  %18969 = vst [vmem:[#allocation171_spill] sm:$0xff] %v14229_v21  ;;  %v18978_v47 = vld [vmem:[#allocation232_spill] sm:$0xff]  ;;  %v17630_v61 = vand.u32 4294901760, %v14229_v21  ;;  %v471_v13 = vsel %vm466_vm0, %v246_v34, 0  ;;  %v19001_v34 = vand.u32 4294901760, %v19000_v58  ;;  %v260_v33 = vld [vmem:[%s10942_s23 + $0xd8] sm:$0xff] }
 0x28f   : > { %2317 = vmatprep.mubr.f32.mxu1 %v18958_v23  ;;  %8961 = vmatpush1.bf16.msra.mxu1 %v14190_v6  ;;  %v14212_v41 = vpack.c.bf16 %v18962_v49, %v18960_v37  ;;  %18975 = vst [vmem:[#allocation173_spill] sm:$0xff] %v14238_v42  ;;  %18976 = vst [vmem:[#allocation50_spill] sm:$0xff] %v14241_v60  ;;  %v17620_v23 = vand.u32 4294901760, %v18978_v47  ;;  %v18979_v54 = vld [vmem:[#allocation32_spill] sm:$0xff]  ;;  %v14252_v49 = vsub.f32 %v468_v10, %v14225_v5 }
 0x290   : > { %6052 = vmatmul.mubr.f32.gmra.mrb[14].mxu0 %v18965_v28  ;;  %8962 = vmatprep.subr.bf16.mxu1 %v17960_v45  ;;  %v17619_v37 = vand.u32 4294901760, %v18979_v54  ;;  %v14254_v28 = vand.u32 4294901760, %v243_v0  ;;  %v242_v25 = vld [vmem:[%s10942_s23 + $0x48] sm:$0xff]  ;;  %v17629_v22 = vand.u32 4294901760, %v14241_v60  ;;  %v14306_v58 = vsub.f32 %v14229_v21, %v17630_v61  ;;  %v19036_v61 = vld [vmem:[#allocation22_spill] sm:$0xff] }
 0x291   : > { %18963 = vst [vmem:[#allocation167_spill] sm:$0xff] %v14212_v41  ;;  %6057 = vmatprep.mubr.f32.mxu0 %v18966_v46  ;;  %18981 = vst [vmem:[#allocation51_spill] sm:$0xff] %v14252_v49  ;;  %v2948_v46 = vsub.f32 %v18978_v47, %v17620_v23  ;;  %v18985_v10 = vld [vmem:[#allocation124_spill] sm:$0xff]  ;;  %v18993_v23 = vld [vmem:[#allocation131_spill] sm:$0xff] }
 0x292   : > { %2319 = vmatmul.mubr.f32.gmra.mrb[16].mxu1 %v18968_v50  ;;  %18982 = vst [vmem:[#allocation172_spill] sm:$0xff] %v14254_v28  ;;  %v2955_v50 = vsub.f32 %v18979_v54, %v17619_v37  ;;  %v18986_v36 = vand.u32 4294901760, %v18985_v10  ;;  %v18992_v37 = vld [vmem:[#allocation174_spill] sm:$0xff]  ;;  %v18994_v10 = vand.u32 4294901760, %v18993_v23  ;;  %v19034_v6 = vld [vmem:[#allocation188_spill] sm:$0xff] }
 0x293   : > { %2324 = vmatprep.mubr.f32.mxu1 %v18970_v35  ;;  %8964 = vmatpush1.bf16.msra.mxu1 %v14212_v41  ;;  %v18987_v35 = vld [vmem:[#allocation128_spill] sm:$0xff]  ;;  %v19052_v21 = vld [vmem:[#allocation194_spill] sm:$0xff] }
 0x294   : > { %6059 = vmatmul.mubr.f32.gmra.mrb[16].mxu0 %v18977_v3  ;;  %8965 = vmatprep.subr.bf16.mxu1 %v17960_v45  ;;  %v18988_v44 = vand.u32 4294901760, %v18987_v35  ;;  %v18990_v3 = vld [vmem:[#allocation169_spill] sm:$0xff]  ;;  %v18996_v35 = vand.u32 4294901760, %v18995_v48  ;;  %v19008_v48 = vand.u32 4294901760, %v19007_v51 }
 0x295   : > { %6064 = vmatprep.mubr.f32.mxu0 %v18980_v4  ;;  %v14277_v4 = vand.u32 4294901760, %v242_v25 }
 0x296   : > { %2326 = vmatmul.mubr.f32.gmra.mrb[18].mxu1 %v18983_v19  ;;  %v14271_v29 = vpack.c.bf16 %v18988_v44, %v18986_v36  ;;  %v2949_v19 = vand.u32 4294901760, %v2948_v46  ;;  %v14284_v36 = vpack.c.bf16 %v18996_v35, %v18994_v10  ;;  %v18998_v44 = vld [vmem:[#allocation139_spill] sm:$0xff]  ;;  %v14294_v46 = vsub.f32 %v243_v0, %v14254_v28  ;;  %v19013_v0 = vld [vmem:[#allocation36_spill] sm:$0xff] }
 0x297   : > { %2331 = vmatprep.mubr.f32.mxu1 %v18984_v24  ;;  %8967 = vmatpush1.bf16.msra.mxu1 %v14238_v42  ;;  %18991 = vst [vmem:[#allocation53_spill] sm:$0xff] %v14277_v4  ;;  %v2956_v24 = vand.u32 4294901760, %v2955_v50  ;;  %v18999_v11 = vand.u32 4294901760, %v18998_v44  ;;  %v19004_v50 = vld [vmem:[#allocation176_spill] sm:$0xff]  ;;  %v19012_v44 = vld [vmem:[#allocation179_spill] sm:$0xff] }
 0x298   : > { %18989 = vst [vmem:[#allocation175_spill] sm:$0xff] %v14271_v29  ;;  %6066 = vmatmul.mubr.f32.gmra.mrb[18].mxu0 %v18990_v3  ;;  %8968 = vmatprep.subr.bf16.mxu1 %v17960_v45  ;;  %18997 = vst [vmem:[#allocation54_spill] sm:$0xff] %v14284_v36  ;;  %v17637_v3 = vand.u32 4294901760, %v14252_v49  ;;  %v19064_v28 = vld [vmem:[#allocation204_spill] sm:$0xff] }
 0x299   : > { %6071 = vmatprep.mubr.f32.mxu0 %v18992_v37  ;;  %v14290_v7 = vpack.c.bf16 %v19001_v34, %v18999_v11  ;;  %19003 = vst [vmem:[#allocation182_spill] sm:$0xff] %v14294_v46  ;;  %v19005_v37 = vld [vmem:[#allocation33_spill] sm:$0xff]  ;;  %v14308_v11 = vand.u32 4294901760, %v471_v13  ;;  %v14310_v35 = vpack.c.bf16 %v2956_v24, %v2949_v19  ;;  %v19014_v34 = vand.u32 4294901760, %v19013_v0 }
 0x29a   : > { %2333 = vmatmul.mubr.f32.gmra.mrb[20].mxu1 %v19004_v50  ;;  %v19006_v23 = vand.u32 4294901760, %v19005_v37  ;;  %v19015_v50 = vld [vmem:[#allocation147_spill] sm:$0xff]  ;;  %v14329_v19 = vsub.f32 %v14241_v60, %v17629_v22  ;;  %v19023_v24 = vld [vmem:[#allocation177_spill] sm:$0xff]  ;;  %v14344_v22 = vsub.f32 %v14252_v49, %v17637_v3 }
 0x29b   : > { %19002 = vst [vmem:[#allocation178_spill] sm:$0xff] %v14290_v7  ;;  %19010 = vst [vmem:[#allocation57_spill] sm:$0xff] %v14308_v11  ;;  %2338 = vmatprep.mubr.f32.mxu1 %v19012_v44  ;;  %8970 = vmatpush1.bf16.msra.mxu1 %v14271_v29  ;;  %v19016_v37 = vand.u32 4294901760, %v19015_v50  ;;  %v19024_v44 = vld [vmem:[#allocation18_spill] sm:$0xff]  ;;  %v250_v50 = vld [vmem:[%s10942_s23 + $0x88] sm:$0xff]  ;;  %v14351_v16 = vsub.f32 %v471_v13, %v14308_v11 }
 0x29c   : > { %v14301_v10 = vpack.c.bf16 %v19008_v48, %v19006_v23  ;;  %19011 = vst [vmem:[#allocation180_spill] sm:$0xff] %v14310_v35  ;;  %v19018_v23 = vld [vmem:[#allocation39_spill] sm:$0xff]  ;;  %6073 = vmatmul.mubr.f32.gmra.mrb[20].mxu0 %v19023_v24  ;;  %8971 = vmatprep.subr.bf16.mxu1 %v17960_v45  ;;  %v19029_v24 = vld [vmem:[#allocation20_spill] sm:$0xff]  ;;  %v19035_v0 = vld [vmem:[#allocation21_spill] sm:$0xff]  ;;  %v14365_v8 = vand.u32 4294901760, %v250_v50 }
 0x29d   : > { %v14318_v51 = vpack.c.bf16 %v19016_v37, %v19014_v34  ;;  %v19019_v48 = vand.u32 4294901760, %v19018_v23  ;;  %v14335_v34 = vsub.f32 %v242_v25, %v14277_v4  ;;  %v19026_v37 = vld [vmem:[#allocation150_spill] sm:$0xff]  ;;  %v19030_v29 = vld [vmem:[#allocation184_spill] sm:$0xff]  ;;  %19031 = vst [vmem:[#allocation185_spill] sm:$0xff] %v14351_v16  ;;  %v19041_v25 = vand.u32 4294901760, %v19029_v24  ;;  %v19055_v60 = vld [vmem:[#allocation37_spill] sm:$0xff] }
 0x29e   : > { %19009 = vst [vmem:[#allocation55_spill] sm:$0xff] %v14301_v10  ;;  %2340 = vmatmul.mubr.f32.gmra.mrb[22].mxu1 %v19030_v29  ;;  %v249_v23 = vld [vmem:[%s10942_s23 + $0x80] sm:$0xff]  ;;  %19037 = vst [vmem:[#allocation190_spill] sm:$0xff] %v14365_v8  ;;  %v19063_v4 = vand.u32 4294901760, %v19055_v60 }
 0x29f   : > { %19017 = vst [vmem:[#allocation183_spill] sm:$0xff] %v14318_v51  ;;  %v14324_v56 = vpack.c.bf16 %v19021_v40, %v19019_v48  ;;  %19025 = vst [vmem:[#allocation60_spill] sm:$0xff] %v14335_v34  ;;  %v19027_v40 = vld [vmem:[#allocation35_spill] sm:$0xff]  ;;  %v19028_v48 = vld [vmem:[#allocation181_spill] sm:$0xff]  ;;  %2345 = vmatprep.mubr.f32.mxu1 %v19034_v6  ;;  %8973 = vmatpush1.bf16.msra.mxu1 %v14284_v36  ;;  %v2787_v12 = vsub.f32 %v19029_v24, %v19041_v25  ;;  %v14384_v9 = vand.u32 4294901760, %v249_v23 }
 0x2a0   : > { %6078 = vmatprep.mubr.f32.mxu0 %v19028_v48  ;;  %v19032_v48 = vand.u32 4294901760, %v19026_v37  ;;  %v19033_v41 = vand.u32 4294901760, %v19027_v40  ;;  %8974 = vmatprep.subr.bf16.mxu1 %v17960_v45  ;;  %v257_v13 = vld [vmem:[%s10942_s23 + $0xc0] sm:$0xff]  ;;  %v19048_v25 = vand.u32 4294901760, %v19035_v0  ;;  %v2983_v5 = vsub.f32 %v19055_v60, %v19063_v4 }
 0x2a1   : > { %19022 = vst [vmem:[#allocation58_spill] sm:$0xff] %v14324_v56  ;;  %6080 = vmatmul.mubr.f32.gmra.mrb[22].mxu0 %v19038_v52  ;;  %v19042_v52 = vand.u32 4294901760, %v14294_v46  ;;  %19043 = vst [vmem:[#allocation61_spill] sm:$0xff] %v14384_v9  ;;  %v14417_v11 = vand.u32 4294901760, %v257_v13 }
 0x2a2   : > { %v2962_v42 = vsub.f32 %v19026_v37, %v19032_v48  ;;  %v2969_v3 = vsub.f32 %v19027_v40, %v19033_v41  ;;  %v19039_v41 = vand.u32 4294901760, %v19024_v44  ;;  %6085 = vmatprep.mubr.f32.mxu0 %v19040_v14  ;;  %v474_v14 = vsel %vm466_vm0, %v253_v1, 0  ;;  %v19170_v37 = vld [vmem:[#allocation110_spill] sm:$0xff] }
 0x2a3   : > { %v14382_v20 = vsub.f32 %v14294_v46, %v19042_v52  ;;  %8976 = vmatpush1.bf16.msra.mxu1 %v14290_v7  ;;  %v6395_v52 = vsub.f32 %v19035_v0, %v19048_v25  ;;  %v19049_v46 = vld [vmem:[#allocation26_spill] sm:$0xff]  ;;  %v2788_v48 = vand.u32 4294901760, %v2787_v12  ;;  %19058 = vst [vmem:[#allocation64_spill] sm:$0xff] %v14417_v11  ;;  %v19068_v0 = vld [vmem:[#allocation205_spill] sm:$0xff] }
 0x2a4   : > { %v2780_v6 = vsub.f32 %v19024_v44, %v19039_v41  ;;  %v2963_v36 = vand.u32 4294901760, %v2962_v42  ;;  %v2970_v29 = vand.u32 4294901760, %v2969_v3  ;;  %v19044_v41 = vld [vmem:[#allocation191_spill] sm:$0xff]  ;;  %v19045_v3 = vld [vmem:[#allocation25_spill] sm:$0xff]  ;;  %v19051_v42 = vld [vmem:[#allocation152_spill] sm:$0xff]  ;;  %8977 = vmatprep.subr.bf16.mxu1 %v17960_v45 }
 0x2a5   : > { %2347 = vmatmul.mubr.f32.gmra.mrb[24].mxu1 %v19044_v41  ;;  %v14400_v41 = vsub.f32 %v250_v50, %v14365_v8  ;;  %6087 = vmatmul.mubr.f32.gmra.mrb[24].mxu0 %v19052_v21  ;;  %v19056_v50 = vld [vmem:[#allocation197_spill] sm:$0xff]  ;;  %v14415_v21 = vand.u32 4294901760, %v474_v14  ;;  %v19060_v8 = vld [vmem:[#allocation200_spill] sm:$0xff]  ;;  %v6396_v4 = vand.u32 4294901760, %v6395_v52  ;;  %v19092_v44 = vld [vmem:[#allocation222_spill] sm:$0xff] }
 0x2a6   : > { %v14391_v49 = vpack.c.bf16 %v2970_v29, %v2963_v36  ;;  %2352 = vmatprep.mubr.f32.mxu1 %v19047_v59  ;;  %v2781_v1 = vand.u32 4294901760, %v2780_v6  ;;  %v19053_v59 = vand.u32 4294901760, %v19036_v61  ;;  %v19054_v29 = vand.u32 4294901760, %v14335_v34  ;;  %6092 = vmatprep.mubr.f32.mxu0 %v19056_v50 }
 0x2a7   : > { %19050 = vst [vmem:[#allocation187_spill] sm:$0xff] %v14400_v41  ;;  %19057 = vst [vmem:[#allocation192_spill] sm:$0xff] %v14415_v21  ;;  %v19059_v6 = vand.u32 4294901760, %v19051_v42  ;;  %v19062_v50 = vand.u32 4294901760, %v19045_v3  ;;  %8979 = vmatpush1.bf16.msra.mxu1 %v14301_v10  ;;  %v267_v10 = vld [vmem:[%s10942_s23 + $0x110] sm:$0xff] }
 0x2a8   : > { %19046 = vst [vmem:[#allocation62_spill] sm:$0xff] %v14391_v49  ;;  %v6402_v36 = vsub.f32 %v19036_v61, %v19053_v59  ;;  %v14411_v25 = vsub.f32 %v14335_v34, %v19054_v29  ;;  %v19061_v34 = vand.u32 4294901760, %v14351_v16  ;;  %8980 = vmatprep.subr.bf16.mxu1 %v17960_v45  ;;  %v2984_v61 = vand.u32 4294901760, %v2983_v5 }
 0x2a9   : > { %v2976_v59 = vsub.f32 %v19051_v42, %v19059_v6  ;;  %2354 = vmatmul.mubr.f32.gmra.mrb[26].mxu1 %v19060_v8  ;;  %v2794_v12 = vsub.f32 %v19045_v3, %v19062_v50  ;;  %v19065_v8 = vand.u32 4294901760, %v19049_v46  ;;  %v19067_v3 = vld [vmem:[#allocation201_spill] sm:$0xff]  ;;  %v14456_v29 = vsub.f32 %v257_v13, %v14417_v11  ;;  %v316_v42 = vld [vmem:[%s10942_s23 + $0x298] sm:$0xff] }
 0x2aa   : > { %v14427_v7 = vsub.f32 %v14351_v16, %v19061_v34  ;;  %2359 = vmatprep.mubr.f32.mxu1 %v19064_v28  ;;  %v14442_v34 = vsub.f32 %v249_v23, %v14384_v9  ;;  %v256_v16 = vld [vmem:[%s10942_s23 + $0xb8] sm:$0xff]  ;;  %6094 = vmatmul.mubr.f32.gmra.mrb[26].mxu0 %v19067_v3  ;;  %v6403_v28 = vand.u32 4294901760, %v6402_v36  ;;  %v14453_v23 = vsub.f32 %v474_v14, %v14415_v21  ;;  %v19077_v3 = vld [vmem:[#allocation209_spill] sm:$0xff] }
 0x2ab   : > { %v2801_v6 = vsub.f32 %v19049_v46, %v19065_v8  ;;  %v2977_v50 = vand.u32 4294901760, %v2976_v59  ;;  %6099 = vmatprep.mubr.f32.mxu0 %v19068_v0  ;;  %v14450_v8 = vpack.c.bf16 %v2788_v48, %v2781_v1  ;;  %19070 = vst [vmem:[#allocation198_spill] sm:$0xff] %v14456_v29  ;;  %v19071_v59 = vld [vmem:[#allocation27_spill] sm:$0xff]  ;;  %v14461_v36 = vand.u32 4294901760, %v256_v16  ;;  %v19075_v48 = vld [vmem:[#allocation212_spill] sm:$0xff]  ;;  %8982 = vmatpush1.bf16.msra.mxu1 %v14318_v51  ;;  %v19081_v11 = vld [vmem:[#allocation213_spill] sm:$0xff] }
 0x2ac   : > { %19066 = vst [vmem:[#allocation65_spill] sm:$0xff] %v14442_v34  ;;  %19069 = vst [vmem:[#allocation193_spill] sm:$0xff] %v14453_v23  ;;  %v19072_v9 = vld [vmem:[#allocation207_spill] sm:$0xff]  ;;  %v477_v5 = vsel %vm466_vm0, %v260_v33, 0  ;;  %v2795_v14 = vand.u32 4294901760, %v2794_v12  ;;  %v19076_v1 = vand.u32 4294901760, %v14400_v41  ;;  %8983 = vmatprep.subr.bf16.mxu1 %v17960_v45  ;;  %v14477_v33 = vpack.c.bf16 %v6403_v28, %v6396_v4 }
 0x2ad   : > { %2361 = vmatmul.mubr.f32.gmra.mrb[28].mxu1 %v19072_v9  ;;  %19073 = vst [vmem:[#allocation66_spill] sm:$0xff] %v14461_v36  ;;  %v14464_v0 = vpack.c.bf16 %v2984_v61, %v2977_v50  ;;  %v2802_v13 = vand.u32 4294901760, %v2801_v6  ;;  %v19078_v61 = vld [vmem:[#allocation28_spill] sm:$0xff]  ;;  %v19079_v12 = vld [vmem:[#allocation158_spill] sm:$0xff]  ;;  %v14489_v46 = vand.u32 4294901760, %v477_v5  ;;  %v19084_v28 = vld [vmem:[#allocation215_spill] sm:$0xff]  ;;  %v14494_v50 = vsub.f32 %v256_v16, %v14461_v36 }
 0x2ae   : > { %2366 = vmatprep.mubr.f32.mxu1 %v19075_v48  ;;  %v14471_v9 = vsub.f32 %v14400_v41, %v19076_v1  ;;  %6101 = vmatmul.mubr.f32.gmra.mrb[28].mxu0 %v19077_v3  ;;  %v264_v48 = vld [vmem:[%s10942_s23 + $0xf8] sm:$0xff]  ;;  %v17703_v6 = vand.u32 4294901760, %v19079_v12  ;;  %v19080_v51 = vld [vmem:[#allocation40_spill] sm:$0xff]  ;;  %v19082_v41 = vand.u32 4294901760, %v19071_v59  ;;  %v263_v4 = vld [vmem:[%s10942_s23 + $0xf0] sm:$0xff]  ;;  %v19087_v16 = vand.u32 4294901760, %v14442_v34 }
 0x2af   : > { %19074 = vst [vmem:[#allocation67_spill] sm:$0xff] %v14464_v0  ;;  %v17704_v21 = vand.u32 4294901760, %v19080_v51  ;;  %6106 = vmatprep.mubr.f32.mxu0 %v19081_v11  ;;  %19083 = vst [vmem:[#allocation195_spill] sm:$0xff] %v14489_v46  ;;  %v480_v11 = vsel %vm466_vm0, %v267_v10, 0  ;;  %v19086_v1 = vld [vmem:[#allocation218_spill] sm:$0xff]  ;;  %8985 = vmatpush1.bf16.msra.mxu1 %v14324_v56  ;;  %v14513_v36 = vand.u32 4294901760, %v264_v48 }
 0x2b0   : > { %v2808_v3 = vsub.f32 %v19071_v59, %v19082_v41  ;;  %19085 = vst [vmem:[#allocation199_spill] sm:$0xff] %v14494_v50  ;;  %v2990_v52 = vsub.f32 %v19079_v12, %v17703_v6  ;;  %v14505_v59 = vpack.c.bf16 %v2802_v13, %v2795_v14  ;;  %v14511_v10 = vsub.f32 %v14442_v34, %v19087_v16  ;;  %v19089_v6 = vld [vmem:[#allocation216_spill] sm:$0xff]  ;;  %v271_v13 = vld [vmem:[%s10942_s23 + $0x130] sm:$0xff] }
 0x2b1   : > { %2368 = vmatmul.mubr.f32.gmra.mrb[30].mxu1 %v19084_v28  ;;  %v2997_v41 = vsub.f32 %v19080_v51, %v17704_v21  ;;  %19088 = vst [vmem:[#allocation69_spill] sm:$0xff] %v14513_v36  ;;  %8986 = vmatprep.subr.bf16.mxu1 %v17960_v45  ;;  %v14520_v14 = vand.u32 4294901760, %v263_v4  ;;  %v274_v28 = vld [vmem:[%s10942_s23 + $0x148] sm:$0xff]  ;;  %v19093_v16 = vand.u32 4294901760, %v14453_v23 }
 0x2b2   : > { %2373 = vmatprep.mubr.f32.mxu1 %v19086_v1  ;;  %6108 = vmatmul.mubr.f32.gmra.mrb[30].mxu0 %v19089_v6  ;;  %v19090_v1 = vand.u32 4294901760, %v19078_v61  ;;  %v2991_v56 = vand.u32 4294901760, %v2990_v52  ;;  %v19094_v6 = vand.u32 4294901760, %v14456_v29  ;;  %v270_v52 = vld [vmem:[%s10942_s23 + $0x128] sm:$0xff]  ;;  %v483_v35 = vsel %vm466_vm0, %v274_v28, 0 }
 0x2b3   : > { %19091 = vst [vmem:[#allocation70_spill] sm:$0xff] %v14520_v14  ;;  %v2998_v24 = vand.u32 4294901760, %v2997_v41  ;;  %6113 = vmatprep.mubr.f32.mxu0 %v19092_v44  ;;  %v14528_v34 = vsub.f32 %v14453_v23, %v19093_v16  ;;  %v19097_v41 = vld [vmem:[#allocation224_spill] sm:$0xff]  ;;  %v2809_v44 = vand.u32 4294901760, %v2808_v3  ;;  %v19098_v23 = vld [vmem:[#allocation226_spill] sm:$0xff]  ;;  %v19104_v16 = vld [vmem:[#allocation31_spill] sm:$0xff] }
 0x2b4   : > { %v2815_v21 = vsub.f32 %v19078_v61, %v19090_v1  ;;  %v14533_v53 = vsub.f32 %v14456_v29, %v19094_v6  ;;  %v14536_v1 = vsub.f32 %v477_v5, %v14489_v46  ;;  %v14538_v61 = vand.u32 4294901760, %v480_v11  ;;  %v19100_v5 = vld [vmem:[#allocation29_spill] sm:$0xff]  ;;  %v19111_v28 = vld [vmem:[#allocation236_spill] sm:$0xff] }
 0x2b5   : > { %2375 = vmatmul.mubr.f32.gmra.mrb[32].mxu1 %v19097_v41  ;;  %v14543_v49 = vpack.c.bf16 %v2998_v24, %v2991_v56  ;;  %v14549_v6 = vsub.f32 %v264_v48, %v14513_v36  ;;  %v14552_v46 = vand.u32 4294901760, %v271_v13  ;;  %v278_v3 = vld [vmem:[%s10942_s23 + $0x168] sm:$0xff]  ;;  %v14558_v24 = vsub.f32 %v263_v4, %v14520_v14  ;;  %v277_v48 = vld [vmem:[%s10942_s23 + $0x160] sm:$0xff] }
 0x2b6   : > { %19095 = vst [vmem:[#allocation202_spill] sm:$0xff] %v14536_v1  ;;  %19096 = vst [vmem:[#allocation206_spill] sm:$0xff] %v14538_v61  ;;  %2380 = vmatprep.mubr.f32.mxu1 %v19098_v23  ;;  %v19102_v41 = vld [vmem:[#allocation225_spill] sm:$0xff]  ;;  %v2816_v56 = vand.u32 4294901760, %v2815_v21  ;;  %v14561_v23 = vand.u32 4294901760, %v270_v52  ;;  %v14568_v30 = vsub.f32 %v480_v11, %v14538_v61  ;;  %v19108_v21 = vand.u32 4294901760, %v14494_v50 }
 0x2b7   : > { %19099 = vst [vmem:[#allocation71_spill] sm:$0xff] %v14549_v6  ;;  %19101 = vst [vmem:[#allocation73_spill] sm:$0xff] %v14552_v46  ;;  %6115 = vmatmul.mubr.f32.gmra.mrb[32].mxu0 %v19102_v41  ;;  %v19107_v41 = vld [vmem:[#allocation231_spill] sm:$0xff]  ;;  %v14576_v0 = vand.u32 4294901760, %v483_v35  ;;  %v19112_v17 = vand.u32 4294901760, %v19100_v5  ;;  %v19115_v29 = vand.u32 4294901760, %v19104_v16 }
 0x2b8   : > { %19103 = vst [vmem:[#allocation203_spill] sm:$0xff] %v14558_v24  ;;  %19105 = vst [vmem:[#allocation208_spill] sm:$0xff] %v14561_v23  ;;  %6120 = vmatprep.mubr.f32.mxu0 %v18919_v2  ;;  %v14574_v4 = vsub.f32 %v14494_v50, %v19108_v21  ;;  %v14578_v2 = vand.u32 4294901760, %v278_v3  ;;  %v14590_v21 = vsub.f32 %v271_v13, %v14552_v46  ;;  %v19114_v50 = vld [vmem:[#allocation234_spill] sm:$0xff]  ;;  %v14611_v36 = vand.u32 4294901760, %v277_v48  ;;  %v330_v51 = vld [vmem:[%s10942_s23 + $0x308] sm:$0xff] }
 0x2b9   : > { %19106 = vst [vmem:[#allocation74_spill] sm:$0xff] %v14568_v30  ;;  %2382 = vmatmul.mubr.f32.gmra.mrb[34].mxu1 %v19107_v41  ;;  %19109 = vst [vmem:[#allocation75_spill] sm:$0xff] %v14576_v0  ;;  %v2822_v61 = vsub.f32 %v19100_v5, %v19112_v17  ;;  %v14593_v14 = vpack.c.bf16 %v2816_v56, %v2809_v44  ;;  %v14600_v11 = vsub.f32 %v270_v52, %v14561_v23  ;;  %v281_v41 = vld [vmem:[%s10942_s23 + $0x180] sm:$0xff]  ;;  %v19120_v52 = vld [vmem:[#allocation86_spill] sm:$0xff] }
 0x2ba   : > { %19110 = vst [vmem:[#allocation210_spill] sm:$0xff] %v14578_v2  ;;  %2387 = vmatprep.mubr.f32.mxu1 %v19111_v28  ;;  %19113 = vst [vmem:[#allocation214_spill] sm:$0xff] %v14590_v21  ;;  %v2829_v28 = vsub.f32 %v19104_v16, %v19115_v29  ;;  %v19117_v17 = vand.u32 4294901760, %v14536_v1  ;;  %v19118_v44 = vld [vmem:[#allocation84_spill] sm:$0xff]  ;;  %v14620_v31 = vsub.f32 %v278_v3, %v14578_v2  ;;  %v19124_v56 = vand.u32 4294901760, %v14549_v6 }
 0x2bb   : > { %6122 = vmatmul.mubr.f32.gmra.mrb[34].mxu0 %v19114_v50  ;;  %19116 = vst [vmem:[#allocation76_spill] sm:$0xff] %v14600_v11  ;;  %19119 = vst [vmem:[#allocation77_spill] sm:$0xff] %v14611_v36  ;;  %v486_v29 = vsel %vm466_vm0, %v281_v41, 0  ;;  %v19155_v27 = vand.u32 4294901760, %v14533_v53  ;;  %v19157_v54 = vand.u32 4294901760, %v14528_v34 }
 0x2bc   : > { %6127 = vmatprep.mubr.f32.mxu0 %v18923_v63  ;;  %v14607_v13 = vsub.f32 %v14536_v1, %v19117_v17  ;;  %v14617_v63 = vsub.f32 %v483_v35, %v14576_v0  ;;  %19122 = vst [vmem:[#allocation217_spill] sm:$0xff] %v14620_v31  ;;  %v19123_v17 = vand.u32 4294901760, %v14306_v58  ;;  %v14627_v50 = vsub.f32 %v14549_v6, %v19124_v56  ;;  %v19134_v6 = vld [vmem:[#allocation88_spill] sm:$0xff] }
 0x2bd   : > { %2389 = vmatmul.mubr.f32.gmra.mrb[36].mxu1 %v18924_v55  ;;  %v2823_v1 = vand.u32 4294901760, %v2822_v61  ;;  %v19125_v35 = vand.u32 4294901760, %v14558_v24  ;;  %v2830_v15 = vand.u32 4294901760, %v2829_v28  ;;  %v17740_v61 = vmov 0.0  }
 0x2be   : > { %19121 = vst [vmem:[#allocation211_spill] sm:$0xff] %v14617_v63  ;;  %2495 = vmatprep.mubr.f32.mxu1 %v19123_v17  ;;  %v285_v17 = vld [vmem:[%s10942_s23 + $0x1a0] sm:$0xff]  ;;  %v19127_v28 = vand.u32 4294901760, %v19118_v44  ;;  %v14653_v58 = vsub.f32 %v277_v48, %v14611_v36  ;;  %v19129_v56 = vand.u32 4294901760, %v14329_v19  ;;  %v19133_v19 = vand.u32 4294901760, %v14590_v21  ;;  %v284_v48 = vld [vmem:[%s10942_s23 + $0x198] sm:$0xff] }
 0x2bf   : > { %6129 = vmatmul.mubr.f32.gmra.mrb[36].mxu0 %v18928_v18  ;;  %v14635_v3 = vsub.f32 %v14558_v24, %v19125_v35  ;;  %v19126_v18 = vand.u32 4294901760, %v14568_v30  ;;  %v19130_v24 = vand.u32 4294901760, %v19120_v52  ;;  %v14674_v32 = vand.u32 4294901760, %v285_v17 }
 0x2c0   : > { %8288 = vmatprep.mubr.msk.f32.mxu0 %vm10766_vm1, %v17740_v61  ;;  %v2836_v35 = vsub.f32 %v19118_v44, %v19127_v28  ;;  %19128 = vst [vmem:[#allocation80_spill] sm:$0xff] %v14653_v58  ;;  %v19132_v28 = vand.u32 4294901760, %v14382_v20  ;;  %v14680_v20 = vpack.c.bf16 %v2830_v15, %v2823_v1  ;;  %v19139_v1 = vld [vmem:[#allocation99_spill] sm:$0xff]  ;;  %v19148_v15 = vand.u32 4294901760, %v14427_v7 }
 0x2c1   : > { %v14647_v55 = vsub.f32 %v14568_v30, %v19126_v18  ;;  %2501 = vmatmul.mubr.f32.vlgmr.msra.gmra.mrb[0].mxu1 %v19129_v56  ;;  %v2843_v41 = vsub.f32 %v19120_v52, %v19130_v24  ;;  %v14662_v30 = vand.u32 4294901760, %v486_v29  ;;  %v14671_v56 = vsub.f32 %v14590_v21, %v19133_v19  ;;  %19135 = vst [vmem:[#allocation219_spill] sm:$0xff] %v14674_v32  ;;  %v292_v61 = vld [vmem:[%s10942_s23 + $0x1d8] sm:$0xff] }
 0x2c2   : > { %8988 = vmatpush1.bf16.msra.mxu1 %v14450_v8  ;;  %2510 = vmatprep.mubr.f32.mxu1 %v19132_v28  ;;  %v19136_v18 = vand.u32 4294901760, %v14344_v22  ;;  %v19137_v28 = vand.u32 4294901760, %v14600_v11  ;;  %v19138_v22 = vmov 0.0   ;;  %v2837_v8 = vand.u32 4294901760, %v2836_v35 }
 0x2c3   : > { %19131 = vst [vmem:[#allocation83_spill] sm:$0xff] %v14662_v30  ;;  %8989 = vmatprep.subr.bf16.mxu1 %v17960_v45  ;;  %v19140_v21 = vand.u32 4294901760, %v14411_v25  ;;  %v14709_v35 = vsub.f32 %v486_v29, %v14662_v30  ;;  %v19144_v25 = vand.u32 4294901760, %v14471_v9  ;;  %v14724_v29 = vand.u32 4294901760, %v284_v48  ;;  %v19149_v9 = vld [vmem:[#allocation90_spill] sm:$0xff]  ;;  %v309_v30 = vld [vmem:[%s10942_s23 + $0x260] sm:$0xff] }
 0x2c4   : > { %8289 = vmatmul.mubr.f32.vlgmr.msra.gmra.mrb[0].mxu0 %v19136_v18  ;;  %v14685_v19 = vsub.f32 %v14600_v11, %v19137_v28  ;;  %v2844_v28 = vand.u32 4294901760, %v2843_v41  ;;  %v19141_v11 = vand.u32 4294901760, %v14617_v63  ;;  %v288_v18 = vld [vmem:[%s10942_s23 + $0x1b8] sm:$0xff] }
 0x2c5   : > { %9519 = vmatpush3.bf16.msra.mxu0 %v14477_v33  ;;  %8291 = vmatprep.mubr.msk.f32.mxu0 %vm10766_vm1, %v19138_v22  ;;  %v19142_v33 = vand.u32 4294901760, %v14620_v31  ;;  %19143 = vst [vmem:[#allocation221_spill] sm:$0xff] %v14709_v35  ;;  %19147 = vst [vmem:[#allocation223_spill] sm:$0xff] %v14724_v29 }
 0x2c6   : > { %2516 = vmatmul.mubr.f32.gmra.mrb[2].mxu1 %v19140_v21  ;;  %v14701_v24 = vsub.f32 %v14617_v63, %v19141_v11  ;;  %9520 = vmatprep.subr.bf16.mxu0 %v17960_v45  ;;  %v19145_v21 = vand.u32 4294901760, %v19134_v6  ;;  %v19150_v11 = vld [vmem:[#allocation102_spill] sm:$0xff]  ;;  %v489_v63 = vsel %vm466_vm0, %v288_v18, 0  ;;  %v8999_v47 = vpack.c.bf16 %v2844_v28, %v2837_v8 }
 0x2c7   : > { %v14706_v62 = vsub.f32 %v14620_v31, %v19142_v33  ;;  %8991 = vmatpush1.bf16.msra.mxu1 %v14505_v59  ;;  %2525 = vmatprep.mubr.f32.mxu1 %v19144_v25  ;;  %v14722_v33 = vsub.f32 %v285_v17, %v14674_v32  ;;  %v295_v31 = vld [vmem:[%s10942_s23 + $0x1f0] sm:$0xff]  ;;  %v19151_v17 = vand.u32 4294901760, %v14653_v58  ;;  %v14746_v25 = vand.u32 4294901760, %v292_v61 }
 0x2c8   : > { %v2850_v41 = vsub.f32 %v19134_v6, %v19145_v21  ;;  %8292 = vmatmul.mubr.f32.gmra.mrb[2].mxu0 %v19148_v15  ;;  %8992 = vmatprep.subr.bf16.mxu1 %v17960_v45  ;;  %v19152_v15 = vand.u32 4294901760, %v19139_v1  ;;  %v19154_v21 = vand.u32 4294901760, %v14511_v10  ;;  %v14759_v10 = vsub.f32 %v284_v48, %v14724_v29  ;;  %v299_v28 = vld [vmem:[%s10942_s23 + $0x210] sm:$0xff] }
 0x2c9   : > { %19146 = vst [vmem:[#allocation220_spill] sm:$0xff] %v14722_v33  ;;  %8294 = vmatprep.mubr.msk.f32.mxu0 %vm10766_vm1, %v19138_v22  ;;  %v14740_v7 = vsub.f32 %v14653_v58, %v19151_v17  ;;  %19153 = vst [vmem:[#allocation227_spill] sm:$0xff] %v14746_v25  ;;  %v291_v58 = vld [vmem:[%s10942_s23 + $0x1d0] sm:$0xff]  ;;  %v492_v8 = vsel %vm466_vm0, %v295_v31, 0  ;;  %v14767_v53 = vand.u32 4294901760, %v489_v63  ;;  %v14781_v26 = vsub.f32 %v292_v61, %v14746_v25  ;;  %v298_v17 = vld [vmem:[%s10942_s23 + $0x208] sm:$0xff] }
 0x2ca   : > { %v2857_v59 = vsub.f32 %v19139_v1, %v19152_v15  ;;  %2531 = vmatmul.mubr.f32.gmra.mrb[4].mxu1 %v19154_v21  ;;  %v2851_v15 = vand.u32 4294901760, %v2850_v41  ;;  %19156 = vst [vmem:[#allocation229_spill] sm:$0xff] %v14759_v10  ;;  %v302_v21 = vld [vmem:[%s10942_s23 + $0x228] sm:$0xff]  ;;  %v19160_v41 = vand.u32 4294901760, %v19150_v11  ;;  %v14783_v18 = vand.u32 4294901760, %v291_v58  ;;  %v19166_v31 = vld [vmem:[#allocation103_spill] sm:$0xff] }
 0x2cb   : > { %2540 = vmatprep.mubr.f32.mxu1 %v19155_v27  ;;  %8994 = vmatpush1.bf16.msra.mxu1 %v14593_v14  ;;  %19158 = vst [vmem:[#allocation228_spill] sm:$0xff] %v14767_v53  ;;  %v19159_v27 = vand.u32 4294901760, %v19149_v9  ;;  %19161 = vst [vmem:[#allocation233_spill] sm:$0xff] %v14781_v26  ;;  %v14788_v29 = vand.u32 4294901760, %v492_v8  ;;  %v495_v40 = vsel %vm466_vm0, %v302_v21, 0  ;;  %v19168_v61 = vand.u32 4294901760, %v14709_v35 }
 0x2cc   : > { %8295 = vmatmul.mubr.f32.gmra.mrb[4].mxu0 %v19157_v54  ;;  %8995 = vmatprep.subr.bf16.mxu1 %v17960_v45  ;;  %v2871_v48 = vsub.f32 %v19150_v11, %v19160_v41  ;;  %v2858_v34 = vand.u32 4294901760, %v2857_v59  ;;  %19162 = vst [vmem:[#allocation237_spill] sm:$0xff] %v14783_v18  ;;  %v14790_v41 = vand.u32 4294901760, %v299_v28  ;;  %v19167_v59 = vand.u32 4294901760, %v14627_v50 }
 0x2cd   : > { %v2864_v14 = vsub.f32 %v19149_v9, %v19159_v27  ;;  %8297 = vmatprep.mubr.msk.f32.mxu0 %vm10766_vm1, %v19138_v22  ;;  %v19163_v27 = vand.u32 4294901760, %v14574_v4  ;;  %19164 = vst [vmem:[#allocation235_spill] sm:$0xff] %v14788_v29  ;;  %v14800_v54 = vsub.f32 %v14709_v35, %v19168_v61  ;;  %v19169_v4 = vand.u32 4294901760, %v14722_v33 }
 0x2ce   : > { %19165 = vst [vmem:[#allocation240_spill] sm:$0xff] %v14790_v41  ;;  %v19171_v21 = vand.u32 4294901760, %v14607_v13  ;;  %v14813_v50 = vsub.f32 %v489_v63, %v14767_v53  ;;  %v14815_v61 = vand.u32 4294901760, %v298_v17  ;;  %v9002_v25 = vpack.c.bf16 %v2858_v34, %v2851_v15  ;;  %v305_v34 = vld [vmem:[%s10942_s23 + $0x240] sm:$0xff] }
 0x2cf   : > { %2546 = vmatmul.mubr.f32.gmra.mrb[6].mxu1 %v19163_v27  ;;  %v14805_v27 = vsub.f32 %v14722_v33, %v19169_v4  ;;  %v306_v4 = vld [vmem:[%s10942_s23 + $0x248] sm:$0xff]  ;;  %v14822_v13 = vsub.f32 %v291_v58, %v14783_v18  ;;  %v19176_v35 = vand.u32 4294901760, %v14635_v3  ;;  %v14829_v63 = vsub.f32 %v492_v8, %v14788_v29 }
 0x2d0   : > { %2555 = vmatprep.mubr.f32.mxu1 %v19167_v59  ;;  %8997 = vmatpush1.bf16.msra.mxu1 %v14680_v20  ;;  %19172 = vst [vmem:[#allocation241_spill] sm:$0xff] %v14813_v50  ;;  %v2865_v20 = vand.u32 4294901760, %v2864_v14  ;;  %v2872_v59 = vand.u32 4294901760, %v2871_v48  ;;  %19173 = vst [vmem:[#allocation78_spill] sm:$0xff] %v14815_v61  ;;  %v14832_v14 = vsub.f32 %v299_v28, %v14790_v41  ;;  %v19179_v48 = vand.u32 4294901760, %v19166_v31 }
 0x2d1   : > { %8298 = vmatmul.mubr.f32.gmra.mrb[6].mxu0 %v19171_v21  ;;  %8998 = vmatprep.subr.bf16.mxu1 %v17960_v45  ;;  %19174 = vst [vmem:[#allocation81_spill] sm:$0xff] %v14822_v13  ;;  %v14824_v21 = vand.u32 4294901760, %v495_v40  ;;  %19177 = vst [vmem:[#allocation12_spill] sm:$0xff] %v14829_v63  ;;  %v19180_v33 = vand.u32 4294901760, %v14671_v56  ;;  %v6265_v3 = vand.u32 4294901760, %v14800_v54  ;;  %v19181_v8 = vand.u32 4294901760, %v19170_v37 }
 0x2d2   : > { %8300 = vmatprep.mubr.msk.f32.mxu0 %vm10766_vm1, %v19138_v22  ;;  %19178 = vst [vmem:[#allocation97_spill] sm:$0xff] %v14832_v14  ;;  %v2878_v15 = vsub.f32 %v19166_v31, %v19179_v48  ;;  %v14848_v29 = vand.u32 4294901760, %v306_v4  ;;  %v19183_v48 = vand.u32 4294901760, %v14647_v55  ;;  %v19184_v58 = vand.u32 4294901760, %v14759_v10 }
 0x2d3   : > { %19175 = vst [vmem:[#allocation85_spill] sm:$0xff] %v14824_v21  ;;  %2561 = vmatmul.mubr.f32.gmra.mrb[8].mxu1 %v19176_v35  ;;  %v2599_v35 = vand.u32 4294901760, %v14805_v27  ;;  %v2885_v28 = vsub.f32 %v19170_v37, %v19181_v8  ;;  %v14858_v54 = vsub.f32 %v298_v17, %v14815_v61  ;;  %v313_v27 = vld [vmem:[%s10942_s23 + $0x280] sm:$0xff]  ;;  %v14865_v8 = vsub.f32 %v495_v40, %v14824_v21 }
 0x2d4   : > { %2570 = vmatprep.mubr.f32.mxu1 %v19180_v33  ;;  %9000 = vmatpush1.bf16.msra.mxu1 %v8999_v47  ;;  %19182 = vst [vmem:[#allocation87_spill] sm:$0xff] %v14848_v29  ;;  %v2604_v47 = vsub.f32 %v14759_v10, %v19184_v58  ;;  %v9005_v33 = vpack.c.bf16 %v2872_v59, %v2865_v20  ;;  %v498_v58 = vsel %vm466_vm0, %v309_v30, 0  ;;  %v19188_v56 = vand.u32 4294901760, %v14685_v19 }
 0x2d5   : > { %8301 = vmatmul.mubr.f32.gmra.mrb[8].mxu0 %v19183_v48  ;;  %9001 = vmatprep.subr.bf16.mxu1 %v17960_v45  ;;  %19185 = vst [vmem:[#allocation13_spill] sm:$0xff] %v14858_v54  ;;  %19186 = vst [vmem:[#allocation98_spill] sm:$0xff] %v14865_v8  ;;  %v14867_v48 = vand.u32 4294901760, %v305_v34  ;;  %v19189_v17 = vand.u32 4294901760, %v14781_v26  ;;  %v2879_v55 = vand.u32 4294901760, %v2878_v15  ;;  %v19190_v40 = vand.u32 4294901760, %v14706_v62 }
 0x2d6   : > { %8303 = vmatprep.mubr.msk.f32.mxu0 %vm10766_vm1, %v19138_v22  ;;  %v2886_v60 = vand.u32 4294901760, %v2885_v28  ;;  %v14881_v30 = vsub.f32 %v306_v4, %v14848_v29  ;;  %v14883_v19 = vand.u32 4294901760, %v313_v27  ;;  %v19193_v59 = vand.u32 4294901760, %v14701_v24  ;;  %v320_v28 = vld [vmem:[%s10942_s23 + $0x2b8] sm:$0xff] }
 0x2d7   : > { %19187 = vst [vmem:[#allocation100_spill] sm:$0xff] %v14867_v48  ;;  %2576 = vmatmul.mubr.f32.gmra.mrb[10].mxu1 %v19188_v56  ;;  %v2613_v20 = vsub.f32 %v14781_v26, %v19189_v17  ;;  %v312_v56 = vld [vmem:[%s10942_s23 + $0x278] sm:$0xff]  ;;  %v2605_v10 = vand.u32 4294901760, %v2604_v47  ;;  %v19194_v15 = vand.u32 4294901760, %v14813_v50  ;;  %v14895_v4 = vand.u32 4294901760, %v498_v58  ;;  %v323_v47 = vld [vmem:[%s10942_s23 + $0x2d0] sm:$0xff] }
 0x2d8   : > { %2585 = vmatprep.mubr.f32.mxu1 %v19190_v40  ;;  %9003 = vmatpush1.bf16.msra.mxu1 %v9002_v25  ;;  %19191 = vst [vmem:[#allocation14_spill] sm:$0xff] %v14881_v30  ;;  %19192 = vst [vmem:[#allocation108_spill] sm:$0xff] %v14883_v19  ;;  %v19196_v40 = vand.u32 4294901760, %v14822_v13  ;;  %v19198_v17 = vand.u32 4294901760, %v14740_v7  ;;  %v19200_v12 = vand.u32 4294901760, %v14832_v14  ;;  %v14921_v7 = vsub.f32 %v313_v27, %v14883_v19  ;;  %v327_v27 = vld [vmem:[%s10942_s23 + $0x2f0] sm:$0xff] }
 0x2d9   : > { %8304 = vmatmul.mubr.f32.gmra.mrb[10].mxu0 %v19193_v59  ;;  %v6274_v62 = vsub.f32 %v14813_v50, %v19194_v15  ;;  %9004 = vmatprep.subr.bf16.mxu1 %v17960_v45  ;;  %19195 = vst [vmem:[#allocation101_spill] sm:$0xff] %v14895_v4  ;;  %v14905_v59 = vsub.f32 %v305_v34, %v14867_v48  ;;  %v501_v15 = vsel %vm466_vm0, %v316_v42, 0  ;;  %v2614_v25 = vand.u32 4294901760, %v2613_v20 }
 0x2da   : > { %8306 = vmatprep.mubr.msk.f32.mxu0 %vm10766_vm1, %v19138_v22  ;;  %v2619_v24 = vsub.f32 %v14822_v13, %v19196_v40  ;;  %v19199_v50 = vand.u32 4294901760, %v14829_v63  ;;  %v2628_v40 = vsub.f32 %v14832_v14, %v19200_v12  ;;  %v14916_v13 = vand.u32 4294901760, %v312_v56  ;;  %19202 = vst [vmem:[#allocation111_spill] sm:$0xff] %v14921_v7 }
 0x2db   : > { %19197 = vst [vmem:[#allocation15_spill] sm:$0xff] %v14905_v59  ;;  %2591 = vmatmul.mubr.f32.gmra.mrb[12].mxu1 %v19198_v17  ;;  %v9008_v34 = vpack.c.bf16 %v2886_v60, %v2879_v55  ;;  %v14923_v20 = vand.u32 4294901760, %v320_v28  ;;  %v319_v17 = vld [vmem:[%s10942_s23 + $0x2b0] sm:$0xff]  ;;  %v19204_v12 = vand.u32 4294901760, %v14858_v54  ;;  %v14931_v60 = vsub.f32 %v498_v58, %v14895_v4 }
 0x2dc   : > { %v6284_v26 = vsub.f32 %v14829_v63, %v19199_v50  ;;  %19201 = vst [vmem:[#allocation109_spill] sm:$0xff] %v14916_v13  ;;  %2600 = vmatprep.mubr.f32.mxu1 %v2599_v35  ;;  %9006 = vmatpush1.bf16.msra.mxu1 %v9005_v33  ;;  %v6275_v50 = vand.u32 4294901760, %v6274_v62  ;;  %v14933_v33 = vand.u32 4294901760, %v501_v15  ;;  %v2620_v55 = vand.u32 4294901760, %v2619_v24  ;;  %v326_v24 = vld [vmem:[%s10942_s23 + $0x2e8] sm:$0xff] }
 0x2dd   : > { %19203 = vst [vmem:[#allocation115_spill] sm:$0xff] %v14923_v20  ;;  %8307 = vmatmul.mubr.f32.gmra.mrb[12].mxu0 %v6265_v3  ;;  %9007 = vmatprep.subr.bf16.mxu1 %v17960_v45  ;;  %v2634_v35 = vsub.f32 %v14858_v54, %v19204_v12  ;;  %19205 = vst [vmem:[#allocation16_spill] sm:$0xff] %v14931_v60  ;;  %v19207_v3 = vand.u32 4294901760, %v14865_v8  ;;  %v504_v12 = vsel %vm466_vm0, %v323_v47, 0  ;;  %v2629_v54 = vand.u32 4294901760, %v2628_v40 }
 0x2de   : > { %19206 = vst [vmem:[#allocation113_spill] sm:$0xff] %v14933_v33  ;;  %8309 = vmatprep.mubr.msk.f32.mxu0 %vm10766_vm1, %v19138_v22  ;;  %v6285_v58 = vand.u32 4294901760, %v6284_v26  ;;  %v14946_v63 = vsub.f32 %v312_v56, %v14916_v13  ;;  %v14948_v14 = vand.u32 4294901760, %v319_v17  ;;  %v14957_v47 = vsub.f32 %v320_v28, %v14923_v20  ;;  %v337_v56 = vld [vmem:[%s10942_s23 + $0x340] sm:$0xff] }
 0x2df   : > { %v14941_v62 = vsub.f32 %v14865_v8, %v19207_v3  ;;  %2606 = vmatmul.mubr.f32.gmra.mrb[14].mxu1 %v2605_v10  ;;  %v19210_v3 = vand.u32 4294901760, %v14881_v30  ;;  %v14959_v26 = vand.u32 4294901760, %v327_v27  ;;  %v334_v10 = vld [vmem:[%s10942_s23 + $0x328] sm:$0xff]  ;;  %v2635_v40 = vand.u32 4294901760, %v2634_v35  ;;  %v333_v20 = vld [vmem:[%s10942_s23 + $0x320] sm:$0xff] }
 0x2e0   : > { %19208 = vst [vmem:[#allocation118_spill] sm:$0xff] %v14946_v63  ;;  %19209 = vst [vmem:[#allocation17_spill] sm:$0xff] %v14948_v14  ;;  %2615 = vmatprep.mubr.f32.mxu1 %v2614_v25  ;;  %9009 = vmatpush1.bf16.msra.mxu1 %v9008_v34  ;;  %v14966_v34 = vsub.f32 %v501_v15, %v14933_v33  ;;  %v19215_v42 = vand.u32 4294901760, %v14905_v59  ;;  %v507_v35 = vsel %vm466_vm0, %v330_v51, 0  ;;  %v14983_v33 = vand.u32 4294901760, %v334_v10 }
 0x2e1   : > { %v2643_v8 = vsub.f32 %v14881_v30, %v19210_v3  ;;  %19211 = vst [vmem:[#allocation120_spill] sm:$0xff] %v14957_v47  ;;  %19212 = vst [vmem:[#allocation123_spill] sm:$0xff] %v14959_v26  ;;  %8310 = vmatmul.mubr.f32.gmra.mrb[14].mxu0 %v6275_v50  ;;  %9010 = vmatprep.subr.bf16.mxu1 %v17960_v45  ;;  %v14968_v3 = vand.u32 4294901760, %v504_v12  ;;  %v6295_v28 = vand.u32 4294901760, %v14941_v62  ;;  %v14976_v50 = vand.u32 4294901760, %v326_v24 }
 0x2e2   : > { %19213 = vst [vmem:[#allocation19_spill] sm:$0xff] %v14966_v34  ;;  %8312 = vmatprep.mubr.msk.f32.mxu0 %vm10766_vm1, %v19138_v22  ;;  %v2649_v30 = vsub.f32 %v14905_v59, %v19215_v42  ;;  %v14981_v15 = vsub.f32 %v319_v17, %v14948_v14  ;;  %19218 = vst [vmem:[#allocation127_spill] sm:$0xff] %v14983_v33  ;;  %v510_v62 = vsel %vm466_vm0, %v337_v56, 0  ;;  %v19219_v42 = vand.u32 4294901760, %v14921_v7  ;;  %v341_v56 = vld [vmem:[%s10942_s23 + $0x360] sm:$0xff] }
 0x2e3   : > { %19214 = vst [vmem:[#allocation121_spill] sm:$0xff] %v14968_v3  ;;  %19216 = vst [vmem:[#allocation125_spill] sm:$0xff] %v14976_v50  ;;  %2621 = vmatmul.mubr.f32.gmra.mrb[16].mxu1 %v2620_v55  ;;  %v2644_v13 = vand.u32 4294901760, %v2643_v8  ;;  %v14993_v25 = vsub.f32 %v327_v27, %v14959_v26  ;;  %v19221_v17 = vand.u32 4294901760, %v14931_v60  ;;  %v15003_v8 = vand.u32 4294901760, %v507_v35 }
 0x2e4   : > { %19217 = vst [vmem:[#allocation23_spill] sm:$0xff] %v14981_v15  ;;  %2630 = vmatprep.mubr.f32.mxu1 %v2629_v54  ;;  %9012 = vmatpush1.bf16.msra.mxu1 %v14128_v57  ;;  %v2658_v51 = vsub.f32 %v14921_v7, %v19219_v42  ;;  %v15001_v57 = vsub.f32 %v504_v12, %v14968_v3  ;;  %v15013_v42 = vand.u32 4294901760, %v510_v62  ;;  %v19227_v54 = vand.u32 4294901760, %v14946_v63  ;;  %v344_v7 = vld [vmem:[%s10942_s23 + $0x378] sm:$0xff] }
 0x2e5   : > { %19220 = vst [vmem:[#allocation132_spill] sm:$0xff] %v14993_v25  ;;  %8313 = vmatmul.mubr.f32.gmra.mrb[16].mxu0 %v6285_v58  ;;  %v6304_v59 = vsub.f32 %v14931_v60, %v19221_v17  ;;  %9013 = vmatprep.subr.bf16.mxu1 %v17960_v45  ;;  %19223 = vst [vmem:[#allocation130_spill] sm:$0xff] %v15003_v8  ;;  %v15009_v27 = vsub.f32 %v326_v24, %v14976_v50  ;;  %v15011_v58 = vand.u32 4294901760, %v333_v20 }
 0x2e6   : > { %19222 = vst [vmem:[#allocation24_spill] sm:$0xff] %v15001_v57  ;;  %8315 = vmatprep.mubr.msk.f32.mxu0 %vm10766_vm1, %v19138_v22  ;;  %19226 = vst [vmem:[#allocation135_spill] sm:$0xff] %v15013_v42  ;;  %v2650_v17 = vand.u32 4294901760, %v2649_v30  ;;  %v2664_v12 = vsub.f32 %v14946_v63, %v19227_v54  ;;  %v15020_v60 = vsub.f32 %v334_v10, %v14983_v33  ;;  %v2659_v24 = vand.u32 4294901760, %v2658_v51  ;;  %v340_v54 = vld [vmem:[%s10942_s23 + $0x358] sm:$0xff]  ;;  %v351_v51 = vld [vmem:[%s10942_s23 + $0x3b0] sm:$0xff] }
 0x2e7   : > { %19224 = vst [vmem:[#allocation133_spill] sm:$0xff] %v15009_v27  ;;  %19225 = vst [vmem:[#allocation30_spill] sm:$0xff] %v15011_v58  ;;  %2636 = vmatmul.mubr.f32.gmra.mrb[18].mxu1 %v2635_v40  ;;  %v19229_v50 = vand.u32 4294901760, %v14957_v47  ;;  %v15028_v3 = vand.u32 4294901760, %v341_v56  ;;  %v6305_v55 = vand.u32 4294901760, %v6304_v59  ;;  %v19231_v63 = vand.u32 4294901760, %v14966_v34 }
 0x2e8   : > { %19228 = vst [vmem:[#allocation140_spill] sm:$0xff] %v15020_v60  ;;  %2645 = vmatprep.mubr.f32.mxu1 %v2644_v13  ;;  %9015 = vmatpush1.bf16.msra.mxu1 %v14161_v39  ;;  %v15037_v13 = vsub.f32 %v507_v35, %v15003_v8  ;;  %v15044_v59 = vsub.f32 %v333_v20, %v15011_v58  ;;  %v2665_v39 = vand.u32 4294901760, %v2664_v12  ;;  %v19235_v35 = vand.u32 4294901760, %v14981_v15 }
 0x2e9   : > { %v2673_v40 = vsub.f32 %v14957_v47, %v19229_v50  ;;  %19230 = vst [vmem:[#allocation34_spill] sm:$0xff] %v15028_v3  ;;  %8316 = vmatmul.mubr.f32.gmra.mrb[18].mxu0 %v6295_v28  ;;  %v6314_v10 = vsub.f32 %v14966_v34, %v19231_v63  ;;  %9016 = vmatprep.subr.bf16.mxu1 %v17960_v45  ;;  %v348_v50 = vld [vmem:[%s10942_s23 + $0x398] sm:$0xff]  ;;  %v513_v63 = vsel %vm466_vm0, %v344_v7, 0  ;;  %v15054_v47 = vand.u32 4294901760, %v340_v54 }
 0x2ea   : > { %19232 = vst [vmem:[#allocation138_spill] sm:$0xff] %v15037_v13  ;;  %8318 = vmatprep.mubr.msk.f32.mxu0 %vm10766_vm1, %v19138_v22  ;;  %19233 = vst [vmem:[#allocation141_spill] sm:$0xff] %v15044_v59  ;;  %v15047_v28 = vsub.f32 %v510_v62, %v15013_v42  ;;  %v2679_v30 = vsub.f32 %v14981_v15, %v19235_v35  ;;  %v19237_v62 = vand.u32 4294901760, %v14993_v25  ;;  %v15064_v12 = vand.u32 4294901760, %v348_v50  ;;  %v347_v35 = vld [vmem:[%s10942_s23 + $0x390] sm:$0xff] }
 0x2eb   : > { %2651 = vmatmul.mubr.f32.gmra.mrb[20].mxu1 %v2650_v17  ;;  %19236 = vst [vmem:[#allocation143_spill] sm:$0xff] %v15054_v47  ;;  %v2674_v20 = vand.u32 4294901760, %v2673_v40  ;;  %v15062_v17 = vsub.f32 %v341_v56, %v15028_v3  ;;  %v6315_v34 = vand.u32 4294901760, %v6314_v10  ;;  %v19240_v15 = vand.u32 4294901760, %v15001_v57 }
 0x2ec   : > { %19234 = vst [vmem:[#allocation38_spill] sm:$0xff] %v15047_v28  ;;  %2660 = vmatprep.mubr.f32.mxu1 %v2659_v24  ;;  %9018 = vmatpush1.bf16.msra.mxu1 %v14198_v38  ;;  %v2688_v7 = vsub.f32 %v14993_v25, %v19237_v62  ;;  %19239 = vst [vmem:[#allocation44_spill] sm:$0xff] %v15064_v12  ;;  %v15072_v38 = vand.u32 4294901760, %v513_v63  ;;  %v355_v62 = vld [vmem:[%s10942_s23 + $0x3d0] sm:$0xff]  ;;  %v19242_v56 = vand.u32 4294901760, %v15009_v27  ;;  %v2680_v40 = vand.u32 4294901760, %v2679_v30 }
 0x2ed   : > { %19238 = vst [vmem:[#allocation148_spill] sm:$0xff] %v15062_v17  ;;  %8319 = vmatmul.mubr.f32.gmra.mrb[20].mxu0 %v6305_v55  ;;  %v6324_v24 = vsub.f32 %v15001_v57, %v19240_v15  ;;  %9019 = vmatprep.subr.bf16.mxu1 %v17960_v45  ;;  %v516_v15 = vsel %vm466_vm0, %v351_v51, 0  ;;  %v19243_v57 = vand.u32 4294901760, %v15020_v60  ;;  %v15087_v3 = vsub.f32 %v340_v54, %v15054_v47  ;;  %v354_v51 = vld [vmem:[%s10942_s23 + $0x3c8] sm:$0xff] }
 0x2ee   : > { %19241 = vst [vmem:[#allocation145_spill] sm:$0xff] %v15072_v38  ;;  %8321 = vmatprep.mubr.msk.f32.mxu0 %vm10766_vm1, %v19138_v22  ;;  %v2694_v55 = vsub.f32 %v15009_v27, %v19242_v56  ;;  %v15089_v58 = vand.u32 4294901760, %v347_v35  ;;  %v358_v56 = vld [vmem:[%s10942_s23 + $0x3e8] sm:$0xff]  ;;  %v2689_v27 = vand.u32 4294901760, %v2688_v7  ;;  %v15097_v30 = vand.u32 4294901760, %v355_v62 }
 0x2ef   : > { %2666 = vmatmul.mubr.f32.gmra.mrb[22].mxu1 %v2665_v39  ;;  %v2703_v42 = vsub.f32 %v15020_v60, %v19243_v57  ;;  %v15095_v39 = vsub.f32 %v348_v50, %v15064_v12  ;;  %v6325_v57 = vand.u32 4294901760, %v6324_v24  ;;  %v19247_v54 = vand.u32 4294901760, %v15037_v13  ;;  %v362_v7 = vld [vmem:[%s10942_s23 + $0x408] sm:$0xff] }
 0x2f0   : > { %19244 = vst [vmem:[#allocation47_spill] sm:$0xff] %v15089_v58  ;;  %2675 = vmatprep.mubr.f32.mxu1 %v2674_v20  ;;  %9021 = vmatpush1.bf16.msra.mxu1 %v14246_v43  ;;  %19246 = vst [vmem:[#allocation56_spill] sm:$0xff] %v15097_v30  ;;  %v15105_v20 = vsub.f32 %v513_v63, %v15072_v38  ;;  %v15107_v43 = vand.u32 4294901760, %v516_v15  ;;  %v2695_v50 = vand.u32 4294901760, %v2694_v55  ;;  %v19251_v25 = vand.u32 4294901760, %v15047_v28  ;;  %v365_v55 = vld [vmem:[%s10942_s23 + $0x420] sm:$0xff] }
 0x2f1   : > { %19245 = vst [vmem:[#allocation52_spill] sm:$0xff] %v15095_v39  ;;  %8322 = vmatmul.mubr.f32.gmra.mrb[22].mxu0 %v6315_v34  ;;  %v6334_v10 = vsub.f32 %v15037_v13, %v19247_v54  ;;  %9022 = vmatprep.subr.bf16.mxu1 %v17960_v45  ;;  %v19250_v34 = vand.u32 4294901760, %v15044_v59  ;;  %v519_v13 = vsel %vm466_vm0, %v358_v56, 0  ;;  %v2704_v63 = vand.u32 4294901760, %v2703_v42  ;;  %v19253_v47 = vld [vmem:[#allocation180_spill] sm:$0xff] }
 0x2f2   : > { %19248 = vst [vmem:[#allocation59_spill] sm:$0xff] %v15105_v20  ;;  %19249 = vst [vmem:[#allocation63_spill] sm:$0xff] %v15107_v43  ;;  %8324 = vmatprep.mubr.msk.f32.mxu0 %vm10766_vm1, %v19138_v22  ;;  %v6344_v54 = vsub.f32 %v15047_v28, %v19251_v25  ;;  %v15121_v38 = vsub.f32 %v347_v35, %v15089_v58  ;;  %v15123_v12 = vand.u32 4294901760, %v354_v51  ;;  %v15134_v42 = vand.u32 4294901760, %v362_v7  ;;  %v361_v56 = vld [vmem:[%s10942_s23 + $0x400] sm:$0xff] }
 0x2f3   : > { %v2709_v24 = vsub.f32 %v15044_v59, %v19250_v34  ;;  %2681 = vmatmul.mubr.f32.gmra.mrb[24].mxu1 %v2680_v40  ;;  %v19254_v34 = vand.u32 4294901760, %v15062_v17  ;;  %v15132_v40 = vsub.f32 %v355_v62, %v15097_v30  ;;  %v6335_v35 = vand.u32 4294901760, %v6334_v10 }
 0x2f4   : > { %19252 = vst [vmem:[#allocation68_spill] sm:$0xff] %v15123_v12  ;;  %2690 = vmatprep.mubr.f32.mxu1 %v2689_v27  ;;  %9024 = vmatpush1.bf16.msra.mxu1 %v19253_v47  ;;  %19256 = vst [vmem:[#allocation79_spill] sm:$0xff] %v15134_v42  ;;  %v15140_v47 = vsub.f32 %v516_v15, %v15107_v43  ;;  %v15142_v27 = vand.u32 4294901760, %v519_v13  ;;  %v6345_v62 = vand.u32 4294901760, %v6344_v54  ;;  %v522_v25 = vsel %vm466_vm0, %v365_v55, 0  ;;  %v19263_v54 = vld [vmem:[#allocation62_spill] sm:$0xff] }
 0x2f5   : > { %v2718_v59 = vsub.f32 %v15062_v17, %v19254_v34  ;;  %19255 = vst [vmem:[#allocation72_spill] sm:$0xff] %v15132_v40  ;;  %8325 = vmatmul.mubr.f32.gmra.mrb[24].mxu0 %v6325_v57  ;;  %9025 = vmatprep.subr.bf16.mxu1 %v17960_v45  ;;  %v2710_v34 = vand.u32 4294901760, %v2709_v24  ;;  %v19259_v57 = vand.u32 4294901760, %v15087_v3  ;;  %v15152_v28 = vsub.f32 %v354_v51, %v15123_v12 }
 0x2f6   : > { %19257 = vst [vmem:[#allocation82_spill] sm:$0xff] %v15140_v47  ;;  %19258 = vst [vmem:[#allocation89_spill] sm:$0xff] %v15142_v27  ;;  %8327 = vmatprep.mubr.msk.f32.mxu0 %vm10766_vm1, %v19138_v22  ;;  %v15154_v15 = vand.u32 4294901760, %v361_v56  ;;  %v19262_v43 = vand.u32 4294901760, %v15095_v39  ;;  %v15162_v55 = vsub.f32 %v362_v7, %v15134_v42 }
 0x2f7   : > { %2696 = vmatmul.mubr.f32.gmra.mrb[26].mxu1 %v2695_v50  ;;  %v2724_v10 = vsub.f32 %v15087_v3, %v19259_v57  ;;  %19260 = vst [vmem:[#allocation91_spill] sm:$0xff] %v15152_v28  ;;  %v2719_v17 = vand.u32 4294901760, %v2718_v59  ;;  %v17862_v50 = vand.u32 4294901760, %v15132_v40  ;;  %v19265_v57 = vand.u32 4294901760, %v15105_v20 }
 0x2f8   : > { %19261 = vst [vmem:[#allocation92_spill] sm:$0xff] %v15154_v15  ;;  %2705 = vmatprep.mubr.f32.mxu1 %v2704_v63  ;;  %v2733_v24 = vsub.f32 %v15095_v39, %v19262_v43  ;;  %9027 = vmatpush1.bf16.msra.mxu1 %v19263_v54  ;;  %19264 = vst [vmem:[#allocation93_spill] sm:$0xff] %v15162_v55  ;;  %v15170_v59 = vsub.f32 %v519_v13, %v15142_v27  ;;  %v15172_v43 = vand.u32 4294901760, %v522_v25 }
 0x2f9   : > { %8328 = vmatmul.mubr.f32.gmra.mrb[26].mxu0 %v6335_v35  ;;  %v6354_v51 = vsub.f32 %v15105_v20, %v19265_v57  ;;  %9028 = vmatprep.subr.bf16.mxu1 %v17960_v45  ;;  %v2725_v7 = vand.u32 4294901760, %v2724_v10  ;;  %v19268_v63 = vand.u32 4294901760, %v15121_v38  ;;  %v15181_v57 = vsub.f32 %v361_v56, %v15154_v15  ;;  %v19270_v20 = vld [vmem:[#allocation67_spill] sm:$0xff] }
 0x2fa   : > { %19266 = vst [vmem:[#allocation94_spill] sm:$0xff] %v15170_v59  ;;  %19267 = vst [vmem:[#allocation95_spill] sm:$0xff] %v15172_v43  ;;  %8330 = vmatprep.mubr.msk.f32.mxu0 %vm10766_vm1, %v19138_v22  ;;  %v2734_v60 = vand.u32 4294901760, %v2733_v24  ;;  %v2748_v13 = vsub.f32 %v15132_v40, %v17862_v50  ;;  %v19271_v39 = vand.u32 4294901760, %v15140_v47  ;;  %v17860_v54 = vand.u32 4294901760, %v15170_v59 }
 0x2fb   : > { %2711 = vmatmul.mubr.f32.gmra.mrb[28].mxu1 %v2710_v34  ;;  %v2739_v35 = vsub.f32 %v15121_v38, %v19268_v63  ;;  %19269 = vst [vmem:[#allocation96_spill] sm:$0xff] %v15181_v57  ;;  %v17861_v34 = vand.u32 4294901760, %v15162_v55  ;;  %v6355_v10 = vand.u32 4294901760, %v6354_v51  ;;  %v19272_v56 = vand.u32 4294901760, %v15152_v28 }
 0x2fc   : > { %2720 = vmatprep.mubr.f32.mxu1 %v2719_v17  ;;  %9030 = vmatpush1.bf16.msra.mxu1 %v19270_v20  ;;  %v6364_v63 = vsub.f32 %v15140_v47, %v19271_v39  ;;  %v15194_v17 = vsub.f32 %v522_v25, %v15172_v43  ;;  %v17859_v24 = vand.u32 4294901760, %v15181_v57  ;;  %v2749_v39 = vand.u32 4294901760, %v2748_v13 }
 0x2fd   : > { %8331 = vmatmul.mubr.f32.gmra.mrb[28].mxu0 %v6345_v62  ;;  %9031 = vmatprep.subr.bf16.mxu1 %v17960_v45  ;;  %v2740_v20 = vand.u32 4294901760, %v2739_v35  ;;  %v2754_v62 = vsub.f32 %v15152_v28, %v19272_v56  ;;  %v2763_v51 = vsub.f32 %v15162_v55, %v17861_v34  ;;  %v19286_v34 = vld [vmem:[#allocation28_spill] sm:$0xff] }
 0x2fe   : > { %8333 = vmatprep.mubr.msk.f32.mxu0 %vm10766_vm1, %v19138_v22  ;;  %v6365_v25 = vand.u32 4294901760, %v6364_v63  ;;  %v17858_v35 = vand.u32 4294901760, %v15194_v17  ;;  %v2769_v13 = vsub.f32 %v15181_v57, %v17859_v24  ;;  %v19282_v24 = vld [vmem:[#allocation49_spill] sm:$0xff] }
 0x2ff   : > { %2726 = vmatmul.mubr.f32.gmra.mrb[30].mxu1 %v2725_v7  ;;  %v6374_v7 = vsub.f32 %v15170_v59, %v17860_v54  ;;  %v19284_v54 = vld [vmem:[#allocation190_spill] sm:$0xff] }
 0x300   : > { %2735 = vmatprep.mubr.f32.mxu1 %v2734_v60  ;;  %9033 = vmatpush1.bf16.msra.mxu1 %v14543_v49  ;;  %v2755_v60 = vand.u32 4294901760, %v2754_v62  ;;  %v2764_v49 = vand.u32 4294901760, %v2763_v51  ;;  %v6384_v63 = vsub.f32 %v15194_v17, %v17858_v35  ;;  %v2770_v56 = vand.u32 4294901760, %v2769_v13  ;;  %v19273_v62 = vld [vmem:[#allocation164_spill] sm:$0xff]  ;;  %v19277_v35 = vld [vmem:[#allocation22_spill] sm:$0xff] }
 0x301   : > { %8334 = vmatmul.mubr.f32.gmra.mrb[30].mxu0 %v6355_v10  ;;  %9034 = vmatprep.subr.bf16.mxu1 %v17960_v45  ;;  %v6375_v10 = vand.u32 4294901760, %v6374_v7  ;;  %v19275_v51 = vld [vmem:[#allocation20_spill] sm:$0xff]  ;;  %v19276_v7 = vld [vmem:[#allocation21_spill] sm:$0xff] }
 0x302   : > { %8336 = vmatprep.mubr.msk.f32.mxu0 %vm10766_vm1, %v19138_v22  ;;  %v19278_v13 = vld [vmem:[#allocation48_spill] sm:$0xff] }
 0x303   : > { %2741 = vmatmul.mubr.f32.gmra.mrb[32].mxu1 %v2740_v20  ;;  %v6385_v20 = vand.u32 4294901760, %v6384_v63  ;;  %v19281_v63 = vld [vmem:[#allocation26_spill] sm:$0xff] }
 0x304   : > { %2750 = vmatprep.mubr.f32.mxu1 %v2749_v39  ;;  %v19274_v39 = vld [vmem:[#allocation18_spill] sm:$0xff] }
 0x305   : > { %8337 = vmatmul.mubr.f32.gmra.mrb[32].mxu0 %v6365_v25  ;;  %v9035_v25 = vpack.c.bf16 %v19275_v51, %v19274_v39 }
 0x306   : > { %8339 = vmatprep.mubr.msk.f32.mxu0 %vm10766_vm1, %v19138_v22 }
 0x307   : > { %2756 = vmatmul.mubr.f32.gmra.mrb[34].mxu1 %v2755_v60  ;;  %v9521_v60 = vpack.c.bf16 %v19277_v35, %v19276_v7 }
 0x308   : > { %2765 = vmatprep.mubr.f32.mxu1 %v2764_v49  ;;  %v19279_v49 = vld [vmem:[#allocation172_spill] sm:$0xff] }
 0x309   : > { %8340 = vmatmul.mubr.f32.gmra.mrb[34].mxu0 %v6375_v10  ;;  %v19280_v10 = vld [vmem:[#allocation25_spill] sm:$0xff] }
 0x30a   : > { %8342 = vmatprep.mubr.msk.f32.mxu0 %vm10766_vm1, %v19138_v22 }
 0x30b   : > { %2771 = vmatmul.mubr.f32.gmra.mrb[36].mxu1 %v2770_v56  ;;  %v9038_v56 = vpack.c.bf16 %v19281_v63, %v19280_v10 }
 0x30c   : > { %3001 = vmatprep.mubr.f32.mxu1 %v19273_v62  ;;  %v19359_v62 = vld [vmem:[#allocation217_spill] sm:$0xff] }
 0x30d   : > { %8343 = vmatmul.mubr.f32.gmra.mrb[36].mxu0 %v6385_v20  ;;  %v19283_v20 = vld [vmem:[#allocation53_spill] sm:$0xff] }
 0x30e   : > { %8349 = vmatprep.mubr.msk.f32.mxu0 %vm10766_vm1, %v19138_v22 }
 0x30f   : > { %3003 = vmatmul.mubr.f32.vlgmr.msra.gmra.mrb[0].mxu1 %v19278_v13  ;;  %v19357_v13 = vld [vmem:[#allocation74_spill] sm:$0xff] }
 0x310   : > { %9036 = vmatpush1.bf16.msra.mxu1 %v9035_v25  ;;  %3008 = vmatprep.mubr.f32.mxu1 %v19279_v49  ;;  %v19285_v25 = vld [vmem:[#allocation27_spill] sm:$0xff]  ;;  %v19287_v49 = vld [vmem:[#allocation57_spill] sm:$0xff] }
 0x311   : > { %8350 = vmatmul.mubr.f32.vlgmr.msra.gmra.mrb[0].mxu0 %v19282_v24  ;;  %9037 = vmatprep.subr.bf16.mxu1 %v17960_v45  ;;  %v9041_v50 = vpack.c.bf16 %v19286_v34, %v19285_v25  ;;  %v19289_v24 = vld [vmem:[#allocation64_spill] sm:$0xff] }
 0x312   : > { %9522 = vmatpush3.bf16.msra.mxu0 %v9521_v60  ;;  %8352 = vmatprep.mubr.msk.f32.mxu0 %vm10766_vm1, %v19138_v22  ;;  %v19288_v60 = vld [vmem:[#allocation61_spill] sm:$0xff] }
 0x313   : > { %3010 = vmatmul.mubr.f32.gmra.mrb[2].mxu1 %v19283_v20  ;;  %9523 = vmatprep.subr.bf16.mxu0 %v17960_v45  ;;  %v19290_v20 = vld [vmem:[#allocation192_spill] sm:$0xff] }
 0x314   : > { %9039 = vmatpush1.bf16.msra.mxu1 %v9038_v56  ;;  %3015 = vmatprep.mubr.f32.mxu1 %v19284_v54  ;;  %v9044_v56 = vpack.c.bf16 %v19104_v16, %v19100_v5  ;;  %v19292_v54 = vld [vmem:[#allocation69_spill] sm:$0xff] }
 0x315   : > { %8353 = vmatmul.mubr.f32.gmra.mrb[2].mxu0 %v19287_v49  ;;  %9040 = vmatprep.subr.bf16.mxu1 %v17960_v45  ;;  %v19291_v49 = vld [vmem:[#allocation66_spill] sm:$0xff] }
 0x316   : > { %8355 = vmatprep.mubr.msk.f32.mxu0 %vm10766_vm1, %v19138_v22 }
 0x317   : > { %3017 = vmatmul.mubr.f32.gmra.mrb[4].mxu1 %v19288_v60  ;;  %v9047_v60 = vpack.c.bf16 %v19120_v52, %v19118_v44 }
 0x318   : > { %3022 = vmatprep.mubr.f32.mxu1 %v19289_v24  ;;  %9042 = vmatpush1.bf16.msra.mxu1 %v9041_v50  ;;  %v19293_v24 = vld [vmem:[#allocation195_spill] sm:$0xff]  ;;  %v19294_v50 = vld [vmem:[#allocation70_spill] sm:$0xff] }
 0x319   : > { %8356 = vmatmul.mubr.f32.gmra.mrb[4].mxu0 %v19290_v20  ;;  %9043 = vmatprep.subr.bf16.mxu1 %v17960_v45  ;;  %v19352_v20 = vld [vmem:[#allocation43_spill] sm:$0xff] }
 0x31a   : > { %8358 = vmatprep.mubr.msk.f32.mxu0 %vm10766_vm1, %v19138_v22 }
 0x31b   : > { %3024 = vmatmul.mubr.f32.gmra.mrb[6].mxu1 %v19291_v49  ;;  %v9050_v49 = vpack.c.bf16 %v19139_v1, %v19134_v6 }
 0x31c   : > { %3029 = vmatprep.mubr.f32.mxu1 %v19292_v54  ;;  %9045 = vmatpush1.bf16.msra.mxu1 %v9044_v56  ;;  %v19295_v54 = vld [vmem:[#allocation206_spill] sm:$0xff]  ;;  %v9053_v56 = vpack.c.bf16 %v19150_v11, %v19149_v9 }
 0x31d   : > { %8359 = vmatmul.mubr.f32.gmra.mrb[6].mxu0 %v19293_v24  ;;  %9046 = vmatprep.subr.bf16.mxu1 %v17960_v45  ;;  %v19351_v24 = vld [vmem:[#allocation71_spill] sm:$0xff] }
 0x31e   : > { %8361 = vmatprep.mubr.msk.f32.mxu0 %vm10766_vm1, %v19138_v22 }
 0x31f   : > { %3031 = vmatmul.mubr.f32.gmra.mrb[8].mxu1 %v19294_v50  ;;  %v19350_v50 = vld [vmem:[#allocation199_spill] sm:$0xff] }
 0x320   : > { %3036 = vmatprep.mubr.f32.mxu1 %v14552_v46  ;;  %9048 = vmatpush1.bf16.msra.mxu1 %v9047_v60  ;;  %v9056_v60 = vpack.c.bf16 %v19170_v37, %v19166_v31  ;;  %v19349_v46 = vld [vmem:[#allocation193_spill] sm:$0xff] }
 0x321   : > { %8362 = vmatmul.mubr.f32.gmra.mrb[8].mxu0 %v19295_v54  ;;  %9049 = vmatprep.subr.bf16.mxu1 %v17960_v45  ;;  %v19332_v54 = vld [vmem:[#allocation158_spill] sm:$0xff] }
 0x322   : > { %8364 = vmatprep.mubr.msk.f32.mxu0 %vm10766_vm1, %v19138_v22 }
 0x323   : > { %3038 = vmatmul.mubr.f32.gmra.mrb[10].mxu1 %v14561_v23  ;;  %v19331_v23 = vld [vmem:[#allocation40_spill] sm:$0xff] }
 0x324   : > { %3043 = vmatprep.mubr.f32.mxu1 %v14578_v2  ;;  %9051 = vmatpush1.bf16.msra.mxu1 %v9050_v49  ;;  %v19296_v2 = vld [vmem:[#allocation83_spill] sm:$0xff] }
 0x325   : > { %8365 = vmatmul.mubr.f32.gmra.mrb[10].mxu0 %v14576_v0  ;;  %9052 = vmatprep.subr.bf16.mxu1 %v17960_v45  ;;  %v19297_v49 = vld [vmem:[#allocation223_spill] sm:$0xff] }
 0x326   : > { %8367 = vmatprep.mubr.msk.f32.mxu0 %vm10766_vm1, %v19138_v22  ;;  %v19298_v0 = vld [vmem:[#allocation227_spill] sm:$0xff] }
 0x327   : > { %3045 = vmatmul.mubr.f32.gmra.mrb[12].mxu1 %v14611_v36  ;;  %v19302_v36 = vld [vmem:[#allocation235_spill] sm:$0xff] }
 0x328   : > { %3050 = vmatprep.mubr.f32.mxu1 %v14674_v32  ;;  %9054 = vmatpush1.bf16.msra.mxu1 %v9053_v56  ;;  %v19299_v56 = vld [vmem:[#allocation117_spill] sm:$0xff] }
 0x329   : > { %8368 = vmatmul.mubr.f32.gmra.mrb[12].mxu0 %v19296_v2  ;;  %9055 = vmatprep.subr.bf16.mxu1 %v17960_v45  ;;  %v19300_v2 = vld [vmem:[#allocation114_spill] sm:$0xff] }
 0x32a   : > { %8370 = vmatprep.mubr.msk.f32.mxu0 %vm10766_vm1, %v19138_v22  ;;  %v19301_v32 = vpack.c.bf16 %v19299_v56, %v19300_v2 }
 0x32b   : > { %3052 = vmatmul.mubr.f32.gmra.mrb[14].mxu1 %v19297_v49  ;;  %v19326_v49 = vld [vmem:[#allocation152_spill] sm:$0xff] }
 0x32c   : > { %3057 = vmatprep.mubr.f32.mxu1 %v19298_v0  ;;  %9057 = vmatpush1.bf16.msra.mxu1 %v9056_v60  ;;  %v19303_v60 = vld [vmem:[#allocation126_spill] sm:$0xff] }
 0x32d   : > { %8371 = vmatmul.mubr.f32.gmra.mrb[14].mxu0 %v14767_v53  ;;  %9058 = vmatprep.subr.bf16.mxu1 %v17960_v45  ;;  %v19304_v53 = vld [vmem:[#allocation122_spill] sm:$0xff] }
 0x32e   : > { %8373 = vmatprep.mubr.msk.f32.mxu0 %vm10766_vm1, %v19138_v22  ;;  %v19321_v0 = vld [vmem:[#allocation150_spill] sm:$0xff] }
 0x32f   : > { %3059 = vmatmul.mubr.f32.gmra.mrb[16].mxu1 %v14783_v18  ;;  %v19305_v18 = vpack.c.bf16 %v19303_v60, %v19304_v53  ;;  %v19376_v60 = vld [vmem:[#allocation173_spill] sm:$0xff]  ;;  %v19377_v53 = vld [vmem:[#allocation98_spill] sm:$0xff] }
 0x330   : > { %3064 = vmatprep.mubr.f32.mxu1 %v14790_v41  ;;  %9060 = vmatpush1.bf16.msra.mxu1 %v19301_v32  ;;  %v19306_v32 = vld [vmem:[#allocation134_spill] sm:$0xff]  ;;  %v19312_v41 = vld [vmem:[#allocation137_spill] sm:$0xff] }
 0x331   : > { %8374 = vmatmul.mubr.f32.gmra.mrb[16].mxu0 %v19302_v36  ;;  %9061 = vmatprep.subr.bf16.mxu1 %v17960_v45  ;;  %v19307_v36 = vld [vmem:[#allocation129_spill] sm:$0xff] }
 0x332   : > { %8376 = vmatprep.mubr.msk.f32.mxu0 %vm10766_vm1, %v19138_v22 }
 0x333   : > { %3066 = vmatmul.mubr.f32.gmra.mrb[18].mxu1 %v14815_v61  ;;  %v19308_v61 = vpack.c.bf16 %v19306_v32, %v19307_v36  ;;  %v19373_v32 = vld [vmem:[#allocation12_spill] sm:$0xff]  ;;  %v19375_v36 = vld [vmem:[#allocation14_spill] sm:$0xff] }
 0x334   : > { %3071 = vmatprep.mubr.f32.mxu1 %v14848_v29  ;;  %9063 = vmatpush1.bf16.msra.mxu1 %v19305_v18  ;;  %v19309_v18 = vld [vmem:[#allocation109_spill] sm:$0xff]  ;;  %v19311_v29 = vld [vmem:[#allocation142_spill] sm:$0xff] }
 0x335   : > { %8377 = vmatmul.mubr.f32.gmra.mrb[18].mxu0 %v14824_v21  ;;  %9064 = vmatprep.subr.bf16.mxu1 %v17960_v45  ;;  %v19310_v21 = vld [vmem:[#allocation115_spill] sm:$0xff] }
 0x336   : > { %8379 = vmatprep.mubr.msk.f32.mxu0 %vm10766_vm1, %v19138_v22 }
 0x337   : > { %3073 = vmatmul.mubr.f32.gmra.mrb[20].mxu1 %v14867_v48  ;;  %v19313_v48 = vpack.c.bf16 %v19311_v29, %v19312_v41  ;;  %v19371_v29 = vld [vmem:[#allocation97_spill] sm:$0xff]  ;;  %v19372_v41 = vld [vmem:[#allocation167_spill] sm:$0xff] }
 0x338   : > { %3078 = vmatprep.mubr.f32.mxu1 %v14883_v19  ;;  %9066 = vmatpush1.bf16.msra.mxu1 %v19308_v61  ;;  %v19314_v19 = vld [vmem:[#allocation113_spill] sm:$0xff]  ;;  %v19315_v61 = vld [vmem:[#allocation32_spill] sm:$0xff] }
 0x339   : > { %8380 = vmatmul.mubr.f32.gmra.mrb[20].mxu0 %v14895_v4  ;;  %9067 = vmatprep.subr.bf16.mxu1 %v17960_v45  ;;  %v19316_v4 = vld [vmem:[#allocation232_spill] sm:$0xff] }
 0x33a   : > { %8382 = vmatprep.mubr.msk.f32.mxu0 %vm10766_vm1, %v19138_v22 }
 0x33b   : > { %3080 = vmatmul.mubr.f32.gmra.mrb[22].mxu1 %v19309_v18  ;;  %v19317_v18 = vpack.c.bf16 %v19315_v61, %v19316_v4  ;;  %v19368_v61 = vld [vmem:[#allocation46_spill] sm:$0xff]  ;;  %v19369_v4 = vld [vmem:[#allocation241_spill] sm:$0xff] }
 0x33c   : > { %3085 = vmatprep.mubr.f32.mxu1 %v19310_v21  ;;  %9069 = vmatpush1.bf16.msra.mxu1 %v19313_v48  ;;  %v19318_v21 = vld [vmem:[#allocation121_spill] sm:$0xff] }
 0x33d   : > { %8383 = vmatmul.mubr.f32.gmra.mrb[22].mxu0 %v19314_v19  ;;  %9070 = vmatprep.subr.bf16.mxu1 %v17960_v45  ;;  %v19319_v48 = vld [vmem:[#allocation125_spill] sm:$0xff]  ;;  %v19320_v19 = vld [vmem:[#allocation35_spill] sm:$0xff] }
 0x33e   : > { %8385 = vmatprep.mubr.msk.f32.mxu0 %vm10766_vm1, %v19138_v22 }
 0x33f   : > { %3087 = vmatmul.mubr.f32.gmra.mrb[24].mxu1 %v14948_v14  ;;  %v19322_v14 = vpack.c.bf16 %v19320_v19, %v19321_v0  ;;  %v19365_v19 = vld [vmem:[#allocation221_spill] sm:$0xff] }
 0x340   : > { %3092 = vmatprep.mubr.f32.mxu1 %v14959_v26  ;;  %9072 = vmatpush1.bf16.msra.mxu1 %v19317_v18  ;;  %v19323_v18 = vld [vmem:[#allocation30_spill] sm:$0xff]  ;;  %v19325_v26 = vld [vmem:[#allocation37_spill] sm:$0xff] }
 0x341   : > { %8386 = vmatmul.mubr.f32.gmra.mrb[24].mxu0 %v19318_v21  ;;  %9073 = vmatprep.subr.bf16.mxu1 %v17960_v45  ;;  %v19324_v21 = vld [vmem:[#allocation34_spill] sm:$0xff]  ;;  %v19367_v0 = vld [vmem:[#allocation233_spill] sm:$0xff] }
 0x342   : > { %8388 = vmatprep.mubr.msk.f32.mxu0 %vm10766_vm1, %v19138_v22 }
 0x343   : > { %3094 = vmatmul.mubr.f32.gmra.mrb[26].mxu1 %v19319_v48  ;;  %v19327_v48 = vpack.c.bf16 %v19325_v26, %v19326_v49  ;;  %v19363_v26 = vld [vmem:[#allocation220_spill] sm:$0xff]  ;;  %v19364_v49 = vld [vmem:[#allocation45_spill] sm:$0xff] }
 0x344   : > { %3099 = vmatprep.mubr.f32.mxu1 %v14983_v33  ;;  %9075 = vmatpush1.bf16.msra.mxu1 %v19322_v14  ;;  %v19328_v33 = vld [vmem:[#allocation135_spill] sm:$0xff] }
 0x345   : > { %8389 = vmatmul.mubr.f32.gmra.mrb[26].mxu0 %v15003_v8  ;;  %9076 = vmatprep.subr.bf16.mxu1 %v17960_v45  ;;  %v19329_v14 = vld [vmem:[#allocation143_spill] sm:$0xff]  ;;  %v19330_v8 = vld [vmem:[#allocation44_spill] sm:$0xff] }
 0x346   : > { %8391 = vmatprep.mubr.msk.f32.mxu0 %vm10766_vm1, %v19138_v22 }
 0x347   : > { %3101 = vmatmul.mubr.f32.gmra.mrb[28].mxu1 %v19323_v18  ;;  %v19333_v18 = vpack.c.bf16 %v19331_v23, %v19332_v54  ;;  %v19360_v23 = vld [vmem:[#allocation165_spill] sm:$0xff]  ;;  %v19361_v54 = vld [vmem:[#allocation211_spill] sm:$0xff] }
 0x348   : > { %3106 = vmatprep.mubr.f32.mxu1 %v19324_v21  ;;  %9078 = vmatpush1.bf16.msra.mxu1 %v19327_v48  ;;  %v19334_v21 = vld [vmem:[#allocation145_spill] sm:$0xff]  ;;  %v19335_v48 = vld [vmem:[#allocation63_spill] sm:$0xff] }
 0x349   : > { %8392 = vmatmul.mubr.f32.gmra.mrb[28].mxu0 %v19328_v33  ;;  %9079 = vmatprep.subr.bf16.mxu1 %v17960_v45  ;;  %v19348_v33 = vld [vmem:[#allocation42_spill] sm:$0xff] }
 0x34a   : > { %8394 = vmatprep.mubr.msk.f32.mxu0 %vm10766_vm1, %v19138_v22 }
 0x34b   : > { %3108 = vmatmul.mubr.f32.gmra.mrb[30].mxu1 %v19329_v14  ;;  %v19347_v14 = vld [vmem:[#allocation198_spill] sm:$0xff] }
 0x34c   : > { %3113 = vmatprep.mubr.f32.mxu1 %v19330_v8  ;;  %9081 = vmatpush1.bf16.msra.mxu1 %v19333_v18  ;;  %v19336_v18 = vld [vmem:[#allocation171_spill] sm:$0xff]  ;;  %v19346_v8 = vld [vmem:[#allocation65_spill] sm:$0xff] }
 0x34d   : > { %8395 = vmatmul.mubr.f32.gmra.mrb[30].mxu0 %v19334_v21  ;;  %9082 = vmatprep.subr.bf16.mxu1 %v17960_v45  ;;  %v19345_v21 = vld [vmem:[#allocation185_spill] sm:$0xff] }
 0x34e   : > { %8397 = vmatprep.mubr.msk.f32.mxu0 %vm10766_vm1, %v19138_v22 }
 0x34f   : > { %3115 = vmatmul.mubr.f32.gmra.mrb[32].mxu1 %v15089_v58  ;;  %v19344_v58 = vld [vmem:[#allocation187_spill] sm:$0xff] }
 0x350   : > { %3120 = vmatprep.mubr.f32.mxu1 %v15097_v30  ;;  %v19338_v30 = vld [vmem:[#allocation41_spill] sm:$0xff] }
 0x351   : > { %8398 = vmatmul.mubr.f32.gmra.mrb[32].mxu0 %v19335_v48  ;;  %v19337_v48 = vld [vmem:[#allocation50_spill] sm:$0xff] }
 0x352   : > { %8400 = vmatprep.mubr.msk.f32.mxu0 %vm10766_vm1, %v19138_v22 }
 0x353   : > { %3122 = vmatmul.mubr.f32.gmra.mrb[34].mxu1 %v15123_v12  ;;  %v19339_v12 = vld [vmem:[#allocation182_spill] sm:$0xff] }
 0x354   : > { %3127 = vmatprep.mubr.f32.mxu1 %v15134_v42  ;;  %v19340_v42 = vld [vmem:[#allocation51_spill] sm:$0xff] }
 0x355   : > { %8401 = vmatmul.mubr.f32.gmra.mrb[34].mxu0 %v15142_v27  ;;  %v19341_v27 = vld [vmem:[#allocation155_spill] sm:$0xff] }
 0x356   : > { %8403 = vmatprep.mubr.msk.f32.mxu0 %vm10766_vm1, %v19138_v22 }
 0x357   : > { %3129 = vmatmul.mubr.f32.gmra.mrb[36].mxu1 %v15154_v15  ;;  %v19342_v15 = vld [vmem:[#allocation60_spill] sm:$0xff] }
 0x358   : > { %3264 = vmatprep.mubr.f32.mxu1 %v19336_v18 }
 0x359   : > { %8404 = vmatmul.mubr.f32.gmra.mrb[36].mxu0 %v15172_v43  ;;  %v19343_v43 = vld [vmem:[#allocation161_spill] sm:$0xff] }
 0x35a   : > { %8410 = vmatprep.mubr.msk.f32.mxu0 %vm10766_vm1, %v19138_v22 }
 0x35b   : > { %3267 = vmatmul.mubr.f32.vlgmr.msra.gmra.mrb[0].mxu1 %v19337_v48 }
 0x35c   : > { %9084 = vmatpush1.bf16.msra.mxu1 %v19338_v30  ;;  %3273 = vmatprep.mubr.f32.mxu1 %v19339_v12  ;;  %v19356_v30 = vld [vmem:[#allocation163_spill] sm:$0xff] }
 0x35d   : > { %8411 = vmatmul.mubr.f32.vlgmr.msra.gmra.mrb[0].mxu0 %v19340_v42  ;;  %9085 = vmatprep.subr.bf16.mxu1 %v17960_v45 }
 0x35e   : > { %9525 = vmatpush3.bf16.msra.mxu0 %v19341_v27  ;;  %8413 = vmatprep.mubr.msk.f32.mxu0 %vm10766_vm1, %v19138_v22  ;;  %v19355_v27 = vld [vmem:[#allocation214_spill] sm:$0xff] }
 0x35f   : > { %3276 = vmatmul.mubr.f32.gmra.mrb[2].mxu1 %v19342_v15  ;;  %9526 = vmatprep.subr.bf16.mxu0 %v17960_v45 }
 0x360   : > { %9087 = vmatpush1.bf16.msra.mxu1 %v19343_v43  ;;  %3282 = vmatprep.mubr.f32.mxu1 %v19344_v58  ;;  %v19353_v43 = vld [vmem:[#allocation202_spill] sm:$0xff] }
 0x361   : > { %8414 = vmatmul.mubr.f32.gmra.mrb[2].mxu0 %v19345_v21  ;;  %9088 = vmatprep.subr.bf16.mxu1 %v17960_v45 }
 0x362   : > { %8416 = vmatprep.mubr.msk.f32.mxu0 %vm10766_vm1, %v19138_v22 }
 0x363   : > { %3285 = vmatmul.mubr.f32.gmra.mrb[4].mxu1 %v19346_v8 }
 0x364   : > { %3291 = vmatprep.mubr.f32.mxu1 %v19347_v14  ;;  %9090 = vmatpush1.bf16.msra.mxu1 %v19348_v33  ;;  %v19354_v33 = vld [vmem:[#allocation203_spill] sm:$0xff] }
 0x365   : > { %8417 = vmatmul.mubr.f32.gmra.mrb[4].mxu0 %v19349_v46  ;;  %9091 = vmatprep.subr.bf16.mxu1 %v17960_v45 }
 0x366   : > { %8419 = vmatprep.mubr.msk.f32.mxu0 %vm10766_vm1, %v19138_v22 }
 0x367   : > { %3294 = vmatmul.mubr.f32.gmra.mrb[6].mxu1 %v19350_v50 }
 0x368   : > { %3300 = vmatprep.mubr.f32.mxu1 %v19351_v24  ;;  %9093 = vmatpush1.bf16.msra.mxu1 %v19352_v20  ;;  %v19358_v20 = vld [vmem:[#allocation76_spill] sm:$0xff] }
 0x369   : > { %8420 = vmatmul.mubr.f32.gmra.mrb[6].mxu0 %v19353_v43  ;;  %9094 = vmatprep.subr.bf16.mxu1 %v17960_v45 }
 0x36a   : > { %8422 = vmatprep.mubr.msk.f32.mxu0 %vm10766_vm1, %v19138_v22 }
 0x36b   : > { %3303 = vmatmul.mubr.f32.gmra.mrb[8].mxu1 %v19354_v33 }
 0x36c   : > { %3309 = vmatprep.mubr.f32.mxu1 %v19355_v27  ;;  %9096 = vmatpush1.bf16.msra.mxu1 %v19356_v30  ;;  %v19362_v30 = vld [vmem:[#allocation80_spill] sm:$0xff] }
 0x36d   : > { %8423 = vmatmul.mubr.f32.gmra.mrb[8].mxu0 %v19357_v13  ;;  %9097 = vmatprep.subr.bf16.mxu1 %v17960_v45 }
 0x36e   : > { %8425 = vmatprep.mubr.msk.f32.mxu0 %vm10766_vm1, %v19138_v22 }
 0x36f   : > { %3312 = vmatmul.mubr.f32.gmra.mrb[10].mxu1 %v19358_v20 }
 0x370   : > { %3318 = vmatprep.mubr.f32.mxu1 %v19359_v62  ;;  %9099 = vmatpush1.bf16.msra.mxu1 %v19360_v23  ;;  %v19366_v23 = vld [vmem:[#allocation229_spill] sm:$0xff] }
 0x371   : > { %8426 = vmatmul.mubr.f32.gmra.mrb[10].mxu0 %v19361_v54  ;;  %9100 = vmatprep.subr.bf16.mxu1 %v17960_v45 }
 0x372   : > { %8428 = vmatprep.mubr.msk.f32.mxu0 %vm10766_vm1, %v19138_v22 }
 0x373   : > { %3321 = vmatmul.mubr.f32.gmra.mrb[12].mxu1 %v19362_v30 }
 0x374   : > { %3327 = vmatprep.mubr.f32.mxu1 %v19363_v26  ;;  %9102 = vmatpush1.bf16.msra.mxu1 %v19364_v49  ;;  %v19370_v49 = vld [vmem:[#allocation81_spill] sm:$0xff] }
 0x375   : > { %8429 = vmatmul.mubr.f32.gmra.mrb[12].mxu0 %v19365_v19  ;;  %9103 = vmatprep.subr.bf16.mxu1 %v17960_v45 }
 0x376   : > { %8431 = vmatprep.mubr.msk.f32.mxu0 %vm10766_vm1, %v19138_v22 }
 0x377   : > { %3330 = vmatmul.mubr.f32.gmra.mrb[14].mxu1 %v19366_v23 }
 0x378   : > { %3336 = vmatprep.mubr.f32.mxu1 %v19367_v0  ;;  %9105 = vmatpush1.bf16.msra.mxu1 %v19368_v61  ;;  %v19374_v61 = vld [vmem:[#allocation13_spill] sm:$0xff] }
 0x379   : > { %8432 = vmatmul.mubr.f32.gmra.mrb[14].mxu0 %v19369_v4  ;;  %9106 = vmatprep.subr.bf16.mxu1 %v17960_v45 }
 0x37a   : > { %8434 = vmatprep.mubr.msk.f32.mxu0 %vm10766_vm1, %v19138_v22 }
 0x37b   : > { %3339 = vmatmul.mubr.f32.gmra.mrb[16].mxu1 %v19370_v49  ;;  %v19381_v49 = vld [vmem:[#allocation16_spill] sm:$0xff] }
 0x37c   : > { %3345 = vmatprep.mubr.f32.mxu1 %v19371_v29  ;;  %9108 = vmatpush1.bf16.msra.mxu1 %v19372_v41  ;;  %v19378_v41 = vld [vmem:[#allocation15_spill] sm:$0xff] }
 0x37d   : > { %8435 = vmatmul.mubr.f32.gmra.mrb[16].mxu0 %v19373_v32  ;;  %9109 = vmatprep.subr.bf16.mxu1 %v17960_v45  ;;  %v19379_v32 = vld [vmem:[#allocation111_spill] sm:$0xff] }
 0x37e   : > { %8437 = vmatprep.mubr.msk.f32.mxu0 %vm10766_vm1, %v19138_v22  ;;  %v19380_v29 = vld [vmem:[#allocation175_spill] sm:$0xff] }
 0x37f   : > { %3348 = vmatmul.mubr.f32.gmra.mrb[18].mxu1 %v19374_v61  ;;  %v19385_v61 = vld [vmem:[#allocation19_spill] sm:$0xff] }
 0x380   : > { %3354 = vmatprep.mubr.f32.mxu1 %v19375_v36  ;;  %9111 = vmatpush1.bf16.msra.mxu1 %v19376_v60  ;;  %v19382_v60 = vld [vmem:[#allocation118_spill] sm:$0xff] }
 0x381   : > { %8438 = vmatmul.mubr.f32.gmra.mrb[18].mxu0 %v19377_v53  ;;  %9112 = vmatprep.subr.bf16.mxu1 %v17960_v45  ;;  %v19383_v53 = vld [vmem:[#allocation120_spill] sm:$0xff]  ;;  %v19384_v36 = vld [vmem:[#allocation54_spill] sm:$0xff] }
 0x382   : > { %8440 = vmatprep.mubr.msk.f32.mxu0 %vm10766_vm1, %v19138_v22 }
 0x383   : > { %3357 = vmatmul.mubr.f32.gmra.mrb[20].mxu1 %v19378_v41  ;;  %v19389_v41 = vld [vmem:[#allocation24_spill] sm:$0xff] }
 0x384   : > { %3363 = vmatprep.mubr.f32.mxu1 %v19379_v32  ;;  %9114 = vmatpush1.bf16.msra.mxu1 %v19380_v29  ;;  %v19386_v29 = vld [vmem:[#allocation23_spill] sm:$0xff]  ;;  %v19388_v32 = vld [vmem:[#allocation178_spill] sm:$0xff] }
 0x385   : > { %8441 = vmatmul.mubr.f32.gmra.mrb[20].mxu0 %v19381_v49  ;;  %9115 = vmatprep.subr.bf16.mxu1 %v17960_v45  ;;  %v19387_v49 = vld [vmem:[#allocation132_spill] sm:$0xff] }
 0x386   : > { %8443 = vmatprep.mubr.msk.f32.mxu0 %vm10766_vm1, %v19138_v22 }
 0x387   : > { %3366 = vmatmul.mubr.f32.gmra.mrb[22].mxu1 %v19382_v60  ;;  %v19393_v60 = vld [vmem:[#allocation138_spill] sm:$0xff] }
 0x388   : > { %3372 = vmatprep.mubr.f32.mxu1 %v19383_v53  ;;  %9117 = vmatpush1.bf16.msra.mxu1 %v19384_v36  ;;  %v19390_v36 = vld [vmem:[#allocation133_spill] sm:$0xff]  ;;  %v19392_v53 = vld [vmem:[#allocation55_spill] sm:$0xff] }
 0x389   : > { %8444 = vmatmul.mubr.f32.gmra.mrb[22].mxu0 %v19385_v61  ;;  %9118 = vmatprep.subr.bf16.mxu1 %v17960_v45  ;;  %v19391_v61 = vld [vmem:[#allocation140_spill] sm:$0xff] }
 0x38a   : > { %8446 = vmatprep.mubr.msk.f32.mxu0 %vm10766_vm1, %v19138_v22 }
 0x38b   : > { %3375 = vmatmul.mubr.f32.gmra.mrb[24].mxu1 %v19386_v29  ;;  %v19397_v29 = vld [vmem:[#allocation38_spill] sm:$0xff] }
 0x38c   : > { %3381 = vmatprep.mubr.f32.mxu1 %v19387_v49  ;;  %9120 = vmatpush1.bf16.msra.mxu1 %v19388_v32  ;;  %v19394_v32 = vld [vmem:[#allocation141_spill] sm:$0xff]  ;;  %v19396_v49 = vld [vmem:[#allocation183_spill] sm:$0xff] }
 0x38d   : > { %8447 = vmatmul.mubr.f32.gmra.mrb[24].mxu0 %v19389_v41  ;;  %9121 = vmatprep.subr.bf16.mxu1 %v17960_v45  ;;  %v19395_v41 = vld [vmem:[#allocation148_spill] sm:$0xff] }
 0x38e   : > { %8449 = vmatprep.mubr.msk.f32.mxu0 %vm10766_vm1, %v19138_v22 }
 0x38f   : > { %3384 = vmatmul.mubr.f32.gmra.mrb[26].mxu1 %v19390_v36 }
 0x390   : > { %3390 = vmatprep.mubr.f32.mxu1 %v19391_v61  ;;  %9123 = vmatpush1.bf16.msra.mxu1 %v19392_v53  ;;  %v19398_v53 = vld [vmem:[#allocation52_spill] sm:$0xff]  ;;  %v19400_v61 = vld [vmem:[#allocation59_spill] sm:$0xff] }
 0x391   : > { %8450 = vmatmul.mubr.f32.gmra.mrb[26].mxu0 %v19393_v60  ;;  %9124 = vmatprep.subr.bf16.mxu1 %v17960_v45  ;;  %v19399_v60 = vld [vmem:[#allocation58_spill] sm:$0xff] }
 0x392   : > { %8452 = vmatprep.mubr.msk.f32.mxu0 %vm10766_vm1, %v19138_v22 }
 0x393   : > { %3393 = vmatmul.mubr.f32.gmra.mrb[28].mxu1 %v19394_v32 }
 0x394   : > { %3399 = vmatprep.mubr.f32.mxu1 %v19395_v41  ;;  %9126 = vmatpush1.bf16.msra.mxu1 %v19396_v49  ;;  %v19402_v49 = vand.u32 4294901760, %v19274_v39  ;;  %v19408_v39 = vand.u32 4294901760, %v19280_v10 }
 0x395   : > { %8453 = vmatmul.mubr.f32.gmra.mrb[28].mxu0 %v19397_v29  ;;  %9127 = vmatprep.subr.bf16.mxu1 %v17960_v45 }
 0x396   : > { %8455 = vmatprep.mubr.msk.f32.mxu0 %vm10766_vm1, %v19138_v22 }
 0x397   : > { %3402 = vmatmul.mubr.f32.gmra.mrb[30].mxu1 %v15087_v3 }
 0x398   : > { %3408 = vmatprep.mubr.f32.mxu1 %v19398_v53  ;;  %9129 = vmatpush1.bf16.msra.mxu1 %v19399_v60  ;;  %v19401_v60 = vand.u32 4294901760, %v19336_v18  ;;  %v19446_v18 = vld [vmem:[#allocation81_spill] sm:$0xff] }
 0x399   : > { %8456 = vmatmul.mubr.f32.gmra.mrb[30].mxu0 %v19400_v61  ;;  %9130 = vmatprep.subr.bf16.mxu1 %v17960_v45 }
 0x39a   : > { %8458 = vmatprep.mubr.msk.f32.mxu0 %vm10766_vm1, %v19138_v22 }
 0x39b   : > { %3411 = vmatmul.mubr.f32.gmra.mrb[32].mxu1 %v15121_v38 }
 0x39c   : > { %3417 = vmatprep.mubr.f32.mxu1 %v15132_v40 }
 0x39d   : > { %8459 = vmatmul.mubr.f32.gmra.mrb[32].mxu0 %v15140_v47  ;;  %v19403_v47 = vand.u32 4294901760, %v19275_v51 }
 0x39e   : > { %8461 = vmatprep.mubr.msk.f32.mxu0 %vm10766_vm1, %v19138_v22 }
 0x39f   : > { %3420 = vmatmul.mubr.f32.gmra.mrb[34].mxu1 %v15152_v28  ;;  %v9131_v40 = vpack.c.bf16 %v19403_v47, %v19402_v49  ;;  %v19409_v47 = vand.u32 4294901760, %v19281_v63  ;;  %v19410_v49 = vand.u32 4294901760, %v19340_v42  ;;  %v19414_v42 = vand.u32 4294901760, %v19286_v34 }
 0x3a0   : > { %3426 = vmatprep.mubr.f32.mxu1 %v15162_v55  ;;  %v19405_v55 = vand.u32 4294901760, %v19277_v35  ;;  %v19419_v34 = vand.u32 4294901760, %v19104_v16  ;;  %v19424_v16 = vand.u32 4294901760, %v19120_v52  ;;  %v19426_v63 = vand.u32 4294901760, %v19354_v33 }
 0x3a1   : > { %8462 = vmatmul.mubr.f32.gmra.mrb[34].mxu0 %v15170_v59  ;;  %v19404_v59 = vand.u32 4294901760, %v19276_v7  ;;  %v9134_v51 = vpack.c.bf16 %v19409_v47, %v19408_v39  ;;  %v19422_v7 = vand.u32 4294901760, %v19351_v24  ;;  %v19427_v24 = vand.u32 4294901760, %v19355_v27  ;;  %v19450_v39 = vld [vmem:[#allocation122_spill] sm:$0xff] }
 0x3a2   : > { %8464 = vmatprep.mubr.msk.f32.mxu0 %vm10766_vm1, %v19138_v22  ;;  %v19429_v52 = vand.u32 4294901760, %v19139_v1  ;;  %v19431_v33 = vand.u32 4294901760, %v19358_v20  ;;  %v19432_v27 = vand.u32 4294901760, %v19359_v62  ;;  %v19434_v1 = vand.u32 4294901760, %v19150_v11  ;;  %v19452_v47 = vld [vmem:[#allocation126_spill] sm:$0xff] }
 0x3a3   : > { %3429 = vmatmul.mubr.f32.gmra.mrb[36].mxu1 %v15181_v57  ;;  %v9527_v28 = vpack.c.bf16 %v19405_v55, %v19404_v59  ;;  %v19406_v57 = vand.u32 4294901760, %v19337_v48  ;;  %v19411_v55 = vand.u32 4294901760, %v19342_v15  ;;  %v19417_v15 = vand.u32 4294901760, %v19347_v14 }
 0x3a4   : > { %3533 = vmatprep.mubr.f32.mxu1 %v19401_v60  ;;  %v19407_v60 = vand.u32 4294901760, %v19339_v12  ;;  %v19412_v12 = vand.u32 4294901760, %v19344_v58  ;;  %v19418_v58 = vand.u32 4294901760, %v19100_v5  ;;  %v19423_v5 = vand.u32 4294901760, %v19118_v44 }
 0x3a5   : > { %8465 = vmatmul.mubr.f32.gmra.mrb[36].mxu0 %v15194_v17  ;;  %v19428_v44 = vand.u32 4294901760, %v19134_v6  ;;  %v19433_v6 = vand.u32 4294901760, %v19149_v9  ;;  %v19436_v20 = vand.u32 4294901760, %v19362_v30  ;;  %v19437_v62 = vand.u32 4294901760, %v19363_v26 }
 0x3a6   : > { %8471 = vmatprep.mubr.msk.f32.mxu0 %vm10766_vm1, %v19138_v22  ;;  %v9140_v35 = vpack.c.bf16 %v19419_v34, %v19418_v58  ;;  %v9143_v10 = vpack.c.bf16 %v19424_v16, %v19423_v5  ;;  %v19438_v9 = vand.u32 4294901760, %v19166_v31  ;;  %v19439_v11 = vand.u32 4294901760, %v19170_v37  ;;  %v19464_v34 = vld [vmem:[#allocation98_spill] sm:$0xff]  ;;  %v19470_v16 = vld [vmem:[#allocation137_spill] sm:$0xff] }
 0x3a7   : > { %3537 = vmatmul.mubr.f32.vlgmr.msra.gmra.mrb[0].mxu1 %v19406_v57  ;;  %v19415_v57 = vand.u32 4294901760, %v19345_v21  ;;  %v19420_v21 = vand.u32 4294901760, %v19349_v46  ;;  %v19425_v46 = vand.u32 4294901760, %v19353_v43  ;;  %v19430_v43 = vand.u32 4294901760, %v19357_v13 }
 0x3a8   : > { %9132 = vmatpush1.bf16.msra.mxu1 %v9131_v40  ;;  %3544 = vmatprep.mubr.f32.mxu1 %v19407_v60  ;;  %v19413_v40 = vand.u32 4294901760, %v19285_v25  ;;  %v9146_v25 = vpack.c.bf16 %v19429_v52, %v19428_v44  ;;  %v19435_v13 = vand.u32 4294901760, %v19361_v54  ;;  %v9152_v14 = vpack.c.bf16 %v19439_v11, %v19438_v9  ;;  %v19448_v60 = vld [vmem:[#allocation97_spill] sm:$0xff]  ;;  %v19474_v44 = vld [vmem:[#allocation16_spill] sm:$0xff]  ;;  %v19486_v11 = vld [vmem:[#allocation23_spill] sm:$0xff] }
 0x3a9   : > { %8472 = vmatmul.mubr.f32.vlgmr.msra.gmra.mrb[0].mxu0 %v19410_v49  ;;  %9133 = vmatprep.subr.bf16.mxu1 %v17960_v45  ;;  %v19440_v54 = vand.u32 4294901760, %v19365_v19  ;;  %v19441_v30 = vand.u32 4294901760, %v19366_v23  ;;  %v19442_v26 = vand.u32 4294901760, %v19367_v0  ;;  %v19443_v31 = vand.u32 4294901760, %v19300_v2  ;;  %v19454_v49 = vld [vmem:[#allocation12_spill] sm:$0xff] }
 0x3aa   : > { %9528 = vmatpush3.bf16.msra.mxu0 %v9527_v28  ;;  %8474 = vmatprep.mubr.msk.f32.mxu0 %vm10766_vm1, %v19138_v22  ;;  %v9137_v59 = vpack.c.bf16 %v19414_v42, %v19413_v40  ;;  %v19416_v28 = vand.u32 4294901760, %v19346_v8  ;;  %v19421_v8 = vand.u32 4294901760, %v19350_v50  ;;  %v9149_v50 = vpack.c.bf16 %v19434_v1, %v19433_v6  ;;  %v19458_v40 = vld [vmem:[#allocation14_spill] sm:$0xff]  ;;  %v19480_v6 = vld [vmem:[#allocation232_spill] sm:$0xff] }
 0x3ab   : > { %3548 = vmatmul.mubr.f32.gmra.mrb[2].mxu1 %v19411_v55  ;;  %9529 = vmatprep.subr.bf16.mxu0 %v17960_v45  ;;  %v19444_v37 = vand.u32 4294901760, %v19299_v56  ;;  %v19445_v19 = vand.u32 4294901760, %v19369_v4  ;;  %v19447_v23 = vand.u32 4294901760, %v19446_v18  ;;  %v19449_v0 = vand.u32 4294901760, %v19448_v60  ;;  %v19456_v55 = vld [vmem:[#allocation13_spill] sm:$0xff]  ;;  %v19494_v18 = vld [vmem:[#allocation24_spill] sm:$0xff] }
 0x3ac   : > { %9135 = vmatpush1.bf16.msra.mxu1 %v9134_v51  ;;  %3555 = vmatprep.mubr.f32.mxu1 %v19412_v12  ;;  %v19451_v2 = vand.u32 4294901760, %v19450_v39  ;;  %v19453_v56 = vand.u32 4294901760, %v19452_v47  ;;  %v19455_v4 = vand.u32 4294901760, %v19454_v49  ;;  %v19457_v12 = vand.u32 4294901760, %v19456_v55 }
 0x3ad   : > { %8475 = vmatmul.mubr.f32.gmra.mrb[2].mxu0 %v19415_v57  ;;  %9136 = vmatprep.subr.bf16.mxu1 %v17960_v45  ;;  %v9155_v48 = vpack.c.bf16 %v19444_v37, %v19443_v31  ;;  %v19459_v42 = vand.u32 4294901760, %v19458_v40  ;;  %v19475_v52 = vand.u32 4294901760, %v19474_v44  ;;  %v19481_v1 = vand.u32 4294901760, %v19480_v6  ;;  %v19492_v37 = vld [vmem:[#allocation35_spill] sm:$0xff]  ;;  %v19507_v40 = vld [vmem:[#allocation158_spill] sm:$0xff]  ;;  %v19531_v44 = vld [vmem:[#allocation41_spill] sm:$0xff] }
 0x3ae   : > { %8477 = vmatprep.mubr.msk.f32.mxu0 %vm10766_vm1, %v19138_v22  ;;  %v9158_v51 = vpack.c.bf16 %v19453_v56, %v19451_v2  ;;  %v19496_v60 = vand.u32 4294901760, %v19390_v36  ;;  %v19499_v2 = vld [vmem:[#allocation152_spill] sm:$0xff]  ;;  %v19501_v56 = vld [vmem:[#allocation37_spill] sm:$0xff]  ;;  %v19505_v36 = vand.u32 4294901760, %v19394_v32  ;;  %v19512_v32 = vand.u32 4294901760, %v15087_v3  ;;  %v19518_v3 = vld [vmem:[#allocation82_spill] sm:$0xff] }
 0x3af   : > { %3559 = vmatmul.mubr.f32.gmra.mrb[4].mxu1 %v19416_v28  ;;  %v19462_v28 = vld [vmem:[#allocation134_spill] sm:$0xff]  ;;  %v19500_v47 = vand.u32 4294901760, %v19499_v2  ;;  %v19538_v6 = vld [vmem:[#allocation57_spill] sm:$0xff]  ;;  %v19559_v2 = vld [vmem:[#allocation223_spill] sm:$0xff] }
 0x3b0   : > { %3566 = vmatprep.mubr.f32.mxu1 %v19417_v15  ;;  %9138 = vmatpush1.bf16.msra.mxu1 %v9137_v59  ;;  %v19460_v59 = vld [vmem:[#allocation129_spill] sm:$0xff]  ;;  %v19463_v15 = vand.u32 4294901760, %v19462_v28 }
 0x3b1   : > { %8478 = vmatmul.mubr.f32.gmra.mrb[4].mxu0 %v19420_v21  ;;  %9139 = vmatprep.subr.bf16.mxu1 %v17960_v45  ;;  %v19461_v57 = vand.u32 4294901760, %v19460_v59  ;;  %v19466_v21 = vld [vmem:[#allocation15_spill] sm:$0xff]  ;;  %v19509_v59 = vld [vmem:[#allocation40_spill] sm:$0xff] }
 0x3b2   : > { %8480 = vmatprep.mubr.msk.f32.mxu0 %vm10766_vm1, %v19138_v22 }
 0x3b3   : > { %3570 = vmatmul.mubr.f32.gmra.mrb[6].mxu1 %v19421_v8  ;;  %v9161_v58 = vpack.c.bf16 %v19463_v15, %v19461_v57  ;;  %v19467_v8 = vand.u32 4294901760, %v19466_v21  ;;  %v19510_v57 = vand.u32 4294901760, %v19509_v59  ;;  %v19511_v15 = vand.u32 4294901760, %v19397_v29  ;;  %v19570_v59 = vld [vmem:[#allocation85_spill] sm:$0xff] }
 0x3b4   : > { %3577 = vmatprep.mubr.f32.mxu1 %v19422_v7  ;;  %9141 = vmatpush1.bf16.msra.mxu1 %v9140_v35  ;;  %v19465_v35 = vand.u32 4294901760, %v19464_v34  ;;  %v19468_v7 = vld [vmem:[#allocation111_spill] sm:$0xff]  ;;  %v19515_v29 = vand.u32 4294901760, %v15121_v38  ;;  %v19516_v34 = vld [vmem:[#allocation72_spill] sm:$0xff]  ;;  %v19519_v21 = vand.u32 4294901760, %v19518_v3 }
 0x3b5   : > { %8481 = vmatmul.mubr.f32.gmra.mrb[6].mxu0 %v19425_v46  ;;  %9142 = vmatprep.subr.bf16.mxu1 %v17960_v45  ;;  %v19469_v5 = vand.u32 4294901760, %v19468_v7  ;;  %v19472_v46 = vld [vmem:[#allocation142_spill] sm:$0xff]  ;;  %v19526_v38 = vld [vmem:[#allocation96_spill] sm:$0xff]  ;;  %v19580_v3 = vld [vmem:[#allocation123_spill] sm:$0xff] }
 0x3b6   : > { %8483 = vmatprep.mubr.msk.f32.mxu0 %vm10766_vm1, %v19138_v22 }
 0x3b7   : > { %3581 = vmatmul.mubr.f32.gmra.mrb[8].mxu1 %v19426_v63  ;;  %v19473_v63 = vand.u32 4294901760, %v19472_v46  ;;  %v19528_v46 = vld [vmem:[#allocation164_spill] sm:$0xff] }
 0x3b8   : > { %3588 = vmatprep.mubr.f32.mxu1 %v19427_v24  ;;  %9144 = vmatpush1.bf16.msra.mxu1 %v9143_v10  ;;  %v19471_v10 = vand.u32 4294901760, %v19470_v16 }
 0x3b9   : > { %8484 = vmatmul.mubr.f32.gmra.mrb[8].mxu0 %v19430_v43  ;;  %9145 = vmatprep.subr.bf16.mxu1 %v17960_v45 }
 0x3ba   : > { %8486 = vmatprep.mubr.msk.f32.mxu0 %vm10766_vm1, %v19138_v22  ;;  %v9164_v24 = vpack.c.bf16 %v19473_v63, %v19471_v10  ;;  %v19527_v10 = vand.u32 4294901760, %v19526_v38  ;;  %v19529_v63 = vand.u32 4294901760, %v15194_v17  ;;  %v19535_v17 = vld [vmem:[#allocation53_spill] sm:$0xff]  ;;  %v19588_v38 = vld [vmem:[#allocation34_spill] sm:$0xff] }
 0x3bb   : > { %3592 = vmatmul.mubr.f32.gmra.mrb[10].mxu1 %v19431_v33  ;;  %v19478_v33 = vld [vmem:[#allocation120_spill] sm:$0xff] }
 0x3bc   : > { %3599 = vmatprep.mubr.f32.mxu1 %v19432_v27  ;;  %9147 = vmatpush1.bf16.msra.mxu1 %v9146_v25  ;;  %v19476_v25 = vld [vmem:[#allocation118_spill] sm:$0xff]  ;;  %v19479_v27 = vand.u32 4294901760, %v19478_v33  ;;  %v19536_v33 = vld [vmem:[#allocation161_spill] sm:$0xff] }
 0x3bd   : > { %8487 = vmatmul.mubr.f32.gmra.mrb[10].mxu0 %v19435_v13  ;;  %9148 = vmatprep.subr.bf16.mxu1 %v17960_v45  ;;  %v19477_v43 = vand.u32 4294901760, %v19476_v25  ;;  %v19533_v25 = vld [vmem:[#allocation49_spill] sm:$0xff] }
 0x3be   : > { %8489 = vmatprep.mubr.msk.f32.mxu0 %vm10766_vm1, %v19138_v22 }
 0x3bf   : > { %3603 = vmatmul.mubr.f32.gmra.mrb[12].mxu1 %v19436_v20 }
 0x3c0   : > { %3610 = vmatprep.mubr.f32.mxu1 %v19437_v62  ;;  %9150 = vmatpush1.bf16.msra.mxu1 %v9149_v50  ;;  %v19482_v50 = vld [vmem:[#allocation32_spill] sm:$0xff]  ;;  %v19484_v62 = vld [vmem:[#allocation19_spill] sm:$0xff] }
 0x3c1   : > { %8490 = vmatmul.mubr.f32.gmra.mrb[12].mxu0 %v19440_v54  ;;  %9151 = vmatprep.subr.bf16.mxu1 %v17960_v45  ;;  %v19483_v13 = vand.u32 4294901760, %v19482_v50  ;;  %v19485_v9 = vand.u32 4294901760, %v19484_v62  ;;  %v19488_v54 = vld [vmem:[#allocation132_spill] sm:$0xff]  ;;  %v19543_v62 = vld [vmem:[#allocation66_spill] sm:$0xff] }
 0x3c2   : > { %8492 = vmatprep.mubr.msk.f32.mxu0 %vm10766_vm1, %v19138_v22  ;;  %v19540_v50 = vld [vmem:[#allocation64_spill] sm:$0xff] }
 0x3c3   : > { %3614 = vmatmul.mubr.f32.gmra.mrb[14].mxu1 %v19441_v30  ;;  %v9167_v20 = vpack.c.bf16 %v19483_v13, %v19481_v1  ;;  %v19489_v30 = vand.u32 4294901760, %v19488_v54  ;;  %v19539_v1 = vld [vmem:[#allocation61_spill] sm:$0xff]  ;;  %v19541_v13 = vld [vmem:[#allocation42_spill] sm:$0xff] }
 0x3c4   : > { %3621 = vmatprep.mubr.f32.mxu1 %v19442_v26  ;;  %9153 = vmatpush1.bf16.msra.mxu1 %v9152_v14  ;;  %v19487_v14 = vand.u32 4294901760, %v19486_v11  ;;  %v19490_v26 = vld [vmem:[#allocation150_spill] sm:$0xff]  ;;  %v19545_v11 = vld [vmem:[#allocation43_spill] sm:$0xff] }
 0x3c5   : > { %8493 = vmatmul.mubr.f32.gmra.mrb[14].mxu0 %v19445_v19  ;;  %9154 = vmatprep.subr.bf16.mxu1 %v17960_v45  ;;  %v19491_v31 = vand.u32 4294901760, %v19490_v26  ;;  %v19547_v54 = vld [vmem:[#allocation70_spill] sm:$0xff]  ;;  %v19549_v26 = vld [vmem:[#allocation163_spill] sm:$0xff] }
 0x3c6   : > { %8495 = vmatprep.mubr.msk.f32.mxu0 %vm10766_vm1, %v19138_v22 }
 0x3c7   : > { %3625 = vmatmul.mubr.f32.gmra.mrb[16].mxu1 %v19447_v23  ;;  %v19495_v23 = vand.u32 4294901760, %v19494_v18  ;;  %v19554_v18 = vld [vmem:[#allocation75_spill] sm:$0xff] }
 0x3c8   : > { %3632 = vmatprep.mubr.f32.mxu1 %v19449_v0  ;;  %9156 = vmatpush1.bf16.msra.mxu1 %v9155_v48  ;;  %v19493_v48 = vand.u32 4294901760, %v19492_v37  ;;  %v19497_v0 = vld [vmem:[#allocation140_spill] sm:$0xff] }
 0x3c9   : > { %8496 = vmatmul.mubr.f32.gmra.mrb[16].mxu0 %v19455_v4  ;;  %9157 = vmatprep.subr.bf16.mxu1 %v17960_v45  ;;  %v19498_v39 = vand.u32 4294901760, %v19497_v0  ;;  %v19503_v4 = vld [vmem:[#allocation138_spill] sm:$0xff]  ;;  %v19551_v37 = vld [vmem:[#allocation208_spill] sm:$0xff]  ;;  %v19557_v0 = vld [vmem:[#allocation45_spill] sm:$0xff] }
 0x3ca   : > { %8498 = vmatprep.mubr.msk.f32.mxu0 %vm10766_vm1, %v19138_v22  ;;  %v9170_v19 = vpack.c.bf16 %v19493_v48, %v19491_v31  ;;  %v19504_v55 = vand.u32 4294901760, %v19503_v4  ;;  %v19550_v31 = vld [vmem:[#allocation206_spill] sm:$0xff]  ;;  %v19564_v4 = vld [vmem:[#allocation240_spill] sm:$0xff] }
 0x3cb   : > { %3636 = vmatmul.mubr.f32.gmra.mrb[18].mxu1 %v19457_v12  ;;  %v19506_v12 = vand.u32 4294901760, %v19395_v41  ;;  %v19513_v41 = vand.u32 4294901760, %v19398_v53  ;;  %v19520_v53 = vld [vmem:[#allocation91_spill] sm:$0xff]  ;;  %v19552_v48 = vld [vmem:[#allocation210_spill] sm:$0xff] }
 0x3cc   : > { %3643 = vmatprep.mubr.f32.mxu1 %v19459_v42  ;;  %9159 = vmatpush1.bf16.msra.mxu1 %v9158_v51  ;;  %v19502_v51 = vand.u32 4294901760, %v19501_v56  ;;  %v19508_v42 = vand.u32 4294901760, %v19507_v40  ;;  %v19561_v56 = vld [vmem:[#allocation46_spill] sm:$0xff]  ;;  %v19568_v40 = vld [vmem:[#allocation87_spill] sm:$0xff] }
 0x3cd   : > { %8499 = vmatmul.mubr.f32.gmra.mrb[18].mxu0 %v19465_v35  ;;  %9160 = vmatprep.subr.bf16.mxu1 %v17960_v45  ;;  %v19517_v35 = vand.u32 4294901760, %v19516_v34  ;;  %v19578_v34 = vld [vmem:[#allocation113_spill] sm:$0xff] }
 0x3ce   : > { %8501 = vmatprep.mubr.msk.f32.mxu0 %vm10766_vm1, %v19138_v22  ;;  %v9173_v49 = vpack.c.bf16 %v19502_v51, %v19500_v47  ;;  %v9176_v28 = vpack.c.bf16 %v19510_v57, %v19508_v42  ;;  %v19560_v47 = vld [vmem:[#allocation227_spill] sm:$0xff]  ;;  %v19562_v51 = vld [vmem:[#allocation228_spill] sm:$0xff]  ;;  %v19569_v42 = vld [vmem:[#allocation173_spill] sm:$0xff] }
 0x3cf   : > { %3647 = vmatmul.mubr.f32.gmra.mrb[20].mxu1 %v19467_v8  ;;  %v19522_v8 = vld [vmem:[#allocation93_spill] sm:$0xff]  ;;  %v19571_v57 = vld [vmem:[#allocation100_spill] sm:$0xff] }
 0x3d0   : > { %3654 = vmatprep.mubr.f32.mxu1 %v19469_v5  ;;  %9162 = vmatpush1.bf16.msra.mxu1 %v9161_v58  ;;  %v19514_v58 = vand.u32 4294901760, %v19400_v61  ;;  %v19521_v61 = vand.u32 4294901760, %v19520_v53  ;;  %v19523_v7 = vand.u32 4294901760, %v19522_v8  ;;  %v19524_v5 = vld [vmem:[#allocation94_spill] sm:$0xff]  ;;  %v19582_v53 = vld [vmem:[#allocation121_spill] sm:$0xff]  ;;  %v19584_v8 = vld [vmem:[#allocation127_spill] sm:$0xff] }
 0x3d1   : > { %8502 = vmatmul.mubr.f32.gmra.mrb[20].mxu0 %v19475_v52  ;;  %9163 = vmatprep.subr.bf16.mxu1 %v17960_v45  ;;  %v19525_v16 = vand.u32 4294901760, %v19524_v5  ;;  %v19532_v52 = vld [vmem:[#allocation172_spill] sm:$0xff]  ;;  %v19586_v5 = vld [vmem:[#allocation130_spill] sm:$0xff] }
 0x3d2   : > { %8504 = vmatprep.mubr.msk.f32.mxu0 %vm10766_vm1, %v19138_v22 }
 0x3d3   : > { %3658 = vmatmul.mubr.f32.gmra.mrb[22].mxu1 %v19477_v43  ;;  %v19534_v43 = vld [vmem:[#allocation155_spill] sm:$0xff] }
 0x3d4   : > { %3665 = vmatprep.mubr.f32.mxu1 %v19479_v27  ;;  %9165 = vmatpush1.bf16.msra.mxu1 %v9164_v24  ;;  %v19530_v24 = vld [vmem:[#allocation48_spill] sm:$0xff]  ;;  %v19537_v27 = vld [vmem:[#allocation190_spill] sm:$0xff] }
 0x3d5   : > { %8505 = vmatmul.mubr.f32.gmra.mrb[22].mxu0 %v19485_v9  ;;  %9166 = vmatprep.subr.bf16.mxu1 %v17960_v45  ;;  %v19544_v9 = vld [vmem:[#allocation69_spill] sm:$0xff] }
 0x3d6   : > { %8507 = vmatprep.mubr.msk.f32.mxu0 %vm10766_vm1, %v19138_v22 }
 0x3d7   : > { %3669 = vmatmul.mubr.f32.gmra.mrb[24].mxu1 %v19487_v14  ;;  %v19546_v14 = vld [vmem:[#allocation195_spill] sm:$0xff] }
 0x3d8   : > { %3676 = vmatprep.mubr.f32.mxu1 %v19489_v30  ;;  %9168 = vmatpush1.bf16.msra.mxu1 %v9167_v20  ;;  %v19542_v20 = vld [vmem:[#allocation192_spill] sm:$0xff]  ;;  %v19548_v30 = vld [vmem:[#allocation73_spill] sm:$0xff] }
 0x3d9   : > { %8508 = vmatmul.mubr.f32.gmra.mrb[24].mxu0 %v19495_v23  ;;  %9169 = vmatprep.subr.bf16.mxu1 %v17960_v45  ;;  %v19555_v23 = vld [vmem:[#allocation77_spill] sm:$0xff] }
 0x3da   : > { %8510 = vmatprep.mubr.msk.f32.mxu0 %vm10766_vm1, %v19138_v22 }
 0x3db   : > { %3680 = vmatmul.mubr.f32.gmra.mrb[26].mxu1 %v19496_v60  ;;  %v19556_v60 = vld [vmem:[#allocation219_spill] sm:$0xff] }
 0x3dc   : > { %3687 = vmatprep.mubr.f32.mxu1 %v19498_v39  ;;  %9171 = vmatpush1.bf16.msra.mxu1 %v9170_v19  ;;  %v19553_v19 = vld [vmem:[#allocation165_spill] sm:$0xff]  ;;  %v19558_v39 = vld [vmem:[#allocation83_spill] sm:$0xff] }
 0x3dd   : > { %8511 = vmatmul.mubr.f32.gmra.mrb[26].mxu0 %v19504_v55  ;;  %9172 = vmatprep.subr.bf16.mxu1 %v17960_v45  ;;  %v19565_v55 = vld [vmem:[#allocation167_spill] sm:$0xff] }
 0x3de   : > { %8513 = vmatprep.mubr.msk.f32.mxu0 %vm10766_vm1, %v19138_v22 }
 0x3df   : > { %3691 = vmatmul.mubr.f32.gmra.mrb[28].mxu1 %v19505_v36  ;;  %v19566_v36 = vld [vmem:[#allocation235_spill] sm:$0xff] }
 0x3e0   : > { %3698 = vmatprep.mubr.f32.mxu1 %v19506_v12  ;;  %9174 = vmatpush1.bf16.msra.mxu1 %v9173_v49  ;;  %v19563_v49 = vld [vmem:[#allocation237_spill] sm:$0xff]  ;;  %v19567_v12 = vld [vmem:[#allocation78_spill] sm:$0xff] }
 0x3e1   : > { %8514 = vmatmul.mubr.f32.gmra.mrb[28].mxu0 %v19511_v15  ;;  %9175 = vmatprep.subr.bf16.mxu1 %v17960_v45  ;;  %v19573_v15 = vld [vmem:[#allocation175_spill] sm:$0xff] }
 0x3e2   : > { %8516 = vmatprep.mubr.msk.f32.mxu0 %vm10766_vm1, %v19138_v22 }
 0x3e3   : > { %3702 = vmatmul.mubr.f32.gmra.mrb[30].mxu1 %v19512_v32  ;;  %v19574_v32 = vld [vmem:[#allocation101_spill] sm:$0xff] }
 0x3e4   : > { %3709 = vmatprep.mubr.f32.mxu1 %v19513_v41  ;;  %9177 = vmatpush1.bf16.msra.mxu1 %v9176_v28  ;;  %v19572_v28 = vld [vmem:[#allocation108_spill] sm:$0xff]  ;;  %v19575_v41 = vld [vmem:[#allocation109_spill] sm:$0xff] }
 0x3e5   : > { %8517 = vmatmul.mubr.f32.gmra.mrb[30].mxu0 %v19514_v58  ;;  %9178 = vmatprep.subr.bf16.mxu1 %v17960_v45  ;;  %v19576_v58 = vld [vmem:[#allocation115_spill] sm:$0xff] }
 0x3e6   : > { %8519 = vmatprep.mubr.msk.f32.mxu0 %vm10766_vm1, %v19138_v22 }
 0x3e7   : > { %3713 = vmatmul.mubr.f32.gmra.mrb[32].mxu1 %v19515_v29  ;;  %v19577_v29 = vld [vmem:[#allocation54_spill] sm:$0xff] }
 0x3e8   : > { %3720 = vmatprep.mubr.f32.mxu1 %v19517_v35  ;;  %v19579_v35 = vld [vmem:[#allocation17_spill] sm:$0xff] }
 0x3e9   : > { %8520 = vmatmul.mubr.f32.gmra.mrb[32].mxu0 %v19519_v21  ;;  %v19581_v21 = vld [vmem:[#allocation178_spill] sm:$0xff] }
 0x3ea   : > { %8522 = vmatprep.mubr.msk.f32.mxu0 %vm10766_vm1, %v19138_v22 }
 0x3eb   : > { %3724 = vmatmul.mubr.f32.gmra.mrb[34].mxu1 %v19521_v61  ;;  %v19583_v61 = vld [vmem:[#allocation125_spill] sm:$0xff] }
 0x3ec   : > { %3731 = vmatprep.mubr.f32.mxu1 %v19523_v7  ;;  %v19585_v7 = vld [vmem:[#allocation55_spill] sm:$0xff] }
 0x3ed   : > { %8523 = vmatmul.mubr.f32.gmra.mrb[34].mxu0 %v19525_v16  ;;  %v19587_v16 = vld [vmem:[#allocation30_spill] sm:$0xff] }
 0x3ee   : > { %8525 = vmatprep.mubr.msk.f32.mxu0 %vm10766_vm1, %v19138_v22 }
 0x3ef   : > { %3735 = vmatmul.mubr.f32.gmra.mrb[36].mxu1 %v19527_v10  ;;  %v19589_v10 = vld [vmem:[#allocation183_spill] sm:$0xff] }
 0x3f0   : > { %3901 = vmatprep.mubr.f32.mxu1 %v19528_v46 }
 0x3f1   : > { %8526 = vmatmul.mubr.f32.gmra.mrb[36].mxu0 %v19529_v63  ;;  %v19590_v63 = vld [vmem:[#allocation135_spill] sm:$0xff] }
 0x3f2   : > { %8532 = vmatprep.mubr.msk.f32.mxu0 %vm10766_vm1, %v19138_v22 }
 0x3f3   : > { %3903 = vmatmul.mubr.f32.vlgmr.msra.gmra.mrb[0].mxu1 %v19530_v24 }
 0x3f4   : > { %9180 = vmatpush1.bf16.msra.mxu1 %v19531_v44  ;;  %3908 = vmatprep.mubr.f32.mxu1 %v19532_v52  ;;  %v19591_v44 = vld [vmem:[#allocation143_spill] sm:$0xff] }
 0x3f5   : > { %8533 = vmatmul.mubr.f32.vlgmr.msra.gmra.mrb[0].mxu0 %v19533_v25  ;;  %9181 = vmatprep.subr.bf16.mxu1 %v17960_v45 }
 0x3f6   : > { %9531 = vmatpush3.bf16.msra.mxu0 %v19534_v43  ;;  %8535 = vmatprep.mubr.msk.f32.mxu0 %vm10766_vm1, %v19138_v22  ;;  %v19592_v43 = vld [vmem:[#allocation44_spill] sm:$0xff] }
 0x3f7   : > { %3910 = vmatmul.mubr.f32.gmra.mrb[2].mxu1 %v19535_v17 }
 0x3f8   : > { %9183 = vmatpush1.bf16.msra.mxu1 %v19536_v33  ;;  %3915 = vmatprep.mubr.f32.mxu1 %v19537_v27  ;;  %v19593_v33 = vld [vmem:[#allocation58_spill] sm:$0xff] }
 0x3f9   : > { %8536 = vmatmul.mubr.f32.gmra.mrb[2].mxu0 %v19538_v6  ;;  %9184 = vmatprep.subr.bf16.mxu1 %v17960_v45 }
 0x3fa   : > { %8538 = vmatprep.mubr.msk.f32.mxu0 %vm10766_vm1, %v19138_v22 }
 0x3fb   : > { %3917 = vmatmul.mubr.f32.gmra.mrb[4].mxu1 %v19539_v1 }
 0x3fc   : > { %3922 = vmatprep.mubr.f32.mxu1 %v19540_v50  ;;  %9186 = vmatpush1.bf16.msra.mxu1 %v19541_v13  ;;  %v19594_v13 = vld [vmem:[#allocation145_spill] sm:$0xff] }
 0x3fd   : > { %8539 = vmatmul.mubr.f32.gmra.mrb[4].mxu0 %v19542_v20  ;;  %9187 = vmatprep.subr.bf16.mxu1 %v17960_v45 }
 0x3fe   : > { %8541 = vmatprep.mubr.msk.f32.mxu0 %vm10766_vm1, %v19138_v22 }
 0x3ff   : > { %3924 = vmatmul.mubr.f32.gmra.mrb[6].mxu1 %v19543_v62 }
 0x400   : > { %3929 = vmatprep.mubr.f32.mxu1 %v19544_v9  ;;  %9189 = vmatpush1.bf16.msra.mxu1 %v19545_v11  ;;  %v19595_v11 = vld [vmem:[#allocation47_spill] sm:$0xff] }
 0x401   : > { %8542 = vmatmul.mubr.f32.gmra.mrb[6].mxu0 %v19546_v14  ;;  %9190 = vmatprep.subr.bf16.mxu1 %v17960_v45 }
 0x402   : > { %8544 = vmatprep.mubr.msk.f32.mxu0 %vm10766_vm1, %v19138_v22 }
 0x403   : > { %3931 = vmatmul.mubr.f32.gmra.mrb[8].mxu1 %v19547_v54 }
 0x404   : > { %3936 = vmatprep.mubr.f32.mxu1 %v19548_v30  ;;  %9192 = vmatpush1.bf16.msra.mxu1 %v19549_v26  ;;  %v19596_v26 = vld [vmem:[#allocation56_spill] sm:$0xff] }
 0x405   : > { %8545 = vmatmul.mubr.f32.gmra.mrb[8].mxu0 %v19550_v31  ;;  %9193 = vmatprep.subr.bf16.mxu1 %v17960_v45 }
 0x406   : > { %8547 = vmatprep.mubr.msk.f32.mxu0 %vm10766_vm1, %v19138_v22 }
 0x407   : > { %3938 = vmatmul.mubr.f32.gmra.mrb[10].mxu1 %v19551_v37 }
 0x408   : > { %3943 = vmatprep.mubr.f32.mxu1 %v19552_v48  ;;  %9195 = vmatpush1.bf16.msra.mxu1 %v19553_v19  ;;  %v19597_v19 = vld [vmem:[#allocation63_spill] sm:$0xff] }
 0x409   : > { %8548 = vmatmul.mubr.f32.gmra.mrb[10].mxu0 %v19554_v18  ;;  %9196 = vmatprep.subr.bf16.mxu1 %v17960_v45 }
 0x40a   : > { %8550 = vmatprep.mubr.msk.f32.mxu0 %vm10766_vm1, %v19138_v22 }
 0x40b   : > { %3945 = vmatmul.mubr.f32.gmra.mrb[12].mxu1 %v19555_v23 }
 0x40c   : > { %3950 = vmatprep.mubr.f32.mxu1 %v19556_v60  ;;  %9198 = vmatpush1.bf16.msra.mxu1 %v19557_v0  ;;  %v19599_v0 = vld [vmem:[#allocation79_spill] sm:$0xff] }
 0x40d   : > { %8551 = vmatmul.mubr.f32.gmra.mrb[12].mxu0 %v19558_v39  ;;  %9199 = vmatprep.subr.bf16.mxu1 %v17960_v45 }
 0x40e   : > { %8553 = vmatprep.mubr.msk.f32.mxu0 %vm10766_vm1, %v19138_v22 }
 0x40f   : > { %3952 = vmatmul.mubr.f32.gmra.mrb[14].mxu1 %v19559_v2 }
 0x410   : > { %3957 = vmatprep.mubr.f32.mxu1 %v19560_v47  ;;  %9201 = vmatpush1.bf16.msra.mxu1 %v19561_v56  ;;  %v19600_v56 = vld [vmem:[#allocation89_spill] sm:$0xff] }
 0x411   : > { %8554 = vmatmul.mubr.f32.gmra.mrb[14].mxu0 %v19562_v51  ;;  %9202 = vmatprep.subr.bf16.mxu1 %v17960_v45 }
 0x412   : > { %8556 = vmatprep.mubr.msk.f32.mxu0 %vm10766_vm1, %v19138_v22 }
 0x413   : > { %3959 = vmatmul.mubr.f32.gmra.mrb[16].mxu1 %v19563_v49 }
 0x414   : > { %3964 = vmatprep.mubr.f32.mxu1 %v19564_v4  ;;  %9204 = vmatpush1.bf16.msra.mxu1 %v19565_v55  ;;  %v19601_v55 = vld [vmem:[#allocation92_spill] sm:$0xff] }
 0x415   : > { %8557 = vmatmul.mubr.f32.gmra.mrb[16].mxu0 %v19566_v36  ;;  %9205 = vmatprep.subr.bf16.mxu1 %v17960_v45 }
 0x416   : > { %8559 = vmatprep.mubr.msk.f32.mxu0 %vm10766_vm1, %v19138_v22 }
 0x417   : > { %3966 = vmatmul.mubr.f32.gmra.mrb[18].mxu1 %v19567_v12 }
 0x418   : > { %3971 = vmatprep.mubr.f32.mxu1 %v19568_v40  ;;  %9207 = vmatpush1.bf16.msra.mxu1 %v19569_v42  ;;  %v19602_v42 = vld [vmem:[#allocation95_spill] sm:$0xff] }
 0x419   : > { %8560 = vmatmul.mubr.f32.gmra.mrb[18].mxu0 %v19570_v59  ;;  %9208 = vmatprep.subr.bf16.mxu1 %v17960_v45 }
 0x41a   : > { %8562 = vmatprep.mubr.msk.f32.mxu0 %vm10766_vm1, %v19138_v22 }
 0x41b   : > { %3973 = vmatmul.mubr.f32.gmra.mrb[20].mxu1 %v19571_v57 }
 0x41c   : > { %3978 = vmatprep.mubr.f32.mxu1 %v19572_v28  ;;  %9210 = vmatpush1.bf16.msra.mxu1 %v19573_v15 }
 0x41d   : > { %8563 = vmatmul.mubr.f32.gmra.mrb[20].mxu0 %v19574_v32  ;;  %9211 = vmatprep.subr.bf16.mxu1 %v17960_v45 }
 0x41e   : > { %8565 = vmatprep.mubr.msk.f32.mxu0 %vm10766_vm1, %v19138_v22 }
 0x41f   : > { %3980 = vmatmul.mubr.f32.gmra.mrb[22].mxu1 %v19575_v41 }
 0x420   : > { %3985 = vmatprep.mubr.f32.mxu1 %v19576_v58  ;;  %9213 = vmatpush1.bf16.msra.mxu1 %v19577_v29 }
 0x421   : > { %8566 = vmatmul.mubr.f32.gmra.mrb[22].mxu0 %v19578_v34  ;;  %9214 = vmatprep.subr.bf16.mxu1 %v17960_v45 }
 0x422   : > { %8568 = vmatprep.mubr.msk.f32.mxu0 %vm10766_vm1, %v19138_v22 }
 0x423   : > { %3987 = vmatmul.mubr.f32.gmra.mrb[24].mxu1 %v19579_v35 }
 0x424   : > { %3992 = vmatprep.mubr.f32.mxu1 %v19580_v3  ;;  %9216 = vmatpush1.bf16.msra.mxu1 %v19581_v21 }
 0x425   : > { %8569 = vmatmul.mubr.f32.gmra.mrb[24].mxu0 %v19582_v53  ;;  %9217 = vmatprep.subr.bf16.mxu1 %v17960_v45 }
 0x426   : > { %8571 = vmatprep.mubr.msk.f32.mxu0 %vm10766_vm1, %v19138_v22 }
 0x427   : > { %3994 = vmatmul.mubr.f32.gmra.mrb[26].mxu1 %v19583_v61 }
 0x428   : > { %3999 = vmatprep.mubr.f32.mxu1 %v19584_v8  ;;  %9219 = vmatpush1.bf16.msra.mxu1 %v19585_v7 }
 0x429   : > { %8572 = vmatmul.mubr.f32.gmra.mrb[26].mxu0 %v19586_v5  ;;  %9220 = vmatprep.subr.bf16.mxu1 %v17960_v45 }
 0x42a   : > { %8574 = vmatprep.mubr.msk.f32.mxu0 %vm10766_vm1, %v19138_v22 }
 0x42b   : > { %4001 = vmatmul.mubr.f32.gmra.mrb[28].mxu1 %v19587_v16 }
 0x42c   : > { %4006 = vmatprep.mubr.f32.mxu1 %v19588_v38  ;;  %9222 = vmatpush1.bf16.msra.mxu1 %v19589_v10 }
 0x42d   : > { %8575 = vmatmul.mubr.f32.gmra.mrb[28].mxu0 %v19590_v63  ;;  %9223 = vmatprep.subr.bf16.mxu1 %v17960_v45  ;;  %v19598_v45 = vld [vmem:[#allocation68_spill] sm:$0xff] }
 0x42e   : > { %8577 = vmatprep.mubr.msk.f32.mxu0 %vm10766_vm1, %v19138_v22 }
 0x42f   : > { %4008 = vmatmul.mubr.f32.gmra.mrb[30].mxu1 %v19591_v44 }
 0x430   : > { %4013 = vmatprep.mubr.f32.mxu1 %v19592_v43  ;;  %9225 = vmatpush1.bf16.msra.mxu1 %v19593_v33 }
 0x431   : > { %8578 = vmatmul.mubr.f32.gmra.mrb[30].mxu0 %v19594_v13 }
 0x432   : > { %8580 = vmatprep.mubr.msk.f32.mxu0 %vm10766_vm1, %v19138_v22 }
 0x433   : > { %4015 = vmatmul.mubr.f32.gmra.mrb[32].mxu1 %v19595_v11 }
 0x434   : > { %4020 = vmatprep.mubr.f32.mxu1 %v19596_v26 }
 0x435   : > { %8581 = vmatmul.mubr.f32.gmra.mrb[32].mxu0 %v19597_v19 }
 0x436   : > { %8583 = vmatprep.mubr.msk.f32.mxu0 %vm10766_vm1, %v19138_v22 }
 0x437   : > { %4022 = vmatmul.mubr.f32.gmra.mrb[34].mxu1 %v19598_v45 }
 0x438   : > { %4027 = vmatprep.mubr.f32.mxu1 %v19599_v0 }
 0x439   : > { %8584 = vmatmul.mubr.f32.gmra.mrb[34].mxu0 %v19600_v56 }
 0x43a   : > { %8586 = vmatprep.mubr.msk.f32.mxu0 %vm10766_vm1, %v19138_v22 }
 0x43b   : > { %4029 = vmatmul.mubr.f32.gmra.mrb[36].mxu1 %v19601_v55 }
 0x43c   : > { %4131 = vmatprep.mubr.f32.mxu1 %v19528_v46  ;;  %v10768_v46 = vmov 0  }
 0x43d   : > { %8587 = vmatmul.mubr.f32.gmra.mrb[36].mxu0 %v19602_v42  ;;  %10458 = vset.pattern.permute.xlu0 %v10768_v46 }
 0x43e   : > { %8593 = vmatprep.mubr.msk.f32.mxu0 %vm10766_vm1, %v19138_v22  ;;  %10459 = vset.pattern.permute.xlu1 %v10768_v46 }
 0x43f   : > { %4133 = vmatmul.mubr.f32.vlgmr.msra.gmra.mrb[0].mxu1 %v19530_v24 }
 0x440   : > { %4138 = vmatprep.mubr.f32.mxu1 %v19532_v52 }
 0x441   : > { %8594 = vmatmul.mubr.f32.vlgmr.msra.gmra.mrb[0].mxu0 %v19533_v25 }
 0x442   : > { %8596 = vmatprep.mubr.msk.f32.mxu0 %vm10766_vm1, %v19138_v22 }
 0x443   : > { %4140 = vmatmul.mubr.f32.gmra.mrb[2].mxu1 %v19535_v17 }
 0x444   : > { %4145 = vmatprep.mubr.f32.mxu1 %v19537_v27 }
 0x445   : > { %8597 = vmatmul.mubr.f32.gmra.mrb[2].mxu0 %v19538_v6 }
 0x446   : > { %8599 = vmatprep.mubr.msk.f32.mxu0 %vm10766_vm1, %v19138_v22 }
 0x447   : > { %4147 = vmatmul.mubr.f32.gmra.mrb[4].mxu1 %v19539_v1 }
 0x448   : > { %4152 = vmatprep.mubr.f32.mxu1 %v19540_v50 }
 0x449   : > { %8600 = vmatmul.mubr.f32.gmra.mrb[4].mxu0 %v19542_v20 }
 0x44a   : > { %8602 = vmatprep.mubr.msk.f32.mxu0 %vm10766_vm1, %v19138_v22 }
 0x44b   : > { %4154 = vmatmul.mubr.f32.gmra.mrb[6].mxu1 %v19543_v62 }
 0x44c   : > { %4159 = vmatprep.mubr.f32.mxu1 %v19544_v9 }
 0x44d   : > { %8603 = vmatmul.mubr.f32.gmra.mrb[6].mxu0 %v19546_v14 }
 0x44e   : > { %8605 = vmatprep.mubr.msk.f32.mxu0 %vm10766_vm1, %v19138_v22 }
 0x44f   : > { %4161 = vmatmul.mubr.f32.gmra.mrb[8].mxu1 %v19547_v54 }
 0x450   : > { %4166 = vmatprep.mubr.f32.mxu1 %v19548_v30 }
 0x451   : > { %8606 = vmatmul.mubr.f32.gmra.mrb[8].mxu0 %v19550_v31 }
 0x452   : > { %8608 = vmatprep.mubr.msk.f32.mxu0 %vm10766_vm1, %v19138_v22 }
 0x453   : > { %4168 = vmatmul.mubr.f32.gmra.mrb[10].mxu1 %v19551_v37 }
 0x454   : > { %4173 = vmatprep.mubr.f32.mxu1 %v19552_v48 }
 0x455   : > { %8609 = vmatmul.mubr.f32.gmra.mrb[10].mxu0 %v19554_v18 }
 0x456   : > { %8611 = vmatprep.mubr.msk.f32.mxu0 %vm10766_vm1, %v19138_v22 }
 0x457   : > { %4175 = vmatmul.mubr.f32.gmra.mrb[12].mxu1 %v19555_v23 }
 0x458   : > { %4180 = vmatprep.mubr.f32.mxu1 %v19556_v60 }
 0x459   : > { %8612 = vmatmul.mubr.f32.gmra.mrb[12].mxu0 %v19558_v39 }
 0x45a   : > { %8614 = vmatprep.mubr.msk.f32.mxu0 %vm10766_vm1, %v19138_v22 }
 0x45b   : > { %4182 = vmatmul.mubr.f32.gmra.mrb[14].mxu1 %v19559_v2 }
 0x45c   : > { %4187 = vmatprep.mubr.f32.mxu1 %v19560_v47 }
 0x45d   : > { %8615 = vmatmul.mubr.f32.gmra.mrb[14].mxu0 %v19562_v51 }
 0x45e   : > { %8617 = vmatprep.mubr.msk.f32.mxu0 %vm10766_vm1, %v19138_v22 }
 0x45f   : > { %4189 = vmatmul.mubr.f32.gmra.mrb[16].mxu1 %v19563_v49 }
 0x460   : > { %4194 = vmatprep.mubr.f32.mxu1 %v19564_v4 }
 0x461   : > { %8618 = vmatmul.mubr.f32.gmra.mrb[16].mxu0 %v19566_v36 }
 0x462   : > { %8620 = vmatprep.mubr.msk.f32.mxu0 %vm10766_vm1, %v19138_v22 }
 0x463   : > { %4196 = vmatmul.mubr.f32.gmra.mrb[18].mxu1 %v19567_v12 }
 0x464   : > { %4201 = vmatprep.mubr.f32.mxu1 %v19568_v40 }
 0x465   : > { %8621 = vmatmul.mubr.f32.gmra.mrb[18].mxu0 %v19570_v59 }
 0x466   : > { %8623 = vmatprep.mubr.msk.f32.mxu0 %vm10766_vm1, %v19138_v22 }
 0x467   : > { %4203 = vmatmul.mubr.f32.gmra.mrb[20].mxu1 %v19571_v57 }
 0x468   : > { %4208 = vmatprep.mubr.f32.mxu1 %v19572_v28 }
 0x469   : > { %8624 = vmatmul.mubr.f32.gmra.mrb[20].mxu0 %v19574_v32 }
 0x46a   : > { %8626 = vmatprep.mubr.msk.f32.mxu0 %vm10766_vm1, %v19138_v22 }
 0x46b   : > { %4210 = vmatmul.mubr.f32.gmra.mrb[22].mxu1 %v19575_v41 }
 0x46c   : > { %4215 = vmatprep.mubr.f32.mxu1 %v19576_v58 }
 0x46d   : > { %8627 = vmatmul.mubr.f32.gmra.mrb[22].mxu0 %v19578_v34 }
 0x46e   : > { %8629 = vmatprep.mubr.msk.f32.mxu0 %vm10766_vm1, %v19138_v22 }
 0x46f   : > { %4217 = vmatmul.mubr.f32.gmra.mrb[24].mxu1 %v19579_v35 }
 0x470   : > { %4222 = vmatprep.mubr.f32.mxu1 %v19580_v3 }
 0x471   : > { %8630 = vmatmul.mubr.f32.gmra.mrb[24].mxu0 %v19582_v53 }
 0x472   : > { %8632 = vmatprep.mubr.msk.f32.mxu0 %vm10766_vm1, %v19138_v22 }
 0x473   : > { %4224 = vmatmul.mubr.f32.gmra.mrb[26].mxu1 %v19583_v61 }
 0x474   : > { %4229 = vmatprep.mubr.f32.mxu1 %v19584_v8 }
 0x475   : > { %8633 = vmatmul.mubr.f32.gmra.mrb[26].mxu0 %v19586_v5 }
 0x476   : > { %8635 = vmatprep.mubr.msk.f32.mxu0 %vm10766_vm1, %v19138_v22 }
 0x477   : > { %4231 = vmatmul.mubr.f32.gmra.mrb[28].mxu1 %v19587_v16 }
 0x478   : > { %4236 = vmatprep.mubr.f32.mxu1 %v19588_v38 }
 0x479   : > { %8636 = vmatmul.mubr.f32.gmra.mrb[28].mxu0 %v19590_v63 }
 0x47a   : > { %8638 = vmatprep.mubr.msk.f32.mxu0 %vm10766_vm1, %v19138_v22 }
 0x47b   : > { %4238 = vmatmul.mubr.f32.gmra.mrb[30].mxu1 %v19591_v44 }
 0x47c   : > { %4243 = vmatprep.mubr.f32.mxu1 %v19592_v43 }
 0x47d   : > { %8639 = vmatmul.mubr.f32.gmra.mrb[30].mxu0 %v19594_v13 }
 0x47e   : > { %8641 = vmatprep.mubr.msk.f32.mxu0 %vm10766_vm1, %v19138_v22 }
 0x47f   : > { %4245 = vmatmul.mubr.f32.gmra.mrb[32].mxu1 %v19595_v11 }
 0x480   : > { %4250 = vmatprep.mubr.f32.mxu1 %v19596_v26 }
 0x481   : > { %8642 = vmatmul.mubr.f32.gmra.mrb[32].mxu0 %v19597_v19 }
 0x482   : > { %8644 = vmatprep.mubr.msk.f32.mxu0 %vm10766_vm1, %v19138_v22 }
 0x483   : > { %4252 = vmatmul.mubr.f32.gmra.mrb[34].mxu1 %v19598_v45 }
 0x484   : > { %4257 = vmatprep.mubr.f32.mxu1 %v19599_v0 }
 0x485   : > { %8645 = vmatmul.mubr.f32.gmra.mrb[34].mxu0 %v19600_v56 }
 0x486   : > { %8647 = vmatprep.mubr.msk.f32.mxu0 %vm10766_vm1, %v19138_v22 }
 0x487   : > { %4259 = vmatmul.mubr.f32.gmra.mrb[36].mxu1 %v19601_v55 }
 0x489   : > { %8648 = vmatmul.mubr.f32.gmra.mrb[36].mxu0 %v19602_v42 }
 0x512   : > { %v4134_v24 = vpop.f32.mrb[0].mxu1 }
 0x513   : > { %v4136_v52 = vpop.f32.mrb[1].mxu1 }
 0x514   : > { %v7255_v25 = vpop.f32.mrb[0].mxu0 }
 0x515   : > { %v9532_v17 = vadd.f32 %v7255_v25, %v4134_v24  ;;  %v8595_v27 = vpop.f32.mrb[1].mxu0 }
 0x516   : > { %v4141_v6 = vpop.f32.mrb[2].mxu1 }
 0x517   : > { %10460 = vtanh.f32 %v9532_v17  ;;  %v4143_v1 = vpop.f32.mrb[3].mxu1 }
 0x518   : > { %v7261_v50 = vpop.f32.mrb[2].mxu0 }
 0x519   : > { %v9533_v20 = vadd.f32 %v7261_v50, %v4141_v6  ;;  %v8598_v62 = vpop.f32.mrb[3].mxu0 }
 0x51a   : > { %v4148_v9 = vpop.f32.mrb[4].mxu1 }
 0x51b   : > { %10462 = vtanh.f32 %v9533_v20  ;;  %v4150_v22 = vpop.f32.mrb[5].mxu1 }
 0x51c   : > { %v7267_v14 = vpop.f32.mrb[4].mxu0 }
 0x51d   : > { %v9534_v54 = vadd.f32 %v7267_v14, %v4148_v9  ;;  %v8601_v30 = vpop.f32.mrb[5].mxu0 }
 0x51e   : > { %v4155_v31 = vpop.f32.mrb[6].mxu1 }
 0x51f   : > { %10464 = vtanh.f32 %v9534_v54  ;;  %v4157_v37 = vpop.f32.mrb[7].mxu1 }
 0x520   : > { %v7273_v48 = vpop.f32.mrb[6].mxu0 }
 0x521   : > { %v10461_v18 = vpop.eup %10460  ;;  %v9535_v23 = vadd.f32 %v7273_v48, %v4155_v31  ;;  %v8604_v60 = vpop.f32.mrb[7].mxu0 }
 0x522   : > { %7388 = vperm.xlu0 %10458, %v10461_v18   ;;  %v4162_v39 = vpop.f32.mrb[8].mxu1 }
 0x523   : > { %10466 = vtanh.f32 %v9535_v23  ;;  %v4164_v2 = vpop.f32.mrb[9].mxu1 }
 0x524   : > { %v7279_v47 = vpop.f32.mrb[8].mxu0 }
 0x525   : > { %v10463_v51 = vpop.eup %10462  ;;  %v9536_v49 = vadd.f32 %v7279_v47, %v4162_v39  ;;  %v8607_v4 = vpop.f32.mrb[9].mxu0 }
 0x526   : > { %7393 = vperm.xlu0 %10458, %v10463_v51   ;;  %v4169_v36 = vpop.f32.mrb[10].mxu1 }
 0x527   : > { %10468 = vtanh.f32 %v9536_v49  ;;  %v4171_v12 = vpop.f32.mrb[11].mxu1 }
 0x528   : > { %v7285_v40 = vpop.f32.mrb[10].mxu0 }
 0x529   : > { %v10465_v59 = vpop.eup %10464  ;;  %v9537_v57 = vadd.f32 %v7285_v40, %v4169_v36  ;;  %v8610_v28 = vpop.f32.mrb[11].mxu0 }
 0x52a   : > { %7398 = vperm.xlu1 %10459, %v10465_v59   ;;  %v4176_v15 = vpop.f32.mrb[12].mxu1 }
 0x52b   : > { %10470 = vtanh.f32 %v9537_v57  ;;  %v4178_v32 = vpop.f32.mrb[13].mxu1 }
 0x52c   : > { %v7291_v41 = vpop.f32.mrb[12].mxu0 }
 0x52d   : > { %v10467_v58 = vpop.eup %10466  ;;  %v9538_v29 = vadd.f32 %v7291_v41, %v4176_v15  ;;  %v8613_v34 = vpop.f32.mrb[13].mxu0 }
 0x52e   : > { %7403 = vperm.xlu1 %10459, %v10467_v58   ;;  %v4183_v35 = vpop.f32.mrb[14].mxu1 }
 0x52f   : > { %10472 = vtanh.f32 %v9538_v29  ;;  %v4185_v3 = vpop.f32.mrb[15].mxu1 }
 0x530   : > { %v7297_v21 = vpop.f32.mrb[14].mxu0 }
 0x531   : > { %v10469_v53 = vpop.eup %10468  ;;  %v9539_v61 = vadd.f32 %v7297_v21, %v4183_v35  ;;  %v8616_v8 = vpop.f32.mrb[15].mxu0 }
 0x532   : > { %7408 = vperm.xlu0 %10458, %v10469_v53   ;;  %v4190_v7 = vpop.f32.mrb[16].mxu1 }
 0x533   : > { %10474 = vtanh.f32 %v9539_v61  ;;  %v4192_v5 = vpop.f32.mrb[17].mxu1 }
 0x534   : > { %v7303_v16 = vpop.f32.mrb[16].mxu0 }
 0x535   : > { %v10471_v38 = vpop.eup %10470  ;;  %v9540_v10 = vadd.f32 %v7303_v16, %v4190_v7  ;;  %v8619_v63 = vpop.f32.mrb[17].mxu0 }
 0x536   : > { %7413 = vperm.xlu1 %10459, %v10471_v38   ;;  %v4197_v44 = vpop.f32.mrb[18].mxu1  ;;  %v15965_v63 = vstv %s465_s8 }
 0x537   : > { %10476 = vtanh.f32 %v9540_v10  ;;  %v4199_v43 = vpop.f32.mrb[19].mxu1 }
 0x538   : > { %v7309_v33 = vpop.f32.mrb[18].mxu0 }
 0x539   : > { %v10473_v13 = vpop.eup %10472  ;;  %v9541_v11 = vadd.f32 %v7309_v33, %v4197_v44  ;;  %v8622_v26 = vpop.f32.mrb[19].mxu0  ;;  %v10498_v44 = vld [vmem:[%s10942_s23 + $0x8] sm:$0xff] }
 0x53a   : > { %7418 = vperm.xlu0 %10458, %v10473_v13   ;;  %v4204_v19 = vpop.f32.mrb[20].mxu1  ;;  %v15969_v43 = vmul.f32 %v10498_v44, %v15965_v63  ;;  %v10499_v33 = vld [vmem:[%s10942_s23 + $0x28] sm:$0xff] }
 0x53b   : > { %10478 = vtanh.f32 %v9541_v11  ;;  %v4206_v45 = vpop.f32.mrb[21].mxu1  ;;  %v15973_v13 = vmul.f32 %v10499_v33, %v15965_v63  ;;  %v10500_v11 = vld [vmem:[%s10942_s23] sm:$0xff]  ;;  %v10530_v33 = vld [vmem:[%s10942_s23 + $0x1c8] sm:$0xff] }
 0x53c   : > { %v7315_v0 = vpop.f32.mrb[20].mxu0  ;;  %v15977_v26 = vmul.f32 %v10500_v11, %v15965_v63  ;;  %v16097_v11 = vmul.f32 %v10530_v33, %v15965_v63 }
 0x53d   : > { %v10475_v56 = vpop.eup %10474  ;;  %v9542_v55 = vadd.f32 %v7315_v0, %v4204_v19  ;;  %v8625_v42 = vpop.f32.mrb[21].mxu0  ;;  %v10501_v19 = vld [vmem:[%s10942_s23 + $0x20] sm:$0xff] }
 0x53e   : > { %7423 = vperm.xlu1 %10459, %v10475_v56   ;;  %v4211_v46 = vpop.f32.mrb[22].mxu1  ;;  %v15981_v45 = vmul.f32 %v10501_v19, %v15965_v63  ;;  %v10502_v0 = vld [vmem:[%s10942_s23 + $0x40] sm:$0xff]  ;;  %19613 = vst [vmem:[#allocation104_spill] sm:$0xff] %v16097_v11  ;;  %v10531_v19 = vld [vmem:[%s10942_s23 + $0x1e8] sm:$0xff] }
 0x53f   : > { %10480 = vtanh.f32 %v9542_v55  ;;  %v4213_v24 = vpop.f32.mrb[23].mxu1  ;;  %v15985_v56 = vmul.f32 %v10502_v0, %v15965_v63  ;;  %v10503_v55 = vld [vmem:[%s10942_s23 + $0x60] sm:$0xff]  ;;  %v16101_v0 = vmul.f32 %v10531_v19, %v15965_v63  ;;  %v10546_v19 = vld [vmem:[%s10942_s23 + $0x2a8] sm:$0xff] }
 0x540   : > { %v7321_v52 = vpop.f32.mrb[22].mxu0  ;;  %v15989_v42 = vmul.f32 %v10503_v55, %v15965_v63  ;;  %v10532_v55 = vld [vmem:[%s10942_s23 + $0x1c0] sm:$0xff]  ;;  %v10589_v11 = vld [vmem:[%s10942_s23 + $0x148] sm:$0xff] }
 0x541   : > { %v10477_v25 = vpop.eup %10476  ;;  %v9543_v17 = vadd.f32 %v7321_v52, %v4211_v46  ;;  %v8628_v27 = vpop.f32.mrb[23].mxu0  ;;  %v10504_v46 = vld [vmem:[%s10942_s23 + $0x38] sm:$0xff]  ;;  %19614 = vst [vmem:[#allocation112_spill] sm:$0xff] %v16101_v0 }
 0x542   : > { %7428 = vperm.xlu0 %10458, %v10477_v25   ;;  %v4218_v6 = vpop.f32.mrb[24].mxu1  ;;  %v15993_v24 = vmul.f32 %v10504_v46, %v15965_v63  ;;  %v10505_v52 = vld [vmem:[%s10942_s23 + $0x58] sm:$0xff]  ;;  %v16105_v46 = vmul.f32 %v10532_v55, %v15965_v63  ;;  %v16161_v55 = vmul.f32 %v10546_v19, %v15965_v63 }
 0x543   : > { %10482 = vtanh.f32 %v9543_v17  ;;  %v4220_v1 = vpop.f32.mrb[25].mxu1  ;;  %v15997_v25 = vmul.f32 %v10505_v52, %v15965_v63  ;;  %v10506_v17 = vld [vmem:[%s10942_s23 + $0x78] sm:$0xff]  ;;  %v10533_v52 = vld [vmem:[%s10942_s23 + $0x1e0] sm:$0xff] }
 0x544   : > { %v7327_v50 = vpop.f32.mrb[24].mxu0  ;;  %v16001_v27 = vmul.f32 %v10506_v17, %v15965_v63  ;;  %19615 = vst [vmem:[#allocation153_spill] sm:$0xff] %v16105_v46  ;;  %v16109_v17 = vmul.f32 %v10533_v52, %v15965_v63  ;;  %19629 = vst [vmem:[#allocation131_spill] sm:$0xff] %v16161_v55  ;;  %v10547_v52 = vld [vmem:[%s10942_s23 + $0x2c8] sm:$0xff]  ;;  %v10553_v19 = vld [vmem:[%s10942_s23 + $0x2f8] sm:$0xff] }
 0x545   : > { %v10479_v20 = vpop.eup %10478  ;;  %v9544_v62 = vadd.f32 %v7327_v50, %v4218_v6  ;;  %v8631_v9 = vpop.f32.mrb[25].mxu0  ;;  %v10507_v6 = vld [vmem:[%s10942_s23 + $0x98] sm:$0xff]  ;;  %v10508_v50 = vld [vmem:[%s10942_s23 + $0x70] sm:$0xff]  ;;  %v10591_v46 = vld [vmem:[%s10942_s23 + $0x168] sm:$0xff] }
 0x546   : > { %7433 = vperm.xlu1 %10459, %v10479_v20   ;;  %v4225_v22 = vpop.f32.mrb[26].mxu1  ;;  %v16005_v1 = vmul.f32 %v10507_v6, %v15965_v63  ;;  %v16009_v20 = vmul.f32 %v10508_v50, %v15965_v63  ;;  %19616 = vst [vmem:[#allocation157_spill] sm:$0xff] %v16109_v17  ;;  %v10534_v6 = vld [vmem:[%s10942_s23 + $0x200] sm:$0xff] }
 0x547   : > { %10484 = vtanh.f32 %v9544_v62  ;;  %v4227_v14 = vpop.f32.mrb[27].mxu1  ;;  %v10509_v62 = vld [vmem:[%s10942_s23 + $0x90] sm:$0xff]  ;;  %v16113_v50 = vmul.f32 %v10534_v6, %v15965_v63  ;;  %v16165_v6 = vmul.f32 %v10547_v52, %v15965_v63  ;;  %v16189_v52 = vmul.f32 %v10553_v19, %v15965_v63 }
 0x548   : > { %v7333_v54 = vpop.f32.mrb[26].mxu0  ;;  %v16013_v9 = vmul.f32 %v10509_v62, %v15965_v63  ;;  %v10535_v62 = vld [vmem:[%s10942_s23 + $0x220] sm:$0xff]  ;;  %v10558_v19 = vld [vmem:[%s10942_s23 + $0x350] sm:$0xff] }
 0x549   : > { %v10481_v30 = vpop.eup %10480  ;;  %v9545_v31 = vadd.f32 %v7333_v54, %v4225_v22  ;;  %v8634_v37 = vpop.f32.mrb[27].mxu0  ;;  %v10510_v22 = vld [vmem:[%s10942_s23 + $0xb0] sm:$0xff]  ;;  %19617 = vst [vmem:[#allocation159_spill] sm:$0xff] %v16113_v50  ;;  %19630 = vst [vmem:[#allocation136_spill] sm:$0xff] %v16165_v6 }
 0x54a   : > { %7438 = vperm.xlu0 %10458, %v10481_v30   ;;  %v4232_v48 = vpop.f32.mrb[28].mxu1  ;;  %v16017_v14 = vmul.f32 %v10510_v22, %v15965_v63  ;;  %v10511_v54 = vld [vmem:[%s10942_s23 + $0xd0] sm:$0xff]  ;;  %v16117_v22 = vmul.f32 %v10535_v62, %v15965_v63  ;;  %v10548_v62 = vld [vmem:[%s10942_s23 + $0x2a0] sm:$0xff]  ;;  %19636 = vst [vmem:[#allocation179_spill] sm:$0xff] %v16189_v52  ;;  %v16209_v52 = vmul.f32 %v10558_v19, %v15965_v63 }
 0x54b   : > { %10486 = vtanh.f32 %v9545_v31  ;;  %v4234_v18 = vpop.f32.mrb[29].mxu1  ;;  %v16021_v30 = vmul.f32 %v10511_v54, %v15965_v63  ;;  %v10512_v31 = vld [vmem:[%s10942_s23 + $0xa8] sm:$0xff]  ;;  %v10536_v54 = vld [vmem:[%s10942_s23 + $0x1f8] sm:$0xff]  ;;  %v10573_v6 = vld [vmem:[%s10942_s23 + $0x410] sm:$0xff] }
 0x54c   : > { %v7339_v23 = vpop.f32.mrb[28].mxu0  ;;  %v16025_v37 = vmul.f32 %v10512_v31, %v15965_v63  ;;  %19618 = vst [vmem:[#allocation162_spill] sm:$0xff] %v16117_v22  ;;  %v16121_v31 = vmul.f32 %v10536_v54, %v15965_v63  ;;  %v16169_v54 = vmul.f32 %v10548_v62, %v15965_v63  ;;  %v10554_v62 = vld [vmem:[%s10942_s23 + $0x318] sm:$0xff]  ;;  %19641 = vst [vmem:[#allocation177_spill] sm:$0xff] %v16209_v52  ;;  %v10563_v52 = vld [vmem:[%s10942_s23 + $0x3a8] sm:$0xff] }
 0x54d   : > { %v10483_v60 = vpop.eup %10482  ;;  %v9546_v39 = vadd.f32 %v7339_v23, %v4232_v48  ;;  %v8637_v2 = vpop.f32.mrb[29].mxu0  ;;  %v10513_v48 = vld [vmem:[%s10942_s23 + $0xc8] sm:$0xff] }
 0x54e   : > { %7443 = vperm.xlu1 %10459, %v10483_v60   ;;  %v4239_v47 = vpop.f32.mrb[30].mxu1  ;;  %v16029_v18 = vmul.f32 %v10513_v48, %v15965_v63  ;;  %v10514_v23 = vld [vmem:[%s10942_s23 + $0xe8] sm:$0xff]  ;;  %19619 = vst [vmem:[#allocation116_spill] sm:$0xff] %v16121_v31  ;;  %v10537_v48 = vld [vmem:[%s10942_s23 + $0x218] sm:$0xff]  ;;  %19631 = vst [vmem:[#allocation139_spill] sm:$0xff] %v16169_v54 }
 0x54f   : > { %10488 = vtanh.f32 %v9546_v39  ;;  %v4241_v51 = vpop.f32.mrb[31].mxu1  ;;  %v16033_v60 = vmul.f32 %v10514_v23, %v15965_v63  ;;  %v10515_v39 = vld [vmem:[%s10942_s23 + $0x108] sm:$0xff]  ;;  %v16125_v23 = vmul.f32 %v10537_v48, %v15965_v63  ;;  %v10549_v48 = vld [vmem:[%s10942_s23 + $0x2c0] sm:$0xff]  ;;  %v10586_v31 = vld [vmem:[%s10942_s23 + $0x110] sm:$0xff] }
 0x550   : > { %v7345_v49 = vpop.f32.mrb[30].mxu0  ;;  %v16037_v2 = vmul.f32 %v10515_v39, %v15965_v63  ;;  %v10538_v39 = vld [vmem:[%s10942_s23 + $0x238] sm:$0xff] }
 0x551   : > { %v10485_v4 = vpop.eup %10484  ;;  %v9547_v36 = vadd.f32 %v7345_v49, %v4239_v47  ;;  %v8640_v12 = vpop.f32.mrb[31].mxu0  ;;  %v10516_v47 = vld [vmem:[%s10942_s23 + $0xe0] sm:$0xff]  ;;  %19620 = vst [vmem:[#allocation119_spill] sm:$0xff] %v16125_v23 }
 0x552   : > { %7448 = vperm.xlu0 %10458, %v10485_v4   ;;  %v4246_v40 = vpop.f32.mrb[32].mxu1  ;;  %v16041_v51 = vmul.f32 %v10516_v47, %v15965_v63  ;;  %v10517_v49 = vld [vmem:[%s10942_s23 + $0x100] sm:$0xff]  ;;  %v16129_v47 = vmul.f32 %v10538_v39, %v15965_v63  ;;  %v16173_v39 = vmul.f32 %v10549_v48, %v15965_v63  ;;  %v16193_v48 = vmul.f32 %v10554_v62, %v15965_v63  ;;  %v10559_v62 = vld [vmem:[%s10942_s23 + $0x370] sm:$0xff] }
 0x553   : > { %10490 = vtanh.f32 %v9547_v36  ;;  %v4248_v59 = vpop.f32.mrb[33].mxu1  ;;  %v16045_v4 = vmul.f32 %v10517_v49, %v15965_v63  ;;  %v10518_v36 = vld [vmem:[%s10942_s23 + $0x120] sm:$0xff]  ;;  %v10539_v49 = vld [vmem:[%s10942_s23 + $0x258] sm:$0xff] }
 0x554   : > { %v7351_v57 = vpop.f32.mrb[32].mxu0  ;;  %v16049_v12 = vmul.f32 %v10518_v36, %v15965_v63  ;;  %19621 = vst [vmem:[#allocation160_spill] sm:$0xff] %v16129_v47  ;;  %v16133_v36 = vmul.f32 %v10539_v49, %v15965_v63  ;;  %19632 = vst [vmem:[#allocation144_spill] sm:$0xff] %v16173_v39  ;;  %v7482_v49 = vlaneseq  ;;  %v464_v39 = vld [vmem:[#allocation6] sm:$0x7f]  ;;  %v10582_v47 = vld [vmem:[%s10942_s23 + $0xb8] sm:$0xff] }
 0x555   : > { %v10487_v28 = vpop.eup %10486  ;;  %v9548_v15 = vadd.f32 %v7351_v57, %v4246_v40  ;;  %v8643_v32 = vpop.f32.mrb[33].mxu0  ;;  %v10519_v40 = vld [vmem:[%s10942_s23 + $0x140] sm:$0xff]  ;;  %v10520_v57 = vld [vmem:[%s10942_s23 + $0x118] sm:$0xff]  ;;  %19637 = vst [vmem:[#allocation36_spill] sm:$0xff] %v16193_v48  ;;  %v16213_v48 = vmul.f32 %v10559_v62, %v15965_v63  ;;  %v16229_v62 = vmul.f32 %v10563_v52, %v15965_v63 }
 0x556   : > { %7453 = vperm.xlu1 %10459, %v10487_v28   ;;  %v4253_v41 = vpop.f32.mrb[34].mxu1  ;;  %v16053_v59 = vmul.f32 %v10519_v40, %v15965_v63  ;;  %v16057_v28 = vmul.f32 %v10520_v57, %v15965_v63  ;;  %19622 = vst [vmem:[#allocation166_spill] sm:$0xff] %v16133_v36  ;;  %v10540_v40 = vld [vmem:[%s10942_s23 + $0x230] sm:$0xff] }
 0x557   : > { %10492 = vtanh.f32 %v9548_v15  ;;  %v4255_v58 = vpop.f32.mrb[35].mxu1  ;;  %v10521_v15 = vld [vmem:[%s10942_s23 + $0x138] sm:$0xff]  ;;  %v16137_v57 = vmul.f32 %v10540_v40, %v15965_v63  ;;  %v10550_v40 = vld [vmem:[%s10942_s23 + $0x2e0] sm:$0xff]  ;;  %19642 = vst [vmem:[#allocation181_spill] sm:$0xff] %v16213_v48  ;;  %19646 = vst [vmem:[#allocation189_spill] sm:$0xff] %v16229_v62 }
 0x558   : > { %v7357_v29 = vpop.f32.mrb[34].mxu0  ;;  %19603 = vst [vmem:[#allocation105_spill] sm:$0xff] %v16053_v59  ;;  %v16061_v32 = vmul.f32 %v10521_v15, %v15965_v63  ;;  %v10541_v15 = vld [vmem:[%s10942_s23 + $0x250] sm:$0xff]  ;;  %v10564_v48 = vld [vmem:[%s10942_s23 + $0x380] sm:$0xff]  ;;  %v10568_v62 = vld [vmem:[%s10942_s23 + $0x3b8] sm:$0xff] }
 0x559   : > { %v10489_v34 = vpop.eup %10488  ;;  %v9549_v35 = vadd.f32 %v7357_v29, %v4253_v41  ;;  %v8646_v3 = vpop.f32.mrb[35].mxu0  ;;  %v10522_v41 = vld [vmem:[%s10942_s23 + $0x158] sm:$0xff]  ;;  %19623 = vst [vmem:[#allocation168_spill] sm:$0xff] %v16137_v57 }
 0x55a   : > { %7458 = vperm.xlu0 %10458, %v10489_v34   ;;  %v4260_v21 = vpop.f32.mrb[36].mxu1  ;;  %19604 = vst [vmem:[#allocation106_spill] sm:$0xff] %v16061_v32  ;;  %v16065_v58 = vmul.f32 %v10522_v41, %v15965_v63  ;;  %v10523_v29 = vld [vmem:[%s10942_s23 + $0x178] sm:$0xff]  ;;  %v16141_v41 = vmul.f32 %v10541_v15, %v15965_v63  ;;  %v16177_v15 = vmul.f32 %v10550_v40, %v15965_v63 }
 0x55b   : > { %10494 = vtanh.f32 %v9549_v35  ;;  %v4262_v53 = vpop.f32.mrb[37].mxu1  ;;  %v16069_v34 = vmul.f32 %v10523_v29, %v15965_v63  ;;  %v10524_v35 = vld [vmem:[%s10942_s23 + $0x150] sm:$0xff]  ;;  %v10555_v40 = vld [vmem:[%s10942_s23 + $0x338] sm:$0xff] }
 0x55c   : > { %v7363_v61 = vpop.f32.mrb[36].mxu0  ;;  %19605 = vst [vmem:[#allocation107_spill] sm:$0xff] %v16065_v58  ;;  %v16073_v3 = vmul.f32 %v10524_v35, %v15965_v63  ;;  %19624 = vst [vmem:[#allocation170_spill] sm:$0xff] %v16141_v41  ;;  %v10542_v29 = vld [vmem:[%s10942_s23 + $0x270] sm:$0xff] }
 0x55d   : > { %v10491_v8 = vpop.eup %10490  ;;  %v9550_v7 = vadd.f32 %v7363_v61, %v4260_v21  ;;  %v8649_v5 = vpop.f32.mrb[37].mxu0  ;;  %19606 = vst [vmem:[#allocation230_spill] sm:$0xff] %v16069_v34  ;;  %v10525_v21 = vld [vmem:[%s10942_s23 + $0x170] sm:$0xff]  ;;  %v16145_v35 = vmul.f32 %v10542_v29, %v15965_v63  ;;  %19633 = vst [vmem:[#allocation176_spill] sm:$0xff] %v16177_v15  ;;  %v10551_v29 = vld [vmem:[%s10942_s23 + $0x300] sm:$0xff] }
 0x55e   : > { %7463 = vperm.xlu1 %10459, %v10491_v8   ;;  %19607 = vst [vmem:[#allocation238_spill] sm:$0xff] %v16073_v3  ;;  %v16077_v53 = vmul.f32 %v10525_v21, %v15965_v63  ;;  %v10526_v61 = vld [vmem:[%s10942_s23 + $0x190] sm:$0xff] }
 0x55f   : > { %10496 = vtanh.f32 %v9550_v7  ;;  %v16081_v8 = vmul.f32 %v10526_v61, %v15965_v63  ;;  %v10527_v7 = vld [vmem:[%s10942_s23 + $0x1b0] sm:$0xff]  ;;  %19625 = vst [vmem:[#allocation124_spill] sm:$0xff] %v16145_v35 }
 0x560   : > { %19608 = vst [vmem:[#allocation239_spill] sm:$0xff] %v16077_v53  ;;  %v16085_v5 = vmul.f32 %v10527_v7, %v15965_v63  ;;  %v10543_v21 = vld [vmem:[%s10942_s23 + $0x290] sm:$0xff]  ;;  %v10544_v7 = vld [vmem:[%s10942_s23 + $0x268] sm:$0xff] }
 0x561   : > { %v10493_v16 = vpop.eup %10492  ;;  %19609 = vst [vmem:[#allocation242_spill] sm:$0xff] %v16081_v8  ;;  %v16149_v61 = vmul.f32 %v10543_v21, %v15965_v63  ;;  %v16181_v21 = vmul.f32 %v10551_v29, %v15965_v63  ;;  %v16197_v29 = vmul.f32 %v10555_v40, %v15965_v63  ;;  %v10557_v15 = vld [vmem:[%s10942_s23 + $0x330] sm:$0xff]  ;;  %v10560_v40 = vld [vmem:[%s10942_s23 + $0x348] sm:$0xff] }
 0x562   : > { %7468 = vperm.xlu0 %10458, %v10493_v16   ;;  %19610 = vst [vmem:[#allocation149_spill] sm:$0xff] %v16085_v5  ;;  %v10528_v16 = vld [vmem:[%s10942_s23 + $0x188] sm:$0xff]  ;;  %v10593_v5 = vld [vmem:[%s10942_s23 + $0x180] sm:$0xff] }
 0x563   : > { %19626 = vst [vmem:[#allocation128_spill] sm:$0xff] %v16149_v61  ;;  %19634 = vst [vmem:[#allocation33_spill] sm:$0xff] %v16181_v21  ;;  %v10556_v21 = vld [vmem:[%s10942_s23 + $0x310] sm:$0xff]  ;;  %v10578_v61 = vld [vmem:[%s10942_s23 + $0x88] sm:$0xff] }
 0x564   : > { %19638 = vst [vmem:[#allocation147_spill] sm:$0xff] %v16197_v29  ;;  %v16217_v29 = vmul.f32 %v10560_v40, %v15965_v63  ;;  %v16233_v40 = vmul.f32 %v10564_v48, %v15965_v63  ;;  %v16249_v48 = vmul.f32 %v10568_v62, %v15965_v63  ;;  %v16269_v62 = vmul.f32 %v10573_v6, %v15965_v63 }
 0x565   : > { %v10495_v38 = vpop.eup %10494 }
 0x566   : > { %7473 = vperm.xlu1 %10459, %v10495_v38   ;;  %v16089_v38 = vmul.f32 %v10528_v16, %v15965_v63  ;;  %v16153_v16 = vmul.f32 %v10544_v7, %v15965_v63  ;;  %v10552_v7 = vld [vmem:[%s10942_s23 + $0x2d8] sm:$0xff]  ;;  %19643 = vst [vmem:[#allocation184_spill] sm:$0xff] %v16217_v29  ;;  %19647 = vst [vmem:[#allocation191_spill] sm:$0xff] %v16233_v40  ;;  %v7483_v29 = vshrl.u32 %v7482_v49, 7 }
 0x567   : > { %19651 = vst [vmem:[#allocation200_spill] sm:$0xff] %v16249_v48  ;;  %v10569_v49 = vld [vmem:[%s10942_s23 + $0x3d8] sm:$0xff]  ;;  %19656 = vst [vmem:[#allocation212_spill] sm:$0xff] %v16269_v62 }
 0x568   : > { %19611 = vst [vmem:[#allocation151_spill] sm:$0xff] %v16089_v38  ;;  %19627 = vst [vmem:[#allocation169_spill] sm:$0xff] %v16153_v16  ;;  %v16253_v40 = vmul.f32 %v10569_v49, %v15965_v63  ;;  %v10574_v48 = vld [vmem:[%s10942_s23 + $0x18] sm:$0xff]  ;;  %v7492_v6 = vsub.s32 2, %v7483_v29  ;;  %v7496_v62 = vsub.s32 3, %v7483_v29  ;;  %v7504_v55 = vsub.s32 5, %v7483_v29 }
 0x569   : > { %v10497_v10 = vpop.eup %10496  ;;  %v16273_v49 = vmul.f32 %v10574_v48, %v15965_v63  ;;  %v7508_v54 = vsub.s32 6, %v7483_v29  ;;  %v10580_v16 = vld [vmem:[%s10942_s23 + $0xa0] sm:$0xff] }
 0x56a   : > { %7478 = vperm.xlu0 %10458, %v10497_v10   ;;  %v10529_v10 = vld [vmem:[%s10942_s23 + $0x1a8] sm:$0xff]  ;;  %19652 = vst [vmem:[#allocation204_spill] sm:$0xff] %v16253_v40  ;;  %v16297_v36 = vmul.f32 %v10580_v16, %v15965_v63  ;;  %v10585_v16 = vld [vmem:[%s10942_s23 + $0xf0] sm:$0xff]  ;;  %v16323_v50 = vrot.slane %v464_v39, %v7492_v6 }
 0x56b   : > { %v16093_v44 = vmul.f32 %v10529_v10, %v15965_v63  ;;  %v10545_v10 = vld [vmem:[%s10942_s23 + $0x288] sm:$0xff]  ;;  %v16317_v23 = vmul.f32 %v10585_v16, %v15965_v63  ;;  %v16333_v16 = vrot.slane %v464_v39, %v7504_v55 }
 0x56c   : > { %v16157_v33 = vmul.f32 %v10545_v10, %v15965_v63  ;;  %v16185_v10 = vmul.f32 %v10552_v7, %v15965_v63  ;;  %v16201_v7 = vmul.f32 %v10556_v21, %v15965_v63  ;;  %v10561_v21 = vld [vmem:[%s10942_s23 + $0x368] sm:$0xff] }
 0x56d   : > { %19612 = vst [vmem:[#allocation156_spill] sm:$0xff] %v16093_v44  ;;  %v10577_v40 = vld [vmem:[%s10942_s23 + $0x68] sm:$0xff]  ;;  %v10594_v44 = vld [vmem:[%s10942_s23 + $0x30] sm:$0xff] }
 0x56e   : > { %19628 = vst [vmem:[#allocation174_spill] sm:$0xff] %v16157_v33  ;;  %19635 = vst [vmem:[#allocation146_spill] sm:$0xff] %v16185_v10  ;;  %v16205_v10 = vmul.f32 %v10557_v15, %v15965_v63  ;;  %v16221_v15 = vmul.f32 %v10561_v21, %v15965_v63  ;;  %v16285_v48 = vmul.f32 %v10577_v40, %v15965_v63  ;;  %v10579_v33 = vld [vmem:[%s10942_s23 + $0x80] sm:$0xff]  ;;  %v10588_v6 = vld [vmem:[%s10942_s23 + $0x128] sm:$0xff] }
 0x56f   : > { %19639 = vst [vmem:[#allocation39_spill] sm:$0xff] %v16201_v7  ;;  %v10565_v7 = vld [vmem:[%s10942_s23 + $0x3a0] sm:$0xff]  ;;  %v16293_v35 = vmul.f32 %v10579_v33, %v15965_v63  ;;  %v10584_v33 = vld [vmem:[%s10942_s23 + $0xf8] sm:$0xff] }
 0x570   : > { %19640 = vst [vmem:[#allocation154_spill] sm:$0xff] %v16205_v10  ;;  %19644 = vst [vmem:[#allocation188_spill] sm:$0xff] %v16221_v15  ;;  %v10562_v10 = vld [vmem:[%s10942_s23 + $0x388] sm:$0xff]  ;;  %v16237_v21 = vmul.f32 %v10565_v7, %v15965_v63  ;;  %v10566_v15 = vld [vmem:[%s10942_s23 + $0x3c0] sm:$0xff]  ;;  %v16313_v22 = vmul.f32 %v10584_v33, %v15965_v63  ;;  %v16329_v33 = vmul.f32 %v10586_v31, %v15965_v63 }
 0x571   : > { %v16225_v19 = vmul.f32 %v10562_v10, %v15965_v63  ;;  %v16241_v10 = vmul.f32 %v10566_v15, %v15965_v63  ;;  %v10570_v7 = vld [vmem:[%s10942_s23 + $0x3f8] sm:$0xff]  ;;  %v10581_v40 = vld [vmem:[%s10942_s23 + $0xc0] sm:$0xff]  ;;  %v16347_v31 = vmul.f32 %v10589_v11, %v15965_v63  ;;  %v7657_v11 = vmul.f32 %v10594_v44, %v15965_v63 }
 0x572   : > { %19648 = vst [vmem:[#allocation196_spill] sm:$0xff] %v16237_v21  ;;  %v16257_v21 = vmul.f32 %v10570_v7, %v15965_v63  ;;  %v10571_v15 = vld [vmem:[%s10942_s23 + $0x418] sm:$0xff]  ;;  %v10575_v7 = vld [vmem:[%s10942_s23 + $0x50] sm:$0xff]  ;;  %v16301_v41 = vmul.f32 %v10581_v40, %v15965_v63 }
 0x573   : > { %19645 = vst [vmem:[#allocation186_spill] sm:$0xff] %v16225_v19  ;;  %19649 = vst [vmem:[#allocation194_spill] sm:$0xff] %v16241_v10  ;;  %v10567_v19 = vld [vmem:[%s10942_s23 + $0x3e0] sm:$0xff]  ;;  %v16261_v10 = vmul.f32 %v10571_v15, %v15965_v63  ;;  %v10576_v15 = vld [vmem:[%s10942_s23 + $0x48] sm:$0xff] }
 0x574   : > { %v16245_v52 = vmul.f32 %v10567_v19, %v15965_v63  ;;  %19653 = vst [vmem:[#allocation201_spill] sm:$0xff] %v16257_v21  ;;  %v10572_v19 = vld [vmem:[%s10942_s23 + $0x3f0] sm:$0xff]  ;;  %v16277_v21 = vmul.f32 %v10575_v7, %v15965_v63  ;;  %v7500_v7 = vsub.s32 4, %v7483_v29  ;;  %19658 = vst [vmem:[#allocation213_spill] sm:$0xff] %v16347_v31  ;;  %v10596_v31 = vld [vmem:[%s10942_s23 + $0x198] sm:$0xff] }
 0x575   : > { %19654 = vst [vmem:[#allocation205_spill] sm:$0xff] %v16261_v10  ;;  %v16281_v10 = vmul.f32 %v10576_v15, %v15965_v63  ;;  %v16289_v15 = vmul.f32 %v10578_v61, %v15965_v63  ;;  %v10583_v61 = vld [vmem:[%s10942_s23 + $0xd8] sm:$0xff]  ;;  %v16381_v59 = vmul.f32 %v10596_v31, %v15965_v63 }
 0x576   : > { %19650 = vst [vmem:[#allocation197_spill] sm:$0xff] %v16245_v52  ;;  %v16265_v52 = vmul.f32 %v10572_v19, %v15965_v63  ;;  %v7484_v19 = vsub.s32 0, %v7483_v29  ;;  %v16309_v57 = vmul.f32 %v10583_v61, %v15965_v63  ;;  %v16325_v61 = vrot.slane %v464_v39, %v7496_v62 }
 0x577   : > { %v16331_v0 = vrot.slane %v464_v39, %v7500_v7  ;;  %v16343_v62 = vmul.f32 %v10588_v6, %v15965_v63  ;;  %v10590_v7 = vld [vmem:[%s10942_s23 + $0x10] sm:$0xff]  ;;  %v16361_v6 = vmul.f32 %v10593_v5, %v15965_v63 }
 0x578   : > { %19655 = vst [vmem:[#allocation207_spill] sm:$0xff] %v16265_v52  ;;  %v7488_v52 = vsub.s32 1, %v7483_v29  ;;  %v16305_v29 = vmul.f32 %v10582_v47, %v15965_v63  ;;  %v16319_v40 = vrot.slane %v464_v39, %v7484_v19  ;;  %v16335_v19 = vrot.slane %v464_v39, %v7508_v54 }
 0x579   : > { %v7653_v55 = vmul.f32 %v10590_v7, %v15965_v63  ;;  %v16353_v54 = vmul.f32 %v10591_v46, %v15965_v63  ;;  %19661 = vst [vmem:[#allocation216_spill] sm:$0xff] %v16361_v6 }
 0x57a   : > { %v16321_v47 = vrot.slane %v464_v39, %v7488_v52  ;;  %v10587_v52 = vld [vmem:[%s10942_s23 + $0x130] sm:$0xff]  ;;  %v10592_v39 = vld [vmem:[%s10942_s23 + $0x160] sm:$0xff] }
 0x57b   : > { %v16339_v17 = vmul.f32 %v10587_v52, %v15965_v63  ;;  %19659 = vst [vmem:[#allocation215_spill] sm:$0xff] %v16353_v54  ;;  %v16357_v52 = vmul.f32 %v10592_v39, %v15965_v63  ;;  %v10595_v39 = vld [vmem:[%s10942_s23 + $0x1a0] sm:$0xff] }
 0x57c   : > { %v16371_v53 = vmul.f32 %v10595_v39, %v15965_v63 }
 0x57d   : > { %19657 = vst [vmem:[#allocation209_spill] sm:$0xff] %v16339_v17  ;;  %19660 = vst [vmem:[#allocation218_spill] sm:$0xff] %v16357_v52 }
 0x57e   : > { %19662 = vst [vmem:[#allocation222_spill] sm:$0xff] %v16371_v53 }
 0x5a1   : > { %v7389_v8 = vpop.permute.xlu0 %7388 }
 0x5a2   : > { %v7517_v38 = vmul.f32 %v16319_v40, %v7389_v8  ;;  %v7518_v7 = vmul.f32 %v16321_v47, %v7389_v8  ;;  %v7519_v46 = vmul.f32 %v16323_v50, %v7389_v8  ;;  %v7520_v34 = vmul.f32 %v16325_v61, %v7389_v8 }
 0x5a3   : > { %v7521_v5 = vmul.f32 %v16331_v0, %v7389_v8  ;;  %v7522_v6 = vmul.f32 %v16333_v16, %v7389_v8  ;;  %v7523_v44 = vmul.f32 %v16335_v19, %v7389_v8 }
 0x5a4   : > { %v7784_v54 = vadd.f32 %v15977_v26, %v7517_v38  ;;  %v7785_v52 = vadd.f32 %v15969_v43, %v7518_v7  ;;  %v7786_v58 = vadd.f32 %v7653_v55, %v7519_v46  ;;  %v7787_v3 = vadd.f32 %v16273_v49, %v7520_v34  ;;  %v10597_v34 = vld [vmem:[%s10942_s23 + $0x1b8] sm:$0xff] }
 0x5a5   : > { %v7788_v39 = vadd.f32 %v15981_v45, %v7521_v5  ;;  %v7789_v53 = vadd.f32 %v15973_v13, %v7522_v6  ;;  %v7790_v32 = vadd.f32 %v7657_v11, %v7523_v44  ;;  %v7394_v17 = vpop.permute.xlu0 %7393  ;;  %v16399_v8 = vmul.f32 %v10597_v34, %v15965_v63 }
 0x5a6   : > { %7917 = vst [vmem:[%s16387_s13] sm:$0xff] %v7784_v54  ;;  %7918 = vst [vmem:[%s16387_s13 + $0x8] sm:$0xff] %v7785_v52  ;;  %v7524_v43 = vmul.f32 %v16319_v40, %v7394_v17  ;;  %v7525_v13 = vmul.f32 %v16321_v47, %v7394_v17  ;;  %v7526_v26 = vmul.f32 %v16323_v50, %v7394_v17  ;;  %v10598_v54 = vld [vmem:[%s10942_s23 + $0x1d8] sm:$0xff] }
 0x5a7   : > { %7919 = vst [vmem:[%s16387_s13 + $0x10] sm:$0xff] %v7786_v58  ;;  %7920 = vst [vmem:[%s16387_s13 + $0x18] sm:$0xff] %v7787_v3  ;;  %v7527_v45 = vmul.f32 %v16325_v61, %v7394_v17  ;;  %v7528_v58 = vmul.f32 %v16331_v0, %v7394_v17  ;;  %v7529_v3 = vmul.f32 %v16333_v16, %v7394_v17 }
 0x5a8   : > { %7921 = vst [vmem:[%s16387_s13 + $0x20] sm:$0xff] %v7788_v39  ;;  %7922 = vst [vmem:[%s16387_s13 + $0x28] sm:$0xff] %v7789_v53  ;;  %v7530_v38 = vmul.f32 %v16335_v19, %v7394_v17  ;;  %v7791_v49 = vadd.f32 %v15993_v24, %v7524_v43  ;;  %v7792_v31 = vadd.f32 %v15985_v56, %v7525_v13  ;;  %v10600_v13 = vld [vmem:[%s10942_s23 + $0x1f0] sm:$0xff] }
 0x5a9   : > { %7923 = vst.msk [vmem:[%s16387_s13 + $0x30] sm:$0xff] %vm466_vm0, %v7790_v32  ;;  %v7793_v55 = vadd.f32 %v16281_v10, %v7526_v26  ;;  %v7794_v53 = vadd.f32 %v16277_v21, %v7527_v45  ;;  %v16414_v32 = vmul.f32 %v10598_v54, %v15965_v63  ;;  %v7795_v52 = vadd.f32 %v15997_v25, %v7528_v58  ;;  %v7399_v6 = vpop.permute.xlu1 %7398  ;;  %v10599_v25 = vld [vmem:[%s10942_s23 + $0x1d0] sm:$0xff] }
 0x5aa   : > { %v7796_v17 = vadd.f32 %v15989_v42, %v7529_v3  ;;  %v7797_v24 = vadd.f32 %v16285_v48, %v7530_v38  ;;  %7924 = vst [vmem:[%s16387_s13 + $0x38] sm:$0xff] %v7791_v49  ;;  %7925 = vst [vmem:[%s16387_s13 + $0x40] sm:$0xff] %v7792_v31  ;;  %v7531_v56 = vmul.f32 %v16319_v40, %v7399_v6 }
 0x5ab   : > { %7926 = vst [vmem:[%s16387_s13 + $0x48] sm:$0xff] %v7793_v55  ;;  %7927 = vst [vmem:[%s16387_s13 + $0x50] sm:$0xff] %v7794_v53  ;;  %v7532_v21 = vmul.f32 %v16321_v47, %v7399_v6  ;;  %v7533_v10 = vmul.f32 %v16323_v50, %v7399_v6  ;;  %v7534_v11 = vmul.f32 %v16325_v61, %v7399_v6 }
 0x5ac   : > { %v16429_v7 = vmul.f32 %v10599_v25, %v15965_v63  ;;  %7928 = vst [vmem:[%s16387_s13 + $0x58] sm:$0xff] %v7795_v52  ;;  %7929 = vst [vmem:[%s16387_s13 + $0x60] sm:$0xff] %v7796_v17  ;;  %v7535_v42 = vmul.f32 %v16331_v0, %v7399_v6  ;;  %v7536_v48 = vmul.f32 %v16333_v16, %v7399_v6  ;;  %v10602_v52 = vld [vmem:[%s10942_s23 + $0x208] sm:$0xff] }
 0x5ad   : > { %7930 = vst.msk [vmem:[%s16387_s13 + $0x68] sm:$0xff] %vm466_vm0, %v7797_v24  ;;  %v7537_v46 = vmul.f32 %v16335_v19, %v7399_v6  ;;  %v7798_v5 = vadd.f32 %v16009_v20, %v7531_v56  ;;  %v7799_v44 = vadd.f32 %v16001_v27, %v7532_v21  ;;  %v7800_v39 = vadd.f32 %v16293_v35, %v7533_v10  ;;  %v7404_v58 = vpop.permute.xlu1 %7403 }
 0x5ae   : > { %v7801_v43 = vadd.f32 %v16289_v15, %v7534_v11  ;;  %v16444_v26 = vmul.f32 %v10600_v13, %v15965_v63  ;;  %v7802_v45 = vadd.f32 %v16013_v9, %v7535_v42  ;;  %v7803_v34 = vadd.f32 %v16005_v1, %v7536_v48  ;;  %v10601_v9 = vld [vmem:[%s10942_s23 + $0x210] sm:$0xff] }
 0x5af   : > { %v7804_v20 = vadd.f32 %v16297_v36, %v7537_v46  ;;  %7931 = vst [vmem:[%s16387_s13 + $0x70] sm:$0xff] %v7798_v5  ;;  %7932 = vst [vmem:[%s16387_s13 + $0x78] sm:$0xff] %v7799_v44  ;;  %v7538_v27 = vmul.f32 %v16319_v40, %v7404_v58  ;;  %v7539_v35 = vmul.f32 %v16321_v47, %v7404_v58  ;;  %v10604_v5 = vld [vmem:[%s10942_s23 + $0x248] sm:$0xff] }
 0x5b0   : > { %7933 = vst [vmem:[%s16387_s13 + $0x80] sm:$0xff] %v7800_v39  ;;  %7934 = vst [vmem:[%s16387_s13 + $0x88] sm:$0xff] %v7801_v43  ;;  %v7540_v15 = vmul.f32 %v16323_v50, %v7404_v58  ;;  %v7541_v3 = vmul.f32 %v16325_v61, %v7404_v58  ;;  %v16459_v38 = vmul.f32 %v10601_v9, %v15965_v63  ;;  %v10606_v9 = vld [vmem:[%s10942_s23 + $0x260] sm:$0xff] }
 0x5b1   : > { %7935 = vst [vmem:[%s16387_s13 + $0x90] sm:$0xff] %v7802_v45  ;;  %7936 = vst [vmem:[%s16387_s13 + $0x98] sm:$0xff] %v7803_v34  ;;  %v7542_v1 = vmul.f32 %v16331_v0, %v7404_v58  ;;  %v7543_v36 = vmul.f32 %v16333_v16, %v7404_v58  ;;  %v7544_v49 = vmul.f32 %v16335_v19, %v7404_v58  ;;  %v7409_v56 = vpop.permute.xlu0 %7408 }
 0x5b2   : > { %7937 = vst.msk [vmem:[%s16387_s13 + $0xa0] sm:$0xff] %vm466_vm0, %v7804_v20  ;;  %v7805_v31 = vadd.f32 %v16025_v37, %v7538_v27  ;;  %v7806_v55 = vadd.f32 %v16017_v14, %v7539_v35  ;;  %v7807_v53 = vadd.f32 %v16305_v29, %v7540_v15  ;;  %v7808_v54 = vadd.f32 %v16301_v41, %v7541_v3  ;;  %v19663_v15 = vld [vmem:[#allocation209_spill] sm:$0xff] }
 0x5b3   : > { %v16474_v17 = vmul.f32 %v10602_v52, %v15965_v63  ;;  %v7809_v24 = vadd.f32 %v16029_v18, %v7542_v1  ;;  %v7810_v6 = vadd.f32 %v16021_v30, %v7543_v36  ;;  %v7811_v37 = vadd.f32 %v16309_v57, %v7544_v49  ;;  %v10603_v18 = vld [vmem:[%s10942_s23 + $0x228] sm:$0xff]  ;;  %v19664_v36 = vld [vmem:[#allocation106_spill] sm:$0xff] }
 0x5b4   : > { %7938 = vst [vmem:[%s16387_s13 + $0xa8] sm:$0xff] %v7805_v31  ;;  %7939 = vst [vmem:[%s16387_s13 + $0xb0] sm:$0xff] %v7806_v55  ;;  %v7545_v14 = vmul.f32 %v16319_v40, %v7409_v56  ;;  %v7546_v41 = vmul.f32 %v16321_v47, %v7409_v56  ;;  %v7547_v29 = vmul.f32 %v16323_v50, %v7409_v56  ;;  %v19665_v31 = vld [vmem:[#allocation105_spill] sm:$0xff] }
 0x5b5   : > { %7940 = vst [vmem:[%s16387_s13 + $0xb8] sm:$0xff] %v7807_v53  ;;  %7941 = vst [vmem:[%s16387_s13 + $0xc0] sm:$0xff] %v7808_v54  ;;  %v7548_v21 = vmul.f32 %v16325_v61, %v7409_v56  ;;  %v16489_v10 = vmul.f32 %v10603_v18, %v15965_v63  ;;  %v7549_v30 = vmul.f32 %v16331_v0, %v7409_v56  ;;  %v7414_v13 = vpop.permute.xlu1 %7413  ;;  %v19666_v53 = vld [vmem:[#allocation213_spill] sm:$0xff]  ;;  %v19668_v18 = vld [vmem:[#allocation107_spill] sm:$0xff] }
 0x5b6   : > { %7942 = vst [vmem:[%s16387_s13 + $0xc8] sm:$0xff] %v7809_v24  ;;  %7943 = vst [vmem:[%s16387_s13 + $0xd0] sm:$0xff] %v7810_v6  ;;  %v7550_v57 = vmul.f32 %v16333_v16, %v7409_v56  ;;  %v7551_v11 = vmul.f32 %v16335_v19, %v7409_v56  ;;  %v7812_v25 = vadd.f32 %v16041_v51, %v7545_v14  ;;  %v10607_v6 = vld [vmem:[%s10942_s23 + $0x280] sm:$0xff] }
 0x5b7   : > { %7944 = vst.msk [vmem:[%s16387_s13 + $0xd8] sm:$0xff] %vm466_vm0, %v7811_v37  ;;  %v7813_v42 = vadd.f32 %v16033_v60, %v7546_v41  ;;  %v7814_v48 = vadd.f32 %v16317_v23, %v7547_v29  ;;  %v7815_v46 = vadd.f32 %v16313_v22, %v7548_v21  ;;  %v16504_v44 = vmul.f32 %v10604_v5, %v15965_v63  ;;  %v19667_v29 = vld [vmem:[#allocation238_spill] sm:$0xff]  ;;  %v19671_v5 = vld [vmem:[#allocation239_spill] sm:$0xff] }
 0x5b8   : > { %v7816_v39 = vadd.f32 %v16045_v4, %v7549_v30  ;;  %v7817_v43 = vadd.f32 %v16037_v2, %v7550_v57  ;;  %v7818_v51 = vadd.f32 %v16329_v33, %v7551_v11  ;;  %7945 = vst [vmem:[%s16387_s13 + $0xe0] sm:$0xff] %v7812_v25  ;;  %v7552_v60 = vmul.f32 %v16319_v40, %v7414_v13  ;;  %v10605_v4 = vld [vmem:[%s10942_s23 + $0x240] sm:$0xff]  ;;  %v19669_v57 = vld [vmem:[#allocation218_spill] sm:$0xff] }
 0x5b9   : > { %7946 = vst [vmem:[%s16387_s13 + $0xe8] sm:$0xff] %v7813_v42  ;;  %7947 = vst [vmem:[%s16387_s13 + $0xf0] sm:$0xff] %v7814_v48  ;;  %v7553_v22 = vmul.f32 %v16321_v47, %v7414_v13  ;;  %v7554_v23 = vmul.f32 %v16323_v50, %v7414_v13  ;;  %v7555_v45 = vmul.f32 %v16325_v61, %v7414_v13  ;;  %v7419_v54 = vpop.permute.xlu0 %7418  ;;  %v19670_v25 = vld [vmem:[#allocation215_spill] sm:$0xff] }
 0x5ba   : > { %7948 = vst [vmem:[%s16387_s13 + $0xf8] sm:$0xff] %v7815_v46  ;;  %v16519_v34 = vmul.f32 %v10605_v4, %v15965_v63  ;;  %7949 = vst [vmem:[%s16387_s13 + $0x100] sm:$0xff] %v7816_v39  ;;  %v7556_v2 = vmul.f32 %v16331_v0, %v7414_v13  ;;  %v7557_v33 = vmul.f32 %v16333_v16, %v7414_v13  ;;  %v10608_v48 = vld [vmem:[%s10942_s23 + $0x278] sm:$0xff] }
 0x5bb   : > { %7950 = vst [vmem:[%s16387_s13 + $0x108] sm:$0xff] %v7817_v43  ;;  %7951 = vst.msk [vmem:[%s16387_s13 + $0x110] sm:$0xff] %vm466_vm0, %v7818_v51  ;;  %v7558_v20 = vmul.f32 %v16335_v19, %v7414_v13  ;;  %v7819_v58 = vadd.f32 %v16057_v28, %v7552_v60  ;;  %v7820_v27 = vadd.f32 %v16049_v12, %v7553_v22  ;;  %v19672_v43 = vld [vmem:[#allocation230_spill] sm:$0xff]  ;;  %v19673_v13 = vld [vmem:[#allocation216_spill] sm:$0xff] }
 0x5bc   : > { %v7821_v35 = vadd.f32 %v16343_v62, %v7554_v23  ;;  %v7822_v3 = vadd.f32 %v19663_v15, %v7555_v45  ;;  %v16534_v1 = vmul.f32 %v10606_v9, %v15965_v63  ;;  %v7823_v49 = vadd.f32 %v19664_v36, %v7556_v2  ;;  %v19674_v15 = vld [vmem:[#allocation151_spill] sm:$0xff]  ;;  %v19675_v9 = vld [vmem:[#allocation242_spill] sm:$0xff] }
 0x5bd   : > { %v7824_v55 = vadd.f32 %v19665_v31, %v7557_v33  ;;  %v7825_v28 = vadd.f32 %v19666_v53, %v7558_v20  ;;  %7952 = vst [vmem:[%s16387_s13 + $0x118] sm:$0xff] %v7819_v58  ;;  %7953 = vst [vmem:[%s16387_s13 + $0x120] sm:$0xff] %v7820_v27  ;;  %v7559_v12 = vmul.f32 %v16319_v40, %v7419_v54  ;;  %v7424_v22 = vpop.permute.xlu1 %7423  ;;  %v10609_v33 = vld [vmem:[%s10942_s23 + $0x298] sm:$0xff] }
 0x5be   : > { %7954 = vst [vmem:[%s16387_s13 + $0x128] sm:$0xff] %v7821_v35  ;;  %7955 = vst [vmem:[%s16387_s13 + $0x130] sm:$0xff] %v7822_v3  ;;  %v7560_v62 = vmul.f32 %v16321_v47, %v7419_v54  ;;  %v7561_v52 = vmul.f32 %v16323_v50, %v7419_v54  ;;  %v7562_v24 = vmul.f32 %v16325_v61, %v7419_v54  ;;  %v19676_v31 = vld [vmem:[#allocation222_spill] sm:$0xff] }
 0x5bf   : > { %v16549_v37 = vmul.f32 %v10607_v6, %v15965_v63  ;;  %7956 = vst [vmem:[%s16387_s13 + $0x138] sm:$0xff] %v7823_v49  ;;  %7957 = vst [vmem:[%s16387_s13 + $0x140] sm:$0xff] %v7824_v55  ;;  %v7563_v56 = vmul.f32 %v16331_v0, %v7419_v54  ;;  %v7564_v14 = vmul.f32 %v16333_v16, %v7419_v54  ;;  %v10610_v53 = vld [vmem:[%s10942_s23 + $0x2b8] sm:$0xff] }
 0x5c0   : > { %7958 = vst.msk [vmem:[%s16387_s13 + $0x148] sm:$0xff] %vm466_vm0, %v7825_v28  ;;  %v7565_v41 = vmul.f32 %v16335_v19, %v7419_v54  ;;  %v7826_v21 = vadd.f32 %v19667_v29, %v7559_v12  ;;  %v7827_v30 = vadd.f32 %v19668_v18, %v7560_v62  ;;  %v7828_v11 = vadd.f32 %v19669_v57, %v7561_v52  ;;  %v19677_v54 = vld [vmem:[#allocation156_spill] sm:$0xff]  ;;  %v19678_v62 = vld [vmem:[#allocation149_spill] sm:$0xff] }
 0x5c1   : > { %v7829_v42 = vadd.f32 %v19670_v25, %v7562_v24  ;;  %v16564_v46 = vmul.f32 %v10608_v48, %v15965_v63  ;;  %v7830_v39 = vadd.f32 %v19671_v5, %v7563_v56  ;;  %v7831_v51 = vadd.f32 %v19672_v43, %v7564_v14  ;;  %v7429_v6 = vpop.permute.xlu0 %7428  ;;  %v10611_v29 = vld [vmem:[%s10942_s23 + $0x2b0] sm:$0xff]  ;;  %v19680_v25 = vld [vmem:[#allocation104_spill] sm:$0xff] }
 0x5c2   : > { %v7832_v60 = vadd.f32 %v19673_v13, %v7565_v41  ;;  %7959 = vst [vmem:[%s16387_s13 + $0x150] sm:$0xff] %v7826_v21  ;;  %7960 = vst [vmem:[%s16387_s13 + $0x158] sm:$0xff] %v7827_v30  ;;  %v7566_v23 = vmul.f32 %v16319_v40, %v7424_v22  ;;  %v7567_v45 = vmul.f32 %v16321_v47, %v7424_v22  ;;  %v19679_v57 = vld [vmem:[#allocation153_spill] sm:$0xff] }
 0x5c3   : > { %7961 = vst [vmem:[%s16387_s13 + $0x160] sm:$0xff] %v7828_v11  ;;  %7962 = vst [vmem:[%s16387_s13 + $0x168] sm:$0xff] %v7829_v42  ;;  %v7568_v4 = vmul.f32 %v16323_v50, %v7424_v22  ;;  %v7569_v2 = vmul.f32 %v16325_v61, %v7424_v22  ;;  %v16579_v20 = vmul.f32 %v10609_v33, %v15965_v63  ;;  %v10613_v33 = vld [vmem:[%s10942_s23 + $0x2f0] sm:$0xff] }
 0x5c4   : > { %7963 = vst [vmem:[%s16387_s13 + $0x170] sm:$0xff] %v7830_v39  ;;  %7964 = vst [vmem:[%s16387_s13 + $0x178] sm:$0xff] %v7831_v51  ;;  %v7570_v58 = vmul.f32 %v16331_v0, %v7424_v22  ;;  %v7571_v27 = vmul.f32 %v16333_v16, %v7424_v22  ;;  %v7572_v35 = vmul.f32 %v16335_v19, %v7424_v22  ;;  %v10612_v39 = vld [vmem:[%s10942_s23 + $0x2d0] sm:$0xff] }
 0x5c5   : > { %7965 = vst.msk [vmem:[%s16387_s13 + $0x180] sm:$0xff] %vm466_vm0, %v7832_v60  ;;  %v7833_v3 = vadd.f32 %v19674_v15, %v7566_v23  ;;  %v7834_v36 = vadd.f32 %v19675_v9, %v7567_v45  ;;  %v7835_v49 = vadd.f32 %v16381_v59, %v7568_v4  ;;  %v7836_v55 = vadd.f32 %v19676_v31, %v7569_v2  ;;  %v19681_v51 = vld [vmem:[#allocation157_spill] sm:$0xff]  ;;  %v19682_v60 = vld [vmem:[#allocation112_spill] sm:$0xff]  ;;  %v7434_v45 = vpop.permute.xlu1 %7433  ;;  %v19684_v9 = vld [vmem:[#allocation159_spill] sm:$0xff] }
 0x5c6   : > { %v16594_v28 = vmul.f32 %v10610_v53, %v15965_v63  ;;  %v7837_v12 = vadd.f32 %v19677_v54, %v7570_v58  ;;  %v7838_v52 = vadd.f32 %v19678_v62, %v7571_v27  ;;  %v7839_v24 = vadd.f32 %v16399_v8, %v7572_v35  ;;  %v19683_v15 = vld [vmem:[#allocation116_spill] sm:$0xff]  ;;  %v19685_v54 = vld [vmem:[#allocation119_spill] sm:$0xff]  ;;  %v19686_v62 = vld [vmem:[#allocation162_spill] sm:$0xff] }
 0x5c7   : > { %7966 = vst [vmem:[%s16387_s13 + $0x188] sm:$0xff] %v7833_v3  ;;  %7967 = vst [vmem:[%s16387_s13 + $0x190] sm:$0xff] %v7834_v36  ;;  %v7573_v59 = vmul.f32 %v16319_v40, %v7429_v6  ;;  %v7574_v56 = vmul.f32 %v16321_v47, %v7429_v6  ;;  %v7575_v14 = vmul.f32 %v16323_v50, %v7429_v6 }
 0x5c8   : > { %7968 = vst [vmem:[%s16387_s13 + $0x198] sm:$0xff] %v7835_v49  ;;  %7969 = vst [vmem:[%s16387_s13 + $0x1a0] sm:$0xff] %v7836_v55  ;;  %v7576_v41 = vmul.f32 %v16325_v61, %v7429_v6  ;;  %v16609_v21 = vmul.f32 %v10611_v29, %v15965_v63  ;;  %v7577_v8 = vmul.f32 %v16331_v0, %v7429_v6  ;;  %v10614_v55 = vld [vmem:[%s10942_s23 + $0x2e8] sm:$0xff] }
 0x5c9   : > { %7970 = vst [vmem:[%s16387_s13 + $0x1a8] sm:$0xff] %v7837_v12  ;;  %7971 = vst [vmem:[%s16387_s13 + $0x1b0] sm:$0xff] %v7838_v52  ;;  %v7578_v18 = vmul.f32 %v16333_v16, %v7429_v6  ;;  %v7579_v30 = vmul.f32 %v16335_v19, %v7429_v6  ;;  %v7840_v11 = vadd.f32 %v19679_v57, %v7573_v59  ;;  %v7439_v6 = vpop.permute.xlu0 %7438  ;;  %v19688_v57 = vld [vmem:[#allocation160_spill] sm:$0xff] }
 0x5ca   : > { %7972 = vst.msk [vmem:[%s16387_s13 + $0x1b8] sm:$0xff] %vm466_vm0, %v7839_v24  ;;  %v7841_v42 = vadd.f32 %v19680_v25, %v7574_v56  ;;  %v7842_v48 = vadd.f32 %v16429_v7, %v7575_v14  ;;  %v7843_v5 = vadd.f32 %v16414_v32, %v7576_v41  ;;  %v16624_v43 = vmul.f32 %v10612_v39, %v15965_v63  ;;  %v10615_v14 = vld [vmem:[%s10942_s23 + $0x308] sm:$0xff]  ;;  %v19689_v39 = vld [vmem:[#allocation170_spill] sm:$0xff] }
 0x5cb   : > { %v7844_v13 = vadd.f32 %v19681_v51, %v7577_v8  ;;  %v7845_v22 = vadd.f32 %v19682_v60, %v7578_v18  ;;  %v7846_v23 = vadd.f32 %v16444_v26, %v7579_v30  ;;  %7973 = vst [vmem:[%s16387_s13 + $0x1c0] sm:$0xff] %v7840_v11  ;;  %v7580_v32 = vmul.f32 %v16319_v40, %v7434_v45  ;;  %v19687_v18 = vld [vmem:[#allocation168_spill] sm:$0xff] }
 0x5cc   : > { %7974 = vst [vmem:[%s16387_s13 + $0x1c8] sm:$0xff] %v7841_v42  ;;  %7975 = vst [vmem:[%s16387_s13 + $0x1d0] sm:$0xff] %v7842_v48  ;;  %v7581_v7 = vmul.f32 %v16321_v47, %v7434_v45  ;;  %v7582_v4 = vmul.f32 %v16323_v50, %v7434_v45  ;;  %v7583_v2 = vmul.f32 %v16325_v61, %v7434_v45  ;;  %v10616_v48 = vld [vmem:[%s10942_s23 + $0x328] sm:$0xff] }
 0x5cd   : > { %7976 = vst [vmem:[%s16387_s13 + $0x1d8] sm:$0xff] %v7843_v5  ;;  %v16639_v58 = vmul.f32 %v10613_v33, %v15965_v63  ;;  %7977 = vst [vmem:[%s16387_s13 + $0x1e0] sm:$0xff] %v7844_v13  ;;  %v7584_v26 = vmul.f32 %v16331_v0, %v7434_v45  ;;  %v7585_v27 = vmul.f32 %v16333_v16, %v7434_v45  ;;  %v19690_v13 = vld [vmem:[#allocation166_spill] sm:$0xff] }
 0x5ce   : > { %7978 = vst [vmem:[%s16387_s13 + $0x1e8] sm:$0xff] %v7845_v22  ;;  %7979 = vst.msk [vmem:[%s16387_s13 + $0x1f0] sm:$0xff] %vm466_vm0, %v7846_v23  ;;  %v7586_v35 = vmul.f32 %v16335_v19, %v7434_v45  ;;  %v7847_v3 = vadd.f32 %v19683_v15, %v7580_v32  ;;  %v7848_v36 = vadd.f32 %v19684_v9, %v7581_v7  ;;  %v7444_v23 = vpop.permute.xlu1 %7443  ;;  %v10617_v7 = vld [vmem:[%s10942_s23 + $0x320] sm:$0xff] }
 0x5cf   : > { %v7849_v49 = vadd.f32 %v16474_v17, %v7582_v4  ;;  %v7850_v31 = vadd.f32 %v16459_v38, %v7583_v2  ;;  %v16654_v53 = vmul.f32 %v10614_v55, %v15965_v63  ;;  %v7851_v12 = vadd.f32 %v19685_v54, %v7584_v26  ;;  %v19691_v26 = vld [vmem:[#allocation169_spill] sm:$0xff]  ;;  %v19694_v54 = vld [vmem:[#allocation128_spill] sm:$0xff] }
 0x5d0   : > { %v7852_v52 = vadd.f32 %v19686_v62, %v7585_v27  ;;  %v7853_v24 = vadd.f32 %v16489_v10, %v7586_v35  ;;  %7980 = vst [vmem:[%s16387_s13 + $0x1f8] sm:$0xff] %v7847_v3  ;;  %7981 = vst [vmem:[%s16387_s13 + $0x200] sm:$0xff] %v7848_v36  ;;  %v7587_v38 = vmul.f32 %v16319_v40, %v7439_v6  ;;  %v19692_v35 = vld [vmem:[#allocation124_spill] sm:$0xff] }
 0x5d1   : > { %7982 = vst [vmem:[%s16387_s13 + $0x208] sm:$0xff] %v7849_v49  ;;  %7983 = vst [vmem:[%s16387_s13 + $0x210] sm:$0xff] %v7850_v31  ;;  %v7588_v17 = vmul.f32 %v16321_v47, %v7439_v6  ;;  %v7589_v59 = vmul.f32 %v16323_v50, %v7439_v6  ;;  %v7590_v56 = vmul.f32 %v16325_v61, %v7439_v6  ;;  %v10618_v36 = vld [vmem:[%s10942_s23 + $0x340] sm:$0xff]  ;;  %v19693_v31 = vld [vmem:[#allocation174_spill] sm:$0xff] }
 0x5d2   : > { %v16669_v41 = vmul.f32 %v10615_v14, %v15965_v63  ;;  %7984 = vst [vmem:[%s16387_s13 + $0x218] sm:$0xff] %v7851_v12  ;;  %7985 = vst [vmem:[%s16387_s13 + $0x220] sm:$0xff] %v7852_v52  ;;  %v7591_v10 = vmul.f32 %v16331_v0, %v7439_v6  ;;  %v7592_v29 = vmul.f32 %v16333_v16, %v7439_v6  ;;  %v7449_v52 = vpop.permute.xlu0 %7448  ;;  %v19695_v14 = vld [vmem:[#allocation139_spill] sm:$0xff] }
 0x5d3   : > { %7986 = vst.msk [vmem:[%s16387_s13 + $0x228] sm:$0xff] %vm466_vm0, %v7853_v24  ;;  %v7593_v8 = vmul.f32 %v16335_v19, %v7439_v6  ;;  %v7854_v30 = vadd.f32 %v19687_v18, %v7587_v38  ;;  %v7855_v11 = vadd.f32 %v19688_v57, %v7588_v17  ;;  %v7856_v25 = vadd.f32 %v16519_v34, %v7589_v59  ;;  %v10619_v38 = vld [vmem:[%s10942_s23 + $0x360] sm:$0xff]  ;;  %v10620_v57 = vld [vmem:[%s10942_s23 + $0x358] sm:$0xff] }
 0x5d4   : > { %v7857_v42 = vadd.f32 %v16504_v44, %v7590_v56  ;;  %v16684_v5 = vmul.f32 %v10616_v48, %v15965_v63  ;;  %v7858_v51 = vadd.f32 %v19689_v39, %v7591_v10  ;;  %v7859_v60 = vadd.f32 %v19690_v13, %v7592_v29  ;;  %v19696_v29 = vld [vmem:[#allocation131_spill] sm:$0xff]  ;;  %v19698_v48 = vld [vmem:[#allocation136_spill] sm:$0xff] }
 0x5d5   : > { %v7860_v22 = vadd.f32 %v16534_v1, %v7593_v8  ;;  %7987 = vst [vmem:[%s16387_s13 + $0x230] sm:$0xff] %v7854_v30  ;;  %7988 = vst [vmem:[%s16387_s13 + $0x238] sm:$0xff] %v7855_v11  ;;  %v7594_v44 = vmul.f32 %v16319_v40, %v7444_v23  ;;  %v7595_v34 = vmul.f32 %v16321_v47, %v7444_v23  ;;  %v7454_v13 = vpop.permute.xlu1 %7453 }
 0x5d6   : > { %7989 = vst [vmem:[%s16387_s13 + $0x240] sm:$0xff] %v7856_v25  ;;  %7990 = vst [vmem:[%s16387_s13 + $0x248] sm:$0xff] %v7857_v42  ;;  %v7596_v45 = vmul.f32 %v16323_v50, %v7444_v23  ;;  %v7597_v32 = vmul.f32 %v16325_v61, %v7444_v23  ;;  %v16699_v4 = vmul.f32 %v10617_v7, %v15965_v63  ;;  %v19697_v25 = vld [vmem:[#allocation144_spill] sm:$0xff] }
 0x5d7   : > { %7991 = vst [vmem:[%s16387_s13 + $0x250] sm:$0xff] %v7858_v51  ;;  %7992 = vst [vmem:[%s16387_s13 + $0x258] sm:$0xff] %v7859_v60  ;;  %v7598_v1 = vmul.f32 %v16331_v0, %v7444_v23  ;;  %v7599_v2 = vmul.f32 %v16333_v16, %v7444_v23  ;;  %v7600_v33 = vmul.f32 %v16335_v19, %v7444_v23  ;;  %v10621_v23 = vld [vmem:[%s10942_s23 + $0x378] sm:$0xff] }
 0x5d8   : > { %7993 = vst.msk [vmem:[%s16387_s13 + $0x260] sm:$0xff] %vm466_vm0, %v7860_v22  ;;  %v7861_v27 = vadd.f32 %v19691_v26, %v7594_v44  ;;  %v7862_v15 = vadd.f32 %v19692_v35, %v7595_v34  ;;  %v7863_v3 = vadd.f32 %v16564_v46, %v7596_v45  ;;  %v7864_v9 = vadd.f32 %v16549_v37, %v7597_v32  ;;  %v19699_v32 = vld [vmem:[#allocation146_spill] sm:$0xff] }
 0x5d9   : > { %v16714_v49 = vmul.f32 %v10618_v36, %v15965_v63  ;;  %v7865_v55 = vadd.f32 %v19693_v31, %v7598_v1  ;;  %v7866_v12 = vadd.f32 %v19694_v54, %v7599_v2  ;;  %v7867_v62 = vadd.f32 %v16579_v20, %v7600_v33  ;;  %v19700_v1 = vld [vmem:[#allocation176_spill] sm:$0xff] }
 0x5da   : > { %7994 = vst [vmem:[%s16387_s13 + $0x268] sm:$0xff] %v7861_v27  ;;  %7995 = vst [vmem:[%s16387_s13 + $0x270] sm:$0xff] %v7862_v15  ;;  %v7601_v37 = vmul.f32 %v16319_v40, %v7449_v52  ;;  %v7602_v46 = vmul.f32 %v16321_v47, %v7449_v52  ;;  %v7603_v24 = vmul.f32 %v16323_v50, %v7449_v52  ;;  %v10622_v27 = vld [vmem:[%s10942_s23 + $0x398] sm:$0xff] }
 0x5db   : > { %7996 = vst [vmem:[%s16387_s13 + $0x278] sm:$0xff] %v7863_v3  ;;  %7997 = vst [vmem:[%s16387_s13 + $0x280] sm:$0xff] %v7864_v9  ;;  %v7604_v6 = vmul.f32 %v16325_v61, %v7449_v52  ;;  %v16729_v17 = vmul.f32 %v10619_v38, %v15965_v63  ;;  %v7605_v20 = vmul.f32 %v16331_v0, %v7449_v52  ;;  %v19701_v15 = vld [vmem:[#allocation179_spill] sm:$0xff]  ;;  %v19702_v9 = vld [vmem:[#allocation33_spill] sm:$0xff] }
 0x5dc   : > { %7998 = vst [vmem:[%s16387_s13 + $0x288] sm:$0xff] %v7865_v55  ;;  %7999 = vst [vmem:[%s16387_s13 + $0x290] sm:$0xff] %v7866_v12  ;;  %v7606_v59 = vmul.f32 %v16333_v16, %v7449_v52  ;;  %v7607_v56 = vmul.f32 %v16335_v19, %v7449_v52  ;;  %v7868_v10 = vadd.f32 %v19695_v14, %v7601_v37  ;;  %v7459_v55 = vpop.permute.xlu0 %7458  ;;  %v19704_v38 = vld [vmem:[#allocation36_spill] sm:$0xff]  ;;  %v10624_v14 = vld [vmem:[%s10942_s23 + $0x3b0] sm:$0xff] }
 0x5dd   : > { %8000 = vst.msk [vmem:[%s16387_s13 + $0x298] sm:$0xff] %vm466_vm0, %v7867_v62  ;;  %v7869_v8 = vadd.f32 %v19696_v29, %v7602_v46  ;;  %v7870_v18 = vadd.f32 %v16609_v21, %v7603_v24  ;;  %v7871_v30 = vadd.f32 %v16594_v28, %v7604_v6  ;;  %v16744_v11 = vmul.f32 %v10620_v57, %v15965_v63  ;;  %v10623_v62 = vld [vmem:[%s10942_s23 + $0x390] sm:$0xff]  ;;  %v19703_v24 = vld [vmem:[#allocation39_spill] sm:$0xff] }
 0x5de   : > { %v7872_v42 = vadd.f32 %v19697_v25, %v7605_v20  ;;  %v7873_v39 = vadd.f32 %v19698_v48, %v7606_v59  ;;  %v7874_v51 = vadd.f32 %v16624_v43, %v7607_v56  ;;  %8001 = vst [vmem:[%s16387_s13 + $0x2a0] sm:$0xff] %v7868_v10  ;;  %v7608_v28 = vmul.f32 %v16319_v40, %v7454_v13  ;;  %v19705_v29 = vld [vmem:[#allocation154_spill] sm:$0xff]  ;;  %v7464_v25 = vpop.permute.xlu1 %7463 }
 0x5df   : > { %8002 = vst [vmem:[%s16387_s13 + $0x2a8] sm:$0xff] %v7869_v8  ;;  %8003 = vst [vmem:[%s16387_s13 + $0x2b0] sm:$0xff] %v7870_v18  ;;  %v7609_v21 = vmul.f32 %v16321_v47, %v7454_v13  ;;  %v7610_v60 = vmul.f32 %v16323_v50, %v7454_v13  ;;  %v7611_v22 = vmul.f32 %v16325_v61, %v7454_v13  ;;  %v19706_v18 = vld [vmem:[#allocation147_spill] sm:$0xff] }
 0x5e0   : > { %8004 = vst [vmem:[%s16387_s13 + $0x2b8] sm:$0xff] %v7871_v30  ;;  %v16759_v44 = vmul.f32 %v10621_v23, %v15965_v63  ;;  %8005 = vst [vmem:[%s16387_s13 + $0x2c0] sm:$0xff] %v7872_v42  ;;  %v7612_v43 = vmul.f32 %v16331_v0, %v7454_v13  ;;  %v7613_v34 = vmul.f32 %v16333_v16, %v7454_v13 }
 0x5e1   : > { %8006 = vst [vmem:[%s16387_s13 + $0x2c8] sm:$0xff] %v7873_v39  ;;  %8007 = vst.msk [vmem:[%s16387_s13 + $0x2d0] sm:$0xff] %vm466_vm0, %v7874_v51  ;;  %v7614_v45 = vmul.f32 %v16335_v19, %v7454_v13  ;;  %v7875_v7 = vadd.f32 %v19699_v32, %v7608_v28  ;;  %v7876_v2 = vadd.f32 %v19700_v1, %v7609_v21  ;;  %v10625_v39 = vld [vmem:[%s10942_s23 + $0x3d0] sm:$0xff]  ;;  %v19707_v21 = vld [vmem:[#allocation184_spill] sm:$0xff] }
 0x5e2   : > { %v7877_v33 = vadd.f32 %v16654_v53, %v7610_v60  ;;  %v7878_v26 = vadd.f32 %v16639_v58, %v7611_v22  ;;  %v16774_v35 = vmul.f32 %v10622_v27, %v15965_v63  ;;  %v7879_v3 = vadd.f32 %v19701_v15, %v7612_v43  ;;  %v19708_v22 = vld [vmem:[#allocation177_spill] sm:$0xff]  ;;  %v7469_v27 = vpop.permute.xlu0 %7468 }
 0x5e3   : > { %v7880_v36 = vadd.f32 %v19702_v9, %v7613_v34  ;;  %v7881_v31 = vadd.f32 %v16669_v41, %v7614_v45  ;;  %8008 = vst [vmem:[%s16387_s13 + $0x2d8] sm:$0xff] %v7875_v7  ;;  %8009 = vst [vmem:[%s16387_s13 + $0x2e0] sm:$0xff] %v7876_v2  ;;  %v7615_v58 = vmul.f32 %v16319_v40, %v7459_v55  ;;  %v10626_v45 = vld [vmem:[%s10942_s23 + $0x3c8] sm:$0xff] }
 0x5e4   : > { %8010 = vst [vmem:[%s16387_s13 + $0x2e8] sm:$0xff] %v7877_v33  ;;  %8011 = vst [vmem:[%s16387_s13 + $0x2f0] sm:$0xff] %v7878_v26  ;;  %v7616_v53 = vmul.f32 %v16321_v47, %v7459_v55  ;;  %v7617_v54 = vmul.f32 %v16323_v50, %v7459_v55  ;;  %v7618_v12 = vmul.f32 %v16325_v61, %v7459_v55  ;;  %v19709_v7 = vld [vmem:[#allocation188_spill] sm:$0xff]  ;;  %v19710_v2 = vld [vmem:[#allocation181_spill] sm:$0xff] }
 0x5e5   : > { %v7765_v52 = vmul.f32 %v10623_v62, %v15965_v63  ;;  %8012 = vst [vmem:[%s16387_s13 + $0x2f8] sm:$0xff] %v7879_v3  ;;  %8013 = vst [vmem:[%s16387_s13 + $0x300] sm:$0xff] %v7880_v36  ;;  %v7619_v41 = vmul.f32 %v16331_v0, %v7459_v55  ;;  %v7620_v37 = vmul.f32 %v16333_v16, %v7459_v55  ;;  %v10627_v9 = vld [vmem:[%s10942_s23 + $0x3e8] sm:$0xff] }
 0x5e6   : > { %8014 = vst.msk [vmem:[%s16387_s13 + $0x308] sm:$0xff] %vm466_vm0, %v7881_v31  ;;  %v7621_v46 = vmul.f32 %v16335_v19, %v7459_v55  ;;  %v7882_v6 = vadd.f32 %v19703_v24, %v7615_v58  ;;  %v7883_v20 = vadd.f32 %v19704_v38, %v7616_v53  ;;  %v7884_v59 = vadd.f32 %v16699_v4, %v7617_v54  ;;  %v19711_v58 = vld [vmem:[#allocation191_spill] sm:$0xff]  ;;  %v19712_v54 = vld [vmem:[#allocation186_spill] sm:$0xff]  ;;  %v19713_v24 = vld [vmem:[#allocation196_spill] sm:$0xff] }
 0x5e7   : > { %v7885_v56 = vadd.f32 %v16684_v5, %v7618_v12  ;;  %v7769_v10 = vmul.f32 %v10624_v14, %v15965_v63  ;;  %v7886_v8 = vadd.f32 %v19705_v29, %v7619_v41  ;;  %v7887_v30 = vadd.f32 %v19706_v18, %v7620_v37  ;;  %v10628_v37 = vld [vmem:[%s10942_s23 + $0x408] sm:$0xff] }
 0x5e8   : > { %v7888_v57 = vadd.f32 %v16714_v49, %v7621_v46  ;;  %8015 = vst [vmem:[%s16387_s13 + $0x310] sm:$0xff] %v7882_v6  ;;  %8016 = vst [vmem:[%s16387_s13 + $0x318] sm:$0xff] %v7883_v20  ;;  %v7622_v4 = vmul.f32 %v16319_v40, %v7464_v25  ;;  %v7623_v5 = vmul.f32 %v16321_v47, %v7464_v25  ;;  %v19714_v38 = vld [vmem:[#allocation189_spill] sm:$0xff] }
 0x5e9   : > { %8017 = vst [vmem:[%s16387_s13 + $0x320] sm:$0xff] %v7884_v59  ;;  %8018 = vst [vmem:[%s16387_s13 + $0x328] sm:$0xff] %v7885_v56  ;;  %v7624_v42 = vmul.f32 %v16323_v50, %v7464_v25  ;;  %v7625_v48 = vmul.f32 %v16325_v61, %v7464_v25  ;;  %v7773_v51 = vmul.f32 %v10625_v39, %v15965_v63  ;;  %v7474_v56 = vpop.permute.xlu1 %7473 }
 0x5ea   : > { %8019 = vst [vmem:[%s16387_s13 + $0x330] sm:$0xff] %v7886_v8  ;;  %8020 = vst [vmem:[%s16387_s13 + $0x338] sm:$0xff] %v7887_v30  ;;  %v7626_v49 = vmul.f32 %v16331_v0, %v7464_v25  ;;  %v7627_v13 = vmul.f32 %v16333_v16, %v7464_v25  ;;  %v7628_v28 = vmul.f32 %v16335_v19, %v7464_v25  ;;  %v10629_v8 = vld [vmem:[%s10942_s23 + $0x400] sm:$0xff] }
 0x5eb   : > { %8021 = vst.msk [vmem:[%s16387_s13 + $0x340] sm:$0xff] %vm466_vm0, %v7888_v57  ;;  %v7889_v60 = vadd.f32 %v19707_v21, %v7622_v4  ;;  %v7890_v23 = vadd.f32 %v19708_v22, %v7623_v5  ;;  %v7891_v43 = vadd.f32 %v16744_v11, %v7624_v42  ;;  %v7892_v34 = vadd.f32 %v16729_v17, %v7625_v48  ;;  %v19715_v25 = vld [vmem:[#allocation200_spill] sm:$0xff]  ;;  %v19716_v5 = vld [vmem:[#allocation194_spill] sm:$0xff] }
 0x5ec   : > { %v7772_v32 = vmul.f32 %v10626_v45, %v15965_v63  ;;  %v7893_v1 = vadd.f32 %v19709_v7, %v7626_v49  ;;  %v7894_v33 = vadd.f32 %v19710_v2, %v7627_v13  ;;  %v7895_v26 = vadd.f32 %v16759_v44, %v7628_v28  ;;  %v10630_v49 = vld [vmem:[%s10942_s23 + $0x420] sm:$0xff] }
 0x5ed   : > { %8022 = vst [vmem:[%s16387_s13 + $0x348] sm:$0xff] %v7889_v60  ;;  %8023 = vst [vmem:[%s16387_s13 + $0x350] sm:$0xff] %v7890_v23  ;;  %v7629_v11 = vmul.f32 %v16319_v40, %v7469_v27  ;;  %v7630_v17 = vmul.f32 %v16321_v47, %v7469_v27  ;;  %v7631_v15 = vmul.f32 %v16323_v50, %v7469_v27  ;;  %v19717_v28 = vld [vmem:[#allocation204_spill] sm:$0xff]  ;;  %v19718_v60 = vld [vmem:[#allocation197_spill] sm:$0xff] }
 0x5ee   : > { %8024 = vst [vmem:[%s16387_s13 + $0x358] sm:$0xff] %v7891_v43  ;;  %8025 = vst [vmem:[%s16387_s13 + $0x360] sm:$0xff] %v7892_v34  ;;  %v7632_v3 = vmul.f32 %v16325_v61, %v7469_v27  ;;  %v7776_v36 = vmul.f32 %v10627_v9, %v15965_v63  ;;  %v7633_v44 = vmul.f32 %v16331_v0, %v7469_v27  ;;  %v7479_v43 = vpop.permute.xlu0 %7478 }
 0x5ef   : > { %8026 = vst [vmem:[%s16387_s13 + $0x368] sm:$0xff] %v7893_v1  ;;  %8027 = vst [vmem:[%s16387_s13 + $0x370] sm:$0xff] %v7894_v33  ;;  %v7634_v31 = vmul.f32 %v16333_v16, %v7469_v27  ;;  %v7635_v55 = vmul.f32 %v16335_v19, %v7469_v27  ;;  %v7896_v53 = vadd.f32 %v19711_v58, %v7629_v11 }
 0x5f0   : > { %8028 = vst.msk [vmem:[%s16387_s13 + $0x378] sm:$0xff] %vm466_vm0, %v7895_v26  ;;  %v7897_v12 = vadd.f32 %v19712_v54, %v7630_v17  ;;  %v7898_v62 = vadd.f32 %v7765_v52, %v7631_v15  ;;  %v7899_v41 = vadd.f32 %v16774_v35, %v7632_v3  ;;  %v7780_v46 = vmul.f32 %v10628_v37, %v15965_v63 }
 0x5f1   : > { %v7900_v6 = vadd.f32 %v19713_v24, %v7633_v44  ;;  %v7901_v20 = vadd.f32 %v19714_v38, %v7634_v31  ;;  %v7902_v59 = vadd.f32 %v7769_v10, %v7635_v55  ;;  %8029 = vst [vmem:[%s16387_s13 + $0x380] sm:$0xff] %v7896_v53  ;;  %v7636_v52 = vmul.f32 %v16319_v40, %v7474_v56 }
 0x5f2   : > { %8030 = vst [vmem:[%s16387_s13 + $0x388] sm:$0xff] %v7897_v12  ;;  %8031 = vst [vmem:[%s16387_s13 + $0x390] sm:$0xff] %v7898_v62  ;;  %v7637_v35 = vmul.f32 %v16321_v47, %v7474_v56  ;;  %v7638_v14 = vmul.f32 %v16323_v50, %v7474_v56  ;;  %v7639_v29 = vmul.f32 %v16325_v61, %v7474_v56 }
 0x5f3   : > { %8032 = vst [vmem:[%s16387_s13 + $0x398] sm:$0xff] %v7899_v41  ;;  %v7779_v18 = vmul.f32 %v10629_v8, %v15965_v63  ;;  %8033 = vst [vmem:[%s16387_s13 + $0x3a0] sm:$0xff] %v7900_v6  ;;  %v7640_v10 = vmul.f32 %v16331_v0, %v7474_v56  ;;  %v7641_v30 = vmul.f32 %v16333_v16, %v7474_v56 }
 0x5f4   : > { %8034 = vst [vmem:[%s16387_s13 + $0x3a8] sm:$0xff] %v7901_v20  ;;  %8035 = vst.msk [vmem:[%s16387_s13 + $0x3b0] sm:$0xff] %vm466_vm0, %v7902_v59  ;;  %v7642_v57 = vmul.f32 %v16335_v19, %v7474_v56  ;;  %v7903_v4 = vadd.f32 %v19715_v25, %v7636_v52  ;;  %v7904_v42 = vadd.f32 %v19716_v5, %v7637_v35 }
 0x5f5   : > { %v7905_v48 = vadd.f32 %v7772_v32, %v7638_v14  ;;  %v7906_v39 = vadd.f32 %v7773_v51, %v7639_v29  ;;  %v7783_v13 = vmul.f32 %v10630_v49, %v15965_v63  ;;  %v7907_v21 = vadd.f32 %v19717_v28, %v7640_v10 }
 0x5f6   : > { %v7908_v22 = vadd.f32 %v19718_v60, %v7641_v30  ;;  %v7909_v23 = vadd.f32 %v7776_v36, %v7642_v57  ;;  %8036 = vst [vmem:[%s16387_s13 + $0x3b8] sm:$0xff] %v7903_v4  ;;  %8037 = vst [vmem:[%s16387_s13 + $0x3c0] sm:$0xff] %v7904_v42  ;;  %v7643_v51 = vmul.f32 %v16319_v40, %v7479_v43 }
 0x5f7   : > { %8038 = vst [vmem:[%s16387_s13 + $0x3c8] sm:$0xff] %v7905_v48  ;;  %8039 = vst [vmem:[%s16387_s13 + $0x3d0] sm:$0xff] %v7906_v39  ;;  %v7644_v34 = vmul.f32 %v16321_v47, %v7479_v43  ;;  %v7645_v45 = vmul.f32 %v16323_v50, %v7479_v43  ;;  %v7646_v63 = vmul.f32 %v16325_v61, %v7479_v43  ;;  %v19719_v47 = vld [vmem:[#allocation207_spill] sm:$0xff]  ;;  %v19720_v61 = vld [vmem:[#allocation201_spill] sm:$0xff] }
 0x5f8   : > { %8040 = vst [vmem:[%s16387_s13 + $0x3d8] sm:$0xff] %v7907_v21  ;;  %8041 = vst [vmem:[%s16387_s13 + $0x3e0] sm:$0xff] %v7908_v22  ;;  %v7647_v32 = vmul.f32 %v16331_v0, %v7479_v43  ;;  %v7648_v7 = vmul.f32 %v16333_v16, %v7479_v43  ;;  %v7649_v40 = vmul.f32 %v16335_v19, %v7479_v43  ;;  %v19721_v0 = vld [vmem:[#allocation212_spill] sm:$0xff]  ;;  %v19722_v19 = vld [vmem:[#allocation205_spill] sm:$0xff] }
 0x5f9   : > { %8042 = vst.msk [vmem:[%s16387_s13 + $0x3e8] sm:$0xff] %vm466_vm0, %v7909_v23  ;;  %v7910_v50 = vadd.f32 %v19719_v47, %v7643_v51  ;;  %v7911_v1 = vadd.f32 %v19720_v61, %v7644_v34  ;;  %v7912_v2 = vadd.f32 %v7779_v18, %v7645_v45  ;;  %v7913_v33 = vadd.f32 %v7780_v46, %v7646_v63 }
 0x5fa   : > { %v7914_v16 = vadd.f32 %v19721_v0, %v7647_v32  ;;  %v7915_v26 = vadd.f32 %v19722_v19, %v7648_v7  ;;  %v7916_v27 = vadd.f32 %v7783_v13, %v7649_v40 }
 0x5fb   : > { %8043 = vst [vmem:[%s16387_s13 + $0x3f0] sm:$0xff] %v7910_v50  ;;  %8044 = vst [vmem:[%s16387_s13 + $0x3f8] sm:$0xff] %v7911_v1 }
 0x5fc   : > { %8045 = vst [vmem:[%s16387_s13 + $0x400] sm:$0xff] %v7912_v2  ;;  %8046 = vst [vmem:[%s16387_s13 + $0x408] sm:$0xff] %v7913_v33 }
 0x5fd   : > { %8047 = vst [vmem:[%s16387_s13 + $0x410] sm:$0xff] %v7914_v16  ;;  %8048 = vst [vmem:[%s16387_s13 + $0x418] sm:$0xff] %v7915_v26 }
 0x5fe   : > { %8049 = vst.msk [vmem:[%s16387_s13 + $0x420] sm:$0xff] %vm466_vm0, %v7916_v27 }
 0x5ff   : > { %10702 = shalt.err (!%p10699_p13)
}
 0x600   : > { %s10703_s10 = scalar_lea.hbm %s16900_s27, 17024  ;;  %s10707_s14 = scalar_lea.hbm %s16960_s4, 34048 }
 0x601   : > { %p10704_p7 = scmp.ne.s32.totalorder %s16900_s27, %s10703_s10  ;;  %p10708_p1 = scmp.lt.u32.totalorder %s16900_s27, %s16960_s4 }
 0x602   : > { %p10709_p11 = scmp.lt.u32.totalorder %s10707_s14, %s10703_s10  ;;  %p10711_p9 = scmp.lt.u32.totalorder %s10703_s10, %s16900_s27 }
 0x603   : > { %p10705_p3 = pnand %p10704_p7, %p19723_p10 }
 0x604   : > { %p10710_p8 = por %p10709_p11, %p10708_p1 }
 0x605   : > { %p10706_p12 = pneg %p10705_p3 }
 0x606   : > { %p10712_p2 = por %p10711_p9, %p10710_p8 }
 0x608   : > { %p10713_p4 = pnand %p10712_p2, %p10706_p12 }
 0x60a   : > { %10716 = shalt.err (!%p10713_p4)
}
 0x60b   : > { %s10770_s8 = smov 896   ;;  %s10771_s13 = smov 56  }
 0x60c   : > { %10397 = dma.vmem_to_hbm [thread:$0]  (%p19723_p10), %s16902_s7, 17024, %s16900_s27, %s8051_s15, %s10770_s8, %s10770_s8, %s10771_s13  }
 0x60d PF: > { %s8080_s6 = sand.u32 1, %s10747_s17   ;;  %p19724_p5 = scmp.ne.s32.totalorder %s17924_s29, 0 }
 0x60e   : > { %p19725_p0 = scmp.ge.s32.totalorder %s10759_s20, 2  ;;  %s8081_s0 = scalar_lea.sflag [#allocation5], %s8080_s6 }
 0x610   : > { %p10408_p6 = pnand %p19725_p0, %p19724_p5 }
 0x612   : > { %10742 = dma.done.wait (!%p10408_p6), %s8081_s0, 17024  }
 0x613   : > { %10744 = vsyncadd (!%p10408_p6), %s8081_s0, 4294950272  ;;  %p19_p13 = scmp.ge.s32.totalorder %s10825_s22, 4   ;;  %s19726_s17 = smov %s10751_s18 }
 0x614   : > { %s19727_s18 = smov %s10755_s19  ;;  %s19728_s19 = smov %s10837_s25 }
 0x615   : > { %s19729_s20 = smov %s10825_s22  ;;  %21 = sbr.rel (!%p19_p13) target bundleno = 8 (0x8), region = 85 }
 0x61c   :  { %8086 = vsyncpa [#allocation4], 1 }
 0x61d   :  { %8088 = vsyncpa [#allocation4 + $0x1], 1 }
 0x61e   :  { %8089 = vsyncpa [#allocation7], 1 }
 0x61f   :  { %8090 = vsyncpa [#allocation5], 1 }
 0x620   :  { %8092 = vsyncpa [#allocation5 + $0x1], 1 }

</bundles_post_ra>
